<compile_context>
chip_gen: v7x
topology: tpu7x:2x2x1
jax: 0.10.0
libtpu: 0.0.40
codegen_flags: <defaults>
</compile_context>

<pallas_src>
import functools
import numpy as np
import jax
import jax.numpy as jnp
from jax.experimental import pallas as pl
from jax.experimental.pallas import tpu as pltpu

_LANE = 128
_VMEM_SPEC = pl.BlockSpec(memory_space=pltpu.MemorySpace.VMEM)


def _round_up(x, m):
    return ((x + m - 1) // m) * m


# ----------------------------------------------------------------------------
# Fused Pallas kernel
# ----------------------------------------------------------------------------
def _lstm_stack_wavefront(layers, x_proj_ref, n_steps, n_batch, Hp):
    """Run an L-layer LSTM stack with a layer-time wavefront.

    layers:     [(wih_ref (Hp,4Hp), whh_ref (Hp,4Hp), b_ref (1,4Hp)), ...]
                (layer 0's wih/b are unused: its input projection + bias is
                 precomputed in x_proj_ref).
    x_proj_ref: VMEM ref (n_steps, n_batch, 4Hp) f32, layer-0 pre-activations.
    Returns [h_n per layer], each (n_batch, Hp) f32.
    """
    L = len(layers)
    h = [jnp.zeros((n_batch, Hp), jnp.float32) for _ in range(L)]
    c = [jnp.zeros((n_batch, Hp), jnp.float32) for _ in range(L)]
    y_prev = [None] * L          # y_prev[l]: layer l output from previous wave
    h_final = [None] * L
    for w in range(n_steps + L - 1):     # static unroll -> straight-line code
        y_new = list(y_prev)
        for l in range(L):
            t = w - l
            if t < 0 or t >= n_steps:
                continue
            wih_ref, whh_ref, b_ref = layers[l]
            if l == 0:
                pre = x_proj_ref[t]                            # (n_batch, 4Hp)
            else:
                # Per-step input projection (same (B,Hp)x(Hp,4Hp) shape as the
                # recurrent matmul); input is previous wave's layer l-1 output.
                x_in = y_prev[l - 1].astype(wih_ref.dtype)
                pre = jnp.dot(x_in, wih_ref[...],
                              preferred_element_type=jnp.float32) + b_ref[...]
            gates = pre + jnp.dot(h[l].astype(whh_ref.dtype), whh_ref[...],
                                  preferred_element_type=jnp.float32)
            # Gate slabs are 128-lane aligned (Hp % 128 == 0): sigmoid only on
            # i/f/o, tanh only on g.  PyTorch gate order: i, f, g, o.
            i_g = jax.nn.sigmoid(gates[:, 0 * Hp:1 * Hp])
            f_g = jax.nn.sigmoid(gates[:, 1 * Hp:2 * Hp])
            g_g = jnp.tanh(gates[:, 2 * Hp:3 * Hp])
            o_g = jax.nn.sigmoid(gates[:, 3 * Hp:4 * Hp])
            c_new = f_g * c[l] + i_g * g_g                     # f32 elementwise
            h_new = o_g * jnp.tanh(c_new)
            c[l] = c_new
            h[l] = h_new
            y_new[l] = h_new
            if t == n_steps - 1:
                h_final[l] = h_new
        y_prev = y_new
    return h_final


def _stock_lstm_kernel(num_layers, T, B, Hp, *refs):
    """Fused forward: encoder LSTM stack -> decoder LSTM stack -> fc.

    refs: x_flat, (wih, whh, b)*L encoder, (wih, whh, b)*L decoder,
          fc_w, fc_b, out_ref, xw_scratch, dxw_scratch.
    """
    L = num_layers
    x_ref = refs[0]
    pos = 1
    enc = [tuple(refs[pos + 3 * l: pos + 3 * l + 3]) for l in range(L)]
    pos += 3 * L
    dec = [tuple(refs[pos + 3 * l: pos + 3 * l + 3]) for l in range(L)]
    pos += 3 * L
    fcw_ref, fcb_ref, out_ref, xw_ref, dxw_ref = refs[pos:pos + 5]

    # ------------------------------ encoder --------------------------------
    # Hoisted layer-0 projection: one (T*B, D) x (D, 4Hp) MXU matmul for the
    # whole sequence, distributed once (off the recurrent critical path) into a
    # (T, B, 4Hp) VMEM scratch so per-step reads are leading-axis indexed.
    wih0_ref, _, b0_ref = enc[0]
    xw_flat = jnp.dot(x_ref[...], wih0_ref[...],
                      preferred_element_type=jnp.float32) + b0_ref[...]
    for t in range(T):
        xw_ref[t] = xw_flat[t * B:(t + 1) * B, :]

    h_enc = _lstm_stack_wavefront(enc, xw_ref, T, B, Hp)       # L x (B, Hp)

    # ------------------------------ decoder --------------------------------
    # PyTorch feeds the (L, B, H) encoder hidden stack as a batch_first
    # sequence: decoder batch = L, decoder time = B.  Hoist decoder layer 0's
    # projection per encoder layer (L row-block stores, no 1-row concats).
    dwih0_ref, _, db0_ref = dec[0]
    for l in range(L):
        dxw_ref[:, l, :] = (jnp.dot(h_enc[l].astype(dwih0_ref.dtype),
                                    dwih0_ref[...],
                                    preferred_element_type=jnp.float32)
                            + db0_ref[...])

    h_dec = _lstm_stack_wavefront(dec, dxw_ref, B, L, Hp)      # final h: (L, Hp)

    # decoder outputs[:, -1, :] is exactly the top layer's final h_n: (L, Hp).
    # TODO(synk): output lane dim is O (=1) -> masked sub-128-lane store; pad O
    # if the result is consumed on-chip downstream.
    h_top = h_dec[L - 1].astype(fcw_ref.dtype)
    out_ref[...] = (jnp.dot(h_top, fcw_ref[...],
                            preferred_element_type=jnp.float32)
                    + fcb_ref[...]).astype(out_ref.dtype)


# ----------------------------------------------------------------------------
# One-time parameter prep (transpose, gate-wise zero-pad H -> Hp, bf16 cast)
# ----------------------------------------------------------------------------
def _pad_rows(w, rows_to):
    if w.shape[0] == rows_to:
        return w
    return jnp.zeros((rows_to,) + w.shape[1:], w.dtype).at[:w.shape[0]].set(w)


def _pad_gate_cols(w, H, Hp):
    """(R, 4H) -> (R, 4Hp), zero-padding each of the 4 gate blocks to Hp cols."""
    if H == Hp:
        return w
    out = jnp.zeros((w.shape[0], 4 * Hp), w.dtype)
    for k in range(4):
        out = out.at[:, k * Hp:k * Hp + H].set(w[:, k * H:(k + 1) * H])
    return out


def prepare_params(enc_params, dec_params, fc_w, fc_b, matmul_dtype=jnp.bfloat16):
    """PyTorch layout -> kernel layout.

    w_ih -> w_ih^T, w_hh -> w_hh^T, biases pre-summed into one row; hidden dim
    zero-padded to Hp = round_up(H, 128) (padded h/c lanes stay exactly 0);
    matmul operands stored in `matmul_dtype` (bf16 default), biases kept f32.
    """
    H = dec_params[0][1].shape[1]                 # w_hh is (4H, H)
    Hp = _round_up(H, _LANE)

    def prep(params, first_input_is_hidden):
        out = []
        for i, (w_ih, w_hh, b_ih, b_hh) in enumerate(params):
            wih_t = jnp.asarray(w_ih).T           # (Din, 4H)
            whh_t = jnp.asarray(w_hh).T           # (H,   4H)
            if first_input_is_hidden or i > 0:    # input is a (padded) hidden state
                wih_t = _pad_rows(wih_t, Hp)
            whh_t = _pad_rows(whh_t, Hp)
            b = (jnp.asarray(b_ih) + jnp.asarray(b_hh)).reshape(1, 4 * H)
            out.append((_pad_gate_cols(wih_t, H, Hp).astype(matmul_dtype),
                        _pad_gate_cols(whh_t, H, Hp).astype(matmul_dtype),
                        _pad_gate_cols(b, H, Hp).astype(jnp.float32)))
        return out

    fc_w_t = _pad_rows(jnp.asarray(fc_w).T, Hp).astype(matmul_dtype)   # (Hp, O)
    fc_b_row = jnp.asarray(fc_b).reshape(1, -1).astype(jnp.float32)    # (1, O)
    return (prep(enc_params, first_input_is_hidden=False),
            prep(dec_params, first_input_is_hidden=True),
            fc_w_t, fc_b_row)


# ----------------------------------------------------------------------------
# Wrapper
# ----------------------------------------------------------------------------
def stock_lstm_forward(x, enc_prep, dec_prep, fc_w_t, fc_b_row):
    """StockLSTM.forward: x (B, T, input_size) -> (num_layers, output_size)."""
    B, T, D = x.shape
    L = len(enc_prep)
    Hp = enc_prep[0][1].shape[0]                  # whh^T is (Hp, 4Hp)
    O = fc_w_t.shape[1]

    # Time-major flatten (row order (t, b)); layer-0 matmul operand dtype.
    # TODO(synk): fold this transpose into a T-chunked grid index_map once the
    # kernel streams x instead of whole-sequence VMEM residency (v7x 64 MiB).
    x_flat = (jnp.transpose(x, (1, 0, 2)).reshape(T * B, D)
              .astype(enc_prep[0][0].dtype))

    args = [x_flat]
    for wih, whh, b in enc_prep:
        args += [wih, whh, b]
    for wih, whh, b in dec_prep:
        args += [wih, whh, b]
    args += [fc_w_t, fc_b_row]

    # Everything is VMEM-resident (no grid at these sizes): give the compiler an
    # explicit scoped-VMEM budget with headroom instead of the platform default
    # (16 MiB on v5e), capped below v7x's 64 MiB physical VMEM.
    arg_bytes = sum(int(np.prod(a.shape)) * a.dtype.itemsize for a in args)
    scratch_bytes = (T * B + B * L) * 4 * Hp * 4
    vmem_limit = int(min(64 << 20,
                         max(32 << 20, 2 * (arg_bytes + scratch_bytes) + (8 << 20))))

    kernel = functools.partial(_stock_lstm_kernel, L, T, B, Hp)
    return pl.pallas_call(
        kernel,
        out_shape=jax.ShapeDtypeStruct((L, O), jnp.float32),
        in_specs=[_VMEM_SPEC] * len(args),
        out_specs=_VMEM_SPEC,
        scratch_shapes=[
            pltpu.VMEM((T, B, 4 * Hp), jnp.float32),   # encoder layer-0 pre-acts
            pltpu.VMEM((B, L, 4 * Hp), jnp.float32),   # decoder layer-0 pre-acts
        ],
        compiler_params=pltpu.CompilerParams(vmem_limit_bytes=vmem_limit),
    )(*args)


# ----------------------------------------------------------------------------
# Deterministic parameter init (PyTorch-style uniform(-1/sqrt(H), 1/sqrt(H)))
# ----------------------------------------------------------------------------
def init_lstm_params(key, num_layers, input_size, hidden_size):
    params = []
    k = 1.0 / float(np.sqrt(hidden_size))
    for layer in range(num_layers):
        in_sz = input_size if layer == 0 else hidden_size
        key, k1, k2, k3, k4 = jax.random.split(key, 5)
        w_ih = jax.random.uniform(k1, (4 * hidden_size, in_sz),
                                  minval=-k, maxval=k, dtype=jnp.float32)
        w_hh = jax.random.uniform(k2, (4 * hidden_size, hidden_size),
                                  minval=-k, maxval=k, dtype=jnp.float32)
        b_ih = jax.random.uniform(k3, (4 * hidden_size,),
                                  minval=-k, maxval=k, dtype=jnp.float32)
        b_hh = jax.random.uniform(k4, (4 * hidden_size,),
                                  minval=-k, maxval=k, dtype=jnp.float32)
        params.append((w_ih, w_hh, b_ih, b_hh))
    return params, key


# ----------------------------------------------------------------------------
# Pure-JAX reference (same math as PyTorch, no Pallas) for correctness checking
# ----------------------------------------------------------------------------
def ref_multilayer_lstm(x_btd, params):
    B, T, _ = x_btd.shape
    seq = x_btd
    h_list, c_list = [], []
    for (w_ih, w_hh, b_ih, b_hh) in params:
        H = w_hh.shape[1]
        h = jnp.zeros((B, H), jnp.float32)
        c = jnp.zeros((B, H), jnp.float32)
        outs = []
        for t in range(T):
            g = seq[:, t, :] @ w_ih.T + b_ih + h @ w_hh.T + b_hh
            i = jax.nn.sigmoid(g[:, :H])
            f = jax.nn.sigmoid(g[:, H:2 * H])
            gg = jnp.tanh(g[:, 2 * H:3 * H])
            o = jax.nn.sigmoid(g[:, 3 * H:])
            c = f * c + i * gg
            h = o * jnp.tanh(c)
            outs.append(h)
        seq = jnp.stack(outs, axis=1)
        h_list.append(h)
        c_list.append(c)
    return seq, (jnp.stack(h_list), jnp.stack(c_list))


# ----------------------------------------------------------------------------
if __name__ == "__main__":
    # StockLSTM(input_size, hidden_size, num_layers, output_size), small shapes.
    input_size, hidden_size, num_layers, output_size = 4, 32, 2, 1
    batch, seq_len = 2, 8

    key = jax.random.PRNGKey(0)
    key, kx = jax.random.split(key)
    x = jax.random.normal(kx, (batch, seq_len, input_size), dtype=jnp.float32)

    enc_params, key = init_lstm_params(key, num_layers, input_size, hidden_size)
    dec_params, key = init_lstm_params(key, num_layers, hidden_size, hidden_size)
    key, kw, kb = jax.random.split(key, 3)
    kfc = 1.0 / float(np.sqrt(hidden_size))
    fc_w = jax.random.uniform(kw, (output_size, hidden_size),
                              minval=-kfc, maxval=kfc, dtype=jnp.float32)
    fc_b = jax.random.uniform(kb, (output_size,),
                              minval=-kfc, maxval=kfc, dtype=jnp.float32)

    # Pure-JAX reference with PyTorch semantics.
    _, (hidden_ref, _) = ref_multilayer_lstm(x, enc_params)
    dec_out_ref, _ = ref_multilayer_lstm(hidden_ref, dec_params)
    ref_out = dec_out_ref[:, -1, :] @ fc_w.T + fc_b

    forward = jax.jit(stock_lstm_forward)

    # f32 matmul path: tight check of structure / padding / wavefront ordering.
    enc32, dec32, fcw32, fcb32 = prepare_params(
        enc_params, dec_params, fc_w, fc_b, matmul_dtype=jnp.float32)
    out32 = jax.block_until_ready(forward(x, enc32, dec32, fcw32, fcb32))
    assert out32.shape == (num_layers, output_size), out32.shape
    np.testing.assert_allclose(np.asarray(out32), np.asarray(ref_out),
                               rtol=1e-5, atol=1e-5)

    # bf16 matmul-operand path (production config): looser tolerance.
    enc16, dec16, fcw16, fcb16 = prepare_params(
        enc_params, dec_params, fc_w, fc_b, matmul_dtype=jnp.bfloat16)
    out16 = jax.block_until_ready(forward(x, enc16, dec16, fcw16, fcb16))
    assert out16.shape == (num_layers, output_size), out16.shape
    np.testing.assert_allclose(np.asarray(out16), np.asarray(ref_out),
                               rtol=5e-2, atol=5e-2)

    print("KERNEL_OK")
</pallas_src>

<mosaic_0001>
module attributes {stable_mosaic.version = 11 : i64} {
  func.func @_stock_lstm_kernel(%arg0: memref<16x4xf32, #tpu.memory_space<vmem>>, %arg1: memref<4x512xf32, #tpu.memory_space<vmem>>, %arg2: memref<128x512xf32, #tpu.memory_space<vmem>>, %arg3: memref<1x512xf32, #tpu.memory_space<vmem>>, %arg4: memref<128x512xf32, #tpu.memory_space<vmem>>, %arg5: memref<128x512xf32, #tpu.memory_space<vmem>>, %arg6: memref<1x512xf32, #tpu.memory_space<vmem>>, %arg7: memref<128x512xf32, #tpu.memory_space<vmem>>, %arg8: memref<128x512xf32, #tpu.memory_space<vmem>>, %arg9: memref<1x512xf32, #tpu.memory_space<vmem>>, %arg10: memref<128x512xf32, #tpu.memory_space<vmem>>, %arg11: memref<128x512xf32, #tpu.memory_space<vmem>>, %arg12: memref<1x512xf32, #tpu.memory_space<vmem>>, %arg13: memref<128x1xf32, #tpu.memory_space<vmem>>, %arg14: memref<1x1xf32, #tpu.memory_space<vmem>>, %arg15: memref<2x1xf32, #tpu.memory_space<vmem>>, %arg16: memref<8x2x512xf32, #tpu.memory_space<vmem>>, %arg17: memref<2x2x512xf32, #tpu.memory_space<vmem>>) attributes {dimension_semantics = [], scalar_prefetch = 0 : i64, scratch_operands = 2 : i64, tpu.core_type = #tpu.core_type<tc>} {
    %c0 = arith.constant 0 : index
    %c0_0 = arith.constant 0 : index
    %0 = vector.load %arg0[%c0, %c0_0] : memref<16x4xf32, #tpu.memory_space<vmem>>, vector<16x4xf32>
    %c0_1 = arith.constant 0 : index
    %c0_2 = arith.constant 0 : index
    %1 = vector.load %arg1[%c0_1, %c0_2] : memref<4x512xf32, #tpu.memory_space<vmem>>, vector<4x512xf32>
    %cst = arith.constant dense<0.000000e+00> : vector<16x512xf32>
    %2 = tpu.matmul %0, %1, %cst {dimension_numbers = #tpu.dot_dimension_numbers<[1], [0], [0], [1], [0, 0, 1, 1], [], []>} : vector<16x4xf32>, vector<4x512xf32>, vector<16x512xf32> -> vector<16x512xf32>
    %c0_3 = arith.constant 0 : index
    %c0_4 = arith.constant 0 : index
    %3 = vector.load %arg3[%c0_3, %c0_4] : memref<1x512xf32, #tpu.memory_space<vmem>>, vector<1x512xf32>
    %4 = vector.broadcast %3 : vector<1x512xf32> to vector<16x512xf32>
    %5 = arith.addf %2, %4 : vector<16x512xf32>
    %6 = vector.extract_strided_slice %5 {offsets = [0, 0], sizes = [2, 512], strides = [1, 1]} : vector<16x512xf32> to vector<2x512xf32>
    %c0_5 = arith.constant 0 : index
    %c0_6 = arith.constant 0 : index
    %c0_7 = arith.constant 0 : index
    %7 = vector.load %arg16[%c0_5, %c0_6, %c0_7] : memref<8x2x512xf32, #tpu.memory_space<vmem>>, vector<1x2x512xf32>
    %8 = vector.shape_cast %7 : vector<1x2x512xf32> to vector<2x512xf32>
    %9 = vector.shape_cast %6 : vector<2x512xf32> to vector<1x2x512xf32>
    tpu.vector_store %arg16[%c0_5, %c0_6, %c0_7], %9 {strides = array<i32>} : memref<8x2x512xf32, #tpu.memory_space<vmem>>, vector<1x2x512xf32>,
    %10 = vector.extract_strided_slice %5 {offsets = [2, 0], sizes = [2, 512], strides = [1, 1]} : vector<16x512xf32> to vector<2x512xf32>
    %c1 = arith.constant 1 : index
    %c0_8 = arith.constant 0 : index
    %c0_9 = arith.constant 0 : index
    %11 = vector.load %arg16[%c1, %c0_8, %c0_9] : memref<8x2x512xf32, #tpu.memory_space<vmem>>, vector<1x2x512xf32>
    %12 = vector.shape_cast %11 : vector<1x2x512xf32> to vector<2x512xf32>
    %13 = vector.shape_cast %10 : vector<2x512xf32> to vector<1x2x512xf32>
    tpu.vector_store %arg16[%c1, %c0_8, %c0_9], %13 {strides = array<i32>} : memref<8x2x512xf32, #tpu.memory_space<vmem>>, vector<1x2x512xf32>,
    %14 = vector.extract_strided_slice %5 {offsets = [4, 0], sizes = [2, 512], strides = [1, 1]} : vector<16x512xf32> to vector<2x512xf32>
    %c2 = arith.constant 2 : index
    %c0_10 = arith.constant 0 : index
    %c0_11 = arith.constant 0 : index
    %15 = vector.load %arg16[%c2, %c0_10, %c0_11] : memref<8x2x512xf32, #tpu.memory_space<vmem>>, vector<1x2x512xf32>
    %16 = vector.shape_cast %15 : vector<1x2x512xf32> to vector<2x512xf32>
    %17 = vector.shape_cast %14 : vector<2x512xf32> to vector<1x2x512xf32>
    tpu.vector_store %arg16[%c2, %c0_10, %c0_11], %17 {strides = array<i32>} : memref<8x2x512xf32, #tpu.memory_space<vmem>>, vector<1x2x512xf32>,
    %18 = vector.extract_strided_slice %5 {offsets = [6, 0], sizes = [2, 512], strides = [1, 1]} : vector<16x512xf32> to vector<2x512xf32>
    %c3 = arith.constant 3 : index
    %c0_12 = arith.constant 0 : index
    %c0_13 = arith.constant 0 : index
    %19 = vector.load %arg16[%c3, %c0_12, %c0_13] : memref<8x2x512xf32, #tpu.memory_space<vmem>>, vector<1x2x512xf32>
    %20 = vector.shape_cast %19 : vector<1x2x512xf32> to vector<2x512xf32>
    %21 = vector.shape_cast %18 : vector<2x512xf32> to vector<1x2x512xf32>
    tpu.vector_store %arg16[%c3, %c0_12, %c0_13], %21 {strides = array<i32>} : memref<8x2x512xf32, #tpu.memory_space<vmem>>, vector<1x2x512xf32>,
    %22 = vector.extract_strided_slice %5 {offsets = [8, 0], sizes = [2, 512], strides = [1, 1]} : vector<16x512xf32> to vector<2x512xf32>
    %c4 = arith.constant 4 : index
    %c0_14 = arith.constant 0 : index
    %c0_15 = arith.constant 0 : index
    %23 = vector.load %arg16[%c4, %c0_14, %c0_15] : memref<8x2x512xf32, #tpu.memory_space<vmem>>, vector<1x2x512xf32>
    %24 = vector.shape_cast %23 : vector<1x2x512xf32> to vector<2x512xf32>
    %25 = vector.shape_cast %22 : vector<2x512xf32> to vector<1x2x512xf32>
    tpu.vector_store %arg16[%c4, %c0_14, %c0_15], %25 {strides = array<i32>} : memref<8x2x512xf32, #tpu.memory_space<vmem>>, vector<1x2x512xf32>,
    %26 = vector.extract_strided_slice %5 {offsets = [10, 0], sizes = [2, 512], strides = [1, 1]} : vector<16x512xf32> to vector<2x512xf32>
    %c5 = arith.constant 5 : index
    %c0_16 = arith.constant 0 : index
    %c0_17 = arith.constant 0 : index
    %27 = vector.load %arg16[%c5, %c0_16, %c0_17] : memref<8x2x512xf32, #tpu.memory_space<vmem>>, vector<1x2x512xf32>
    %28 = vector.shape_cast %27 : vector<1x2x512xf32> to vector<2x512xf32>
    %29 = vector.shape_cast %26 : vector<2x512xf32> to vector<1x2x512xf32>
    tpu.vector_store %arg16[%c5, %c0_16, %c0_17], %29 {strides = array<i32>} : memref<8x2x512xf32, #tpu.memory_space<vmem>>, vector<1x2x512xf32>,
    %30 = vector.extract_strided_slice %5 {offsets = [12, 0], sizes = [2, 512], strides = [1, 1]} : vector<16x512xf32> to vector<2x512xf32>
    %c6 = arith.constant 6 : index
    %c0_18 = arith.constant 0 : index
    %c0_19 = arith.constant 0 : index
    %31 = vector.load %arg16[%c6, %c0_18, %c0_19] : memref<8x2x512xf32, #tpu.memory_space<vmem>>, vector<1x2x512xf32>
    %32 = vector.shape_cast %31 : vector<1x2x512xf32> to vector<2x512xf32>
    %33 = vector.shape_cast %30 : vector<2x512xf32> to vector<1x2x512xf32>
    tpu.vector_store %arg16[%c6, %c0_18, %c0_19], %33 {strides = array<i32>} : memref<8x2x512xf32, #tpu.memory_space<vmem>>, vector<1x2x512xf32>,
    %34 = vector.extract_strided_slice %5 {offsets = [14, 0], sizes = [2, 512], strides = [1, 1]} : vector<16x512xf32> to vector<2x512xf32>
    %c7 = arith.constant 7 : index
    %c0_20 = arith.constant 0 : index
    %c0_21 = arith.constant 0 : index
    %35 = vector.load %arg16[%c7, %c0_20, %c0_21] : memref<8x2x512xf32, #tpu.memory_space<vmem>>, vector<1x2x512xf32>
    %36 = vector.shape_cast %35 : vector<1x2x512xf32> to vector<2x512xf32>
    %37 = vector.shape_cast %34 : vector<2x512xf32> to vector<1x2x512xf32>
    tpu.vector_store %arg16[%c7, %c0_20, %c0_21], %37 {strides = array<i32>} : memref<8x2x512xf32, #tpu.memory_space<vmem>>, vector<1x2x512xf32>,
    %cst_22 = arith.constant 0.000000e+00 : f32
    %38 = vector.broadcast %cst_22 : f32 to vector<2x128xf32>
    %cst_23 = arith.constant 0.000000e+00 : f32
    %39 = vector.broadcast %cst_23 : f32 to vector<2x128xf32>
    %cst_24 = arith.constant 0.000000e+00 : f32
    %40 = vector.broadcast %cst_24 : f32 to vector<2x128xf32>
    %cst_25 = arith.constant 0.000000e+00 : f32
    %41 = vector.broadcast %cst_25 : f32 to vector<2x128xf32>
    %c0_26 = arith.constant 0 : index
    %c0_27 = arith.constant 0 : index
    %c0_28 = arith.constant 0 : index
    %42 = vector.load %arg16[%c0_26, %c0_27, %c0_28] : memref<8x2x512xf32, #tpu.memory_space<vmem>>, vector<1x2x512xf32>
    %43 = vector.shape_cast %42 : vector<1x2x512xf32> to vector<2x512xf32>
    %c0_29 = arith.constant 0 : index
    %c0_30 = arith.constant 0 : index
    %44 = vector.load %arg2[%c0_29, %c0_30] : memref<128x512xf32, #tpu.memory_space<vmem>>, vector<128x512xf32>
    %cst_31 = arith.constant dense<0.000000e+00> : vector<2x512xf32>
    %45 = tpu.matmul %38, %44, %cst_31 {dimension_numbers = #tpu.dot_dimension_numbers<[1], [0], [0], [1], [0, 0, 1, 1], [], []>} : vector<2x128xf32>, vector<128x512xf32>, vector<2x512xf32> -> vector<2x512xf32>
    %46 = arith.addf %43, %45 : vector<2x512xf32>
    %47 = vector.extract_strided_slice %46 {offsets = [0, 0], sizes = [2, 128], strides = [1, 1]} : vector<2x512xf32> to vector<2x128xf32>
    %48 = arith.negf %47 : vector<2x128xf32>
    %49 = math.exp %48 : vector<2x128xf32>
    %cst_32 = arith.constant 1.000000e+00 : f32
    %50 = vector.broadcast %cst_32 : f32 to vector<2x128xf32>
    %51 = arith.addf %50, %49 : vector<2x128xf32>
    %52 = arith.divf %50, %51 : vector<2x128xf32>
    %53 = vector.extract_strided_slice %46 {offsets = [0, 128], sizes = [2, 128], strides = [1, 1]} : vector<2x512xf32> to vector<2x128xf32>
    %54 = arith.negf %53 : vector<2x128xf32>
    %55 = math.exp %54 : vector<2x128xf32>
    %cst_33 = arith.constant 1.000000e+00 : f32
    %56 = vector.broadcast %cst_33 : f32 to vector<2x128xf32>
    %57 = arith.addf %56, %55 : vector<2x128xf32>
    %58 = arith.divf %56, %57 : vector<2x128xf32>
    %59 = vector.extract_strided_slice %46 {offsets = [0, 256], sizes = [2, 128], strides = [1, 1]} : vector<2x512xf32> to vector<2x128xf32>
    %60 = math.tanh %59 : vector<2x128xf32>
    %61 = vector.extract_strided_slice %46 {offsets = [0, 384], sizes = [2, 128], strides = [1, 1]} : vector<2x512xf32> to vector<2x128xf32>
    %62 = arith.negf %61 : vector<2x128xf32>
    %63 = math.exp %62 : vector<2x128xf32>
    %cst_34 = arith.constant 1.000000e+00 : f32
    %64 = vector.broadcast %cst_34 : f32 to vector<2x128xf32>
    %65 = arith.addf %64, %63 : vector<2x128xf32>
    %66 = arith.divf %64, %65 : vector<2x128xf32>
    %67 = arith.mulf %58, %40 : vector<2x128xf32>
    %68 = arith.mulf %52, %60 : vector<2x128xf32>
    %69 = arith.addf %67, %68 : vector<2x128xf32>
    %70 = math.tanh %69 : vector<2x128xf32>
    %71 = arith.mulf %66, %70 : vector<2x128xf32>
    %c1_35 = arith.constant 1 : index
    %c0_36 = arith.constant 0 : index
    %c0_37 = arith.constant 0 : index
    %72 = vector.load %arg16[%c1_35, %c0_36, %c0_37] : memref<8x2x512xf32, #tpu.memory_space<vmem>>, vector<1x2x512xf32>
    %73 = vector.shape_cast %72 : vector<1x2x512xf32> to vector<2x512xf32>
    %c0_38 = arith.constant 0 : index
    %c0_39 = arith.constant 0 : index
    %74 = vector.load %arg2[%c0_38, %c0_39] : memref<128x512xf32, #tpu.memory_space<vmem>>, vector<128x512xf32>
    %cst_40 = arith.constant dense<0.000000e+00> : vector<2x512xf32>
    %75 = tpu.matmul %71, %74, %cst_40 {dimension_numbers = #tpu.dot_dimension_numbers<[1], [0], [0], [1], [0, 0, 1, 1], [], []>} : vector<2x128xf32>, vector<128x512xf32>, vector<2x512xf32> -> vector<2x512xf32>
    %76 = arith.addf %73, %75 : vector<2x512xf32>
    %77 = vector.extract_strided_slice %76 {offsets = [0, 0], sizes = [2, 128], strides = [1, 1]} : vector<2x512xf32> to vector<2x128xf32>
    %78 = arith.negf %77 : vector<2x128xf32>
    %79 = math.exp %78 : vector<2x128xf32>
    %cst_41 = arith.constant 1.000000e+00 : f32
    %80 = vector.broadcast %cst_41 : f32 to vector<2x128xf32>
    %81 = arith.addf %80, %79 : vector<2x128xf32>
    %82 = arith.divf %80, %81 : vector<2x128xf32>
    %83 = vector.extract_strided_slice %76 {offsets = [0, 128], sizes = [2, 128], strides = [1, 1]} : vector<2x512xf32> to vector<2x128xf32>
    %84 = arith.negf %83 : vector<2x128xf32>
    %85 = math.exp %84 : vector<2x128xf32>
    %cst_42 = arith.constant 1.000000e+00 : f32
    %86 = vector.broadcast %cst_42 : f32 to vector<2x128xf32>
    %87 = arith.addf %86, %85 : vector<2x128xf32>
    %88 = arith.divf %86, %87 : vector<2x128xf32>
    %89 = vector.extract_strided_slice %76 {offsets = [0, 256], sizes = [2, 128], strides = [1, 1]} : vector<2x512xf32> to vector<2x128xf32>
    %90 = math.tanh %89 : vector<2x128xf32>
    %91 = vector.extract_strided_slice %76 {offsets = [0, 384], sizes = [2, 128], strides = [1, 1]} : vector<2x512xf32> to vector<2x128xf32>
    %92 = arith.negf %91 : vector<2x128xf32>
    %93 = math.exp %92 : vector<2x128xf32>
    %cst_43 = arith.constant 1.000000e+00 : f32
    %94 = vector.broadcast %cst_43 : f32 to vector<2x128xf32>
    %95 = arith.addf %94, %93 : vector<2x128xf32>
    %96 = arith.divf %94, %95 : vector<2x128xf32>
    %97 = arith.mulf %88, %69 : vector<2x128xf32>
    %98 = arith.mulf %82, %90 : vector<2x128xf32>
    %99 = arith.addf %97, %98 : vector<2x128xf32>
    %100 = math.tanh %99 : vector<2x128xf32>
    %101 = arith.mulf %96, %100 : vector<2x128xf32>
    %c0_44 = arith.constant 0 : index
    %c0_45 = arith.constant 0 : index
    %102 = vector.load %arg4[%c0_44, %c0_45] : memref<128x512xf32, #tpu.memory_space<vmem>>, vector<128x512xf32>
    %cst_46 = arith.constant dense<0.000000e+00> : vector<2x512xf32>
    %103 = tpu.matmul %71, %102, %cst_46 {dimension_numbers = #tpu.dot_dimension_numbers<[1], [0], [0], [1], [0, 0, 1, 1], [], []>} : vector<2x128xf32>, vector<128x512xf32>, vector<2x512xf32> -> vector<2x512xf32>
    %c0_47 = arith.constant 0 : index
    %c0_48 = arith.constant 0 : index
    %104 = vector.load %arg6[%c0_47, %c0_48] : memref<1x512xf32, #tpu.memory_space<vmem>>, vector<1x512xf32>
    %105 = vector.broadcast %104 : vector<1x512xf32> to vector<2x512xf32>
    %106 = arith.addf %103, %105 : vector<2x512xf32>
    %c0_49 = arith.constant 0 : index
    %c0_50 = arith.constant 0 : index
    %107 = vector.load %arg5[%c0_49, %c0_50] : memref<128x512xf32, #tpu.memory_space<vmem>>, vector<128x512xf32>
    %cst_51 = arith.constant dense<0.000000e+00> : vector<2x512xf32>
    %108 = tpu.matmul %39, %107, %cst_51 {dimension_numbers = #tpu.dot_dimension_numbers<[1], [0], [0], [1], [0, 0, 1, 1], [], []>} : vector<2x128xf32>, vector<128x512xf32>, vector<2x512xf32> -> vector<2x512xf32>
    %109 = arith.addf %106, %108 : vector<2x512xf32>
    %110 = vector.extract_strided_slice %109 {offsets = [0, 0], sizes = [2, 128], strides = [1, 1]} : vector<2x512xf32> to vector<2x128xf32>
    %111 = arith.negf %110 : vector<2x128xf32>
    %112 = math.exp %111 : vector<2x128xf32>
    %cst_52 = arith.constant 1.000000e+00 : f32
    %113 = vector.broadcast %cst_52 : f32 to vector<2x128xf32>
    %114 = arith.addf %113, %112 : vector<2x128xf32>
    %115 = arith.divf %113, %114 : vector<2x128xf32>
    %116 = vector.extract_strided_slice %109 {offsets = [0, 128], sizes = [2, 128], strides = [1, 1]} : vector<2x512xf32> to vector<2x128xf32>
    %117 = arith.negf %116 : vector<2x128xf32>
    %118 = math.exp %117 : vector<2x128xf32>
    %cst_53 = arith.constant 1.000000e+00 : f32
    %119 = vector.broadcast %cst_53 : f32 to vector<2x128xf32>
    %120 = arith.addf %119, %118 : vector<2x128xf32>
    %121 = arith.divf %119, %120 : vector<2x128xf32>
    %122 = vector.extract_strided_slice %109 {offsets = [0, 256], sizes = [2, 128], strides = [1, 1]} : vector<2x512xf32> to vector<2x128xf32>
    %123 = math.tanh %122 : vector<2x128xf32>
    %124 = vector.extract_strided_slice %109 {offsets = [0, 384], sizes = [2, 128], strides = [1, 1]} : vector<2x512xf32> to vector<2x128xf32>
    %125 = arith.negf %124 : vector<2x128xf32>
    %126 = math.exp %125 : vector<2x128xf32>
    %cst_54 = arith.constant 1.000000e+00 : f32
    %127 = vector.broadcast %cst_54 : f32 to vector<2x128xf32>
    %128 = arith.addf %127, %126 : vector<2x128xf32>
    %129 = arith.divf %127, %128 : vector<2x128xf32>
    %130 = arith.mulf %121, %41 : vector<2x128xf32>
    %131 = arith.mulf %115, %123 : vector<2x128xf32>
    %132 = arith.addf %130, %131 : vector<2x128xf32>
    %133 = math.tanh %132 : vector<2x128xf32>
    %134 = arith.mulf %129, %133 : vector<2x128xf32>
    %c2_55 = arith.constant 2 : index
    %c0_56 = arith.constant 0 : index
    %c0_57 = arith.constant 0 : index
    %135 = vector.load %arg16[%c2_55, %c0_56, %c0_57] : memref<8x2x512xf32, #tpu.memory_space<vmem>>, vector<1x2x512xf32>
    %136 = vector.shape_cast %135 : vector<1x2x512xf32> to vector<2x512xf32>
    %c0_58 = arith.constant 0 : index
    %c0_59 = arith.constant 0 : index
    %137 = vector.load %arg2[%c0_58, %c0_59] : memref<128x512xf32, #tpu.memory_space<vmem>>, vector<128x512xf32>
    %cst_60 = arith.constant dense<0.000000e+00> : vector<2x512xf32>
    %138 = tpu.matmul %101, %137, %cst_60 {dimension_numbers = #tpu.dot_dimension_numbers<[1], [0], [0], [1], [0, 0, 1, 1], [], []>} : vector<2x128xf32>, vector<128x512xf32>, vector<2x512xf32> -> vector<2x512xf32>
    %139 = arith.addf %136, %138 : vector<2x512xf32>
    %140 = vector.extract_strided_slice %139 {offsets = [0, 0], sizes = [2, 128], strides = [1, 1]} : vector<2x512xf32> to vector<2x128xf32>
    %141 = arith.negf %140 : vector<2x128xf32>
    %142 = math.exp %141 : vector<2x128xf32>
    %cst_61 = arith.constant 1.000000e+00 : f32
    %143 = vector.broadcast %cst_61 : f32 to vector<2x128xf32>
    %144 = arith.addf %143, %142 : vector<2x128xf32>
    %145 = arith.divf %143, %144 : vector<2x128xf32>
    %146 = vector.extract_strided_slice %139 {offsets = [0, 128], sizes = [2, 128], strides = [1, 1]} : vector<2x512xf32> to vector<2x128xf32>
    %147 = arith.negf %146 : vector<2x128xf32>
    %148 = math.exp %147 : vector<2x128xf32>
    %cst_62 = arith.constant 1.000000e+00 : f32
    %149 = vector.broadcast %cst_62 : f32 to vector<2x128xf32>
    %150 = arith.addf %149, %148 : vector<2x128xf32>
    %151 = arith.divf %149, %150 : vector<2x128xf32>
    %152 = vector.extract_strided_slice %139 {offsets = [0, 256], sizes = [2, 128], strides = [1, 1]} : vector<2x512xf32> to vector<2x128xf32>
    %153 = math.tanh %152 : vector<2x128xf32>
    %154 = vector.extract_strided_slice %139 {offsets = [0, 384], sizes = [2, 128], strides = [1, 1]} : vector<2x512xf32> to vector<2x128xf32>
    %155 = arith.negf %154 : vector<2x128xf32>
    %156 = math.exp %155 : vector<2x128xf32>
    %cst_63 = arith.constant 1.000000e+00 : f32
    %157 = vector.broadcast %cst_63 : f32 to vector<2x128xf32>
    %158 = arith.addf %157, %156 : vector<2x128xf32>
    %159 = arith.divf %157, %158 : vector<2x128xf32>
    %160 = arith.mulf %151, %99 : vector<2x128xf32>
    %161 = arith.mulf %145, %153 : vector<2x128xf32>
    %162 = arith.addf %160, %161 : vector<2x128xf32>
    %163 = math.tanh %162 : vector<2x128xf32>
    %164 = arith.mulf %159, %163 : vector<2x128xf32>
    %c0_64 = arith.constant 0 : index
    %c0_65 = arith.constant 0 : index
    %165 = vector.load %arg4[%c0_64, %c0_65] : memref<128x512xf32, #tpu.memory_space<vmem>>, vector<128x512xf32>
    %cst_66 = arith.constant dense<0.000000e+00> : vector<2x512xf32>
    %166 = tpu.matmul %101, %165, %cst_66 {dimension_numbers = #tpu.dot_dimension_numbers<[1], [0], [0], [1], [0, 0, 1, 1], [], []>} : vector<2x128xf32>, vector<128x512xf32>, vector<2x512xf32> -> vector<2x512xf32>
    %c0_67 = arith.constant 0 : index
    %c0_68 = arith.constant 0 : index
    %167 = vector.load %arg6[%c0_67, %c0_68] : memref<1x512xf32, #tpu.memory_space<vmem>>, vector<1x512xf32>
    %168 = vector.broadcast %167 : vector<1x512xf32> to vector<2x512xf32>
    %169 = arith.addf %166, %168 : vector<2x512xf32>
    %c0_69 = arith.constant 0 : index
    %c0_70 = arith.constant 0 : index
    %170 = vector.load %arg5[%c0_69, %c0_70] : memref<128x512xf32, #tpu.memory_space<vmem>>, vector<128x512xf32>
    %cst_71 = arith.constant dense<0.000000e+00> : vector<2x512xf32>
    %171 = tpu.matmul %134, %170, %cst_71 {dimension_numbers = #tpu.dot_dimension_numbers<[1], [0], [0], [1], [0, 0, 1, 1], [], []>} : vector<2x128xf32>, vector<128x512xf32>, vector<2x512xf32> -> vector<2x512xf32>
    %172 = arith.addf %169, %171 : vector<2x512xf32>
    %173 = vector.extract_strided_slice %172 {offsets = [0, 0], sizes = [2, 128], strides = [1, 1]} : vector<2x512xf32> to vector<2x128xf32>
    %174 = arith.negf %173 : vector<2x128xf32>
    %175 = math.exp %174 : vector<2x128xf32>
    %cst_72 = arith.constant 1.000000e+00 : f32
    %176 = vector.broadcast %cst_72 : f32 to vector<2x128xf32>
    %177 = arith.addf %176, %175 : vector<2x128xf32>
    %178 = arith.divf %176, %177 : vector<2x128xf32>
    %179 = vector.extract_strided_slice %172 {offsets = [0, 128], sizes = [2, 128], strides = [1, 1]} : vector<2x512xf32> to vector<2x128xf32>
    %180 = arith.negf %179 : vector<2x128xf32>
    %181 = math.exp %180 : vector<2x128xf32>
    %cst_73 = arith.constant 1.000000e+00 : f32
    %182 = vector.broadcast %cst_73 : f32 to vector<2x128xf32>
    %183 = arith.addf %182, %181 : vector<2x128xf32>
    %184 = arith.divf %182, %183 : vector<2x128xf32>
    %185 = vector.extract_strided_slice %172 {offsets = [0, 256], sizes = [2, 128], strides = [1, 1]} : vector<2x512xf32> to vector<2x128xf32>
    %186 = math.tanh %185 : vector<2x128xf32>
    %187 = vector.extract_strided_slice %172 {offsets = [0, 384], sizes = [2, 128], strides = [1, 1]} : vector<2x512xf32> to vector<2x128xf32>
    %188 = arith.negf %187 : vector<2x128xf32>
    %189 = math.exp %188 : vector<2x128xf32>
    %cst_74 = arith.constant 1.000000e+00 : f32
    %190 = vector.broadcast %cst_74 : f32 to vector<2x128xf32>
    %191 = arith.addf %190, %189 : vector<2x128xf32>
    %192 = arith.divf %190, %191 : vector<2x128xf32>
    %193 = arith.mulf %184, %132 : vector<2x128xf32>
    %194 = arith.mulf %178, %186 : vector<2x128xf32>
    %195 = arith.addf %193, %194 : vector<2x128xf32>
    %196 = math.tanh %195 : vector<2x128xf32>
    %197 = arith.mulf %192, %196 : vector<2x128xf32>
    %c3_75 = arith.constant 3 : index
    %c0_76 = arith.constant 0 : index
    %c0_77 = arith.constant 0 : index
    %198 = vector.load %arg16[%c3_75, %c0_76, %c0_77] : memref<8x2x512xf32, #tpu.memory_space<vmem>>, vector<1x2x512xf32>
    %199 = vector.shape_cast %198 : vector<1x2x512xf32> to vector<2x512xf32>
    %c0_78 = arith.constant 0 : index
    %c0_79 = arith.constant 0 : index
    %200 = vector.load %arg2[%c0_78, %c0_79] : memref<128x512xf32, #tpu.memory_space<vmem>>, vector<128x512xf32>
    %cst_80 = arith.constant dense<0.000000e+00> : vector<2x512xf32>
    %201 = tpu.matmul %164, %200, %cst_80 {dimension_numbers = #tpu.dot_dimension_numbers<[1], [0], [0], [1], [0, 0, 1, 1], [], []>} : vector<2x128xf32>, vector<128x512xf32>, vector<2x512xf32> -> vector<2x512xf32>
    %202 = arith.addf %199, %201 : vector<2x512xf32>
    %203 = vector.extract_strided_slice %202 {offsets = [0, 0], sizes = [2, 128], strides = [1, 1]} : vector<2x512xf32> to vector<2x128xf32>
    %204 = arith.negf %203 : vector<2x128xf32>
    %205 = math.exp %204 : vector<2x128xf32>
    %cst_81 = arith.constant 1.000000e+00 : f32
    %206 = vector.broadcast %cst_81 : f32 to vector<2x128xf32>
    %207 = arith.addf %206, %205 : vector<2x128xf32>
    %208 = arith.divf %206, %207 : vector<2x128xf32>
    %209 = vector.extract_strided_slice %202 {offsets = [0, 128], sizes = [2, 128], strides = [1, 1]} : vector<2x512xf32> to vector<2x128xf32>
    %210 = arith.negf %209 : vector<2x128xf32>
    %211 = math.exp %210 : vector<2x128xf32>
    %cst_82 = arith.constant 1.000000e+00 : f32
    %212 = vector.broadcast %cst_82 : f32 to vector<2x128xf32>
    %213 = arith.addf %212, %211 : vector<2x128xf32>
    %214 = arith.divf %212, %213 : vector<2x128xf32>
    %215 = vector.extract_strided_slice %202 {offsets = [0, 256], sizes = [2, 128], strides = [1, 1]} : vector<2x512xf32> to vector<2x128xf32>
    %216 = math.tanh %215 : vector<2x128xf32>
    %217 = vector.extract_strided_slice %202 {offsets = [0, 384], sizes = [2, 128], strides = [1, 1]} : vector<2x512xf32> to vector<2x128xf32>
    %218 = arith.negf %217 : vector<2x128xf32>
    %219 = math.exp %218 : vector<2x128xf32>
    %cst_83 = arith.constant 1.000000e+00 : f32
    %220 = vector.broadcast %cst_83 : f32 to vector<2x128xf32>
    %221 = arith.addf %220, %219 : vector<2x128xf32>
    %222 = arith.divf %220, %221 : vector<2x128xf32>
    %223 = arith.mulf %214, %162 : vector<2x128xf32>
    %224 = arith.mulf %208, %216 : vector<2x128xf32>
    %225 = arith.addf %223, %224 : vector<2x128xf32>
    %226 = math.tanh %225 : vector<2x128xf32>
    %227 = arith.mulf %222, %226 : vector<2x128xf32>
    %c0_84 = arith.constant 0 : index
    %c0_85 = arith.constant 0 : index
    %228 = vector.load %arg4[%c0_84, %c0_85] : memref<128x512xf32, #tpu.memory_space<vmem>>, vector<128x512xf32>
    %cst_86 = arith.constant dense<0.000000e+00> : vector<2x512xf32>
    %229 = tpu.matmul %164, %228, %cst_86 {dimension_numbers = #tpu.dot_dimension_numbers<[1], [0], [0], [1], [0, 0, 1, 1], [], []>} : vector<2x128xf32>, vector<128x512xf32>, vector<2x512xf32> -> vector<2x512xf32>
    %c0_87 = arith.constant 0 : index
    %c0_88 = arith.constant 0 : index
    %230 = vector.load %arg6[%c0_87, %c0_88] : memref<1x512xf32, #tpu.memory_space<vmem>>, vector<1x512xf32>
    %231 = vector.broadcast %230 : vector<1x512xf32> to vector<2x512xf32>
    %232 = arith.addf %229, %231 : vector<2x512xf32>
    %c0_89 = arith.constant 0 : index
    %c0_90 = arith.constant 0 : index
    %233 = vector.load %arg5[%c0_89, %c0_90] : memref<128x512xf32, #tpu.memory_space<vmem>>, vector<128x512xf32>
    %cst_91 = arith.constant dense<0.000000e+00> : vector<2x512xf32>
    %234 = tpu.matmul %197, %233, %cst_91 {dimension_numbers = #tpu.dot_dimension_numbers<[1], [0], [0], [1], [0, 0, 1, 1], [], []>} : vector<2x128xf32>, vector<128x512xf32>, vector<2x512xf32> -> vector<2x512xf32>
    %235 = arith.addf %232, %234 : vector<2x512xf32>
    %236 = vector.extract_strided_slice %235 {offsets = [0, 0], sizes = [2, 128], strides = [1, 1]} : vector<2x512xf32> to vector<2x128xf32>
    %237 = arith.negf %236 : vector<2x128xf32>
    %238 = math.exp %237 : vector<2x128xf32>
    %cst_92 = arith.constant 1.000000e+00 : f32
    %239 = vector.broadcast %cst_92 : f32 to vector<2x128xf32>
    %240 = arith.addf %239, %238 : vector<2x128xf32>
    %241 = arith.divf %239, %240 : vector<2x128xf32>
    %242 = vector.extract_strided_slice %235 {offsets = [0, 128], sizes = [2, 128], strides = [1, 1]} : vector<2x512xf32> to vector<2x128xf32>
    %243 = arith.negf %242 : vector<2x128xf32>
    %244 = math.exp %243 : vector<2x128xf32>
    %cst_93 = arith.constant 1.000000e+00 : f32
    %245 = vector.broadcast %cst_93 : f32 to vector<2x128xf32>
    %246 = arith.addf %245, %244 : vector<2x128xf32>
    %247 = arith.divf %245, %246 : vector<2x128xf32>
    %248 = vector.extract_strided_slice %235 {offsets = [0, 256], sizes = [2, 128], strides = [1, 1]} : vector<2x512xf32> to vector<2x128xf32>
    %249 = math.tanh %248 : vector<2x128xf32>
    %250 = vector.extract_strided_slice %235 {offsets = [0, 384], sizes = [2, 128], strides = [1, 1]} : vector<2x512xf32> to vector<2x128xf32>
    %251 = arith.negf %250 : vector<2x128xf32>
    %252 = math.exp %251 : vector<2x128xf32>
    %cst_94 = arith.constant 1.000000e+00 : f32
    %253 = vector.broadcast %cst_94 : f32 to vector<2x128xf32>
    %254 = arith.addf %253, %252 : vector<2x128xf32>
    %255 = arith.divf %253, %254 : vector<2x128xf32>
    %256 = arith.mulf %247, %195 : vector<2x128xf32>
    %257 = arith.mulf %241, %249 : vector<2x128xf32>
    %258 = arith.addf %256, %257 : vector<2x128xf32>
    %259 = math.tanh %258 : vector<2x128xf32>
    %260 = arith.mulf %255, %259 : vector<2x128xf32>
    %c4_95 = arith.constant 4 : index
    %c0_96 = arith.constant 0 : index
    %c0_97 = arith.constant 0 : index
    %261 = vector.load %arg16[%c4_95, %c0_96, %c0_97] : memref<8x2x512xf32, #tpu.memory_space<vmem>>, vector<1x2x512xf32>
    %262 = vector.shape_cast %261 : vector<1x2x512xf32> to vector<2x512xf32>
    %c0_98 = arith.constant 0 : index
    %c0_99 = arith.constant 0 : index
    %263 = vector.load %arg2[%c0_98, %c0_99] : memref<128x512xf32, #tpu.memory_space<vmem>>, vector<128x512xf32>
    %cst_100 = arith.constant dense<0.000000e+00> : vector<2x512xf32>
    %264 = tpu.matmul %227, %263, %cst_100 {dimension_numbers = #tpu.dot_dimension_numbers<[1], [0], [0], [1], [0, 0, 1, 1], [], []>} : vector<2x128xf32>, vector<128x512xf32>, vector<2x512xf32> -> vector<2x512xf32>
    %265 = arith.addf %262, %264 : vector<2x512xf32>
    %266 = vector.extract_strided_slice %265 {offsets = [0, 0], sizes = [2, 128], strides = [1, 1]} : vector<2x512xf32> to vector<2x128xf32>
    %267 = arith.negf %266 : vector<2x128xf32>
    %268 = math.exp %267 : vector<2x128xf32>
    %cst_101 = arith.constant 1.000000e+00 : f32
    %269 = vector.broadcast %cst_101 : f32 to vector<2x128xf32>
    %270 = arith.addf %269, %268 : vector<2x128xf32>
    %271 = arith.divf %269, %270 : vector<2x128xf32>
    %272 = vector.extract_strided_slice %265 {offsets = [0, 128], sizes = [2, 128], strides = [1, 1]} : vector<2x512xf32> to vector<2x128xf32>
    %273 = arith.negf %272 : vector<2x128xf32>
    %274 = math.exp %273 : vector<2x128xf32>
    %cst_102 = arith.constant 1.000000e+00 : f32
    %275 = vector.broadcast %cst_102 : f32 to vector<2x128xf32>
    %276 = arith.addf %275, %274 : vector<2x128xf32>
    %277 = arith.divf %275, %276 : vector<2x128xf32>
    %278 = vector.extract_strided_slice %265 {offsets = [0, 256], sizes = [2, 128], strides = [1, 1]} : vector<2x512xf32> to vector<2x128xf32>
    %279 = math.tanh %278 : vector<2x128xf32>
    %280 = vector.extract_strided_slice %265 {offsets = [0, 384], sizes = [2, 128], strides = [1, 1]} : vector<2x512xf32> to vector<2x128xf32>
    %281 = arith.negf %280 : vector<2x128xf32>
    %282 = math.exp %281 : vector<2x128xf32>
    %cst_103 = arith.constant 1.000000e+00 : f32
    %283 = vector.broadcast %cst_103 : f32 to vector<2x128xf32>
    %284 = arith.addf %283, %282 : vector<2x128xf32>
    %285 = arith.divf %283, %284 : vector<2x128xf32>
    %286 = arith.mulf %277, %225 : vector<2x128xf32>
    %287 = arith.mulf %271, %279 : vector<2x128xf32>
    %288 = arith.addf %286, %287 : vector<2x128xf32>
    %289 = math.tanh %288 : vector<2x128xf32>
    %290 = arith.mulf %285, %289 : vector<2x128xf32>
    %c0_104 = arith.constant 0 : index
    %c0_105 = arith.constant 0 : index
    %291 = vector.load %arg4[%c0_104, %c0_105] : memref<128x512xf32, #tpu.memory_space<vmem>>, vector<128x512xf32>
    %cst_106 = arith.constant dense<0.000000e+00> : vector<2x512xf32>
    %292 = tpu.matmul %227, %291, %cst_106 {dimension_numbers = #tpu.dot_dimension_numbers<[1], [0], [0], [1], [0, 0, 1, 1], [], []>} : vector<2x128xf32>, vector<128x512xf32>, vector<2x512xf32> -> vector<2x512xf32>
    %c0_107 = arith.constant 0 : index
    %c0_108 = arith.constant 0 : index
    %293 = vector.load %arg6[%c0_107, %c0_108] : memref<1x512xf32, #tpu.memory_space<vmem>>, vector<1x512xf32>
    %294 = vector.broadcast %293 : vector<1x512xf32> to vector<2x512xf32>
    %295 = arith.addf %292, %294 : vector<2x512xf32>
    %c0_109 = arith.constant 0 : index
    %c0_110 = arith.constant 0 : index
    %296 = vector.load %arg5[%c0_109, %c0_110] : memref<128x512xf32, #tpu.memory_space<vmem>>, vector<128x512xf32>
    %cst_111 = arith.constant dense<0.000000e+00> : vector<2x512xf32>
    %297 = tpu.matmul %260, %296, %cst_111 {dimension_numbers = #tpu.dot_dimension_numbers<[1], [0], [0], [1], [0, 0, 1, 1], [], []>} : vector<2x128xf32>, vector<128x512xf32>, vector<2x512xf32> -> vector<2x512xf32>
    %298 = arith.addf %295, %297 : vector<2x512xf32>
    %299 = vector.extract_strided_slice %298 {offsets = [0, 0], sizes = [2, 128], strides = [1, 1]} : vector<2x512xf32> to vector<2x128xf32>
    %300 = arith.negf %299 : vector<2x128xf32>
    %301 = math.exp %300 : vector<2x128xf32>
    %cst_112 = arith.constant 1.000000e+00 : f32
    %302 = vector.broadcast %cst_112 : f32 to vector<2x128xf32>
    %303 = arith.addf %302, %301 : vector<2x128xf32>
    %304 = arith.divf %302, %303 : vector<2x128xf32>
    %305 = vector.extract_strided_slice %298 {offsets = [0, 128], sizes = [2, 128], strides = [1, 1]} : vector<2x512xf32> to vector<2x128xf32>
    %306 = arith.negf %305 : vector<2x128xf32>
    %307 = math.exp %306 : vector<2x128xf32>
    %cst_113 = arith.constant 1.000000e+00 : f32
    %308 = vector.broadcast %cst_113 : f32 to vector<2x128xf32>
    %309 = arith.addf %308, %307 : vector<2x128xf32>
    %310 = arith.divf %308, %309 : vector<2x128xf32>
    %311 = vector.extract_strided_slice %298 {offsets = [0, 256], sizes = [2, 128], strides = [1, 1]} : vector<2x512xf32> to vector<2x128xf32>
    %312 = math.tanh %311 : vector<2x128xf32>
    %313 = vector.extract_strided_slice %298 {offsets = [0, 384], sizes = [2, 128], strides = [1, 1]} : vector<2x512xf32> to vector<2x128xf32>
    %314 = arith.negf %313 : vector<2x128xf32>
    %315 = math.exp %314 : vector<2x128xf32>
    %cst_114 = arith.constant 1.000000e+00 : f32
    %316 = vector.broadcast %cst_114 : f32 to vector<2x128xf32>
    %317 = arith.addf %316, %315 : vector<2x128xf32>
    %318 = arith.divf %316, %317 : vector<2x128xf32>
    %319 = arith.mulf %310, %258 : vector<2x128xf32>
    %320 = arith.mulf %304, %312 : vector<2x128xf32>
    %321 = arith.addf %319, %320 : vector<2x128xf32>
    %322 = math.tanh %321 : vector<2x128xf32>
    %323 = arith.mulf %318, %322 : vector<2x128xf32>
    %c5_115 = arith.constant 5 : index
    %c0_116 = arith.constant 0 : index
    %c0_117 = arith.constant 0 : index
    %324 = vector.load %arg16[%c5_115, %c0_116, %c0_117] : memref<8x2x512xf32, #tpu.memory_space<vmem>>, vector<1x2x512xf32>
    %325 = vector.shape_cast %324 : vector<1x2x512xf32> to vector<2x512xf32>
    %c0_118 = arith.constant 0 : index
    %c0_119 = arith.constant 0 : index
    %326 = vector.load %arg2[%c0_118, %c0_119] : memref<128x512xf32, #tpu.memory_space<vmem>>, vector<128x512xf32>
    %cst_120 = arith.constant dense<0.000000e+00> : vector<2x512xf32>
    %327 = tpu.matmul %290, %326, %cst_120 {dimension_numbers = #tpu.dot_dimension_numbers<[1], [0], [0], [1], [0, 0, 1, 1], [], []>} : vector<2x128xf32>, vector<128x512xf32>, vector<2x512xf32> -> vector<2x512xf32>
    %328 = arith.addf %325, %327 : vector<2x512xf32>
    %329 = vector.extract_strided_slice %328 {offsets = [0, 0], sizes = [2, 128], strides = [1, 1]} : vector<2x512xf32> to vector<2x128xf32>
    %330 = arith.negf %329 : vector<2x128xf32>
    %331 = math.exp %330 : vector<2x128xf32>
    %cst_121 = arith.constant 1.000000e+00 : f32
    %332 = vector.broadcast %cst_121 : f32 to vector<2x128xf32>
    %333 = arith.addf %332, %331 : vector<2x128xf32>
    %334 = arith.divf %332, %333 : vector<2x128xf32>
    %335 = vector.extract_strided_slice %328 {offsets = [0, 128], sizes = [2, 128], strides = [1, 1]} : vector<2x512xf32> to vector<2x128xf32>
    %336 = arith.negf %335 : vector<2x128xf32>
    %337 = math.exp %336 : vector<2x128xf32>
    %cst_122 = arith.constant 1.000000e+00 : f32
    %338 = vector.broadcast %cst_122 : f32 to vector<2x128xf32>
    %339 = arith.addf %338, %337 : vector<2x128xf32>
    %340 = arith.divf %338, %339 : vector<2x128xf32>
    %341 = vector.extract_strided_slice %328 {offsets = [0, 256], sizes = [2, 128], strides = [1, 1]} : vector<2x512xf32> to vector<2x128xf32>
    %342 = math.tanh %341 : vector<2x128xf32>
    %343 = vector.extract_strided_slice %328 {offsets = [0, 384], sizes = [2, 128], strides = [1, 1]} : vector<2x512xf32> to vector<2x128xf32>
    %344 = arith.negf %343 : vector<2x128xf32>
    %345 = math.exp %344 : vector<2x128xf32>
    %cst_123 = arith.constant 1.000000e+00 : f32
    %346 = vector.broadcast %cst_123 : f32 to vector<2x128xf32>
    %347 = arith.addf %346, %345 : vector<2x128xf32>
    %348 = arith.divf %346, %347 : vector<2x128xf32>
    %349 = arith.mulf %340, %288 : vector<2x128xf32>
    %350 = arith.mulf %334, %342 : vector<2x128xf32>
    %351 = arith.addf %349, %350 : vector<2x128xf32>
    %352 = math.tanh %351 : vector<2x128xf32>
    %353 = arith.mulf %348, %352 : vector<2x128xf32>
    %c0_124 = arith.constant 0 : index
    %c0_125 = arith.constant 0 : index
    %354 = vector.load %arg4[%c0_124, %c0_125] : memref<128x512xf32, #tpu.memory_space<vmem>>, vector<128x512xf32>
    %cst_126 = arith.constant dense<0.000000e+00> : vector<2x512xf32>
    %355 = tpu.matmul %290, %354, %cst_126 {dimension_numbers = #tpu.dot_dimension_numbers<[1], [0], [0], [1], [0, 0, 1, 1], [], []>} : vector<2x128xf32>, vector<128x512xf32>, vector<2x512xf32> -> vector<2x512xf32>
    %c0_127 = arith.constant 0 : index
    %c0_128 = arith.constant 0 : index
    %356 = vector.load %arg6[%c0_127, %c0_128] : memref<1x512xf32, #tpu.memory_space<vmem>>, vector<1x512xf32>
    %357 = vector.broadcast %356 : vector<1x512xf32> to vector<2x512xf32>
    %358 = arith.addf %355, %357 : vector<2x512xf32>
    %c0_129 = arith.constant 0 : index
    %c0_130 = arith.constant 0 : index
    %359 = vector.load %arg5[%c0_129, %c0_130] : memref<128x512xf32, #tpu.memory_space<vmem>>, vector<128x512xf32>
    %cst_131 = arith.constant dense<0.000000e+00> : vector<2x512xf32>
    %360 = tpu.matmul %323, %359, %cst_131 {dimension_numbers = #tpu.dot_dimension_numbers<[1], [0], [0], [1], [0, 0, 1, 1], [], []>} : vector<2x128xf32>, vector<128x512xf32>, vector<2x512xf32> -> vector<2x512xf32>
    %361 = arith.addf %358, %360 : vector<2x512xf32>
    %362 = vector.extract_strided_slice %361 {offsets = [0, 0], sizes = [2, 128], strides = [1, 1]} : vector<2x512xf32> to vector<2x128xf32>
    %363 = arith.negf %362 : vector<2x128xf32>
    %364 = math.exp %363 : vector<2x128xf32>
    %cst_132 = arith.constant 1.000000e+00 : f32
    %365 = vector.broadcast %cst_132 : f32 to vector<2x128xf32>
    %366 = arith.addf %365, %364 : vector<2x128xf32>
    %367 = arith.divf %365, %366 : vector<2x128xf32>
    %368 = vector.extract_strided_slice %361 {offsets = [0, 128], sizes = [2, 128], strides = [1, 1]} : vector<2x512xf32> to vector<2x128xf32>
    %369 = arith.negf %368 : vector<2x128xf32>
    %370 = math.exp %369 : vector<2x128xf32>
    %cst_133 = arith.constant 1.000000e+00 : f32
    %371 = vector.broadcast %cst_133 : f32 to vector<2x128xf32>
    %372 = arith.addf %371, %370 : vector<2x128xf32>
    %373 = arith.divf %371, %372 : vector<2x128xf32>
    %374 = vector.extract_strided_slice %361 {offsets = [0, 256], sizes = [2, 128], strides = [1, 1]} : vector<2x512xf32> to vector<2x128xf32>
    %375 = math.tanh %374 : vector<2x128xf32>
    %376 = vector.extract_strided_slice %361 {offsets = [0, 384], sizes = [2, 128], strides = [1, 1]} : vector<2x512xf32> to vector<2x128xf32>
    %377 = arith.negf %376 : vector<2x128xf32>
    %378 = math.exp %377 : vector<2x128xf32>
    %cst_134 = arith.constant 1.000000e+00 : f32
    %379 = vector.broadcast %cst_134 : f32 to vector<2x128xf32>
    %380 = arith.addf %379, %378 : vector<2x128xf32>
    %381 = arith.divf %379, %380 : vector<2x128xf32>
    %382 = arith.mulf %373, %321 : vector<2x128xf32>
    %383 = arith.mulf %367, %375 : vector<2x128xf32>
    %384 = arith.addf %382, %383 : vector<2x128xf32>
    %385 = math.tanh %384 : vector<2x128xf32>
    %386 = arith.mulf %381, %385 : vector<2x128xf32>
    %c6_135 = arith.constant 6 : index
    %c0_136 = arith.constant 0 : index
    %c0_137 = arith.constant 0 : index
    %387 = vector.load %arg16[%c6_135, %c0_136, %c0_137] : memref<8x2x512xf32, #tpu.memory_space<vmem>>, vector<1x2x512xf32>
    %388 = vector.shape_cast %387 : vector<1x2x512xf32> to vector<2x512xf32>
    %c0_138 = arith.constant 0 : index
    %c0_139 = arith.constant 0 : index
    %389 = vector.load %arg2[%c0_138, %c0_139] : memref<128x512xf32, #tpu.memory_space<vmem>>, vector<128x512xf32>
    %cst_140 = arith.constant dense<0.000000e+00> : vector<2x512xf32>
    %390 = tpu.matmul %353, %389, %cst_140 {dimension_numbers = #tpu.dot_dimension_numbers<[1], [0], [0], [1], [0, 0, 1, 1], [], []>} : vector<2x128xf32>, vector<128x512xf32>, vector<2x512xf32> -> vector<2x512xf32>
    %391 = arith.addf %388, %390 : vector<2x512xf32>
    %392 = vector.extract_strided_slice %391 {offsets = [0, 0], sizes = [2, 128], strides = [1, 1]} : vector<2x512xf32> to vector<2x128xf32>
    %393 = arith.negf %392 : vector<2x128xf32>
    %394 = math.exp %393 : vector<2x128xf32>
    %cst_141 = arith.constant 1.000000e+00 : f32
    %395 = vector.broadcast %cst_141 : f32 to vector<2x128xf32>
    %396 = arith.addf %395, %394 : vector<2x128xf32>
    %397 = arith.divf %395, %396 : vector<2x128xf32>
    %398 = vector.extract_strided_slice %391 {offsets = [0, 128], sizes = [2, 128], strides = [1, 1]} : vector<2x512xf32> to vector<2x128xf32>
    %399 = arith.negf %398 : vector<2x128xf32>
    %400 = math.exp %399 : vector<2x128xf32>
    %cst_142 = arith.constant 1.000000e+00 : f32
    %401 = vector.broadcast %cst_142 : f32 to vector<2x128xf32>
    %402 = arith.addf %401, %400 : vector<2x128xf32>
    %403 = arith.divf %401, %402 : vector<2x128xf32>
    %404 = vector.extract_strided_slice %391 {offsets = [0, 256], sizes = [2, 128], strides = [1, 1]} : vector<2x512xf32> to vector<2x128xf32>
    %405 = math.tanh %404 : vector<2x128xf32>
    %406 = vector.extract_strided_slice %391 {offsets = [0, 384], sizes = [2, 128], strides = [1, 1]} : vector<2x512xf32> to vector<2x128xf32>
    %407 = arith.negf %406 : vector<2x128xf32>
    %408 = math.exp %407 : vector<2x128xf32>
    %cst_143 = arith.constant 1.000000e+00 : f32
    %409 = vector.broadcast %cst_143 : f32 to vector<2x128xf32>
    %410 = arith.addf %409, %408 : vector<2x128xf32>
    %411 = arith.divf %409, %410 : vector<2x128xf32>
    %412 = arith.mulf %403, %351 : vector<2x128xf32>
    %413 = arith.mulf %397, %405 : vector<2x128xf32>
    %414 = arith.addf %412, %413 : vector<2x128xf32>
    %415 = math.tanh %414 : vector<2x128xf32>
    %416 = arith.mulf %411, %415 : vector<2x128xf32>
    %c0_144 = arith.constant 0 : index
    %c0_145 = arith.constant 0 : index
    %417 = vector.load %arg4[%c0_144, %c0_145] : memref<128x512xf32, #tpu.memory_space<vmem>>, vector<128x512xf32>
    %cst_146 = arith.constant dense<0.000000e+00> : vector<2x512xf32>
    %418 = tpu.matmul %353, %417, %cst_146 {dimension_numbers = #tpu.dot_dimension_numbers<[1], [0], [0], [1], [0, 0, 1, 1], [], []>} : vector<2x128xf32>, vector<128x512xf32>, vector<2x512xf32> -> vector<2x512xf32>
    %c0_147 = arith.constant 0 : index
    %c0_148 = arith.constant 0 : index
    %419 = vector.load %arg6[%c0_147, %c0_148] : memref<1x512xf32, #tpu.memory_space<vmem>>, vector<1x512xf32>
    %420 = vector.broadcast %419 : vector<1x512xf32> to vector<2x512xf32>
    %421 = arith.addf %418, %420 : vector<2x512xf32>
    %c0_149 = arith.constant 0 : index
    %c0_150 = arith.constant 0 : index
    %422 = vector.load %arg5[%c0_149, %c0_150] : memref<128x512xf32, #tpu.memory_space<vmem>>, vector<128x512xf32>
    %cst_151 = arith.constant dense<0.000000e+00> : vector<2x512xf32>
    %423 = tpu.matmul %386, %422, %cst_151 {dimension_numbers = #tpu.dot_dimension_numbers<[1], [0], [0], [1], [0, 0, 1, 1], [], []>} : vector<2x128xf32>, vector<128x512xf32>, vector<2x512xf32> -> vector<2x512xf32>
    %424 = arith.addf %421, %423 : vector<2x512xf32>
    %425 = vector.extract_strided_slice %424 {offsets = [0, 0], sizes = [2, 128], strides = [1, 1]} : vector<2x512xf32> to vector<2x128xf32>
    %426 = arith.negf %425 : vector<2x128xf32>
    %427 = math.exp %426 : vector<2x128xf32>
    %cst_152 = arith.constant 1.000000e+00 : f32
    %428 = vector.broadcast %cst_152 : f32 to vector<2x128xf32>
    %429 = arith.addf %428, %427 : vector<2x128xf32>
    %430 = arith.divf %428, %429 : vector<2x128xf32>
    %431 = vector.extract_strided_slice %424 {offsets = [0, 128], sizes = [2, 128], strides = [1, 1]} : vector<2x512xf32> to vector<2x128xf32>
    %432 = arith.negf %431 : vector<2x128xf32>
    %433 = math.exp %432 : vector<2x128xf32>
    %cst_153 = arith.constant 1.000000e+00 : f32
    %434 = vector.broadcast %cst_153 : f32 to vector<2x128xf32>
    %435 = arith.addf %434, %433 : vector<2x128xf32>
    %436 = arith.divf %434, %435 : vector<2x128xf32>
    %437 = vector.extract_strided_slice %424 {offsets = [0, 256], sizes = [2, 128], strides = [1, 1]} : vector<2x512xf32> to vector<2x128xf32>
    %438 = math.tanh %437 : vector<2x128xf32>
    %439 = vector.extract_strided_slice %424 {offsets = [0, 384], sizes = [2, 128], strides = [1, 1]} : vector<2x512xf32> to vector<2x128xf32>
    %440 = arith.negf %439 : vector<2x128xf32>
    %441 = math.exp %440 : vector<2x128xf32>
    %cst_154 = arith.constant 1.000000e+00 : f32
    %442 = vector.broadcast %cst_154 : f32 to vector<2x128xf32>
    %443 = arith.addf %442, %441 : vector<2x128xf32>
    %444 = arith.divf %442, %443 : vector<2x128xf32>
    %445 = arith.mulf %436, %384 : vector<2x128xf32>
    %446 = arith.mulf %430, %438 : vector<2x128xf32>
    %447 = arith.addf %445, %446 : vector<2x128xf32>
    %448 = math.tanh %447 : vector<2x128xf32>
    %449 = arith.mulf %444, %448 : vector<2x128xf32>
    %c7_155 = arith.constant 7 : index
    %c0_156 = arith.constant 0 : index
    %c0_157 = arith.constant 0 : index
    %450 = vector.load %arg16[%c7_155, %c0_156, %c0_157] : memref<8x2x512xf32, #tpu.memory_space<vmem>>, vector<1x2x512xf32>
    %451 = vector.shape_cast %450 : vector<1x2x512xf32> to vector<2x512xf32>
    %c0_158 = arith.constant 0 : index
    %c0_159 = arith.constant 0 : index
    %452 = vector.load %arg2[%c0_158, %c0_159] : memref<128x512xf32, #tpu.memory_space<vmem>>, vector<128x512xf32>
    %cst_160 = arith.constant dense<0.000000e+00> : vector<2x512xf32>
    %453 = tpu.matmul %416, %452, %cst_160 {dimension_numbers = #tpu.dot_dimension_numbers<[1], [0], [0], [1], [0, 0, 1, 1], [], []>} : vector<2x128xf32>, vector<128x512xf32>, vector<2x512xf32> -> vector<2x512xf32>
    %454 = arith.addf %451, %453 : vector<2x512xf32>
    %455 = vector.extract_strided_slice %454 {offsets = [0, 0], sizes = [2, 128], strides = [1, 1]} : vector<2x512xf32> to vector<2x128xf32>
    %456 = arith.negf %455 : vector<2x128xf32>
    %457 = math.exp %456 : vector<2x128xf32>
    %cst_161 = arith.constant 1.000000e+00 : f32
    %458 = vector.broadcast %cst_161 : f32 to vector<2x128xf32>
    %459 = arith.addf %458, %457 : vector<2x128xf32>
    %460 = arith.divf %458, %459 : vector<2x128xf32>
    %461 = vector.extract_strided_slice %454 {offsets = [0, 128], sizes = [2, 128], strides = [1, 1]} : vector<2x512xf32> to vector<2x128xf32>
    %462 = arith.negf %461 : vector<2x128xf32>
    %463 = math.exp %462 : vector<2x128xf32>
    %cst_162 = arith.constant 1.000000e+00 : f32
    %464 = vector.broadcast %cst_162 : f32 to vector<2x128xf32>
    %465 = arith.addf %464, %463 : vector<2x128xf32>
    %466 = arith.divf %464, %465 : vector<2x128xf32>
    %467 = vector.extract_strided_slice %454 {offsets = [0, 256], sizes = [2, 128], strides = [1, 1]} : vector<2x512xf32> to vector<2x128xf32>
    %468 = math.tanh %467 : vector<2x128xf32>
    %469 = vector.extract_strided_slice %454 {offsets = [0, 384], sizes = [2, 128], strides = [1, 1]} : vector<2x512xf32> to vector<2x128xf32>
    %470 = arith.negf %469 : vector<2x128xf32>
    %471 = math.exp %470 : vector<2x128xf32>
    %cst_163 = arith.constant 1.000000e+00 : f32
    %472 = vector.broadcast %cst_163 : f32 to vector<2x128xf32>
    %473 = arith.addf %472, %471 : vector<2x128xf32>
    %474 = arith.divf %472, %473 : vector<2x128xf32>
    %475 = arith.mulf %466, %414 : vector<2x128xf32>
    %476 = arith.mulf %460, %468 : vector<2x128xf32>
    %477 = arith.addf %475, %476 : vector<2x128xf32>
    %478 = math.tanh %477 : vector<2x128xf32>
    %479 = arith.mulf %474, %478 : vector<2x128xf32>
    %c0_164 = arith.constant 0 : index
    %c0_165 = arith.constant 0 : index
    %480 = vector.load %arg4[%c0_164, %c0_165] : memref<128x512xf32, #tpu.memory_space<vmem>>, vector<128x512xf32>
    %cst_166 = arith.constant dense<0.000000e+00> : vector<2x512xf32>
    %481 = tpu.matmul %416, %480, %cst_166 {dimension_numbers = #tpu.dot_dimension_numbers<[1], [0], [0], [1], [0, 0, 1, 1], [], []>} : vector<2x128xf32>, vector<128x512xf32>, vector<2x512xf32> -> vector<2x512xf32>
    %c0_167 = arith.constant 0 : index
    %c0_168 = arith.constant 0 : index
    %482 = vector.load %arg6[%c0_167, %c0_168] : memref<1x512xf32, #tpu.memory_space<vmem>>, vector<1x512xf32>
    %483 = vector.broadcast %482 : vector<1x512xf32> to vector<2x512xf32>
    %484 = arith.addf %481, %483 : vector<2x512xf32>
    %c0_169 = arith.constant 0 : index
    %c0_170 = arith.constant 0 : index
    %485 = vector.load %arg5[%c0_169, %c0_170] : memref<128x512xf32, #tpu.memory_space<vmem>>, vector<128x512xf32>
    %cst_171 = arith.constant dense<0.000000e+00> : vector<2x512xf32>
    %486 = tpu.matmul %449, %485, %cst_171 {dimension_numbers = #tpu.dot_dimension_numbers<[1], [0], [0], [1], [0, 0, 1, 1], [], []>} : vector<2x128xf32>, vector<128x512xf32>, vector<2x512xf32> -> vector<2x512xf32>
    %487 = arith.addf %484, %486 : vector<2x512xf32>
    %488 = vector.extract_strided_slice %487 {offsets = [0, 0], sizes = [2, 128], strides = [1, 1]} : vector<2x512xf32> to vector<2x128xf32>
    %489 = arith.negf %488 : vector<2x128xf32>
    %490 = math.exp %489 : vector<2x128xf32>
    %cst_172 = arith.constant 1.000000e+00 : f32
    %491 = vector.broadcast %cst_172 : f32 to vector<2x128xf32>
    %492 = arith.addf %491, %490 : vector<2x128xf32>
    %493 = arith.divf %491, %492 : vector<2x128xf32>
    %494 = vector.extract_strided_slice %487 {offsets = [0, 128], sizes = [2, 128], strides = [1, 1]} : vector<2x512xf32> to vector<2x128xf32>
    %495 = arith.negf %494 : vector<2x128xf32>
    %496 = math.exp %495 : vector<2x128xf32>
    %cst_173 = arith.constant 1.000000e+00 : f32
    %497 = vector.broadcast %cst_173 : f32 to vector<2x128xf32>
    %498 = arith.addf %497, %496 : vector<2x128xf32>
    %499 = arith.divf %497, %498 : vector<2x128xf32>
    %500 = vector.extract_strided_slice %487 {offsets = [0, 256], sizes = [2, 128], strides = [1, 1]} : vector<2x512xf32> to vector<2x128xf32>
    %501 = math.tanh %500 : vector<2x128xf32>
    %502 = vector.extract_strided_slice %487 {offsets = [0, 384], sizes = [2, 128], strides = [1, 1]} : vector<2x512xf32> to vector<2x128xf32>
    %503 = arith.negf %502 : vector<2x128xf32>
    %504 = math.exp %503 : vector<2x128xf32>
    %cst_174 = arith.constant 1.000000e+00 : f32
    %505 = vector.broadcast %cst_174 : f32 to vector<2x128xf32>
    %506 = arith.addf %505, %504 : vector<2x128xf32>
    %507 = arith.divf %505, %506 : vector<2x128xf32>
    %508 = arith.mulf %499, %447 : vector<2x128xf32>
    %509 = arith.mulf %493, %501 : vector<2x128xf32>
    %510 = arith.addf %508, %509 : vector<2x128xf32>
    %511 = math.tanh %510 : vector<2x128xf32>
    %512 = arith.mulf %507, %511 : vector<2x128xf32>
    %c0_175 = arith.constant 0 : index
    %c0_176 = arith.constant 0 : index
    %513 = vector.load %arg4[%c0_175, %c0_176] : memref<128x512xf32, #tpu.memory_space<vmem>>, vector<128x512xf32>
    %cst_177 = arith.constant dense<0.000000e+00> : vector<2x512xf32>
    %514 = tpu.matmul %479, %513, %cst_177 {dimension_numbers = #tpu.dot_dimension_numbers<[1], [0], [0], [1], [0, 0, 1, 1], [], []>} : vector<2x128xf32>, vector<128x512xf32>, vector<2x512xf32> -> vector<2x512xf32>
    %c0_178 = arith.constant 0 : index
    %c0_179 = arith.constant 0 : index
    %515 = vector.load %arg6[%c0_178, %c0_179] : memref<1x512xf32, #tpu.memory_space<vmem>>, vector<1x512xf32>
    %516 = vector.broadcast %515 : vector<1x512xf32> to vector<2x512xf32>
    %517 = arith.addf %514, %516 : vector<2x512xf32>
    %c0_180 = arith.constant 0 : index
    %c0_181 = arith.constant 0 : index
    %518 = vector.load %arg5[%c0_180, %c0_181] : memref<128x512xf32, #tpu.memory_space<vmem>>, vector<128x512xf32>
    %cst_182 = arith.constant dense<0.000000e+00> : vector<2x512xf32>
    %519 = tpu.matmul %512, %518, %cst_182 {dimension_numbers = #tpu.dot_dimension_numbers<[1], [0], [0], [1], [0, 0, 1, 1], [], []>} : vector<2x128xf32>, vector<128x512xf32>, vector<2x512xf32> -> vector<2x512xf32>
    %520 = arith.addf %517, %519 : vector<2x512xf32>
    %521 = vector.extract_strided_slice %520 {offsets = [0, 0], sizes = [2, 128], strides = [1, 1]} : vector<2x512xf32> to vector<2x128xf32>
    %522 = arith.negf %521 : vector<2x128xf32>
    %523 = math.exp %522 : vector<2x128xf32>
    %cst_183 = arith.constant 1.000000e+00 : f32
    %524 = vector.broadcast %cst_183 : f32 to vector<2x128xf32>
    %525 = arith.addf %524, %523 : vector<2x128xf32>
    %526 = arith.divf %524, %525 : vector<2x128xf32>
    %527 = vector.extract_strided_slice %520 {offsets = [0, 128], sizes = [2, 128], strides = [1, 1]} : vector<2x512xf32> to vector<2x128xf32>
    %528 = arith.negf %527 : vector<2x128xf32>
    %529 = math.exp %528 : vector<2x128xf32>
    %cst_184 = arith.constant 1.000000e+00 : f32
    %530 = vector.broadcast %cst_184 : f32 to vector<2x128xf32>
    %531 = arith.addf %530, %529 : vector<2x128xf32>
    %532 = arith.divf %530, %531 : vector<2x128xf32>
    %533 = vector.extract_strided_slice %520 {offsets = [0, 256], sizes = [2, 128], strides = [1, 1]} : vector<2x512xf32> to vector<2x128xf32>
    %534 = math.tanh %533 : vector<2x128xf32>
    %535 = vector.extract_strided_slice %520 {offsets = [0, 384], sizes = [2, 128], strides = [1, 1]} : vector<2x512xf32> to vector<2x128xf32>
    %536 = arith.negf %535 : vector<2x128xf32>
    %537 = math.exp %536 : vector<2x128xf32>
    %cst_185 = arith.constant 1.000000e+00 : f32
    %538 = vector.broadcast %cst_185 : f32 to vector<2x128xf32>
    %539 = arith.addf %538, %537 : vector<2x128xf32>
    %540 = arith.divf %538, %539 : vector<2x128xf32>
    %541 = arith.mulf %532, %510 : vector<2x128xf32>
    %542 = arith.mulf %526, %534 : vector<2x128xf32>
    %543 = arith.addf %541, %542 : vector<2x128xf32>
    %544 = math.tanh %543 : vector<2x128xf32>
    %545 = arith.mulf %540, %544 : vector<2x128xf32>
    %c0_186 = arith.constant 0 : index
    %c0_187 = arith.constant 0 : index
    %546 = vector.load %arg7[%c0_186, %c0_187] : memref<128x512xf32, #tpu.memory_space<vmem>>, vector<128x512xf32>
    %cst_188 = arith.constant dense<0.000000e+00> : vector<2x512xf32>
    %547 = tpu.matmul %479, %546, %cst_188 {dimension_numbers = #tpu.dot_dimension_numbers<[1], [0], [0], [1], [0, 0, 1, 1], [], []>} : vector<2x128xf32>, vector<128x512xf32>, vector<2x512xf32> -> vector<2x512xf32>
    %c0_189 = arith.constant 0 : index
    %c0_190 = arith.constant 0 : index
    %548 = vector.load %arg9[%c0_189, %c0_190] : memref<1x512xf32, #tpu.memory_space<vmem>>, vector<1x512xf32>
    %549 = vector.broadcast %548 : vector<1x512xf32> to vector<2x512xf32>
    %550 = arith.addf %547, %549 : vector<2x512xf32>
    %c0_191 = arith.constant 0 : index
    %c0_192 = arith.constant 0 : index
    %c0_193 = arith.constant 0 : index
    %551 = vector.load %arg17[%c0_191, %c0_192, %c0_193] : memref<2x2x512xf32, #tpu.memory_space<vmem>>, vector<2x1x512xf32>
    %552 = vector.shape_cast %551 : vector<2x1x512xf32> to vector<2x512xf32>
    %553 = vector.shape_cast %550 : vector<2x512xf32> to vector<2x1x512xf32>
    tpu.vector_store %arg17[%c0_191, %c0_192, %c0_193], %553 {strides = array<i32>} : memref<2x2x512xf32, #tpu.memory_space<vmem>>, vector<2x1x512xf32>,
    %c0_194 = arith.constant 0 : index
    %c0_195 = arith.constant 0 : index
    %554 = vector.load %arg7[%c0_194, %c0_195] : memref<128x512xf32, #tpu.memory_space<vmem>>, vector<128x512xf32>
    %cst_196 = arith.constant dense<0.000000e+00> : vector<2x512xf32>
    %555 = tpu.matmul %545, %554, %cst_196 {dimension_numbers = #tpu.dot_dimension_numbers<[1], [0], [0], [1], [0, 0, 1, 1], [], []>} : vector<2x128xf32>, vector<128x512xf32>, vector<2x512xf32> -> vector<2x512xf32>
    %c0_197 = arith.constant 0 : index
    %c0_198 = arith.constant 0 : index
    %556 = vector.load %arg9[%c0_197, %c0_198] : memref<1x512xf32, #tpu.memory_space<vmem>>, vector<1x512xf32>
    %557 = vector.broadcast %556 : vector<1x512xf32> to vector<2x512xf32>
    %558 = arith.addf %555, %557 : vector<2x512xf32>
    %c0_199 = arith.constant 0 : index
    %c1_200 = arith.constant 1 : index
    %c0_201 = arith.constant 0 : index
    %559 = vector.load %arg17[%c0_199, %c1_200, %c0_201] : memref<2x2x512xf32, #tpu.memory_space<vmem>>, vector<2x1x512xf32>
    %560 = vector.shape_cast %559 : vector<2x1x512xf32> to vector<2x512xf32>
    %561 = vector.shape_cast %558 : vector<2x512xf32> to vector<2x1x512xf32>
    tpu.vector_store %arg17[%c0_199, %c1_200, %c0_201], %561 {strides = array<i32>} : memref<2x2x512xf32, #tpu.memory_space<vmem>>, vector<2x1x512xf32>,
    %cst_202 = arith.constant 0.000000e+00 : f32
    %562 = vector.broadcast %cst_202 : f32 to vector<2x128xf32>
    %cst_203 = arith.constant 0.000000e+00 : f32
    %563 = vector.broadcast %cst_203 : f32 to vector<2x128xf32>
    %cst_204 = arith.constant 0.000000e+00 : f32
    %564 = vector.broadcast %cst_204 : f32 to vector<2x128xf32>
    %cst_205 = arith.constant 0.000000e+00 : f32
    %565 = vector.broadcast %cst_205 : f32 to vector<2x128xf32>
    %c0_206 = arith.constant 0 : index
    %c0_207 = arith.constant 0 : index
    %c0_208 = arith.constant 0 : index
    %566 = vector.load %arg17[%c0_206, %c0_207, %c0_208] : memref<2x2x512xf32, #tpu.memory_space<vmem>>, vector<1x2x512xf32>
    %567 = vector.shape_cast %566 : vector<1x2x512xf32> to vector<2x512xf32>
    %c0_209 = arith.constant 0 : index
    %c0_210 = arith.constant 0 : index
    %568 = vector.load %arg8[%c0_209, %c0_210] : memref<128x512xf32, #tpu.memory_space<vmem>>, vector<128x512xf32>
    %cst_211 = arith.constant dense<0.000000e+00> : vector<2x512xf32>
    %569 = tpu.matmul %562, %568, %cst_211 {dimension_numbers = #tpu.dot_dimension_numbers<[1], [0], [0], [1], [0, 0, 1, 1], [], []>} : vector<2x128xf32>, vector<128x512xf32>, vector<2x512xf32> -> vector<2x512xf32>
    %570 = arith.addf %567, %569 : vector<2x512xf32>
    %571 = vector.extract_strided_slice %570 {offsets = [0, 0], sizes = [2, 128], strides = [1, 1]} : vector<2x512xf32> to vector<2x128xf32>
    %572 = arith.negf %571 : vector<2x128xf32>
    %573 = math.exp %572 : vector<2x128xf32>
    %cst_212 = arith.constant 1.000000e+00 : f32
    %574 = vector.broadcast %cst_212 : f32 to vector<2x128xf32>
    %575 = arith.addf %574, %573 : vector<2x128xf32>
    %576 = arith.divf %574, %575 : vector<2x128xf32>
    %577 = vector.extract_strided_slice %570 {offsets = [0, 128], sizes = [2, 128], strides = [1, 1]} : vector<2x512xf32> to vector<2x128xf32>
    %578 = arith.negf %577 : vector<2x128xf32>
    %579 = math.exp %578 : vector<2x128xf32>
    %cst_213 = arith.constant 1.000000e+00 : f32
    %580 = vector.broadcast %cst_213 : f32 to vector<2x128xf32>
    %581 = arith.addf %580, %579 : vector<2x128xf32>
    %582 = arith.divf %580, %581 : vector<2x128xf32>
    %583 = vector.extract_strided_slice %570 {offsets = [0, 256], sizes = [2, 128], strides = [1, 1]} : vector<2x512xf32> to vector<2x128xf32>
    %584 = math.tanh %583 : vector<2x128xf32>
    %585 = vector.extract_strided_slice %570 {offsets = [0, 384], sizes = [2, 128], strides = [1, 1]} : vector<2x512xf32> to vector<2x128xf32>
    %586 = arith.negf %585 : vector<2x128xf32>
    %587 = math.exp %586 : vector<2x128xf32>
    %cst_214 = arith.constant 1.000000e+00 : f32
    %588 = vector.broadcast %cst_214 : f32 to vector<2x128xf32>
    %589 = arith.addf %588, %587 : vector<2x128xf32>
    %590 = arith.divf %588, %589 : vector<2x128xf32>
    %591 = arith.mulf %582, %564 : vector<2x128xf32>
    %592 = arith.mulf %576, %584 : vector<2x128xf32>
    %593 = arith.addf %591, %592 : vector<2x128xf32>
    %594 = math.tanh %593 : vector<2x128xf32>
    %595 = arith.mulf %590, %594 : vector<2x128xf32>
    %c1_215 = arith.constant 1 : index
    %c0_216 = arith.constant 0 : index
    %c0_217 = arith.constant 0 : index
    %596 = vector.load %arg17[%c1_215, %c0_216, %c0_217] : memref<2x2x512xf32, #tpu.memory_space<vmem>>, vector<1x2x512xf32>
    %597 = vector.shape_cast %596 : vector<1x2x512xf32> to vector<2x512xf32>
    %c0_218 = arith.constant 0 : index
    %c0_219 = arith.constant 0 : index
    %598 = vector.load %arg8[%c0_218, %c0_219] : memref<128x512xf32, #tpu.memory_space<vmem>>, vector<128x512xf32>
    %cst_220 = arith.constant dense<0.000000e+00> : vector<2x512xf32>
    %599 = tpu.matmul %595, %598, %cst_220 {dimension_numbers = #tpu.dot_dimension_numbers<[1], [0], [0], [1], [0, 0, 1, 1], [], []>} : vector<2x128xf32>, vector<128x512xf32>, vector<2x512xf32> -> vector<2x512xf32>
    %600 = arith.addf %597, %599 : vector<2x512xf32>
    %601 = vector.extract_strided_slice %600 {offsets = [0, 0], sizes = [2, 128], strides = [1, 1]} : vector<2x512xf32> to vector<2x128xf32>
    %602 = arith.negf %601 : vector<2x128xf32>
    %603 = math.exp %602 : vector<2x128xf32>
    %cst_221 = arith.constant 1.000000e+00 : f32
    %604 = vector.broadcast %cst_221 : f32 to vector<2x128xf32>
    %605 = arith.addf %604, %603 : vector<2x128xf32>
    %606 = arith.divf %604, %605 : vector<2x128xf32>
    %607 = vector.extract_strided_slice %600 {offsets = [0, 128], sizes = [2, 128], strides = [1, 1]} : vector<2x512xf32> to vector<2x128xf32>
    %608 = arith.negf %607 : vector<2x128xf32>
    %609 = math.exp %608 : vector<2x128xf32>
    %cst_222 = arith.constant 1.000000e+00 : f32
    %610 = vector.broadcast %cst_222 : f32 to vector<2x128xf32>
    %611 = arith.addf %610, %609 : vector<2x128xf32>
    %612 = arith.divf %610, %611 : vector<2x128xf32>
    %613 = vector.extract_strided_slice %600 {offsets = [0, 256], sizes = [2, 128], strides = [1, 1]} : vector<2x512xf32> to vector<2x128xf32>
    %614 = math.tanh %613 : vector<2x128xf32>
    %615 = vector.extract_strided_slice %600 {offsets = [0, 384], sizes = [2, 128], strides = [1, 1]} : vector<2x512xf32> to vector<2x128xf32>
    %616 = arith.negf %615 : vector<2x128xf32>
    %617 = math.exp %616 : vector<2x128xf32>
    %cst_223 = arith.constant 1.000000e+00 : f32
    %618 = vector.broadcast %cst_223 : f32 to vector<2x128xf32>
    %619 = arith.addf %618, %617 : vector<2x128xf32>
    %620 = arith.divf %618, %619 : vector<2x128xf32>
    %621 = arith.mulf %612, %593 : vector<2x128xf32>
    %622 = arith.mulf %606, %614 : vector<2x128xf32>
    %623 = arith.addf %621, %622 : vector<2x128xf32>
    %624 = math.tanh %623 : vector<2x128xf32>
    %625 = arith.mulf %620, %624 : vector<2x128xf32>
    %c0_224 = arith.constant 0 : index
    %c0_225 = arith.constant 0 : index
    %626 = vector.load %arg10[%c0_224, %c0_225] : memref<128x512xf32, #tpu.memory_space<vmem>>, vector<128x512xf32>
    %cst_226 = arith.constant dense<0.000000e+00> : vector<2x512xf32>
    %627 = tpu.matmul %595, %626, %cst_226 {dimension_numbers = #tpu.dot_dimension_numbers<[1], [0], [0], [1], [0, 0, 1, 1], [], []>} : vector<2x128xf32>, vector<128x512xf32>, vector<2x512xf32> -> vector<2x512xf32>
    %c0_227 = arith.constant 0 : index
    %c0_228 = arith.constant 0 : index
    %628 = vector.load %arg12[%c0_227, %c0_228] : memref<1x512xf32, #tpu.memory_space<vmem>>, vector<1x512xf32>
    %629 = vector.broadcast %628 : vector<1x512xf32> to vector<2x512xf32>
    %630 = arith.addf %627, %629 : vector<2x512xf32>
    %c0_229 = arith.constant 0 : index
    %c0_230 = arith.constant 0 : index
    %631 = vector.load %arg11[%c0_229, %c0_230] : memref<128x512xf32, #tpu.memory_space<vmem>>, vector<128x512xf32>
    %cst_231 = arith.constant dense<0.000000e+00> : vector<2x512xf32>
    %632 = tpu.matmul %563, %631, %cst_231 {dimension_numbers = #tpu.dot_dimension_numbers<[1], [0], [0], [1], [0, 0, 1, 1], [], []>} : vector<2x128xf32>, vector<128x512xf32>, vector<2x512xf32> -> vector<2x512xf32>
    %633 = arith.addf %630, %632 : vector<2x512xf32>
    %634 = vector.extract_strided_slice %633 {offsets = [0, 0], sizes = [2, 128], strides = [1, 1]} : vector<2x512xf32> to vector<2x128xf32>
    %635 = arith.negf %634 : vector<2x128xf32>
    %636 = math.exp %635 : vector<2x128xf32>
    %cst_232 = arith.constant 1.000000e+00 : f32
    %637 = vector.broadcast %cst_232 : f32 to vector<2x128xf32>
    %638 = arith.addf %637, %636 : vector<2x128xf32>
    %639 = arith.divf %637, %638 : vector<2x128xf32>
    %640 = vector.extract_strided_slice %633 {offsets = [0, 128], sizes = [2, 128], strides = [1, 1]} : vector<2x512xf32> to vector<2x128xf32>
    %641 = arith.negf %640 : vector<2x128xf32>
    %642 = math.exp %641 : vector<2x128xf32>
    %cst_233 = arith.constant 1.000000e+00 : f32
    %643 = vector.broadcast %cst_233 : f32 to vector<2x128xf32>
    %644 = arith.addf %643, %642 : vector<2x128xf32>
    %645 = arith.divf %643, %644 : vector<2x128xf32>
    %646 = vector.extract_strided_slice %633 {offsets = [0, 256], sizes = [2, 128], strides = [1, 1]} : vector<2x512xf32> to vector<2x128xf32>
    %647 = math.tanh %646 : vector<2x128xf32>
    %648 = vector.extract_strided_slice %633 {offsets = [0, 384], sizes = [2, 128], strides = [1, 1]} : vector<2x512xf32> to vector<2x128xf32>
    %649 = arith.negf %648 : vector<2x128xf32>
    %650 = math.exp %649 : vector<2x128xf32>
    %cst_234 = arith.constant 1.000000e+00 : f32
    %651 = vector.broadcast %cst_234 : f32 to vector<2x128xf32>
    %652 = arith.addf %651, %650 : vector<2x128xf32>
    %653 = arith.divf %651, %652 : vector<2x128xf32>
    %654 = arith.mulf %645, %565 : vector<2x128xf32>
    %655 = arith.mulf %639, %647 : vector<2x128xf32>
    %656 = arith.addf %654, %655 : vector<2x128xf32>
    %657 = math.tanh %656 : vector<2x128xf32>
    %658 = arith.mulf %653, %657 : vector<2x128xf32>
    %c0_235 = arith.constant 0 : index
    %c0_236 = arith.constant 0 : index
    %659 = vector.load %arg10[%c0_235, %c0_236] : memref<128x512xf32, #tpu.memory_space<vmem>>, vector<128x512xf32>
    %cst_237 = arith.constant dense<0.000000e+00> : vector<2x512xf32>
    %660 = tpu.matmul %625, %659, %cst_237 {dimension_numbers = #tpu.dot_dimension_numbers<[1], [0], [0], [1], [0, 0, 1, 1], [], []>} : vector<2x128xf32>, vector<128x512xf32>, vector<2x512xf32> -> vector<2x512xf32>
    %c0_238 = arith.constant 0 : index
    %c0_239 = arith.constant 0 : index
    %661 = vector.load %arg12[%c0_238, %c0_239] : memref<1x512xf32, #tpu.memory_space<vmem>>, vector<1x512xf32>
    %662 = vector.broadcast %661 : vector<1x512xf32> to vector<2x512xf32>
    %663 = arith.addf %660, %662 : vector<2x512xf32>
    %c0_240 = arith.constant 0 : index
    %c0_241 = arith.constant 0 : index
    %664 = vector.load %arg11[%c0_240, %c0_241] : memref<128x512xf32, #tpu.memory_space<vmem>>, vector<128x512xf32>
    %cst_242 = arith.constant dense<0.000000e+00> : vector<2x512xf32>
    %665 = tpu.matmul %658, %664, %cst_242 {dimension_numbers = #tpu.dot_dimension_numbers<[1], [0], [0], [1], [0, 0, 1, 1], [], []>} : vector<2x128xf32>, vector<128x512xf32>, vector<2x512xf32> -> vector<2x512xf32>
    %666 = arith.addf %663, %665 : vector<2x512xf32>
    %667 = vector.extract_strided_slice %666 {offsets = [0, 0], sizes = [2, 128], strides = [1, 1]} : vector<2x512xf32> to vector<2x128xf32>
    %668 = arith.negf %667 : vector<2x128xf32>
    %669 = math.exp %668 : vector<2x128xf32>
    %cst_243 = arith.constant 1.000000e+00 : f32
    %670 = vector.broadcast %cst_243 : f32 to vector<2x128xf32>
    %671 = arith.addf %670, %669 : vector<2x128xf32>
    %672 = arith.divf %670, %671 : vector<2x128xf32>
    %673 = vector.extract_strided_slice %666 {offsets = [0, 128], sizes = [2, 128], strides = [1, 1]} : vector<2x512xf32> to vector<2x128xf32>
    %674 = arith.negf %673 : vector<2x128xf32>
    %675 = math.exp %674 : vector<2x128xf32>
    %cst_244 = arith.constant 1.000000e+00 : f32
    %676 = vector.broadcast %cst_244 : f32 to vector<2x128xf32>
    %677 = arith.addf %676, %675 : vector<2x128xf32>
    %678 = arith.divf %676, %677 : vector<2x128xf32>
    %679 = vector.extract_strided_slice %666 {offsets = [0, 256], sizes = [2, 128], strides = [1, 1]} : vector<2x512xf32> to vector<2x128xf32>
    %680 = math.tanh %679 : vector<2x128xf32>
    %681 = vector.extract_strided_slice %666 {offsets = [0, 384], sizes = [2, 128], strides = [1, 1]} : vector<2x512xf32> to vector<2x128xf32>
    %682 = arith.negf %681 : vector<2x128xf32>
    %683 = math.exp %682 : vector<2x128xf32>
    %cst_245 = arith.constant 1.000000e+00 : f32
    %684 = vector.broadcast %cst_245 : f32 to vector<2x128xf32>
    %685 = arith.addf %684, %683 : vector<2x128xf32>
    %686 = arith.divf %684, %685 : vector<2x128xf32>
    %687 = arith.mulf %678, %656 : vector<2x128xf32>
    %688 = arith.mulf %672, %680 : vector<2x128xf32>
    %689 = arith.addf %687, %688 : vector<2x128xf32>
    %690 = math.tanh %689 : vector<2x128xf32>
    %691 = arith.mulf %686, %690 : vector<2x128xf32>
    %c0_246 = arith.constant 0 : index
    %c0_247 = arith.constant 0 : index
    %692 = vector.load %arg13[%c0_246, %c0_247] : memref<128x1xf32, #tpu.memory_space<vmem>>, vector<128x1xf32>
    %cst_248 = arith.constant dense<0.000000e+00> : vector<2x1xf32>
    %693 = tpu.matmul %691, %692, %cst_248 {dimension_numbers = #tpu.dot_dimension_numbers<[1], [0], [0], [1], [0, 0, 1, 1], [], []>} : vector<2x128xf32>, vector<128x1xf32>, vector<2x1xf32> -> vector<2x1xf32>
    %c0_249 = arith.constant 0 : index
    %c0_250 = arith.constant 0 : index
    %694 = vector.load %arg14[%c0_249, %c0_250] : memref<1x1xf32, #tpu.memory_space<vmem>>, vector<1x1xf32>
    %695 = vector.broadcast %694 : vector<1x1xf32> to vector<2x1xf32>
    %696 = arith.addf %693, %695 : vector<2x1xf32>
    %c0_251 = arith.constant 0 : index
    %c0_252 = arith.constant 0 : index
    %697 = vector.load %arg15[%c0_251, %c0_252] : memref<2x1xf32, #tpu.memory_space<vmem>>, vector<2x1xf32>
    tpu.vector_store %arg15[%c0_251, %c0_252], %696 {strides = array<i32>} : memref<2x1xf32, #tpu.memory_space<vmem>>, vector<2x1xf32>,
    return
  }
}

</mosaic_0001>

<bundles_post_ra>
// kernel: stock_lstm_forward.1
= control target key start
LH: loop header
LB: loop body
LE: loop exit
PB: predicated region body
PF: predicated region fallthrough
CT: control target
= control target key end

     0   :  { %s11445_s0 = inlined_call_operand.vmem [shape: f32[16,4], index: 0, kind: input, shape index: {}]   ;;  %s11446_s1 = inlined_call_operand.vmem [shape: f32[4,512], index: 1, kind: input, shape index: {}]   ;;  %s11447_s2 = inlined_call_operand.hbm [shape: f32[128,512], index: 2, kind: input, shape index: {}]   ;;  %s11448_s3 = inlined_call_operand.vmem [shape: f32[1,512], index: 3, kind: input, shape index: {}]   ;;  %s11449_s4 = inlined_call_operand.hbm [shape: f32[128,512], index: 4, kind: input, shape index: {}]   ;;  %s11450_s5 = inlined_call_operand.hbm [shape: f32[128,512], index: 5, kind: input, shape index: {}]   ;;  %s11451_s6 = inlined_call_operand.vmem [shape: f32[1,512], index: 6, kind: input, shape index: {}]   ;;  %s11452_s7 = inlined_call_operand.hbm [shape: f32[128,512], index: 7, kind: input, shape index: {}]   ;;  %s11453_s8 = inlined_call_operand.hbm [shape: f32[128,512], index: 8, kind: input, shape index: {}]   ;;  %s11454_s9 = inlined_call_operand.vmem [shape: f32[1,512], index: 9, kind: input, shape index: {}]   ;;  %s11455_s10 = inlined_call_operand.hbm [shape: f32[128,512], index: 10, kind: input, shape index: {}]   ;;  %s11456_s11 = inlined_call_operand.hbm [shape: f32[128,512], index: 11, kind: input, shape index: {}]   ;;  %s11457_s12 = inlined_call_operand.vmem [shape: f32[1,512], index: 12, kind: input, shape index: {}]   ;;  %s11458_s13 = inlined_call_operand.vmem [shape: f32[128,1], index: 13, kind: input, shape index: {}]   ;;  %s11459_s14 = inlined_call_operand.<no memory space> [shape: f32[1,1], index: 14, kind: input, shape index: {}]   ;;  %s11460_s15 = inlined_call_operand.vmem [shape: f32[2,1], index: 15, kind: output, shape index: {}]  }
   0x1   :  { %v20_v0 = vstv %s11459_s14 }
   0x2   :  { %21 = vst [vmem:[#allocation4] sm:$0x1] %v20_v0 }
   0x3   :  { %22 = vsyncpa [#allocation6], 0 }
   0x4   :  { %23 = vsyncpa [#allocation8], 0 }
   0x5   :  { %24 = vsyncpa [#allocation11], 0 }
   0x6   :  { %25 = vsyncpa [#allocation14], 0  ;;  %s9386_s20 = smov [#allocation7]   ;;  %s9387_s22 = smov [#allocation10]  }
   0x7   :  { %s49_s21 = sshll.u32 %s9386_s20, 4  ;;  %s75_s23 = sshll.u32 %s9387_s22, 4  ;;  %s50_s21 = int_to_ptr.vmem [resolvable:$true] %s49_s21  ;;  %s9483_s23 = int_to_ptr.vmem [resolvable:$true] %s75_s23 }
   0x8   :  { %s9224_s26 = scalar_lea.hbm %s11449_s4, 8192 }
   0x9   :  { %p9225_p0 = scmp.ne.s32.totalorder %s11449_s4, %s9224_s26  ;;  %p9228_p1 = scmp.lt.u32.totalorder %s9224_s26, %s11449_s4 }
   0xb   :  { %p9230_p2 = pnand %p9228_p1, %p9225_p0 }
   0xd   :  { %9233 = shalt.err (!%p9230_p2)
}
   0xe   :  { %s9234_s30 = scalar_lea.vmem %s50_s21, 8192  ;;  %p9239_p4 = scmp.lt.s32.totalorder %s50_s21, %s50_s21 }
   0xf   :  { %p9235_p3 = scmp.ne.s32.totalorder %s50_s21, %s9234_s30  ;;  %p9240_p5 = scmp.lt.s32.totalorder %s9234_s30, %s9234_s30 }
  0x11   :  { %p9241_p6 = por %p9240_p5, %p9239_p4 }
  0x13   :  { %p9242_p7 = pnand %p9241_p6, %p9235_p3 }
  0x15   :  { %9245 = shalt.err (!%p9242_p7)
}
  0x16   :  { %s9388_s16 = smov 512   ;;  %s9389_s17 = smov 32  }
  0x17   :  { %55 = dma.hbm_to_vmem [thread:$0]  %s11449_s4, 8192, %s50_s21, [#allocation8], %s9388_s16, %s9388_s16, %s9389_s17  }
  0x18   :  { %s9246_s24 = scalar_lea.hbm %s11452_s7, 8192 }
  0x19   :  { %p9247_p8 = scmp.ne.s32.totalorder %s11452_s7, %s9246_s24  ;;  %p9250_p9 = scmp.lt.u32.totalorder %s9246_s24, %s11452_s7 }
  0x1b   :  { %p9252_p10 = pnand %p9250_p9, %p9247_p8 }
  0x1d   :  { %9255 = shalt.err (!%p9252_p10)
}
  0x1e   :  { %s9256_s14 = scalar_lea.vmem %s9483_s23, 8192  ;;  %p9261_p12 = scmp.lt.s32.totalorder %s9483_s23, %s9483_s23 }
  0x1f   :  { %p9257_p11 = scmp.ne.s32.totalorder %s9483_s23, %s9256_s14  ;;  %p9262_p13 = scmp.lt.s32.totalorder %s9256_s14, %s9256_s14 }
  0x21   :  { %p9263_p0 = por %p9262_p13, %p9261_p12 }
  0x23   :  { %p9264_p1 = pnand %p9263_p0, %p9257_p11 }
  0x25   :  { %9267 = shalt.err (!%p9264_p1)
}
  0x26   :  { %81 = dma.hbm_to_vmem [thread:$0]  %s11452_s7, 8192, %s9483_s23, [#allocation11], %s9388_s16, %s9388_s16, %s9389_s17  }
  0x27   :  { %s9390_s29 = smov [#allocation13]   ;;  %s9391_s18 = smov [#allocation5]  }
  0x28   :  { %s101_s30 = sshll.u32 %s9390_s29, 4  ;;  %s35_s19 = sshll.u32 %s9391_s18, 4  ;;  %s102_s30 = int_to_ptr.vmem [resolvable:$true] %s101_s30  ;;  %s9520_s19 = int_to_ptr.vmem [resolvable:$true] %s35_s19 }
  0x29   :  { %s9268_s24 = scalar_lea.hbm %s11455_s10, 8192 }
  0x2a   :  { %p9269_p2 = scmp.ne.s32.totalorder %s11455_s10, %s9268_s24  ;;  %p9272_p3 = scmp.lt.u32.totalorder %s9268_s24, %s11455_s10 }
  0x2c   :  { %p9274_p4 = pnand %p9272_p3, %p9269_p2 }
  0x2e   :  { %9277 = shalt.err (!%p9274_p4)
}
  0x2f   :  { %s9278_s7 = scalar_lea.vmem %s102_s30, 8192  ;;  %p9283_p6 = scmp.lt.s32.totalorder %s102_s30, %s102_s30 }
  0x30   :  { %p9279_p5 = scmp.ne.s32.totalorder %s102_s30, %s9278_s7  ;;  %p9284_p7 = scmp.lt.s32.totalorder %s9278_s7, %s9278_s7 }
  0x32   :  { %p9285_p8 = por %p9284_p7, %p9283_p6 }
  0x34   :  { %p9286_p9 = pnand %p9285_p8, %p9279_p5 }
  0x36   :  { %9289 = shalt.err (!%p9286_p9)
}
  0x37   :  { %107 = dma.hbm_to_vmem [thread:$0]  %s11455_s10, 8192, %s102_s30, [#allocation14], %s9388_s16, %s9388_s16, %s9389_s17  }
  0x38   :  { %s9290_s29 = scalar_lea.hbm %s11447_s2, 8192 }
  0x39   :  { %p9291_p10 = scmp.ne.s32.totalorder %s11447_s2, %s9290_s29  ;;  %p9294_p11 = scmp.lt.u32.totalorder %s9290_s29, %s11447_s2 }
  0x3b   :  { %p9296_p12 = pnand %p9294_p11, %p9291_p10 }
  0x3d   :  { %9299 = shalt.err (!%p9296_p12)
}
  0x3e   :  { %s9300_s25 = scalar_lea.vmem %s9520_s19, 8192  ;;  %p9305_p0 = scmp.lt.s32.totalorder %s9520_s19, %s9520_s19 }
  0x3f   :  { %p9301_p13 = scmp.ne.s32.totalorder %s9520_s19, %s9300_s25  ;;  %p9306_p1 = scmp.lt.s32.totalorder %s9300_s25, %s9300_s25 }
  0x41   :  { %p9307_p2 = por %p9306_p1, %p9305_p0 }
  0x43   :  { %p9308_p3 = pnand %p9307_p2, %p9301_p13 }
  0x45   :  { %9311 = shalt.err (!%p9308_p3)
}
  0x46   :  { %41 = dma.hbm_to_vmem [thread:$0]  %s11447_s2, 8192, %s9520_s19, [#allocation6], %s9388_s16, %s9388_s16, %s9389_s17  }
  0x47   :  { %s9392_s26 = smov [#allocation9]   ;;  %s9393_s28 = smov [#allocation12]  }
  0x48   :  { %s61_s27 = sshll.u32 %s9392_s26, 4  ;;  %s87_s7 = sshll.u32 %s9393_s28, 4  ;;  %s62_s27 = int_to_ptr.vmem [resolvable:$true] %s61_s27  ;;  %s9557_s7 = int_to_ptr.vmem [resolvable:$true] %s87_s7 }
  0x49   :  { %s9312_s4 = scalar_lea.hbm %s11450_s5, 8192 }
  0x4a   :  { %p9313_p4 = scmp.ne.s32.totalorder %s11450_s5, %s9312_s4  ;;  %p9316_p5 = scmp.lt.u32.totalorder %s9312_s4, %s11450_s5 }
  0x4c   :  { %p9318_p6 = pnand %p9316_p5, %p9313_p4 }
  0x4e   :  { %9321 = shalt.err (!%p9318_p6)
}
  0x4f   :  { %s9322_s2 = scalar_lea.vmem %s62_s27, 8192  ;;  %p9327_p8 = scmp.lt.s32.totalorder %s62_s27, %s62_s27 }
  0x50   :  { %p9323_p7 = scmp.ne.s32.totalorder %s62_s27, %s9322_s2  ;;  %p9328_p9 = scmp.lt.s32.totalorder %s9322_s2, %s9322_s2 }
  0x52   :  { %p9329_p10 = por %p9328_p9, %p9327_p8 }
  0x54   :  { %p9330_p11 = pnand %p9329_p10, %p9323_p7 }
  0x56   :  { %9333 = shalt.err (!%p9330_p11)
}
  0x57   :  { %67 = dma.hbm_to_vmem [thread:$0]  %s11450_s5, 8192, %s62_s27, [#allocation8], %s9388_s16, %s9388_s16, %s9389_s17  }
  0x58   :  { %s9334_s10 = scalar_lea.hbm %s11453_s8, 8192 }
  0x59   :  { %p9335_p12 = scmp.ne.s32.totalorder %s11453_s8, %s9334_s10  ;;  %p9338_p13 = scmp.lt.u32.totalorder %s9334_s10, %s11453_s8 }
  0x5b   :  { %p9340_p0 = pnand %p9338_p13, %p9335_p12 }
  0x5d   :  { %9343 = shalt.err (!%p9340_p0)
}
  0x5e   :  { %s9344_s14 = scalar_lea.vmem %s9557_s7, 8192  ;;  %p9349_p2 = scmp.lt.s32.totalorder %s9557_s7, %s9557_s7 }
  0x5f   :  { %p9345_p1 = scmp.ne.s32.totalorder %s9557_s7, %s9344_s14  ;;  %p9350_p3 = scmp.lt.s32.totalorder %s9344_s14, %s9344_s14 }
  0x61   :  { %p9351_p4 = por %p9350_p3, %p9349_p2 }
  0x63   :  { %p9352_p5 = pnand %p9351_p4, %p9345_p1 }
  0x65   :  { %9355 = shalt.err (!%p9352_p5)
}
  0x66   :  { %93 = dma.hbm_to_vmem [thread:$0]  %s11453_s8, 8192, %s9557_s7, [#allocation11], %s9388_s16, %s9388_s16, %s9389_s17  }
  0x67   :  { %s9394_s4 = smov [#allocation15]   ;;  %s9356_s20 = scalar_lea.hbm %s11456_s11, 8192 }
  0x68   :  { %s113_s21 = sshll.u32 %s9394_s4, 4  ;;  %p9357_p6 = scmp.ne.s32.totalorder %s11456_s11, %s9356_s20  ;;  %s114_s21 = int_to_ptr.vmem [resolvable:$true] %s113_s21 }
  0x69   :  { %p9360_p7 = scmp.lt.u32.totalorder %s9356_s20, %s11456_s11 }
  0x6b   :  { %p9362_p8 = pnand %p9360_p7, %p9357_p6 }
  0x6d   :  { %9365 = shalt.err (!%p9362_p8)
}
  0x6e   :  { %s9366_s25 = scalar_lea.vmem %s114_s21, 8192  ;;  %p9371_p10 = scmp.lt.s32.totalorder %s114_s21, %s114_s21 }
  0x6f   :  { %p9367_p9 = scmp.ne.s32.totalorder %s114_s21, %s9366_s25  ;;  %p9372_p11 = scmp.lt.s32.totalorder %s9366_s25, %s9366_s25 }
  0x71   :  { %p9373_p12 = por %p9372_p11, %p9371_p10 }
  0x73   :  { %p9374_p13 = pnand %p9373_p12, %p9367_p9 }
  0x75   :  { %9377 = shalt.err (!%p9374_p13)
}
  0x76   :  { %119 = dma.hbm_to_vmem [thread:$0]  %s11456_s11, 8192, %s114_s21, [#allocation14], %s9388_s16, %s9388_s16, %s9389_s17  }
  0x77   :  { %9378 = dma.done.wait [#allocation6], 8192  }
  0x78   :  { %9379 = vsyncadd [#allocation6], 4294959104 }
  0x79   :  { %9380 = dma.done.wait [#allocation8], 16384  }
  0x7a   :  { %9381 = vsyncadd [#allocation8], 4294950912 }
  0x7b   :  { %9382 = dma.done.wait [#allocation11], 16384  }
  0x7c   :  { %9383 = vsyncadd [#allocation11], 4294950912 }
  0x7d   :  { %9384 = dma.done.wait [#allocation14], 16384  }
  0x7e   :  { %9385 = vsyncadd [#allocation14], 4294950912  ;;  %v11462_v1 = vmov 0.0   ;;  %v149_v2 = vld [vmem:[%s11446_s1] sm:$0xff]  ;;  %vm184_vm0 = vcmask 1043456   ;;  %v150_v3 = vld [vmem:[%s11446_s1 + $0x8] sm:$0xff] }
  0x7f   :  { %257 = vmatprep.mubr.f32.mxu1 %v11462_v1  ;;  %579 = vmatprep.mubr.f32.mxu0 %v11462_v1  ;;  %v175_v4 = vcombine.high %v149_v2, %v149_v2  ;;  %v147_v5 = vld [vmem:[%s11445_s0] sm:$0xff]  ;;  %v176_v6 = vcombine.high %v150_v3, %v150_v3  ;;  %vm177_vm1 = vcmask 31744   ;;  %v454_v10 = vld [vmem:[#allocation5 + $0x18] sm:$0xff]  ;;  %v451_v12 = vld [vmem:[#allocation5] sm:$0xff]  ;;  %vm9399_vm3 = vmmov 0  }
  0x80   :  { %v452_v7 = vld [vmem:[#allocation5 + $0x8] sm:$0xff]  ;;  %v458_v11 = vld [vmem:[#allocation5 + $0x38] sm:$0xff]  ;;  %v455_v14 = vld [vmem:[#allocation5 + $0x20] sm:$0xff]  ;;  %vm6605_vm4 = vcmask 1024  }
  0x81   :  { %v456_v8 = vld [vmem:[#allocation5 + $0x28] sm:$0xff]  ;;  %6615 = vmatprep.subr.msk.mxu1 %vm184_vm0, %v175_v4  ;;  %v9623_v13 = vpack.c.bf16 %v458_v11, %v454_v10  ;;  %v9627_v15 = vpack.c.bf16 %v455_v14, %v451_v12  ;;  %v459_v19 = vld [vmem:[#allocation5 + $0x40] sm:$0xff]  ;;  %v148_v21 = vld [vmem:[%s11445_s0 + $0x8] sm:$0xff] }
  0x82   :  { %v9620_v9 = vpack.c.bf16 %v456_v8, %v452_v7  ;;  %6616 = vmatpush1.msk.msra.mxu1 %vm184_vm0, %v149_v2  ;;  %v460_v16 = vld [vmem:[#allocation5 + $0x48] sm:$0xff]  ;;  %v463_v20 = vld [vmem:[#allocation5 + $0x60] sm:$0xff]  ;;  %v453_v22 = vld [vmem:[#allocation5 + $0x10] sm:$0xff] }
  0x83   :  { %11721 = vst [vmem:[#allocation21_spill] sm:$0xff] %v9623_v13  ;;  %11722 = vst [vmem:[#allocation22_spill] sm:$0xff] %v9627_v15  ;;  %v464_v17 = vld [vmem:[#allocation5 + $0x68] sm:$0xff]  ;;  %6617 = vmatmul.mubr.msk.f32.vlgmr.msra.gmra.mrb[0].mxu1 %vm177_vm1, %v147_v5  ;;  %6619 = vmatprep.subr.msk.mxu1 %vm184_vm0, %v176_v6  ;;  %v457_v24 = vld [vmem:[#allocation5 + $0x30] sm:$0xff]  ;;  %v9640_v26 = vpack.c.bf16 %v463_v20, %v459_v19 }
  0x84   :  { %11720 = vst [vmem:[#allocation20_spill] sm:$0xff] %v9620_v9  ;;  %6737 = vmatprep.subr.bf16.mxu0 %v9620_v9  ;;  %v9631_v18 = vpack.c.bf16 %v464_v17, %v460_v16  ;;  %6620 = vmatpush1.msk.msra.mxu1 %vm184_vm0, %v150_v3  ;;  %v468_v23 = vld [vmem:[#allocation5 + $0x88] sm:$0xff]  ;;  %v462_v25 = vld [vmem:[#allocation5 + $0x58] sm:$0xff]  ;;  %v467_v30 = vld [vmem:[#allocation5 + $0x80] sm:$0xff]  ;;  %v9647_v34 = vpack.c.bf16 %v457_v24, %v453_v22 }
  0x85   :  { %263 = vmatprep.mubr.f32.mxu1 %v11462_v1  ;;  %6769 = vmatprep.subr.bf16.mxu1 %v9623_v13  ;;  %11724 = vst [vmem:[#allocation24_spill] sm:$0xff] %v9640_v26  ;;  %v472_v27 = vld [vmem:[#allocation5 + $0xa8] sm:$0xff]  ;;  %v466_v28 = vld [vmem:[#allocation5 + $0x78] sm:$0xff]  ;;  %v471_v31 = vld [vmem:[#allocation5 + $0xa0] sm:$0xff] }
  0x86   :  { %11723 = vst [vmem:[#allocation23_spill] sm:$0xff] %v9631_v18  ;;  %6739 = vmatpush1.bf16.msra.mxu0 %v9627_v15  ;;  %v9643_v29 = vpack.c.bf16 %v472_v27, %v468_v23  ;;  %v476_v32 = vld [vmem:[#allocation5 + $0xc8] sm:$0xff]  ;;  %11726 = vst [vmem:[#allocation26_spill] sm:$0xff] %v9647_v34  ;;  %v9649_v35 = vpack.c.bf16 %v466_v28, %v462_v25  ;;  %v461_v36 = vld [vmem:[#allocation5 + $0x50] sm:$0xff]  ;;  %v9652_v39 = vpack.c.bf16 %v471_v31, %v467_v30 }
  0x87   :  { %6741 = vmatprep.subr.bf16.mxu0 %v9631_v18  ;;  %6618 = vmatmul.mubr.msk.f32.gmra.mrb[2].mxu1 %vm177_vm1, %v148_v21  ;;  %v480_v33 = vld [vmem:[#allocation5 + $0xe8] sm:$0xff]  ;;  %v465_v37 = vld [vmem:[#allocation5 + $0x70] sm:$0xff]  ;;  %v470_v38 = vld [vmem:[#allocation5 + $0x98] sm:$0xff] }
  0x88   :  { %11725 = vst [vmem:[#allocation25_spill] sm:$0xff] %v9643_v29  ;;  %334 = vmatprep.mubr.f32.mxu1 %v11462_v1  ;;  %11727 = vst [vmem:[#allocation27_spill] sm:$0xff] %v9649_v35  ;;  %v474_v40 = vld [vmem:[#allocation5 + $0xb8] sm:$0xff]  ;;  %v9655_v41 = vpack.c.bf16 %v480_v33, %v476_v32  ;;  %v475_v42 = vld [vmem:[#allocation5 + $0xc0] sm:$0xff]  ;;  %v9660_v46 = vpack.c.bf16 %v465_v37, %v461_v36 }
  0x89   :  { %11728 = vst [vmem:[#allocation28_spill] sm:$0xff] %v9652_v39  ;;  %v479_v43 = vld [vmem:[#allocation5 + $0xe0] sm:$0xff]  ;;  %v484_v44 = vld [vmem:[#allocation5 + $0x108] sm:$0xff]  ;;  %v9663_v47 = vpack.c.bf16 %v474_v40, %v470_v38  ;;  %v469_v48 = vld [vmem:[#allocation5 + $0x90] sm:$0xff] }
  0x8a   :  { %6743 = vmatpush1.bf16.msra.mxu0 %v9640_v26  ;;  %11729 = vst [vmem:[#allocation29_spill] sm:$0xff] %v9655_v41  ;;  %v488_v45 = vld [vmem:[#allocation5 + $0x128] sm:$0xff]  ;;  %11730 = vst [vmem:[#allocation30_spill] sm:$0xff] %v9660_v46  ;;  %v473_v49 = vld [vmem:[#allocation5 + $0xb0] sm:$0xff]  ;;  %v9666_v51 = vpack.c.bf16 %v479_v43, %v475_v42 }
  0x8b   :  { %6745 = vmatprep.subr.bf16.mxu0 %v9643_v29  ;;  %6621 = vmatmul.mubr.msk.f32.vlgmr.msra.gmra.mrb[4].mxu1 %vm177_vm1, %v147_v5  ;;  %11731 = vst [vmem:[#allocation31_spill] sm:$0xff] %v9663_v47  ;;  %v478_v50 = vld [vmem:[#allocation5 + $0xd8] sm:$0xff]  ;;  %v9669_v53 = vpack.c.bf16 %v488_v45, %v484_v44  ;;  %v483_v54 = vld [vmem:[#allocation5 + $0x100] sm:$0xff]  ;;  %v492_v56 = vld [vmem:[#allocation5 + $0x148] sm:$0xff]  ;;  %v9673_v58 = vpack.c.bf16 %v473_v49, %v469_v48 }
  0x8c   :  { %6771 = vmatpush1.bf16.msra.mxu1 %v9647_v34  ;;  %340 = vmatprep.mubr.f32.mxu1 %v11462_v1  ;;  %11732 = vst [vmem:[#allocation32_spill] sm:$0xff] %v9666_v51  ;;  %v482_v52 = vld [vmem:[#allocation5 + $0xf8] sm:$0xff]  ;;  %v487_v55 = vld [vmem:[#allocation5 + $0x120] sm:$0xff]  ;;  %v496_v57 = vld [vmem:[#allocation5 + $0x168] sm:$0xff] }
  0x8d   :  { %6773 = vmatprep.subr.bf16.mxu1 %v9649_v35  ;;  %11733 = vst [vmem:[#allocation33_spill] sm:$0xff] %v9669_v53  ;;  %11734 = vst [vmem:[#allocation34_spill] sm:$0xff] %v9673_v58  ;;  %v9677_v59 = vpack.c.bf16 %v482_v52, %v478_v50  ;;  %v477_v60 = vld [vmem:[#allocation5 + $0xd0] sm:$0xff]  ;;  %v486_v62 = vld [vmem:[#allocation5 + $0x118] sm:$0xff]  ;;  %v9680_v63 = vpack.c.bf16 %v487_v55, %v483_v54  ;;  %v9683_v2 = vpack.c.bf16 %v496_v57, %v492_v56 }
  0x8e   :  { %6747 = vmatpush1.bf16.msra.mxu0 %v9652_v39  ;;  %v481_v61 = vld [vmem:[#allocation5 + $0xf0] sm:$0xff]  ;;  %v490_v0 = vld [vmem:[#allocation5 + $0x138] sm:$0xff]  ;;  %v491_v3 = vld [vmem:[#allocation5 + $0x140] sm:$0xff] }
  0x8f   :  { %6749 = vmatprep.subr.bf16.mxu0 %v9655_v41  ;;  %6622 = vmatmul.mubr.msk.f32.gmra.mrb[6].mxu1 %vm177_vm1, %v148_v21  ;;  %11735 = vst [vmem:[#allocation35_spill] sm:$0xff] %v9677_v59  ;;  %11736 = vst [vmem:[#allocation36_spill] sm:$0xff] %v9680_v63  ;;  %v495_v4 = vld [vmem:[#allocation5 + $0x160] sm:$0xff]  ;;  %v500_v5 = vld [vmem:[#allocation5 + $0x188] sm:$0xff]  ;;  %v9686_v7 = vpack.c.bf16 %v481_v61, %v477_v60  ;;  %v9689_v8 = vpack.c.bf16 %v490_v0, %v486_v62  ;;  %v11461_v0 = vlaneseq }
  0x90   :  { %6775 = vmatpush1.bf16.msra.mxu1 %v9660_v46  ;;  %650 = vmatprep.mubr.f32.mxu1 %v11462_v1  ;;  %11737 = vst [vmem:[#allocation37_spill] sm:$0xff] %v9683_v2  ;;  %v504_v6 = vld [vmem:[#allocation5 + $0x1a8] sm:$0xff]  ;;  %v485_v10 = vld [vmem:[#allocation5 + $0x110] sm:$0xff]  ;;  %v494_v12 = vld [vmem:[#allocation5 + $0x158] sm:$0xff]  ;;  %v9692_v14 = vpack.c.bf16 %v495_v4, %v491_v3 }
  0x91   :  { %6777 = vmatprep.subr.bf16.mxu1 %v9663_v47  ;;  %11738 = vst [vmem:[#allocation38_spill] sm:$0xff] %v9686_v7  ;;  %11739 = vst [vmem:[#allocation39_spill] sm:$0xff] %v9689_v8  ;;  %v489_v11 = vld [vmem:[#allocation5 + $0x130] sm:$0xff]  ;;  %v498_v16 = vld [vmem:[#allocation5 + $0x178] sm:$0xff]  ;;  %v9695_v17 = vpack.c.bf16 %v504_v6, %v500_v5  ;;  %v9774_v3 = vshrl.u32 %v11461_v0, 7 }
  0x92   :  { %6751 = vmatpush1.bf16.msra.mxu0 %v9666_v51  ;;  %11740 = vst [vmem:[#allocation40_spill] sm:$0xff] %v9692_v14  ;;  %v499_v19 = vld [vmem:[#allocation5 + $0x180] sm:$0xff]  ;;  %v508_v21 = vld [vmem:[#allocation5 + $0x1c8] sm:$0xff]  ;;  %v9698_v23 = vpack.c.bf16 %v489_v11, %v485_v10  ;;  %v9701_v24 = vpack.c.bf16 %v498_v16, %v494_v12  ;;  %v493_v25 = vld [vmem:[#allocation5 + $0x150] sm:$0xff] }
  0x93   :  { %6753 = vmatprep.subr.bf16.mxu0 %v9669_v53  ;;  %11741 = vst [vmem:[#allocation41_spill] sm:$0xff] %v9695_v17  ;;  %v503_v20 = vld [vmem:[#allocation5 + $0x1a0] sm:$0xff]  ;;  %v512_v22 = vld [vmem:[#allocation5 + $0x1e8] sm:$0xff]  ;;  %v497_v27 = vld [vmem:[#allocation5 + $0x170] sm:$0xff]  ;;  %v9777_v4 = vsub.s32 0, %v9774_v3  ;;  %v9783_v6 = vsub.s32 1, %v9774_v3 }
  0x94   :  { %6779 = vmatpush1.bf16.msra.mxu1 %v9673_v58  ;;  %11742 = vst [vmem:[#allocation42_spill] sm:$0xff] %v9698_v23  ;;  %11743 = vst [vmem:[#allocation43_spill] sm:$0xff] %v9701_v24  ;;  %v502_v28 = vld [vmem:[#allocation5 + $0x198] sm:$0xff]  ;;  %v9704_v30 = vpack.c.bf16 %v503_v20, %v499_v19  ;;  %v9707_v32 = vpack.c.bf16 %v512_v22, %v508_v21  ;;  %v507_v33 = vld [vmem:[#allocation5 + $0x1c0] sm:$0xff]  ;;  %v9710_v37 = vpack.c.bf16 %v497_v27, %v493_v25  ;;  %v9396_v19 = vmov 1983009808  }
  0x95   :  { %6781 = vmatprep.subr.bf16.mxu1 %v9677_v59  ;;  %v506_v31 = vld [vmem:[#allocation5 + $0x1b8] sm:$0xff]  ;;  %v511_v36 = vld [vmem:[#allocation5 + $0x1e0] sm:$0xff]  ;;  %v501_v40 = vld [vmem:[#allocation5 + $0x190] sm:$0xff]  ;;  %11754 = vst [vmem:[#allocation54_spill] sm:$0xff] %v9774_v3  ;;  %v354_v20 = vunpack.c.l.s4 %v9396_v19  ;;  %v9788_v22 = vsub.s32 2, %v9774_v3  ;;  %v9791_v27 = vsub.s32 3, %v9774_v3 }
  0x96   :  { %6755 = vmatpush1.bf16.msra.mxu0 %v9680_v63  ;;  %11744 = vst [vmem:[#allocation44_spill] sm:$0xff] %v9704_v30  ;;  %11745 = vst [vmem:[#allocation45_spill] sm:$0xff] %v9707_v32  ;;  %v9713_v38 = vpack.c.bf16 %v506_v31, %v502_v28  ;;  %v505_v42 = vld [vmem:[#allocation5 + $0x1b0] sm:$0xff]  ;;  %v9716_v43 = vpack.c.bf16 %v511_v36, %v507_v33  ;;  %v510_v44 = vld [vmem:[#allocation5 + $0x1d8] sm:$0xff] }
  0x97   :  { %6757 = vmatprep.subr.bf16.mxu0 %v9683_v2  ;;  %11746 = vst [vmem:[#allocation46_spill] sm:$0xff] %v9710_v37  ;;  %v514_v45 = vld [vmem:[#allocation5 + $0x1f8] sm:$0xff]  ;;  %v9720_v48 = vpack.c.bf16 %v505_v42, %v501_v40  ;;  %v509_v50 = vld [vmem:[#allocation5 + $0x1d0] sm:$0xff]  ;;  %v909_v55 = vld [vmem:[#allocation7 + $0x8] sm:$0xff]  ;;  %v355_v36 = vunpack.c.0.s8 %v354_v20 }
  0x98   :  { %6783 = vmatpush1.bf16.msra.mxu1 %v9686_v7  ;;  %11747 = vst [vmem:[#allocation47_spill] sm:$0xff] %v9713_v38  ;;  %11748 = vst [vmem:[#allocation48_spill] sm:$0xff] %v9716_v43  ;;  %v9723_v49 = vpack.c.bf16 %v514_v45, %v510_v44  ;;  %v513_v52 = vld [vmem:[#allocation5 + $0x1f0] sm:$0xff]  ;;  %v913_v56 = vld [vmem:[#allocation7 + $0x28] sm:$0xff] }
  0x99   :  { %6785 = vmatprep.subr.bf16.mxu1 %v9689_v8  ;;  %11749 = vst [vmem:[#allocation49_spill] sm:$0xff] %v9720_v48  ;;  %v9728_v54 = vpack.c.bf16 %v513_v52, %v509_v50  ;;  %v911_v57 = vld [vmem:[#allocation7 + $0x18] sm:$0xff]  ;;  %v9767_v60 = vpack.c.bf16 %v913_v56, %v909_v55  ;;  %11755 = vst [vmem:[#allocation55_spill] sm:$0xff] %v9777_v4  ;;  %v151_v5 = vld [vmem:[%s11448_s3] sm:$0xf] }
  0x9a   :  { %6759 = vmatpush1.bf16.msra.mxu0 %v9692_v14  ;;  %11750 = vst [vmem:[#allocation50_spill] sm:$0xff] %v9723_v49  ;;  %v915_v61 = vld [vmem:[#allocation7 + $0x38] sm:$0xff]  ;;  %11756 = vst [vmem:[#allocation56_spill] sm:$0xff] %v9783_v6  ;;  %v156_v10 = vrot.slane %v151_v5, %v9777_v4  ;;  %v160_v11 = vrot.slane %v151_v5, %v9783_v6  ;;  %v164_v44 = vrot.slane %v151_v5, %v9788_v22  ;;  %v938_v4 = vld [vmem:[#allocation7 + $0xf0] sm:$0xff] }
  0x9b   :  { %6761 = vmatprep.subr.bf16.mxu0 %v9695_v17  ;;  %11751 = vst [vmem:[#allocation51_spill] sm:$0xff] %v9728_v54  ;;  %11752 = vst [vmem:[#allocation52_spill] sm:$0xff] %v9767_v60  ;;  %v9769_v62 = vpack.c.bf16 %v915_v61, %v911_v57  ;;  %v168_v50 = vrot.slane %v151_v5, %v9791_v27  ;;  %v9796_v57 = vsub.s32 %v355_v36, %v9774_v3  ;;  %v939_v6 = vld [vmem:[#allocation7 + $0xf8] sm:$0xff] }
  0x9c   :  { %6787 = vmatpush1.bf16.msra.mxu1 %v9698_v23  ;;  %11757 = vst [vmem:[#allocation57_spill] sm:$0xff] %v9788_v22  ;;  %11758 = vst [vmem:[#allocation58_spill] sm:$0xff] %v9791_v27  ;;  %v931_v27 = vld [vmem:[#allocation7 + $0xb8] sm:$0xff] }
  0x9d   :  { %6789 = vmatprep.subr.bf16.mxu1 %v9701_v24  ;;  %11753 = vst [vmem:[#allocation53_spill] sm:$0xff] %v9769_v62  ;;  %v935_v22 = vld [vmem:[#allocation7 + $0xd8] sm:$0xff] }
  0x9e   :  { %6763 = vmatpush1.bf16.msra.mxu0 %v9704_v30 }
  0x9f   :  { %6765 = vmatprep.subr.bf16.mxu0 %v9707_v32 }
  0xa0   :  { %6791 = vmatpush1.bf16.msra.mxu1 %v9710_v37 }
  0xa1   :  { %6793 = vmatprep.subr.bf16.mxu1 %v9713_v38 }
  0xa2   :  { %6767 = vmatpush1.bf16.msra.mxu0 %v9716_v43 }
  0xa3   :  { %6801 = vmatprep.subr.bf16.mxu0 %v9620_v9 }
  0xa4   :  { %6795 = vmatpush1.bf16.msra.mxu1 %v9720_v48 }
  0xa5   :  { %580 = vmatmul.mubr.f32.vlgmr.msra.gmra.mrb[0].mxu0 %v11462_v1  ;;  %6797 = vmatprep.subr.bf16.mxu1 %v9723_v49 }
  0xa6   :  { %6803 = vmatpush1.bf16.msra.mxu0 %v9627_v15  ;;  %776 = vmatprep.mubr.f32.mxu0 %v11462_v1 }
  0xa7   :  { %6805 = vmatprep.subr.bf16.mxu0 %v9631_v18 }
  0xa8   :  { %6799 = vmatpush1.bf16.msra.mxu1 %v9728_v54 }
  0xa9   :  { %6833 = vmatprep.subr.bf16.mxu1 %v9623_v13 }
  0xaa   :  { %6807 = vmatpush1.bf16.msra.mxu0 %v9640_v26 }
  0xab   :  { %6809 = vmatprep.subr.bf16.mxu0 %v9643_v29  ;;  %651 = vmatmul.mubr.f32.vlgmr.msra.gmra.mrb[8].mxu1 %v11462_v1 }
  0xac   :  { %6835 = vmatpush1.bf16.msra.mxu1 %v9647_v34  ;;  %847 = vmatprep.mubr.f32.mxu1 %v11462_v1 }
  0xad   :  { %6837 = vmatprep.subr.bf16.mxu1 %v9649_v35 }
  0xae   :  { %6811 = vmatpush1.bf16.msra.mxu0 %v9652_v39 }
  0xaf   :  { %6813 = vmatprep.subr.bf16.mxu0 %v9655_v41 }
  0xb0   :  { %6839 = vmatpush1.bf16.msra.mxu1 %v9660_v46 }
  0xb1   :  { %6841 = vmatprep.subr.bf16.mxu1 %v9663_v47 }
  0xb2   :  { %6815 = vmatpush1.bf16.msra.mxu0 %v9666_v51 }
  0xb3   :  { %6817 = vmatprep.subr.bf16.mxu0 %v9669_v53 }
  0xb4   :  { %6843 = vmatpush1.bf16.msra.mxu1 %v9673_v58 }
  0xb5   :  { %6845 = vmatprep.subr.bf16.mxu1 %v9677_v59 }
  0xb6   :  { %6819 = vmatpush1.bf16.msra.mxu0 %v9680_v63 }
  0xb7   :  { %6821 = vmatprep.subr.bf16.mxu0 %v9683_v2 }
  0xb8   :  { %6847 = vmatpush1.bf16.msra.mxu1 %v9686_v7 }
  0xb9   :  { %6849 = vmatprep.subr.bf16.mxu1 %v9689_v8 }
  0xba   :  { %6823 = vmatpush1.bf16.msra.mxu0 %v9692_v14 }
  0xbb   :  { %6825 = vmatprep.subr.bf16.mxu0 %v9695_v17 }
  0xbc   :  { %6851 = vmatpush1.bf16.msra.mxu1 %v9698_v23 }
  0xbd   :  { %6853 = vmatprep.subr.bf16.mxu1 %v9701_v24 }
  0xbe   :  { %6827 = vmatpush1.bf16.msra.mxu0 %v9704_v30 }
  0xbf   :  { %6829 = vmatprep.subr.bf16.mxu0 %v9707_v32 }
  0xc0   :  { %6855 = vmatpush1.bf16.msra.mxu1 %v9710_v37 }
  0xc1   :  { %6857 = vmatprep.subr.bf16.mxu1 %v9713_v38 }
  0xc2   :  { %6831 = vmatpush1.bf16.msra.mxu0 %v9716_v43 }
  0xc3   :  { %6865 = vmatprep.subr.bf16.mxu0 %v9767_v60 }
  0xc4   :  { %6859 = vmatpush1.bf16.msra.mxu1 %v9720_v48 }
  0xc5   :  { %6861 = vmatprep.subr.bf16.mxu1 %v9723_v49 }
  0xc8   :  { %6863 = vmatpush1.bf16.msra.mxu1 %v9728_v54 }
  0xc9   :  { %6897 = vmatprep.subr.bf16.mxu1 %v9769_v62 }
 0x156   :  { %v259_v12 = vpop.f32.mrb[0].mxu1 }
 0x157   :  { %v260_v16 = vadd.f32 %v259_v12, %v156_v10  ;;  %v261_v21 = vpop.f32.mrb[1].mxu1 }
 0x158   :  { %v262_v25 = vadd.f32 %v261_v21, %v160_v11 }
 0x15a   :  { %v351_v28 = vcombine.low %v260_v16, %v262_v25  ;;  %v374_v31 = vcombine.high %v260_v16, %v262_v25  ;;  %v265_v33 = vpop.f32.mrb[2].mxu1 }
 0x15b   :  { %v266_v40 = vadd.f32 %v265_v33, %v156_v10  ;;  %v267_v42 = vpop.f32.mrb[3].mxu1 }
 0x15c   :  { %v268_v45 = vadd.f32 %v267_v42, %v160_v11  ;;  %v9799_v10 = vrot.slane %v351_v28, %v9796_v57  ;;  %v9802_v11 = vrot.slane %v374_v31, %v9796_v57 }
 0x15e   :  { %v402_v52 = vcombine.low %v266_v40, %v268_v45  ;;  %v426_v55 = vcombine.high %v266_v40, %v268_v45  ;;  %v336_v56 = vpop.f32.mrb[4].mxu1  ;;  %11759 = vst [vmem:[#allocation59_spill] sm:$0xff] %v9802_v11  ;;  %v927_v11 = vld [vmem:[#allocation7 + $0x98] sm:$0xff] }
 0x15f   :  { %v337_v61 = vadd.f32 %v336_v56, %v164_v44  ;;  %v338_v12 = vpop.f32.mrb[5].mxu1 }
 0x160   :  { %v339_v19 = vadd.f32 %v338_v12, %v168_v50  ;;  %v9822_v12 = vrot.slane %v426_v55, %v9796_v57 }
 0x162   :  { %v352_v21 = vcombine.low %v337_v61, %v339_v19  ;;  %v375_v16 = vcombine.high %v337_v61, %v339_v19  ;;  %v342_v25 = vpop.f32.mrb[6].mxu1  ;;  %v9819_v61 = vrot.slane %v402_v52, %v9796_v57  ;;  %11762 = vst [vmem:[#allocation62_spill] sm:$0xff] %v9822_v12 }
 0x163   :  { %v343_v20 = vadd.f32 %v342_v25, %v164_v44  ;;  %v344_v33 = vpop.f32.mrb[7].mxu1 }
 0x164   :  { %v9805_v5 = vrot.slane %v352_v21, %v9796_v57  ;;  %v9808_v36 = vrot.slane %v375_v16, %v9796_v57  ;;  %v345_v40 = vadd.f32 %v344_v33, %v168_v50  ;;  %11761 = vst [vmem:[#allocation61_spill] sm:$0xff] %v9819_v61  ;;  %v925_v61 = vld [vmem:[#allocation7 + $0x88] sm:$0xff] }
 0x166   :  { %11760 = vst [vmem:[#allocation60_spill] sm:$0xff] %v9808_v36  ;;  %v367_v42 = vcombine.low %v9799_v10, %v9805_v5  ;;  %v403_v44 = vcombine.low %v343_v20, %v345_v40  ;;  %v427_v56 = vcombine.high %v343_v20, %v345_v40  ;;  %v929_v36 = vld [vmem:[#allocation7 + $0xa8] sm:$0xff] }
 0x168   :  { %v9825_v50 = vrot.slane %v403_v44, %v9796_v57  ;;  %v9828_v19 = vrot.slane %v427_v56, %v9796_v57 }
 0x16a   :  { %11763 = vst [vmem:[#allocation63_spill] sm:$0xff] %v9825_v50  ;;  %11764 = vst [vmem:[#allocation64_spill] sm:$0xff] %v9828_v19  ;;  %v922_v50 = vld [vmem:[#allocation7 + $0x70] sm:$0xff] }
 0x178   :  { %v581_v55 = vpop.f32.mrb[0].mxu0 }
 0x179   :  { %v583_v20 = vpop.f32.mrb[1].mxu0 }
 0x17a   :  { %v661_v33 = vcombine.low %v581_v55, %v583_v20 }
 0x17c   :  { %v669_v56 = vrot.slane %v661_v33, %v9796_v57 }
 0x17e   :  { %v652_v40 = vpop.f32.mrb[8].mxu1 }
 0x17f   :  { %v654_v44 = vpop.f32.mrb[9].mxu1 }
 0x180   :  { %v662_v0 = vcombine.low %v652_v40, %v654_v44  ;;  %v923_v44 = vld [vmem:[#allocation7 + $0x78] sm:$0xff] }
 0x182   :  { %v676_v31 = vrot.slane %v662_v0, %v9796_v57 }
 0x184   :  { %v677_v21 = vcombine.low %v669_v56, %v676_v31 }
 0x186   :  { %v679_v28 = vadd.f32 %v677_v21, %v367_v42 }
 0x188   :  { %v6623_v45 = vmul.f32 -1.442695, %v679_v28  ;;  %v687_v16 = vrot.slane %v679_v28, 2  ;;  %v698_v25 = vrot.slane %v679_v28, 6  ;;  %v695_v19 = vrot.slane %v679_v28, 4  ;;  %v912_v28 = vld [vmem:[#allocation7 + $0x20] sm:$0xff] }
 0x18a   :  { %8904 = vpow2.f32 %v6623_v45  ;;  %v6624_v1 = vmul.f32 -1.442695, %v687_v16  ;;  %v6625_v3 = vmul.f32 -1.442695, %v698_v25  ;;  %v910_v25 = vld [vmem:[#allocation7 + $0x10] sm:$0xff] }
 0x18c   :  { %8906 = vpow2.f32 %v6624_v1  ;;  %v908_v1 = vld [vmem:[#allocation7] sm:$0xff] }
 0x18d   :  { %8908 = vpow2.f32 %v6625_v3  ;;  %v914_v3 = vld [vmem:[#allocation7 + $0x30] sm:$0xff] }
 0x194   :  { %v8905_v52 = vpop.eup %8904 }
 0x195   :  { %v683_v12 = vadd.f32 1.0, %v8905_v52  ;;  %v921_v52 = vld [vmem:[#allocation7 + $0x68] sm:$0xff] }
 0x196   :  { %v8907_v55 = vpop.eup %8906 }
 0x197   :  { %8910 = vrcp.f32 %v683_v12  ;;  %v692_v20 = vadd.f32 1.0, %v8907_v55  ;;  %v8909_v33 = vpop.eup %8908  ;;  %v917_v12 = vld [vmem:[#allocation7 + $0x48] sm:$0xff] }
 0x198   :  { %8912 = vtanh.f32 %v695_v19  ;;  %v703_v21 = vadd.f32 1.0, %v8909_v33  ;;  %v919_v19 = vld [vmem:[#allocation7 + $0x58] sm:$0xff]  ;;  %v9845_v33 = vpack.c.bf16 %v914_v3, %v910_v25  ;;  %v924_v25 = vld [vmem:[#allocation7 + $0x80] sm:$0xff] }
 0x199   :  { %8914 = vrcp.f32 %v692_v20  ;;  %v9843_v20 = vpack.c.bf16 %v912_v28, %v908_v1  ;;  %v928_v3 = vld [vmem:[#allocation7 + $0xa0] sm:$0xff] }
 0x19a   :  { %8916 = vrcp.f32 %v703_v21  ;;  %v9849_v21 = vpack.c.bf16 %v921_v52, %v917_v12  ;;  %v9863_v12 = vpack.c.bf16 %v929_v36, %v925_v61  ;;  %v9865_v52 = vpack.c.bf16 %v931_v27, %v927_v11  ;;  %v932_v27 = vld [vmem:[#allocation7 + $0xc0] sm:$0xff] }
 0x19b   :  { %v936_v11 = vld [vmem:[#allocation7 + $0xe0] sm:$0xff] }
 0x19c   :  { %11765 = vst [vmem:[#allocation65_spill] sm:$0xff] %v9849_v21  ;;  %11769 = vst [vmem:[#allocation69_spill] sm:$0xff] %v9863_v12 }
 0x19d   :  { %11770 = vst [vmem:[#allocation70_spill] sm:$0xff] %v9865_v52 }
 0x1a1   :  { %v8911_v0 = vpop.eup %8910 }
 0x1a2   :  { %v8913_v31 = vpop.eup %8912 }
 0x1a3   :  { %v8915_v42 = vpop.eup %8914  ;;  %v707_v45 = vmul.f32 %v8913_v31, %v8911_v0  ;;  %v916_v0 = vld [vmem:[#allocation7 + $0x40] sm:$0xff] }
 0x1a4   :  { %v706_v40 = vmul.f32 0.0, %v8915_v42  ;;  %v8917_v56 = vpop.eup %8916  ;;  %v920_v31 = vld [vmem:[#allocation7 + $0x60] sm:$0xff] }
 0x1a5   :  { %v9857_v1 = vpack.c.bf16 %v920_v31, %v916_v0  ;;  %v11771_v0 = vmov 0.0   ;;  %v9879_v31 = vpack.c.bf16 %v939_v6, %v935_v22 }
 0x1a6   :  { %v9840_v16 = vadd.f32 %v707_v45, %v706_v40  ;;  %v9851_v40 = vpack.c.bf16 %v923_v44, %v919_v19  ;;  %v918_v45 = vld [vmem:[#allocation7 + $0x50] sm:$0xff] }
 0x1a7   :  { %11767 = vst [vmem:[#allocation67_spill] sm:$0xff] %v9857_v1  ;;  %v9859_v28 = vpack.c.bf16 %v922_v50, %v918_v45  ;;  %v926_v19 = vld [vmem:[#allocation7 + $0x90] sm:$0xff]  ;;  %v9871_v50 = vpack.c.bf16 %v928_v3, %v924_v25  ;;  %11775 = vst [vmem:[#allocation74_spill] sm:$0xff] %v9879_v31  ;;  %v9883_v25 = vpack.c.bf16 %v936_v11, %v932_v27  ;;  %v948_v11 = vld [vmem:[#allocation7 + $0x140] sm:$0xff] }
 0x1a8   :  { %8918 = vtanh.f32 %v9840_v16  ;;  %11766 = vst [vmem:[#allocation66_spill] sm:$0xff] %v9851_v40  ;;  %v930_v44 = vld [vmem:[#allocation7 + $0xb0] sm:$0xff] }
 0x1a9   :  { %11768 = vst [vmem:[#allocation68_spill] sm:$0xff] %v9859_v28  ;;  %11772 = vst [vmem:[#allocation71_spill] sm:$0xff] %v9871_v50  ;;  %v9873_v36 = vpack.c.bf16 %v930_v44, %v926_v19  ;;  %v934_v45 = vld [vmem:[#allocation7 + $0xd0] sm:$0xff]  ;;  %v940_v19 = vld [vmem:[#allocation7 + $0x100] sm:$0xff] }
 0x1aa   :  { %11776 = vst [vmem:[#allocation75_spill] sm:$0xff] %v9883_v25  ;;  %v9885_v3 = vpack.c.bf16 %v938_v4, %v934_v45  ;;  %v944_v44 = vld [vmem:[#allocation7 + $0x120] sm:$0xff] }
 0x1ab   :  { %11773 = vst [vmem:[#allocation72_spill] sm:$0xff] %v9873_v36  ;;  %v9895_v4 = vpack.c.bf16 %v944_v44, %v940_v19  ;;  %v952_v45 = vld [vmem:[#allocation7 + $0x160] sm:$0xff] }
 0x1ac   :  { %11777 = vst [vmem:[#allocation76_spill] sm:$0xff] %v9885_v3  ;;  %v9907_v19 = vpack.c.bf16 %v952_v45, %v948_v11 }
 0x1ad   :  { %11780 = vst [vmem:[#allocation79_spill] sm:$0xff] %v9895_v4 }
 0x1ae   :  { %11784 = vst [vmem:[#allocation83_spill] sm:$0xff] %v9907_v19 }
 0x1b2   :  { %v8919_v55 = vpop.eup %8918 }
 0x1b3   :  { %v9847_v42 = vmul.f32 %v8919_v55, %v8917_v56  ;;  %v933_v56 = vld [vmem:[#allocation7 + $0xc8] sm:$0xff] }
 0x1b4   :  { %v937_v55 = vld [vmem:[#allocation7 + $0xe8] sm:$0xff] }
 0x1b5   :  { %777 = vmatmul.mubr.f32.vlgmr.msra.gmra.mrb[2].mxu0 %v9847_v42  ;;  %848 = vmatmul.mubr.f32.vlgmr.msra.gmra.mrb[10].mxu1 %v9847_v42  ;;  %v9877_v61 = vpack.c.bf16 %v937_v55, %v933_v56  ;;  %v942_v56 = vld [vmem:[#allocation7 + $0x110] sm:$0xff] }
 0x1b6   :  { %6867 = vmatpush1.bf16.msra.mxu0 %v9843_v20  ;;  %6899 = vmatpush1.bf16.msra.mxu1 %v9845_v33  ;;  %v946_v55 = vld [vmem:[#allocation7 + $0x130] sm:$0xff] }
 0x1b7   :  { %6869 = vmatprep.subr.bf16.mxu0 %v9849_v21  ;;  %6901 = vmatprep.subr.bf16.mxu1 %v9851_v40  ;;  %11774 = vst [vmem:[#allocation73_spill] sm:$0xff] %v9877_v61  ;;  %v941_v40 = vld [vmem:[#allocation7 + $0x108] sm:$0xff]  ;;  %v943_v21 = vld [vmem:[#allocation7 + $0x118] sm:$0xff]  ;;  %v9897_v27 = vpack.c.bf16 %v946_v55, %v942_v56  ;;  %v956_v56 = vld [vmem:[#allocation7 + $0x180] sm:$0xff] }
 0x1b8   :  { %1058 = vmatprep.mubr.f32.mxu0 %v11771_v0  ;;  %1129 = vmatprep.mubr.f32.mxu1 %v11771_v0  ;;  %v960_v55 = vld [vmem:[#allocation7 + $0x1a0] sm:$0xff] }
 0x1b9   :  { %11781 = vst [vmem:[#allocation80_spill] sm:$0xff] %v9897_v27  ;;  %v9919_v11 = vpack.c.bf16 %v960_v55, %v956_v56 }
 0x1ba   :  { %6871 = vmatpush1.bf16.msra.mxu0 %v9857_v1  ;;  %6903 = vmatpush1.bf16.msra.mxu1 %v9859_v28  ;;  %v945_v1 = vld [vmem:[#allocation7 + $0x128] sm:$0xff]  ;;  %v947_v28 = vld [vmem:[#allocation7 + $0x138] sm:$0xff] }
 0x1bb   :  { %6873 = vmatprep.subr.bf16.mxu0 %v9863_v12  ;;  %6905 = vmatprep.subr.bf16.mxu1 %v9865_v52  ;;  %v9889_v6 = vpack.c.bf16 %v945_v1, %v941_v40  ;;  %v9891_v22 = vpack.c.bf16 %v947_v28, %v943_v21  ;;  %v949_v52 = vld [vmem:[#allocation7 + $0x148] sm:$0xff]  ;;  %v951_v12 = vld [vmem:[#allocation7 + $0x158] sm:$0xff]  ;;  %v950_v1 = vld [vmem:[#allocation7 + $0x150] sm:$0xff]  ;;  %11788 = vst [vmem:[#allocation87_spill] sm:$0xff] %v9919_v11 }
 0x1bc   :  { %v954_v28 = vld [vmem:[#allocation7 + $0x170] sm:$0xff] }
 0x1bd   :  { %11778 = vst [vmem:[#allocation77_spill] sm:$0xff] %v9889_v6  ;;  %11779 = vst [vmem:[#allocation78_spill] sm:$0xff] %v9891_v22  ;;  %v9909_v44 = vpack.c.bf16 %v954_v28, %v950_v1  ;;  %v964_v1 = vld [vmem:[#allocation7 + $0x1c0] sm:$0xff] }
 0x1be   :  { %6875 = vmatpush1.bf16.msra.mxu0 %v9871_v50  ;;  %6907 = vmatpush1.bf16.msra.mxu1 %v9873_v36  ;;  %v953_v50 = vld [vmem:[#allocation7 + $0x168] sm:$0xff]  ;;  %v955_v36 = vld [vmem:[#allocation7 + $0x178] sm:$0xff]  ;;  %v968_v28 = vld [vmem:[#allocation7 + $0x1e0] sm:$0xff] }
 0x1bf   :  { %6877 = vmatprep.subr.bf16.mxu0 %v9877_v61  ;;  %6909 = vmatprep.subr.bf16.mxu1 %v9879_v31  ;;  %v9901_v21 = vpack.c.bf16 %v953_v50, %v949_v52  ;;  %v9903_v40 = vpack.c.bf16 %v955_v36, %v951_v12  ;;  %v957_v31 = vld [vmem:[#allocation7 + $0x188] sm:$0xff]  ;;  %v959_v61 = vld [vmem:[#allocation7 + $0x198] sm:$0xff]  ;;  %11785 = vst [vmem:[#allocation84_spill] sm:$0xff] %v9909_v44  ;;  %v958_v50 = vld [vmem:[#allocation7 + $0x190] sm:$0xff] }
 0x1c0   :  { %v962_v36 = vld [vmem:[#allocation7 + $0x1b0] sm:$0xff]  ;;  %v9931_v56 = vpack.c.bf16 %v968_v28, %v964_v1 }
 0x1c1   :  { %11782 = vst [vmem:[#allocation81_spill] sm:$0xff] %v9901_v21  ;;  %11783 = vst [vmem:[#allocation82_spill] sm:$0xff] %v9903_v40  ;;  %v9921_v45 = vpack.c.bf16 %v962_v36, %v958_v50  ;;  %v1136_v50 = vld [vmem:[#allocation9] sm:$0xff] }
 0x1c2   :  { %6879 = vmatpush1.bf16.msra.mxu0 %v9883_v25  ;;  %6911 = vmatpush1.bf16.msra.mxu1 %v9885_v3  ;;  %v961_v25 = vld [vmem:[#allocation7 + $0x1a8] sm:$0xff]  ;;  %v963_v3 = vld [vmem:[#allocation7 + $0x1b8] sm:$0xff]  ;;  %11792 = vst [vmem:[#allocation91_spill] sm:$0xff] %v9931_v56  ;;  %v1140_v36 = vld [vmem:[#allocation9 + $0x20] sm:$0xff] }
 0x1c3   :  { %6881 = vmatprep.subr.bf16.mxu0 %v9889_v6  ;;  %6913 = vmatprep.subr.bf16.mxu1 %v9891_v22  ;;  %v9913_v12 = vpack.c.bf16 %v961_v25, %v957_v31  ;;  %v9915_v52 = vpack.c.bf16 %v963_v3, %v959_v61  ;;  %v965_v22 = vld [vmem:[#allocation7 + $0x1c8] sm:$0xff]  ;;  %v967_v6 = vld [vmem:[#allocation7 + $0x1d8] sm:$0xff]  ;;  %11789 = vst [vmem:[#allocation88_spill] sm:$0xff] %v9921_v45  ;;  %v966_v25 = vld [vmem:[#allocation7 + $0x1d0] sm:$0xff] }
 0x1c4   :  { %v970_v3 = vld [vmem:[#allocation7 + $0x1f0] sm:$0xff]  ;;  %v9943_v1 = vpack.c.bf16 %v1140_v36, %v1136_v50 }
 0x1c5   :  { %11786 = vst [vmem:[#allocation85_spill] sm:$0xff] %v9913_v12  ;;  %11787 = vst [vmem:[#allocation86_spill] sm:$0xff] %v9915_v52  ;;  %v9933_v55 = vpack.c.bf16 %v970_v3, %v966_v25  ;;  %v1144_v25 = vld [vmem:[#allocation9 + $0x40] sm:$0xff] }
 0x1c6   :  { %6883 = vmatpush1.bf16.msra.mxu0 %v9895_v4  ;;  %6915 = vmatpush1.bf16.msra.mxu1 %v9897_v27  ;;  %v969_v4 = vld [vmem:[#allocation7 + $0x1e8] sm:$0xff]  ;;  %v971_v27 = vld [vmem:[#allocation7 + $0x1f8] sm:$0xff]  ;;  %11796 = vst [vmem:[#allocation95_spill] sm:$0xff] %v9943_v1  ;;  %v1148_v3 = vld [vmem:[#allocation9 + $0x60] sm:$0xff] }
 0x1c7   :  { %6885 = vmatprep.subr.bf16.mxu0 %v9901_v21  ;;  %6917 = vmatprep.subr.bf16.mxu1 %v9903_v40  ;;  %v9925_v61 = vpack.c.bf16 %v969_v4, %v965_v22  ;;  %v9927_v31 = vpack.c.bf16 %v971_v27, %v967_v6  ;;  %v1137_v40 = vld [vmem:[#allocation9 + $0x8] sm:$0xff]  ;;  %v1139_v21 = vld [vmem:[#allocation9 + $0x18] sm:$0xff]  ;;  %11793 = vst [vmem:[#allocation92_spill] sm:$0xff] %v9933_v55  ;;  %v1138_v4 = vld [vmem:[#allocation9 + $0x10] sm:$0xff] }
 0x1c8   :  { %v1142_v27 = vld [vmem:[#allocation9 + $0x30] sm:$0xff]  ;;  %v9957_v50 = vpack.c.bf16 %v1148_v3, %v1144_v25 }
 0x1c9   :  { %11790 = vst [vmem:[#allocation89_spill] sm:$0xff] %v9925_v61  ;;  %11791 = vst [vmem:[#allocation90_spill] sm:$0xff] %v9927_v31  ;;  %v9945_v28 = vpack.c.bf16 %v1142_v27, %v1138_v4  ;;  %v1154_v4 = vld [vmem:[#allocation9 + $0x90] sm:$0xff]  ;;  %v1161_v27 = vld [vmem:[#allocation9 + $0xc8] sm:$0xff] }
 0x1ca   :  { %6887 = vmatpush1.bf16.msra.mxu0 %v9907_v19  ;;  %6919 = vmatpush1.bf16.msra.mxu1 %v9909_v44  ;;  %v1141_v19 = vld [vmem:[#allocation9 + $0x28] sm:$0xff]  ;;  %v1143_v44 = vld [vmem:[#allocation9 + $0x38] sm:$0xff]  ;;  %11800 = vst [vmem:[#allocation99_spill] sm:$0xff] %v9957_v50 }
 0x1cb   :  { %6889 = vmatprep.subr.bf16.mxu0 %v9913_v12  ;;  %6921 = vmatprep.subr.bf16.mxu1 %v9915_v52  ;;  %v9937_v6 = vpack.c.bf16 %v1141_v19, %v1137_v40  ;;  %v9939_v22 = vpack.c.bf16 %v1143_v44, %v1139_v21  ;;  %v1145_v52 = vld [vmem:[#allocation9 + $0x48] sm:$0xff]  ;;  %v1147_v12 = vld [vmem:[#allocation9 + $0x58] sm:$0xff]  ;;  %11797 = vst [vmem:[#allocation96_spill] sm:$0xff] %v9945_v28  ;;  %v1146_v19 = vld [vmem:[#allocation9 + $0x50] sm:$0xff] }
 0x1cc   :  { %v1150_v44 = vld [vmem:[#allocation9 + $0x70] sm:$0xff] }
 0x1cd   :  { %11794 = vst [vmem:[#allocation93_spill] sm:$0xff] %v9937_v6  ;;  %11795 = vst [vmem:[#allocation94_spill] sm:$0xff] %v9939_v22 }
 0x1ce   :  { %6891 = vmatpush1.bf16.msra.mxu0 %v9919_v11  ;;  %6923 = vmatpush1.bf16.msra.mxu1 %v9921_v45  ;;  %v1149_v11 = vld [vmem:[#allocation9 + $0x68] sm:$0xff]  ;;  %v1151_v45 = vld [vmem:[#allocation9 + $0x78] sm:$0xff] }
 0x1cf   :  { %6893 = vmatprep.subr.bf16.mxu0 %v9925_v61  ;;  %6925 = vmatprep.subr.bf16.mxu1 %v9927_v31  ;;  %v9949_v21 = vpack.c.bf16 %v1149_v11, %v1145_v52  ;;  %v9951_v40 = vpack.c.bf16 %v1151_v45, %v1147_v12  ;;  %v1153_v31 = vld [vmem:[#allocation9 + $0x88] sm:$0xff]  ;;  %v1155_v61 = vld [vmem:[#allocation9 + $0x98] sm:$0xff]  ;;  %v9959_v52 = vpack.c.bf16 %v1150_v44, %v1146_v19  ;;  %v1152_v12 = vld [vmem:[#allocation9 + $0x80] sm:$0xff] }
 0x1d0   :  { %v1156_v11 = vld [vmem:[#allocation9 + $0xa0] sm:$0xff]  ;;  %v1162_v19 = vld [vmem:[#allocation9 + $0xd0] sm:$0xff] }
 0x1d1   :  { %11798 = vst [vmem:[#allocation97_spill] sm:$0xff] %v9949_v21  ;;  %11799 = vst [vmem:[#allocation98_spill] sm:$0xff] %v9951_v40  ;;  %v9971_v25 = vpack.c.bf16 %v1156_v11, %v1152_v12  ;;  %v1166_v44 = vld [vmem:[#allocation9 + $0xf0] sm:$0xff] }
 0x1d2   :  { %6895 = vmatpush1.bf16.msra.mxu0 %v9931_v56  ;;  %6927 = vmatpush1.bf16.msra.mxu1 %v9933_v55  ;;  %v1157_v56 = vld [vmem:[#allocation9 + $0xa8] sm:$0xff]  ;;  %v1159_v55 = vld [vmem:[#allocation9 + $0xb8] sm:$0xff]  ;;  %11801 = vst [vmem:[#allocation100_spill] sm:$0xff] %v9959_v52  ;;  %v9985_v11 = vpack.c.bf16 %v1166_v44, %v1162_v19  ;;  %v1176_v19 = vld [vmem:[#allocation9 + $0x140] sm:$0xff] }
 0x1d3   :  { %6929 = vmatprep.subr.bf16.mxu0 %v9937_v6  ;;  %6961 = vmatprep.subr.bf16.mxu1 %v9939_v22  ;;  %v9963_v45 = vpack.c.bf16 %v1157_v56, %v1153_v31  ;;  %v9965_v36 = vpack.c.bf16 %v1159_v55, %v1155_v61  ;;  %v1163_v22 = vld [vmem:[#allocation9 + $0xd8] sm:$0xff]  ;;  %11804 = vst [vmem:[#allocation103_spill] sm:$0xff] %v9971_v25  ;;  %v1160_v61 = vld [vmem:[#allocation9 + $0xc0] sm:$0xff] }
 0x1d4   :  { %v1164_v56 = vld [vmem:[#allocation9 + $0xe0] sm:$0xff]  ;;  %11809 = vst [vmem:[#allocation108_spill] sm:$0xff] %v9985_v11 }
 0x1d5   :  { %1059 = vmatmul.mubr.f32.vlgmr.msra.gmra.mrb[4].mxu0 %v9847_v42  ;;  %1130 = vmatmul.mubr.f32.vlgmr.msra.gmra.mrb[12].mxu1 %v9847_v42  ;;  %11802 = vst [vmem:[#allocation101_spill] sm:$0xff] %v9963_v45  ;;  %11803 = vst [vmem:[#allocation102_spill] sm:$0xff] %v9965_v36  ;;  %v1158_v42 = vld [vmem:[#allocation9 + $0xb0] sm:$0xff]  ;;  %v9983_v12 = vpack.c.bf16 %v1164_v56, %v1160_v61  ;;  %v1180_v44 = vld [vmem:[#allocation9 + $0x160] sm:$0xff] }
 0x1d6   :  { %6931 = vmatpush1.bf16.msra.mxu0 %v9943_v1  ;;  %6963 = vmatpush1.bf16.msra.mxu1 %v9945_v28  ;;  %v1165_v1 = vld [vmem:[#allocation9 + $0xe8] sm:$0xff]  ;;  %v1167_v28 = vld [vmem:[#allocation9 + $0xf8] sm:$0xff]  ;;  %v9973_v31 = vpack.c.bf16 %v1158_v42, %v1154_v4  ;;  %v1168_v4 = vld [vmem:[#allocation9 + $0x100] sm:$0xff] }
 0x1d7   :  { %6933 = vmatprep.subr.bf16.mxu0 %v9949_v21  ;;  %6965 = vmatprep.subr.bf16.mxu1 %v9951_v40  ;;  %v9977_v55 = vpack.c.bf16 %v1165_v1, %v1161_v27  ;;  %v9979_v3 = vpack.c.bf16 %v1167_v28, %v1163_v22  ;;  %v1169_v40 = vld [vmem:[#allocation9 + $0x108] sm:$0xff]  ;;  %v1171_v21 = vld [vmem:[#allocation9 + $0x118] sm:$0xff]  ;;  %11808 = vst [vmem:[#allocation107_spill] sm:$0xff] %v9983_v12  ;;  %v1172_v42 = vld [vmem:[#allocation9 + $0x120] sm:$0xff] }
 0x1d8   :  { %1264 = vmatprep.mubr.f32.mxu0 %v11771_v0  ;;  %1335 = vmatprep.mubr.f32.mxu1 %v11771_v0  ;;  %11805 = vst [vmem:[#allocation104_spill] sm:$0xff] %v9973_v31  ;;  %v1170_v28 = vld [vmem:[#allocation9 + $0x110] sm:$0xff]  ;;  %v9995_v61 = vpack.c.bf16 %v1172_v42, %v1168_v4  ;;  %v10007_v4 = vpack.c.bf16 %v1180_v44, %v1176_v19 }
 0x1d9   :  { %11806 = vst [vmem:[#allocation105_spill] sm:$0xff] %v9977_v55  ;;  %11807 = vst [vmem:[#allocation106_spill] sm:$0xff] %v9979_v3  ;;  %v1174_v27 = vld [vmem:[#allocation9 + $0x130] sm:$0xff] }
 0x1da   :  { %6935 = vmatpush1.bf16.msra.mxu0 %v9957_v50  ;;  %6967 = vmatpush1.bf16.msra.mxu1 %v9959_v52  ;;  %v1173_v50 = vld [vmem:[#allocation9 + $0x128] sm:$0xff]  ;;  %v1175_v52 = vld [vmem:[#allocation9 + $0x138] sm:$0xff]  ;;  %11812 = vst [vmem:[#allocation111_spill] sm:$0xff] %v9995_v61  ;;  %v9997_v56 = vpack.c.bf16 %v1174_v27, %v1170_v28  ;;  %11816 = vst [vmem:[#allocation115_spill] sm:$0xff] %v10007_v4 }
 0x1db   :  { %6937 = vmatprep.subr.bf16.mxu0 %v9963_v45  ;;  %6969 = vmatprep.subr.bf16.mxu1 %v9965_v36  ;;  %v9989_v22 = vpack.c.bf16 %v1173_v50, %v1169_v40  ;;  %v9991_v1 = vpack.c.bf16 %v1175_v52, %v1171_v21  ;;  %v1177_v36 = vld [vmem:[#allocation9 + $0x148] sm:$0xff]  ;;  %v1179_v45 = vld [vmem:[#allocation9 + $0x158] sm:$0xff]  ;;  %v1178_v50 = vld [vmem:[#allocation9 + $0x150] sm:$0xff] }
 0x1dc   :  { %11813 = vst [vmem:[#allocation112_spill] sm:$0xff] %v9997_v56  ;;  %v1182_v52 = vld [vmem:[#allocation9 + $0x170] sm:$0xff]  ;;  %v1184_v28 = vld [vmem:[#allocation9 + $0x180] sm:$0xff] }
 0x1dd   :  { %11810 = vst [vmem:[#allocation109_spill] sm:$0xff] %v9989_v22  ;;  %11811 = vst [vmem:[#allocation110_spill] sm:$0xff] %v9991_v1  ;;  %v10009_v42 = vpack.c.bf16 %v1182_v52, %v1178_v50  ;;  %v1188_v27 = vld [vmem:[#allocation9 + $0x1a0] sm:$0xff]  ;;  %v1198_v52 = vld [vmem:[#allocation9 + $0x1f0] sm:$0xff] }
 0x1de   :  { %6939 = vmatpush1.bf16.msra.mxu0 %v9971_v25  ;;  %6971 = vmatpush1.bf16.msra.mxu1 %v9973_v31  ;;  %v1181_v25 = vld [vmem:[#allocation9 + $0x168] sm:$0xff]  ;;  %v1183_v31 = vld [vmem:[#allocation9 + $0x178] sm:$0xff]  ;;  %v10019_v19 = vpack.c.bf16 %v1188_v27, %v1184_v28  ;;  %v1192_v50 = vld [vmem:[#allocation9 + $0x1c0] sm:$0xff] }
 0x1df   :  { %6941 = vmatprep.subr.bf16.mxu0 %v9977_v55  ;;  %6973 = vmatprep.subr.bf16.mxu1 %v9979_v3  ;;  %v10001_v21 = vpack.c.bf16 %v1181_v25, %v1177_v36  ;;  %v10003_v40 = vpack.c.bf16 %v1183_v31, %v1179_v45  ;;  %v1185_v3 = vld [vmem:[#allocation9 + $0x188] sm:$0xff]  ;;  %v1187_v55 = vld [vmem:[#allocation9 + $0x198] sm:$0xff]  ;;  %11817 = vst [vmem:[#allocation116_spill] sm:$0xff] %v10009_v42  ;;  %v1186_v25 = vld [vmem:[#allocation9 + $0x190] sm:$0xff] }
 0x1e0   :  { %v1190_v31 = vld [vmem:[#allocation9 + $0x1b0] sm:$0xff]  ;;  %11820 = vst [vmem:[#allocation119_spill] sm:$0xff] %v10019_v19 }
 0x1e1   :  { %11814 = vst [vmem:[#allocation113_spill] sm:$0xff] %v10001_v21  ;;  %11815 = vst [vmem:[#allocation114_spill] sm:$0xff] %v10003_v40  ;;  %v10021_v44 = vpack.c.bf16 %v1190_v31, %v1186_v25 }
 0x1e2   :  { %6943 = vmatpush1.bf16.msra.mxu0 %v9983_v12  ;;  %6975 = vmatpush1.bf16.msra.mxu1 %v9985_v11  ;;  %v1189_v12 = vld [vmem:[#allocation9 + $0x1a8] sm:$0xff]  ;;  %v1191_v11 = vld [vmem:[#allocation9 + $0x1b8] sm:$0xff] }
 0x1e3   :  { %6945 = vmatprep.subr.bf16.mxu0 %v9989_v22  ;;  %6977 = vmatprep.subr.bf16.mxu1 %v9991_v1  ;;  %v10013_v45 = vpack.c.bf16 %v1189_v12, %v1185_v3  ;;  %v10015_v36 = vpack.c.bf16 %v1191_v11, %v1187_v55  ;;  %v1193_v1 = vld [vmem:[#allocation9 + $0x1c8] sm:$0xff]  ;;  %v1195_v22 = vld [vmem:[#allocation9 + $0x1d8] sm:$0xff]  ;;  %11821 = vst [vmem:[#allocation120_spill] sm:$0xff] %v10021_v44  ;;  %v1196_v12 = vld [vmem:[#allocation9 + $0x1e0] sm:$0xff] }
 0x1e4   :  { %v1194_v11 = vld [vmem:[#allocation9 + $0x1d0] sm:$0xff]  ;;  %v10031_v28 = vpack.c.bf16 %v1196_v12, %v1192_v50 }
 0x1e5   :  { %11818 = vst [vmem:[#allocation117_spill] sm:$0xff] %v10013_v45  ;;  %11819 = vst [vmem:[#allocation118_spill] sm:$0xff] %v10015_v36  ;;  %v10033_v27 = vpack.c.bf16 %v1198_v52, %v1194_v11  ;;  %v11826_v52 = vcombine.high %v9799_v10, %v9805_v5 }
 0x1e6   :  { %6947 = vmatpush1.bf16.msra.mxu0 %v9995_v61  ;;  %6979 = vmatpush1.bf16.msra.mxu1 %v9997_v56  ;;  %v1197_v61 = vld [vmem:[#allocation9 + $0x1e8] sm:$0xff]  ;;  %v1199_v56 = vld [vmem:[#allocation9 + $0x1f8] sm:$0xff]  ;;  %11824 = vst [vmem:[#allocation123_spill] sm:$0xff] %v10031_v28 }
 0x1e7   :  { %6949 = vmatprep.subr.bf16.mxu0 %v10001_v21  ;;  %6981 = vmatprep.subr.bf16.mxu1 %v10003_v40  ;;  %v10025_v55 = vpack.c.bf16 %v1197_v61, %v1193_v1  ;;  %v10027_v3 = vpack.c.bf16 %v1199_v56, %v1195_v22  ;;  %11825 = vst [vmem:[#allocation124_spill] sm:$0xff] %v10033_v27 }
 0x1e9   :  { %11822 = vst [vmem:[#allocation121_spill] sm:$0xff] %v10025_v55  ;;  %11823 = vst [vmem:[#allocation122_spill] sm:$0xff] %v10027_v3 }
 0x1ea   :  { %6951 = vmatpush1.bf16.msra.mxu0 %v10007_v4  ;;  %6983 = vmatpush1.bf16.msra.mxu1 %v10009_v42 }
 0x1eb   :  { %6953 = vmatprep.subr.bf16.mxu0 %v10013_v45  ;;  %6985 = vmatprep.subr.bf16.mxu1 %v10015_v36 }
 0x1ee   :  { %6955 = vmatpush1.bf16.msra.mxu0 %v10019_v19  ;;  %6987 = vmatpush1.bf16.msra.mxu1 %v10021_v44 }
 0x1ef   :  { %6957 = vmatprep.subr.bf16.mxu0 %v10025_v55  ;;  %6989 = vmatprep.subr.bf16.mxu1 %v10027_v3 }
 0x1f2   :  { %6959 = vmatpush1.bf16.msra.mxu0 %v10031_v28  ;;  %6991 = vmatpush1.bf16.msra.mxu1 %v10033_v27 }
 0x1f3   :  { %6993 = vmatprep.subr.bf16.mxu0 %v9620_v9  ;;  %7025 = vmatprep.subr.bf16.mxu1 %v9623_v13 }
 0x1f5   :  { %1265 = vmatmul.mubr.f32.vlgmr.msra.gmra.mrb[4].mxu0 %v11771_v0  ;;  %1336 = vmatmul.mubr.f32.vlgmr.msra.gmra.mrb[12].mxu1 %v11771_v0 }
 0x1f6   :  { %6995 = vmatpush1.bf16.msra.mxu0 %v9627_v15  ;;  %7027 = vmatpush1.bf16.msra.mxu1 %v9647_v34 }
 0x1f7   :  { %6997 = vmatprep.subr.bf16.mxu0 %v9631_v18  ;;  %7029 = vmatprep.subr.bf16.mxu1 %v9649_v35 }
 0x1f8   :  { %1435 = vmatprep.mubr.f32.mxu0 %v11771_v0  ;;  %1506 = vmatprep.mubr.f32.mxu1 %v11771_v0 }
 0x1fa   :  { %6999 = vmatpush1.bf16.msra.mxu0 %v9640_v26  ;;  %7031 = vmatpush1.bf16.msra.mxu1 %v9660_v46 }
 0x1fb   :  { %7001 = vmatprep.subr.bf16.mxu0 %v9643_v29  ;;  %7033 = vmatprep.subr.bf16.mxu1 %v9663_v47 }
 0x1fe   :  { %7003 = vmatpush1.bf16.msra.mxu0 %v9652_v39  ;;  %7035 = vmatpush1.bf16.msra.mxu1 %v9673_v58 }
 0x1ff   :  { %7005 = vmatprep.subr.bf16.mxu0 %v9655_v41  ;;  %7037 = vmatprep.subr.bf16.mxu1 %v9677_v59 }
 0x202   :  { %7007 = vmatpush1.bf16.msra.mxu0 %v9666_v51  ;;  %7039 = vmatpush1.bf16.msra.mxu1 %v9686_v7 }
 0x203   :  { %7009 = vmatprep.subr.bf16.mxu0 %v9669_v53  ;;  %7041 = vmatprep.subr.bf16.mxu1 %v9689_v8 }
 0x206   :  { %7011 = vmatpush1.bf16.msra.mxu0 %v9680_v63  ;;  %7043 = vmatpush1.bf16.msra.mxu1 %v9698_v23 }
 0x207   :  { %7013 = vmatprep.subr.bf16.mxu0 %v9683_v2  ;;  %7045 = vmatprep.subr.bf16.mxu1 %v9701_v24 }
 0x20a   :  { %7015 = vmatpush1.bf16.msra.mxu0 %v9692_v14  ;;  %7047 = vmatpush1.bf16.msra.mxu1 %v9710_v37 }
 0x20b   :  { %7017 = vmatprep.subr.bf16.mxu0 %v9695_v17  ;;  %7049 = vmatprep.subr.bf16.mxu1 %v9713_v38 }
 0x20e   :  { %7019 = vmatpush1.bf16.msra.mxu0 %v9704_v30  ;;  %7051 = vmatpush1.bf16.msra.mxu1 %v9720_v48 }
 0x20f   :  { %7021 = vmatprep.subr.bf16.mxu0 %v9707_v32  ;;  %7053 = vmatprep.subr.bf16.mxu1 %v9723_v49 }
 0x212   :  { %7023 = vmatpush1.bf16.msra.mxu0 %v9716_v43  ;;  %7055 = vmatpush1.bf16.msra.mxu1 %v9728_v54 }
 0x213   :  { %7057 = vmatprep.subr.bf16.mxu0 %v9767_v60  ;;  %7089 = vmatprep.subr.bf16.mxu1 %v9769_v62 }
 0x288   :  { %v778_v22 = vpop.f32.mrb[2].mxu0  ;;  %v849_v1 = vpop.f32.mrb[10].mxu1 }
 0x289   :  { %v780_v61 = vpop.f32.mrb[3].mxu0  ;;  %v851_v56 = vpop.f32.mrb[11].mxu1 }
 0x28a   :  { %v858_v25 = vcombine.low %v778_v22, %v780_v61  ;;  %v859_v31 = vcombine.low %v849_v1, %v851_v56 }
 0x28c   :  { %v866_v50 = vrot.slane %v858_v25, %v9796_v57  ;;  %v873_v12 = vrot.slane %v859_v31, %v9796_v57 }
 0x28e   :  { %v874_v11 = vcombine.low %v866_v50, %v873_v12  ;;  %v11829_v50 = vld [vmem:[#allocation67_spill] sm:$0xff]  ;;  %v11830_v12 = vld [vmem:[#allocation68_spill] sm:$0xff] }
 0x290   :  { %v876_v43 = vadd.f32 %v874_v11, %v11826_v52  ;;  %v11831_v11 = vld [vmem:[#allocation55_spill] sm:$0xff] }
 0x292   :  { %v6626_v54 = vmul.f32 -1.442695, %v876_v43  ;;  %v884_v49 = vrot.slane %v876_v43, 2  ;;  %v895_v62 = vrot.slane %v876_v43, 6  ;;  %v892_v30 = vrot.slane %v876_v43, 4 }
 0x294   :  { %8920 = vpow2.f32 %v6626_v54  ;;  %v6627_v60 = vmul.f32 -1.442695, %v884_v49  ;;  %v6628_v32 = vmul.f32 -1.442695, %v895_v62  ;;  %v11828_v62 = vld [vmem:[#allocation66_spill] sm:$0xff] }
 0x296   :  { %8922 = vpow2.f32 %v6627_v60 }
 0x297   :  { %8924 = vpow2.f32 %v6628_v32 }
 0x29e   :  { %v8921_v48 = vpop.eup %8920 }
 0x29f   :  { %v880_v22 = vadd.f32 1.0, %v8921_v48 }
 0x2a0   :  { %v8923_v1 = vpop.eup %8922 }
 0x2a1   :  { %8926 = vrcp.f32 %v880_v22  ;;  %v889_v61 = vadd.f32 1.0, %v8923_v1  ;;  %v8925_v56 = vpop.eup %8924  ;;  %v11833_v22 = vld [vmem:[#allocation69_spill] sm:$0xff]  ;;  %v11834_v1 = vld [vmem:[#allocation70_spill] sm:$0xff] }
 0x2a2   :  { %8928 = vtanh.f32 %v892_v30  ;;  %v900_v31 = vadd.f32 1.0, %v8925_v56  ;;  %v11827_v30 = vld [vmem:[#allocation65_spill] sm:$0xff] }
 0x2a3   :  { %8930 = vrcp.f32 %v889_v61  ;;  %v11835_v61 = vld [vmem:[#allocation56_spill] sm:$0xff] }
 0x2a4   :  { %8932 = vrcp.f32 %v900_v31  ;;  %v11838_v31 = vld [vmem:[#allocation72_spill] sm:$0xff] }
 0x2ab   :  { %v8927_v25 = vpop.eup %8926 }
 0x2ac   :  { %v8929_v10 = vpop.eup %8928 }
 0x2ad   :  { %v8931_v5 = vpop.eup %8930  ;;  %v904_v49 = vmul.f32 %v8929_v10, %v8927_v25 }
 0x2ae   :  { %v903_v54 = vmul.f32 %v8931_v5, %v9840_v16  ;;  %v8933_v43 = vpop.eup %8932  ;;  %v972_v16 = vld [vmem:[%s11451_s6] sm:$0xf]  ;;  %v11837_v5 = vld [vmem:[#allocation71_spill] sm:$0xff] }
 0x2af   :  { %v10098_v52 = vrot.slane %v972_v16, %v11831_v11  ;;  %v10103_v56 = vrot.slane %v972_v16, %v11835_v61  ;;  %v11840_v11 = vld [vmem:[#allocation74_spill] sm:$0xff]  ;;  %v11841_v61 = vld [vmem:[#allocation75_spill] sm:$0xff] }
 0x2b0   :  { %v10083_v60 = vadd.f32 %v904_v49, %v903_v54 }
 0x2b1   :  { %11832 = vst [vmem:[#allocation65_spill] sm:$0xff] %v10098_v52  ;;  %11836 = vst [vmem:[#allocation66_spill] sm:$0xff] %v10103_v56 }
 0x2b2   :  { %8934 = vtanh.f32 %v10083_v60 }
 0x2bc   :  { %v8935_v48 = vpop.eup %8934 }
 0x2bd   :  { %v907_v32 = vmul.f32 %v8935_v48, %v8933_v43  ;;  %v11839_v48 = vld [vmem:[#allocation73_spill] sm:$0xff] }
 0x2bf   :  { %1436 = vmatmul.mubr.f32.vlgmr.msra.gmra.mrb[6].mxu0 %v907_v32  ;;  %1507 = vmatmul.mubr.f32.vlgmr.msra.gmra.mrb[14].mxu1 %v907_v32 }
 0x2c0   :  { %7059 = vmatpush1.bf16.msra.mxu0 %v9843_v20  ;;  %7091 = vmatpush1.bf16.msra.mxu1 %v9845_v33 }
 0x2c1   :  { %7061 = vmatprep.subr.bf16.mxu0 %v11827_v30  ;;  %7093 = vmatprep.subr.bf16.mxu1 %v11828_v62 }
 0x2c2   :  { %1631 = vmatprep.mubr.f32.mxu0 %v11771_v0  ;;  %1702 = vmatprep.mubr.f32.mxu1 %v11771_v0 }
 0x2c4   :  { %7063 = vmatpush1.bf16.msra.mxu0 %v11829_v50  ;;  %7095 = vmatpush1.bf16.msra.mxu1 %v11830_v12  ;;  %v11842_v50 = vld [vmem:[#allocation76_spill] sm:$0xff] }
 0x2c5   :  { %7065 = vmatprep.subr.bf16.mxu0 %v11833_v22  ;;  %7097 = vmatprep.subr.bf16.mxu1 %v11834_v1 }
 0x2c8   :  { %v1266_v25 = vpop.f32.mrb[4].mxu0  ;;  %v1337_v10 = vpop.f32.mrb[12].mxu1  ;;  %7067 = vmatpush1.bf16.msra.mxu0 %v11837_v5  ;;  %7099 = vmatpush1.bf16.msra.mxu1 %v11838_v31  ;;  %v11843_v5 = vld [vmem:[#allocation77_spill] sm:$0xff]  ;;  %v11844_v31 = vld [vmem:[#allocation78_spill] sm:$0xff] }
 0x2c9   :  { %v8808_v54 = vadd.f32 %v1266_v25, %v10098_v52  ;;  %v1268_v49 = vpop.f32.mrb[5].mxu0  ;;  %v1339_v43 = vpop.f32.mrb[13].mxu1  ;;  %7069 = vmatprep.subr.bf16.mxu0 %v11839_v48  ;;  %7101 = vmatprep.subr.bf16.mxu1 %v11840_v11  ;;  %v11845_v25 = vld [vmem:[#allocation79_spill] sm:$0xff]  ;;  %v11846_v52 = vld [vmem:[#allocation80_spill] sm:$0xff]  ;;  %v11847_v48 = vld [vmem:[#allocation57_spill] sm:$0xff] }
 0x2ca   :  { %v8809_v22 = vadd.f32 %v1268_v49, %v10103_v56  ;;  %v10118_v11 = vrot.slane %v972_v16, %v11847_v48  ;;  %v11849_v49 = vld [vmem:[#allocation81_spill] sm:$0xff]  ;;  %v11857_v56 = vld [vmem:[#allocation87_spill] sm:$0xff] }
 0x2cb   :  { %v6629_v1 = vmul.f32 -1.442695, %v8808_v54  ;;  %v11851_v54 = vld [vmem:[#allocation83_spill] sm:$0xff] }
 0x2cc   :  { %v6630_v12 = vmul.f32 -1.442695, %v8809_v22  ;;  %7071 = vmatpush1.bf16.msra.mxu0 %v11841_v61  ;;  %7103 = vmatpush1.bf16.msra.mxu1 %v11842_v50  ;;  %11848 = vst [vmem:[#allocation125_spill] sm:$0xff] %v10118_v11  ;;  %v11850_v22 = vld [vmem:[#allocation82_spill] sm:$0xff]  ;;  %v11852_v50 = vld [vmem:[#allocation84_spill] sm:$0xff] }
 0x2cd   :  { %8936 = vpow2.f32 %v6629_v1  ;;  %7073 = vmatprep.subr.bf16.mxu0 %v11843_v5  ;;  %7105 = vmatprep.subr.bf16.mxu1 %v11844_v31  ;;  %v11853_v1 = vld [vmem:[#allocation58_spill] sm:$0xff]  ;;  %v11855_v31 = vld [vmem:[#allocation85_spill] sm:$0xff] }
 0x2ce   :  { %8938 = vpow2.f32 %v6630_v12  ;;  %v10125_v5 = vrot.slane %v972_v16, %v11853_v1  ;;  %v8810_v12 = vadd.f32 %v1337_v10, %v10118_v11  ;;  %v11860_v16 = vld [vmem:[#allocation90_spill] sm:$0xff]  ;;  %v11861_v10 = vld [vmem:[#allocation91_spill] sm:$0xff]  ;;  %v11862_v1 = vld [vmem:[#allocation92_spill] sm:$0xff] }
 0x2d0   :  { %7075 = vmatpush1.bf16.msra.mxu0 %v11845_v25  ;;  %7107 = vmatpush1.bf16.msra.mxu1 %v11846_v52  ;;  %11854 = vst [vmem:[#allocation126_spill] sm:$0xff] %v10125_v5  ;;  %v11856_v25 = vld [vmem:[#allocation86_spill] sm:$0xff]  ;;  %8940 = vtanh.f32 %v8810_v12  ;;  %v11866_v12 = vld [vmem:[#allocation97_spill] sm:$0xff] }
 0x2d1   :  { %7077 = vmatprep.subr.bf16.mxu0 %v11849_v49  ;;  %7109 = vmatprep.subr.bf16.mxu1 %v11850_v22  ;;  %v11858_v49 = vld [vmem:[#allocation88_spill] sm:$0xff]  ;;  %v11859_v22 = vld [vmem:[#allocation89_spill] sm:$0xff] }
 0x2d4   :  { %7079 = vmatpush1.bf16.msra.mxu0 %v11851_v54  ;;  %7111 = vmatpush1.bf16.msra.mxu1 %v11852_v50  ;;  %v8811_v50 = vadd.f32 %v1339_v43, %v10125_v5  ;;  %v11865_v43 = vld [vmem:[#allocation96_spill] sm:$0xff]  ;;  %v11876_v5 = vld [vmem:[#allocation107_spill] sm:$0xff] }
 0x2d5   :  { %7081 = vmatprep.subr.bf16.mxu0 %v11855_v31  ;;  %7113 = vmatprep.subr.bf16.mxu1 %v11856_v25 }
 0x2d6   :  { %v6631_v25 = vmul.f32 -1.442695, %v8811_v50 }
 0x2d7   :  { %v8937_v52 = vpop.eup %8936 }
 0x2d8   :  { %v8939_v48 = vpop.eup %8938  ;;  %v1349_v61 = vadd.f32 1.0, %v8937_v52  ;;  %7083 = vmatpush1.bf16.msra.mxu0 %v11857_v56  ;;  %7115 = vmatpush1.bf16.msra.mxu1 %v11858_v49  ;;  %v11863_v52 = vld [vmem:[#allocation94_spill] sm:$0xff] }
 0x2d9   :  { %v1355_v54 = vadd.f32 1.0, %v8939_v48  ;;  %7085 = vmatprep.subr.bf16.mxu0 %v11859_v22  ;;  %7117 = vmatprep.subr.bf16.mxu1 %v11860_v16  ;;  %v11864_v48 = vld [vmem:[#allocation95_spill] sm:$0xff]  ;;  %v11874_v16 = vld [vmem:[#allocation105_spill] sm:$0xff]  ;;  %v11875_v22 = vld [vmem:[#allocation106_spill] sm:$0xff] }
 0x2da   :  { %8942 = vrcp.f32 %v1349_v61  ;;  %v11867_v61 = vld [vmem:[#allocation98_spill] sm:$0xff]  ;;  %v8941_v50 = vpop.eup %8940 }
 0x2db   :  { %8944 = vrcp.f32 %v1355_v54 }
 0x2dc   :  { %7087 = vmatpush1.bf16.msra.mxu0 %v11861_v10  ;;  %7119 = vmatpush1.bf16.msra.mxu1 %v11862_v1  ;;  %8946 = vpow2.f32 %v6631_v25  ;;  %v11873_v10 = vld [vmem:[#allocation104_spill] sm:$0xff] }
 0x2dd   :  { %7121 = vmatprep.subr.bf16.mxu0 %v9937_v6  ;;  %7153 = vmatprep.subr.bf16.mxu1 %v11863_v52  ;;  %v11868_v6 = vld [vmem:[#allocation99_spill] sm:$0xff]  ;;  %v11869_v52 = vld [vmem:[#allocation100_spill] sm:$0xff] }
 0x2df   :  { %1632 = vmatmul.mubr.f32.vlgmr.msra.gmra.mrb[8].mxu0 %v907_v32  ;;  %1703 = vmatmul.mubr.f32.vlgmr.msra.gmra.mrb[16].mxu1 %v907_v32 }
 0x2e0   :  { %7123 = vmatpush1.bf16.msra.mxu0 %v11864_v48  ;;  %7155 = vmatpush1.bf16.msra.mxu1 %v11865_v43  ;;  %v11870_v48 = vld [vmem:[#allocation101_spill] sm:$0xff]  ;;  %v11871_v43 = vld [vmem:[#allocation102_spill] sm:$0xff] }
 0x2e1   :  { %7125 = vmatprep.subr.bf16.mxu0 %v11866_v12  ;;  %7157 = vmatprep.subr.bf16.mxu1 %v11867_v61  ;;  %v11872_v61 = vld [vmem:[#allocation103_spill] sm:$0xff] }
 0x2e2   :  { %1773 = vmatprep.mubr.f32.mxu0 %v11771_v0  ;;  %1844 = vmatprep.mubr.f32.mxu1 %v11771_v0 }
 0x2e4   :  { %v8943_v54 = vpop.eup %8942  ;;  %7127 = vmatpush1.bf16.msra.mxu0 %v11868_v6  ;;  %7159 = vmatpush1.bf16.msra.mxu1 %v11869_v52  ;;  %v11877_v52 = vld [vmem:[#allocation108_spill] sm:$0xff] }
 0x2e5   :  { %v8945_v32 = vpop.eup %8944  ;;  %v1366_v1 = vmul.f32 %v8943_v54, %v8941_v50  ;;  %7129 = vmatprep.subr.bf16.mxu0 %v11870_v48  ;;  %7161 = vmatprep.subr.bf16.mxu1 %v11871_v43  ;;  %v11878_v50 = vld [vmem:[#allocation109_spill] sm:$0xff]  ;;  %v11879_v54 = vld [vmem:[#allocation110_spill] sm:$0xff] }
 0x2e6   :  { %v1365_v25 = vmul.f32 0.0, %v8945_v32  ;;  %v8947_v6 = vpop.eup %8946 }
 0x2e7   :  { %v1362_v32 = vadd.f32 1.0, %v8947_v6 }
 0x2e8   :  { %v10149_v12 = vadd.f32 %v1366_v1, %v1365_v25  ;;  %7131 = vmatpush1.bf16.msra.mxu0 %v11872_v61  ;;  %7163 = vmatpush1.bf16.msra.mxu1 %v11873_v10  ;;  %v11880_v1 = vld [vmem:[#allocation111_spill] sm:$0xff]  ;;  %v11881_v25 = vld [vmem:[#allocation112_spill] sm:$0xff] }
 0x2e9   :  { %7133 = vmatprep.subr.bf16.mxu0 %v11874_v16  ;;  %7165 = vmatprep.subr.bf16.mxu1 %v11875_v22 }
 0x2ea   :  { %8948 = vtanh.f32 %v10149_v12 }
 0x2eb   :  { %8950 = vrcp.f32 %v1362_v32 }
 0x2ec   :  { %7135 = vmatpush1.bf16.msra.mxu0 %v11876_v5  ;;  %7167 = vmatpush1.bf16.msra.mxu1 %v11877_v52 }
 0x2ed   :  { %7137 = vmatprep.subr.bf16.mxu0 %v11878_v50  ;;  %7169 = vmatprep.subr.bf16.mxu1 %v11879_v54 }
 0x2f0   :  { %7139 = vmatpush1.bf16.msra.mxu0 %v11880_v1  ;;  %7171 = vmatpush1.bf16.msra.mxu1 %v11881_v25 }
 0x2f1   :  { %7141 = vmatprep.subr.bf16.mxu0 %v10001_v21  ;;  %7173 = vmatprep.subr.bf16.mxu1 %v10003_v40 }
 0x2f4   :  { %7143 = vmatpush1.bf16.msra.mxu0 %v10007_v4  ;;  %7175 = vmatpush1.bf16.msra.mxu1 %v10009_v42  ;;  %v8949_v6 = vpop.eup %8948 }
 0x2f5   :  { %7145 = vmatprep.subr.bf16.mxu0 %v10013_v45  ;;  %7177 = vmatprep.subr.bf16.mxu1 %v10015_v36  ;;  %v8951_v21 = vpop.eup %8950 }
 0x2f6   :  { %v1369_v32 = vmul.f32 %v8951_v21, %v8949_v6  ;;  %v11882_v21 = vld [vmem:[#allocation44_spill] sm:$0xff]  ;;  %v11883_v6 = vld [vmem:[#allocation49_spill] sm:$0xff] }
 0x2f8   :  { %7147 = vmatpush1.bf16.msra.mxu0 %v10019_v19  ;;  %7179 = vmatpush1.bf16.msra.mxu1 %v10021_v44 }
 0x2f9   :  { %7149 = vmatprep.subr.bf16.mxu0 %v10025_v55  ;;  %7181 = vmatprep.subr.bf16.mxu1 %v10027_v3 }
 0x2fc   :  { %7151 = vmatpush1.bf16.msra.mxu0 %v10031_v28  ;;  %7183 = vmatpush1.bf16.msra.mxu1 %v10033_v27 }
 0x2fd   :  { %7185 = vmatprep.subr.bf16.mxu0 %v9620_v9  ;;  %7217 = vmatprep.subr.bf16.mxu1 %v9623_v13 }
 0x2ff   :  { %1774 = vmatmul.mubr.f32.vlgmr.msra.gmra.mrb[8].mxu0 %v1369_v32  ;;  %1845 = vmatmul.mubr.f32.vlgmr.msra.gmra.mrb[16].mxu1 %v1369_v32  ;;  %v11884_v32 = vld [vmem:[#allocation45_spill] sm:$0xff] }
 0x300   :  { %7187 = vmatpush1.bf16.msra.mxu0 %v9627_v15  ;;  %7219 = vmatpush1.bf16.msra.mxu1 %v9647_v34 }
 0x301   :  { %7189 = vmatprep.subr.bf16.mxu0 %v9631_v18  ;;  %7221 = vmatprep.subr.bf16.mxu1 %v9649_v35 }
 0x302   :  { %1944 = vmatprep.mubr.f32.mxu0 %v11771_v0  ;;  %2015 = vmatprep.mubr.f32.mxu1 %v11771_v0 }
 0x304   :  { %7191 = vmatpush1.bf16.msra.mxu0 %v9640_v26  ;;  %7223 = vmatpush1.bf16.msra.mxu1 %v9660_v46 }
 0x305   :  { %7193 = vmatprep.subr.bf16.mxu0 %v9643_v29  ;;  %7225 = vmatprep.subr.bf16.mxu1 %v9663_v47 }
 0x308   :  { %7195 = vmatpush1.bf16.msra.mxu0 %v9652_v39  ;;  %7227 = vmatpush1.bf16.msra.mxu1 %v9673_v58 }
 0x309   :  { %7197 = vmatprep.subr.bf16.mxu0 %v9655_v41  ;;  %7229 = vmatprep.subr.bf16.mxu1 %v9677_v59 }
 0x30c   :  { %7199 = vmatpush1.bf16.msra.mxu0 %v9666_v51  ;;  %7231 = vmatpush1.bf16.msra.mxu1 %v9686_v7  ;;  %v11891_v51 = vld [vmem:[#allocation60_spill] sm:$0xff] }
 0x30d   :  { %7201 = vmatprep.subr.bf16.mxu0 %v9669_v53  ;;  %7233 = vmatprep.subr.bf16.mxu1 %v9689_v8 }
 0x310   :  { %7203 = vmatpush1.bf16.msra.mxu0 %v9680_v63  ;;  %7235 = vmatpush1.bf16.msra.mxu1 %v9698_v23  ;;  %v11885_v63 = vld [vmem:[#allocation50_spill] sm:$0xff]  ;;  %v11886_v23 = vld [vmem:[#allocation48_spill] sm:$0xff] }
 0x311   :  { %7205 = vmatprep.subr.bf16.mxu0 %v9683_v2  ;;  %7237 = vmatprep.subr.bf16.mxu1 %v9701_v24  ;;  %v11887_v2 = vld [vmem:[#allocation51_spill] sm:$0xff]  ;;  %v11888_v24 = vld [vmem:[#allocation52_spill] sm:$0xff] }
 0x314   :  { %7207 = vmatpush1.bf16.msra.mxu0 %v9692_v14  ;;  %7239 = vmatpush1.bf16.msra.mxu1 %v9710_v37  ;;  %v11889_v14 = vld [vmem:[#allocation53_spill] sm:$0xff] }
 0x315   :  { %7209 = vmatprep.subr.bf16.mxu0 %v9695_v17  ;;  %7241 = vmatprep.subr.bf16.mxu1 %v9713_v38 }
 0x318   :  { %7211 = vmatpush1.bf16.msra.mxu0 %v11882_v21  ;;  %7243 = vmatpush1.bf16.msra.mxu1 %v11883_v6 }
 0x319   :  { %7213 = vmatprep.subr.bf16.mxu0 %v11884_v32  ;;  %7245 = vmatprep.subr.bf16.mxu1 %v11885_v63  ;;  %v11890_v63 = vld [vmem:[#allocation59_spill] sm:$0xff] }
 0x31c   :  { %7215 = vmatpush1.bf16.msra.mxu0 %v11886_v23  ;;  %7247 = vmatpush1.bf16.msra.mxu1 %v11887_v2  ;;  %v11892_v23 = vcombine.low %v11890_v63, %v11891_v51 }
 0x31d   :  { %7249 = vmatprep.subr.bf16.mxu0 %v11888_v24  ;;  %7281 = vmatprep.subr.bf16.mxu1 %v11889_v14 }
 0x392   :  { %v1437_v37 = vpop.f32.mrb[6].mxu0  ;;  %v1508_v17 = vpop.f32.mrb[14].mxu1 }
 0x393   :  { %v1439_v8 = vpop.f32.mrb[7].mxu0  ;;  %v1510_v38 = vpop.f32.mrb[15].mxu1 }
 0x394   :  { %v1517_v53 = vcombine.low %v1437_v37, %v1439_v8  ;;  %v1518_v21 = vcombine.low %v1508_v17, %v1510_v38 }
 0x396   :  { %v1525_v6 = vrot.slane %v1517_v53, %v9796_v57  ;;  %v1532_v32 = vrot.slane %v1518_v21, %v9796_v57 }
 0x398   :  { %v1533_v7 = vcombine.low %v1525_v6, %v1532_v32  ;;  %v11896_v6 = vld [vmem:[#allocation70_spill] sm:$0xff] }
 0x39a   :  { %v1535_v59 = vadd.f32 %v1533_v7, %v11892_v23 }
 0x39c   :  { %v6632_v2 = vmul.f32 -1.442695, %v1535_v59  ;;  %v1543_v41 = vrot.slane %v1535_v59, 2  ;;  %v1554_v14 = vrot.slane %v1535_v59, 6  ;;  %v1551_v47 = vrot.slane %v1535_v59, 4 }
 0x39e   :  { %8952 = vpow2.f32 %v6632_v2  ;;  %v6633_v24 = vmul.f32 -1.442695, %v1543_v41  ;;  %v6634_v58 = vmul.f32 -1.442695, %v1554_v14  ;;  %v11894_v14 = vld [vmem:[#allocation68_spill] sm:$0xff] }
 0x3a0   :  { %8954 = vpow2.f32 %v6633_v24 }
 0x3a1   :  { %8956 = vpow2.f32 %v6634_v58 }
 0x3a8   :  { %v8953_v39 = vpop.eup %8952 }
 0x3a9   :  { %v1539_v8 = vadd.f32 1.0, %v8953_v39 }
 0x3aa   :  { %v8955_v17 = vpop.eup %8954 }
 0x3ab   :  { %8958 = vrcp.f32 %v1539_v8  ;;  %v1548_v53 = vadd.f32 1.0, %v8955_v17  ;;  %v8957_v37 = vpop.eup %8956  ;;  %v11897_v17 = vld [vmem:[#allocation71_spill] sm:$0xff] }
 0x3ac   :  { %8960 = vtanh.f32 %v1551_v47  ;;  %v1559_v23 = vadd.f32 1.0, %v8957_v37  ;;  %v11893_v47 = vld [vmem:[#allocation67_spill] sm:$0xff]  ;;  %v11899_v37 = vld [vmem:[#allocation65_spill] sm:$0xff] }
 0x3ad   :  { %8962 = vrcp.f32 %v1548_v53  ;;  %v11898_v53 = vld [vmem:[#allocation72_spill] sm:$0xff] }
 0x3ae   :  { %8964 = vrcp.f32 %v1559_v23  ;;  %v11900_v23 = vld [vmem:[#allocation73_spill] sm:$0xff] }
 0x3b5   :  { %v8959_v38 = vpop.eup %8958 }
 0x3b6   :  { %v8961_v21 = vpop.eup %8960 }
 0x3b7   :  { %v8963_v7 = vpop.eup %8962  ;;  %v1563_v41 = vmul.f32 %v8961_v21, %v8959_v38 }
 0x3b8   :  { %v1562_v2 = vmul.f32 %v8963_v7, %v10083_v60  ;;  %v8965_v39 = vpop.eup %8964  ;;  %v11895_v60 = vld [vmem:[#allocation69_spill] sm:$0xff] }
 0x3ba   :  { %v10216_v24 = vadd.f32 %v1563_v41, %v1562_v2  ;;  %v11901_v2 = vld [vmem:[#allocation74_spill] sm:$0xff] }
 0x3bb   :  { %v11902_v41 = vld [vmem:[#allocation66_spill] sm:$0xff] }
 0x3bc   :  { %8966 = vtanh.f32 %v10216_v24 }
 0x3c6   :  { %v8967_v59 = vpop.eup %8966 }
 0x3c7   :  { %v1566_v58 = vmul.f32 %v8967_v59, %v8965_v39 }
 0x3c9   :  { %1945 = vmatmul.mubr.f32.vlgmr.msra.gmra.mrb[10].mxu0 %v1566_v58  ;;  %2016 = vmatmul.mubr.f32.vlgmr.msra.gmra.mrb[18].mxu1 %v1566_v58 }
 0x3ca   :  { %7251 = vmatpush1.bf16.msra.mxu0 %v9843_v20  ;;  %7283 = vmatpush1.bf16.msra.mxu1 %v9845_v33 }
 0x3cb   :  { %7253 = vmatprep.subr.bf16.mxu0 %v11827_v30  ;;  %7285 = vmatprep.subr.bf16.mxu1 %v11828_v62 }
 0x3cc   :  { %2140 = vmatprep.mubr.f32.mxu0 %v11771_v0  ;;  %2211 = vmatprep.mubr.f32.mxu1 %v11771_v0 }
 0x3ce   :  { %7255 = vmatpush1.bf16.msra.mxu0 %v11893_v47  ;;  %7287 = vmatpush1.bf16.msra.mxu1 %v11894_v14  ;;  %v11903_v14 = vld [vmem:[#allocation75_spill] sm:$0xff] }
 0x3cf   :  { %7257 = vmatprep.subr.bf16.mxu0 %v11895_v60  ;;  %7289 = vmatprep.subr.bf16.mxu1 %v11896_v6  ;;  %v11904_v6 = vld [vmem:[#allocation76_spill] sm:$0xff] }
 0x3d2   :  { %v1775_v32 = vpop.f32.mrb[8].mxu0  ;;  %v1846_v8 = vpop.f32.mrb[16].mxu1  ;;  %7259 = vmatpush1.bf16.msra.mxu0 %v11897_v17  ;;  %7291 = vmatpush1.bf16.msra.mxu1 %v11898_v53  ;;  %v11905_v17 = vld [vmem:[#allocation77_spill] sm:$0xff]  ;;  %v11906_v53 = vld [vmem:[#allocation78_spill] sm:$0xff] }
 0x3d3   :  { %v8812_v38 = vadd.f32 %v1775_v32, %v11899_v37  ;;  %v1777_v21 = vpop.f32.mrb[9].mxu0  ;;  %v1848_v7 = vpop.f32.mrb[17].mxu1  ;;  %7261 = vmatprep.subr.bf16.mxu0 %v11900_v23  ;;  %7293 = vmatprep.subr.bf16.mxu1 %v11901_v2  ;;  %v11907_v32 = vld [vmem:[#allocation79_spill] sm:$0xff]  ;;  %v11908_v37 = vld [vmem:[#allocation80_spill] sm:$0xff]  ;;  %v11909_v23 = vld [vmem:[#allocation81_spill] sm:$0xff] }
 0x3d4   :  { %v8813_v39 = vadd.f32 %v1777_v21, %v11902_v41  ;;  %v11910_v2 = vld [vmem:[#allocation82_spill] sm:$0xff]  ;;  %v11912_v21 = vld [vmem:[#allocation84_spill] sm:$0xff] }
 0x3d5   :  { %v6635_v59 = vmul.f32 -1.442695, %v8812_v38  ;;  %v11911_v38 = vld [vmem:[#allocation83_spill] sm:$0xff] }
 0x3d6   :  { %v6636_v60 = vmul.f32 -1.442695, %v8813_v39  ;;  %7263 = vmatpush1.bf16.msra.mxu0 %v11903_v14  ;;  %7295 = vmatpush1.bf16.msra.mxu1 %v11904_v6  ;;  %v8814_v39 = vadd.f32 %v1846_v8, %v10118_v11  ;;  %v11917_v8 = vld [vmem:[#allocation91_spill] sm:$0xff] }
 0x3d7   :  { %8968 = vpow2.f32 %v6635_v59  ;;  %7265 = vmatprep.subr.bf16.mxu0 %v11905_v17  ;;  %7297 = vmatprep.subr.bf16.mxu1 %v11906_v53  ;;  %v11913_v59 = vld [vmem:[#allocation86_spill] sm:$0xff] }
 0x3d8   :  { %8970 = vpow2.f32 %v6636_v60 }
 0x3d9   :  { %8972 = vtanh.f32 %v8814_v39  ;;  %v11921_v39 = vld [vmem:[#allocation95_spill] sm:$0xff] }
 0x3da   :  { %7267 = vmatpush1.bf16.msra.mxu0 %v11907_v32  ;;  %7299 = vmatpush1.bf16.msra.mxu1 %v11908_v37 }
 0x3db   :  { %7269 = vmatprep.subr.bf16.mxu0 %v11909_v23  ;;  %7301 = vmatprep.subr.bf16.mxu1 %v11910_v2  ;;  %v11914_v2 = vld [vmem:[#allocation126_spill] sm:$0xff] }
 0x3dc   :  { %v8815_v37 = vadd.f32 %v1848_v7, %v11914_v2  ;;  %v11922_v7 = vld [vmem:[#allocation96_spill] sm:$0xff] }
 0x3de   :  { %7271 = vmatpush1.bf16.msra.mxu0 %v11911_v38  ;;  %7303 = vmatpush1.bf16.msra.mxu1 %v11912_v21  ;;  %v11915_v38 = vld [vmem:[#allocation89_spill] sm:$0xff]  ;;  %v11916_v21 = vld [vmem:[#allocation90_spill] sm:$0xff] }
 0x3df   :  { %7273 = vmatprep.subr.bf16.mxu0 %v11855_v31  ;;  %7305 = vmatprep.subr.bf16.mxu1 %v11913_v59  ;;  %v11918_v59 = vld [vmem:[#allocation92_spill] sm:$0xff]  ;;  %v6637_v31 = vmul.f32 -1.442695, %v8815_v37 }
 0x3e1   :  { %v8969_v53 = vpop.eup %8968 }
 0x3e2   :  { %v8971_v60 = vpop.eup %8970  ;;  %v1858_v17 = vadd.f32 1.0, %v8969_v53  ;;  %7275 = vmatpush1.bf16.msra.mxu0 %v11857_v56  ;;  %7307 = vmatpush1.bf16.msra.mxu1 %v11858_v49  ;;  %v11919_v53 = vld [vmem:[#allocation93_spill] sm:$0xff]  ;;  %v11920_v56 = vld [vmem:[#allocation94_spill] sm:$0xff] }
 0x3e3   :  { %v1864_v23 = vadd.f32 1.0, %v8971_v60  ;;  %7277 = vmatprep.subr.bf16.mxu0 %v11915_v38  ;;  %7309 = vmatprep.subr.bf16.mxu1 %v11916_v21  ;;  %v11923_v60 = vld [vmem:[#allocation97_spill] sm:$0xff]  ;;  %v8973_v37 = vpop.eup %8972 }
 0x3e4   :  { %8974 = vrcp.f32 %v1858_v17  ;;  %v11924_v17 = vld [vmem:[#allocation98_spill] sm:$0xff] }
 0x3e5   :  { %8976 = vrcp.f32 %v1864_v23 }
 0x3e6   :  { %7279 = vmatpush1.bf16.msra.mxu0 %v11917_v8  ;;  %7311 = vmatpush1.bf16.msra.mxu1 %v11918_v59  ;;  %8978 = vpow2.f32 %v6637_v31 }
 0x3e7   :  { %7313 = vmatprep.subr.bf16.mxu0 %v11919_v53  ;;  %7345 = vmatprep.subr.bf16.mxu1 %v11920_v56  ;;  %v11925_v53 = vld [vmem:[#allocation99_spill] sm:$0xff]  ;;  %v11926_v56 = vld [vmem:[#allocation100_spill] sm:$0xff] }
 0x3e9   :  { %2141 = vmatmul.mubr.f32.vlgmr.msra.gmra.mrb[12].mxu0 %v1566_v58  ;;  %2212 = vmatmul.mubr.f32.vlgmr.msra.gmra.mrb[20].mxu1 %v1566_v58 }
 0x3ea   :  { %7315 = vmatpush1.bf16.msra.mxu0 %v11921_v39  ;;  %7347 = vmatpush1.bf16.msra.mxu1 %v11922_v7 }
 0x3eb   :  { %7317 = vmatprep.subr.bf16.mxu0 %v11923_v60  ;;  %7349 = vmatprep.subr.bf16.mxu1 %v11924_v17 }
 0x3ec   :  { %2282 = vmatprep.mubr.f32.mxu0 %v11771_v0  ;;  %2353 = vmatprep.mubr.f32.mxu1 %v11771_v0 }
 0x3ee   :  { %v8975_v23 = vpop.eup %8974  ;;  %7319 = vmatpush1.bf16.msra.mxu0 %v11925_v53  ;;  %7351 = vmatpush1.bf16.msra.mxu1 %v11926_v56 }
 0x3ef   :  { %v8977_v58 = vpop.eup %8976  ;;  %v1875_v59 = vmul.f32 %v8975_v23, %v8973_v37  ;;  %7321 = vmatprep.subr.bf16.mxu0 %v11870_v48  ;;  %7353 = vmatprep.subr.bf16.mxu1 %v11871_v43 }
 0x3f0   :  { %v1874_v31 = vmul.f32 %v8977_v58, %v10149_v12  ;;  %v8979_v53 = vpop.eup %8978  ;;  %v11928_v58 = vld [vmem:[#allocation31_spill] sm:$0xff] }
 0x3f1   :  { %v1871_v12 = vadd.f32 1.0, %v8979_v53 }
 0x3f2   :  { %v10268_v60 = vadd.f32 %v1875_v59, %v1874_v31  ;;  %7323 = vmatpush1.bf16.msra.mxu0 %v11872_v61  ;;  %7355 = vmatpush1.bf16.msra.mxu1 %v11873_v10  ;;  %v11927_v59 = vld [vmem:[#allocation113_spill] sm:$0xff]  ;;  %v11929_v31 = vld [vmem:[#allocation28_spill] sm:$0xff] }
 0x3f3   :  { %7325 = vmatprep.subr.bf16.mxu0 %v11874_v16  ;;  %7357 = vmatprep.subr.bf16.mxu1 %v11875_v22 }
 0x3f4   :  { %8980 = vtanh.f32 %v10268_v60 }
 0x3f5   :  { %8982 = vrcp.f32 %v1871_v12  ;;  %v11930_v12 = vld [vmem:[#allocation34_spill] sm:$0xff] }
 0x3f6   :  { %7327 = vmatpush1.bf16.msra.mxu0 %v11876_v5  ;;  %7359 = vmatpush1.bf16.msra.mxu1 %v11877_v52 }
 0x3f7   :  { %7329 = vmatprep.subr.bf16.mxu0 %v11878_v50  ;;  %7361 = vmatprep.subr.bf16.mxu1 %v11879_v54 }
 0x3fa   :  { %7331 = vmatpush1.bf16.msra.mxu0 %v11880_v1  ;;  %7363 = vmatpush1.bf16.msra.mxu1 %v11881_v25 }
 0x3fb   :  { %7333 = vmatprep.subr.bf16.mxu0 %v11927_v59  ;;  %7365 = vmatprep.subr.bf16.mxu1 %v10003_v40 }
 0x3fe   :  { %7335 = vmatpush1.bf16.msra.mxu0 %v10007_v4  ;;  %7367 = vmatpush1.bf16.msra.mxu1 %v10009_v42  ;;  %v8981_v53 = vpop.eup %8980 }
 0x3ff   :  { %7337 = vmatprep.subr.bf16.mxu0 %v10013_v45  ;;  %7369 = vmatprep.subr.bf16.mxu1 %v10015_v36  ;;  %v8983_v37 = vpop.eup %8982 }
 0x400   :  { %v1878_v23 = vmul.f32 %v8983_v37, %v8981_v53  ;;  %v11931_v53 = vld [vmem:[#allocation29_spill] sm:$0xff]  ;;  %v11932_v37 = vld [vmem:[#allocation35_spill] sm:$0xff] }
 0x402   :  { %7339 = vmatpush1.bf16.msra.mxu0 %v10019_v19  ;;  %7371 = vmatpush1.bf16.msra.mxu1 %v10021_v44 }
 0x403   :  { %7341 = vmatprep.subr.bf16.mxu0 %v10025_v55  ;;  %7373 = vmatprep.subr.bf16.mxu1 %v10027_v3 }
 0x406   :  { %7343 = vmatpush1.bf16.msra.mxu0 %v10031_v28  ;;  %7375 = vmatpush1.bf16.msra.mxu1 %v10033_v27 }
 0x407   :  { %7377 = vmatprep.subr.bf16.mxu0 %v9620_v9  ;;  %7409 = vmatprep.subr.bf16.mxu1 %v9623_v13 }
 0x409   :  { %2283 = vmatmul.mubr.f32.vlgmr.msra.gmra.mrb[12].mxu0 %v1878_v23  ;;  %2354 = vmatmul.mubr.f32.vlgmr.msra.gmra.mrb[20].mxu1 %v1878_v23  ;;  %v11933_v23 = vld [vmem:[#allocation32_spill] sm:$0xff] }
 0x40a   :  { %7379 = vmatpush1.bf16.msra.mxu0 %v9627_v15  ;;  %7411 = vmatpush1.bf16.msra.mxu1 %v9647_v34 }
 0x40b   :  { %7381 = vmatprep.subr.bf16.mxu0 %v9631_v18  ;;  %7413 = vmatprep.subr.bf16.mxu1 %v9649_v35  ;;  %v11934_v35 = vld [vmem:[#allocation38_spill] sm:$0xff]  ;;  %v11935_v18 = vld [vmem:[#allocation33_spill] sm:$0xff] }
 0x40c   :  { %2453 = vmatprep.mubr.f32.mxu0 %v11771_v0  ;;  %2524 = vmatprep.mubr.f32.mxu1 %v11771_v0 }
 0x40e   :  { %7383 = vmatpush1.bf16.msra.mxu0 %v9640_v26  ;;  %7415 = vmatpush1.bf16.msra.mxu1 %v9660_v46  ;;  %v11936_v26 = vld [vmem:[#allocation39_spill] sm:$0xff]  ;;  %v11937_v46 = vld [vmem:[#allocation36_spill] sm:$0xff] }
 0x40f   :  { %7385 = vmatprep.subr.bf16.mxu0 %v9643_v29  ;;  %7417 = vmatprep.subr.bf16.mxu1 %v11928_v58  ;;  %v11938_v29 = vld [vmem:[#allocation42_spill] sm:$0xff]  ;;  %v11939_v58 = vld [vmem:[#allocation37_spill] sm:$0xff] }
 0x412   :  { %7387 = vmatpush1.bf16.msra.mxu0 %v11929_v31  ;;  %7419 = vmatpush1.bf16.msra.mxu1 %v11930_v12  ;;  %v11940_v31 = vld [vmem:[#allocation43_spill] sm:$0xff]  ;;  %v11941_v12 = vld [vmem:[#allocation40_spill] sm:$0xff] }
 0x413   :  { %7389 = vmatprep.subr.bf16.mxu0 %v11931_v53  ;;  %7421 = vmatprep.subr.bf16.mxu1 %v11932_v37  ;;  %v11942_v53 = vld [vmem:[#allocation46_spill] sm:$0xff]  ;;  %v11943_v37 = vld [vmem:[#allocation41_spill] sm:$0xff] }
 0x416   :  { %7391 = vmatpush1.bf16.msra.mxu0 %v11933_v23  ;;  %7423 = vmatpush1.bf16.msra.mxu1 %v11934_v35  ;;  %v11944_v23 = vld [vmem:[#allocation47_spill] sm:$0xff]  ;;  %v11945_v35 = vld [vmem:[#allocation44_spill] sm:$0xff] }
 0x417   :  { %7393 = vmatprep.subr.bf16.mxu0 %v11935_v18  ;;  %7425 = vmatprep.subr.bf16.mxu1 %v11936_v26  ;;  %v11946_v18 = vld [vmem:[#allocation49_spill] sm:$0xff] }
 0x418   :  { %v11947_v26 = vld [vmem:[#allocation45_spill] sm:$0xff] }
 0x41a   :  { %7395 = vmatpush1.bf16.msra.mxu0 %v11937_v46  ;;  %7427 = vmatpush1.bf16.msra.mxu1 %v11938_v29  ;;  %v11948_v46 = vld [vmem:[#allocation50_spill] sm:$0xff]  ;;  %v11949_v29 = vld [vmem:[#allocation48_spill] sm:$0xff] }
 0x41b   :  { %7397 = vmatprep.subr.bf16.mxu0 %v11939_v58  ;;  %7429 = vmatprep.subr.bf16.mxu1 %v11940_v31  ;;  %v11950_v58 = vld [vmem:[#allocation51_spill] sm:$0xff]  ;;  %v11951_v31 = vld [vmem:[#allocation52_spill] sm:$0xff] }
 0x41e   :  { %7399 = vmatpush1.bf16.msra.mxu0 %v11941_v12  ;;  %7431 = vmatpush1.bf16.msra.mxu1 %v11942_v53  ;;  %v11952_v12 = vld [vmem:[#allocation53_spill] sm:$0xff] }
 0x41f   :  { %7401 = vmatprep.subr.bf16.mxu0 %v11943_v37  ;;  %7433 = vmatprep.subr.bf16.mxu1 %v11944_v23 }
 0x422   :  { %7403 = vmatpush1.bf16.msra.mxu0 %v11945_v35  ;;  %7435 = vmatpush1.bf16.msra.mxu1 %v11946_v18 }
 0x423   :  { %7405 = vmatprep.subr.bf16.mxu0 %v11947_v26  ;;  %7437 = vmatprep.subr.bf16.mxu1 %v11948_v46 }
 0x426   :  { %7407 = vmatpush1.bf16.msra.mxu0 %v11949_v29  ;;  %7439 = vmatpush1.bf16.msra.mxu1 %v11950_v58  ;;  %v11953_v29 = vcombine.high %v11890_v63, %v11891_v51 }
 0x427   :  { %7441 = vmatprep.subr.bf16.mxu0 %v11951_v31  ;;  %7473 = vmatprep.subr.bf16.mxu1 %v11952_v12 }
 0x49c   :  { %v1946_v53 = vpop.f32.mrb[10].mxu0  ;;  %v2017_v37 = vpop.f32.mrb[18].mxu1 }
 0x49d   :  { %v1948_v34 = vpop.f32.mrb[11].mxu0  ;;  %v2019_v23 = vpop.f32.mrb[19].mxu1 }
 0x49e   :  { %v2026_v15 = vcombine.low %v1946_v53, %v1948_v34  ;;  %v2027_v35 = vcombine.low %v2017_v37, %v2019_v23  ;;  %v11957_v37 = vld [vmem:[#allocation71_spill] sm:$0xff]  ;;  %v11958_v23 = vld [vmem:[#allocation72_spill] sm:$0xff] }
 0x4a0   :  { %v2034_v18 = vrot.slane %v2026_v15, %v9796_v57  ;;  %v2041_v26 = vrot.slane %v2027_v35, %v9796_v57 }
 0x4a2   :  { %v2042_v13 = vcombine.low %v2034_v18, %v2041_v26 }
 0x4a4   :  { %v2044_v46 = vadd.f32 %v2042_v13, %v11953_v29 }
 0x4a6   :  { %v6638_v58 = vmul.f32 -1.442695, %v2044_v46  ;;  %v2052_v9 = vrot.slane %v2044_v46, 2  ;;  %v2063_v12 = vrot.slane %v2044_v46, 6  ;;  %v2060_v3 = vrot.slane %v2044_v46, 4 }
 0x4a8   :  { %8984 = vpow2.f32 %v6638_v58  ;;  %v6639_v31 = vmul.f32 -1.442695, %v2052_v9  ;;  %v6640_v27 = vmul.f32 -1.442695, %v2063_v12  ;;  %v11956_v58 = vld [vmem:[#allocation70_spill] sm:$0xff] }
 0x4aa   :  { %8986 = vpow2.f32 %v6639_v31 }
 0x4ab   :  { %8988 = vpow2.f32 %v6640_v27 }
 0x4b2   :  { %v8985_v28 = vpop.eup %8984 }
 0x4b3   :  { %v2048_v34 = vadd.f32 1.0, %v8985_v28 }
 0x4b4   :  { %v8987_v53 = vpop.eup %8986 }
 0x4b5   :  { %8990 = vrcp.f32 %v2048_v34  ;;  %v2057_v15 = vadd.f32 1.0, %v8987_v53  ;;  %v8989_v18 = vpop.eup %8988  ;;  %v11959_v34 = vld [vmem:[#allocation65_spill] sm:$0xff] }
 0x4b6   :  { %8992 = vtanh.f32 %v2060_v3  ;;  %v2068_v29 = vadd.f32 1.0, %v8989_v18  ;;  %v11954_v3 = vld [vmem:[#allocation68_spill] sm:$0xff] }
 0x4b7   :  { %8994 = vrcp.f32 %v2057_v15 }
 0x4b8   :  { %8996 = vrcp.f32 %v2068_v29 }
 0x4bf   :  { %v8991_v26 = vpop.eup %8990 }
 0x4c0   :  { %v8993_v35 = vpop.eup %8992 }
 0x4c1   :  { %v8995_v13 = vpop.eup %8994  ;;  %v2072_v9 = vmul.f32 %v8993_v35, %v8991_v26  ;;  %v11960_v26 = vld [vmem:[#allocation73_spill] sm:$0xff]  ;;  %v11961_v35 = vld [vmem:[#allocation74_spill] sm:$0xff] }
 0x4c2   :  { %v2071_v51 = vmul.f32 %v8995_v13, %v10216_v24  ;;  %v8997_v46 = vpop.eup %8996  ;;  %v11955_v24 = vld [vmem:[#allocation69_spill] sm:$0xff] }
 0x4c4   :  { %v10335_v63 = vadd.f32 %v2072_v9, %v2071_v51  ;;  %v11962_v9 = vld [vmem:[#allocation77_spill] sm:$0xff] }
 0x4c6   :  { %8998 = vtanh.f32 %v10335_v63 }
 0x4d0   :  { %v8999_v28 = vpop.eup %8998 }
 0x4d1   :  { %v2075_v27 = vmul.f32 %v8999_v28, %v8997_v46  ;;  %v11963_v46 = vld [vmem:[#allocation78_spill] sm:$0xff]  ;;  %v11964_v28 = vld [vmem:[#allocation80_spill] sm:$0xff] }
 0x4d3   :  { %2454 = vmatmul.mubr.f32.vlgmr.msra.gmra.mrb[14].mxu0 %v2075_v27  ;;  %2525 = vmatmul.mubr.f32.vlgmr.msra.gmra.mrb[22].mxu1 %v2075_v27 }
 0x4d4   :  { %7443 = vmatpush1.bf16.msra.mxu0 %v9843_v20  ;;  %7475 = vmatpush1.bf16.msra.mxu1 %v9845_v33 }
 0x4d5   :  { %7445 = vmatprep.subr.bf16.mxu0 %v11827_v30  ;;  %7477 = vmatprep.subr.bf16.mxu1 %v11828_v62 }
 0x4d6   :  { %2649 = vmatprep.mubr.f32.mxu0 %v11771_v0  ;;  %2720 = vmatprep.mubr.f32.mxu1 %v11771_v0 }
 0x4d8   :  { %7447 = vmatpush1.bf16.msra.mxu0 %v11893_v47  ;;  %7479 = vmatpush1.bf16.msra.mxu1 %v11954_v3 }
 0x4d9   :  { %7449 = vmatprep.subr.bf16.mxu0 %v11955_v24  ;;  %7481 = vmatprep.subr.bf16.mxu1 %v11956_v58 }
 0x4dc   :  { %v2284_v31 = vpop.f32.mrb[12].mxu0  ;;  %v2355_v12 = vpop.f32.mrb[20].mxu1  ;;  %7451 = vmatpush1.bf16.msra.mxu0 %v11957_v37  ;;  %7483 = vmatpush1.bf16.msra.mxu1 %v11958_v23 }
 0x4dd   :  { %v8816_v53 = vadd.f32 %v2284_v31, %v11959_v34  ;;  %v2286_v15 = vpop.f32.mrb[13].mxu0  ;;  %v2357_v18 = vpop.f32.mrb[21].mxu1  ;;  %7453 = vmatprep.subr.bf16.mxu0 %v11960_v26  ;;  %7485 = vmatprep.subr.bf16.mxu1 %v11961_v35  ;;  %v11965_v31 = vld [vmem:[#allocation81_spill] sm:$0xff]  ;;  %v11966_v35 = vld [vmem:[#allocation82_spill] sm:$0xff] }
 0x4de   :  { %v8817_v13 = vadd.f32 %v2286_v15, %v11902_v41  ;;  %v11968_v15 = vld [vmem:[#allocation84_spill] sm:$0xff] }
 0x4df   :  { %v6641_v29 = vmul.f32 -1.442695, %v8816_v53  ;;  %v11967_v53 = vld [vmem:[#allocation83_spill] sm:$0xff] }
 0x4e0   :  { %v6642_v51 = vmul.f32 -1.442695, %v8817_v13  ;;  %7455 = vmatpush1.bf16.msra.mxu0 %v11903_v14  ;;  %7487 = vmatpush1.bf16.msra.mxu1 %v11904_v6  ;;  %v8818_v13 = vadd.f32 %v2355_v12, %v10118_v11  ;;  %v11972_v12 = vld [vmem:[#allocation92_spill] sm:$0xff] }
 0x4e1   :  { %9000 = vpow2.f32 %v6641_v29  ;;  %7457 = vmatprep.subr.bf16.mxu0 %v11962_v9  ;;  %7489 = vmatprep.subr.bf16.mxu1 %v11963_v46  ;;  %v11969_v29 = vld [vmem:[#allocation85_spill] sm:$0xff]  ;;  %v11970_v9 = vld [vmem:[#allocation86_spill] sm:$0xff] }
 0x4e2   :  { %9002 = vpow2.f32 %v6642_v51 }
 0x4e3   :  { %9004 = vtanh.f32 %v8818_v13 }
 0x4e4   :  { %7459 = vmatpush1.bf16.msra.mxu0 %v11907_v32  ;;  %7491 = vmatpush1.bf16.msra.mxu1 %v11964_v28  ;;  %v11971_v32 = vld [vmem:[#allocation87_spill] sm:$0xff] }
 0x4e5   :  { %7461 = vmatprep.subr.bf16.mxu0 %v11965_v31  ;;  %7493 = vmatprep.subr.bf16.mxu1 %v11966_v35  ;;  %v8819_v35 = vadd.f32 %v2357_v18, %v11914_v2  ;;  %v11975_v18 = vld [vmem:[#allocation97_spill] sm:$0xff] }
 0x4e8   :  { %7463 = vmatpush1.bf16.msra.mxu0 %v11967_v53  ;;  %7495 = vmatpush1.bf16.msra.mxu1 %v11968_v15 }
 0x4e9   :  { %7465 = vmatprep.subr.bf16.mxu0 %v11969_v29  ;;  %7497 = vmatprep.subr.bf16.mxu1 %v11970_v9  ;;  %v6643_v9 = vmul.f32 -1.442695, %v8819_v35 }
 0x4eb   :  { %v9001_v46 = vpop.eup %9000 }
 0x4ec   :  { %v9003_v51 = vpop.eup %9002  ;;  %v2367_v6 = vadd.f32 1.0, %v9001_v46  ;;  %7467 = vmatpush1.bf16.msra.mxu0 %v11971_v32  ;;  %7499 = vmatpush1.bf16.msra.mxu1 %v11858_v49  ;;  %v11973_v46 = vld [vmem:[#allocation93_spill] sm:$0xff]  ;;  %v11974_v32 = vld [vmem:[#allocation94_spill] sm:$0xff] }
 0x4ed   :  { %v2373_v31 = vadd.f32 1.0, %v9003_v51  ;;  %7469 = vmatprep.subr.bf16.mxu0 %v11915_v38  ;;  %7501 = vmatprep.subr.bf16.mxu1 %v11916_v21 }
 0x4ee   :  { %9006 = vrcp.f32 %v2367_v6  ;;  %v9005_v6 = vpop.eup %9004 }
 0x4ef   :  { %9008 = vrcp.f32 %v2373_v31  ;;  %v11976_v31 = vld [vmem:[#allocation99_spill] sm:$0xff] }
 0x4f0   :  { %7471 = vmatpush1.bf16.msra.mxu0 %v11917_v8  ;;  %7503 = vmatpush1.bf16.msra.mxu1 %v11972_v12  ;;  %9010 = vpow2.f32 %v6643_v9 }
 0x4f1   :  { %7505 = vmatprep.subr.bf16.mxu0 %v11973_v46  ;;  %7537 = vmatprep.subr.bf16.mxu1 %v11974_v32 }
 0x4f3   :  { %2650 = vmatmul.mubr.f32.vlgmr.msra.gmra.mrb[16].mxu0 %v2075_v27  ;;  %2721 = vmatmul.mubr.f32.vlgmr.msra.gmra.mrb[24].mxu1 %v2075_v27 }
 0x4f4   :  { %7507 = vmatpush1.bf16.msra.mxu0 %v11921_v39  ;;  %7539 = vmatpush1.bf16.msra.mxu1 %v11922_v7 }
 0x4f5   :  { %7509 = vmatprep.subr.bf16.mxu0 %v11975_v18  ;;  %7541 = vmatprep.subr.bf16.mxu1 %v11924_v17 }
 0x4f6   :  { %2791 = vmatprep.mubr.f32.mxu0 %v11771_v0  ;;  %2862 = vmatprep.mubr.f32.mxu1 %v11771_v0 }
 0x4f8   :  { %v9007_v35 = vpop.eup %9006  ;;  %7511 = vmatpush1.bf16.msra.mxu0 %v11976_v31  ;;  %7543 = vmatpush1.bf16.msra.mxu1 %v11926_v56 }
 0x4f9   :  { %v9009_v27 = vpop.eup %9008  ;;  %v2384_v13 = vmul.f32 %v9007_v35, %v9005_v6  ;;  %7513 = vmatprep.subr.bf16.mxu0 %v11870_v48  ;;  %7545 = vmatprep.subr.bf16.mxu1 %v11871_v43  ;;  %v11977_v6 = vld [vmem:[#allocation122_spill] sm:$0xff] }
 0x4fa   :  { %v2383_v9 = vmul.f32 %v9009_v27, %v10268_v60  ;;  %v9011_v31 = vpop.eup %9010  ;;  %v11978_v27 = vld [vmem:[#allocation123_spill] sm:$0xff] }
 0x4fb   :  { %v2380_v60 = vadd.f32 1.0, %v9011_v31 }
 0x4fc   :  { %v10387_v51 = vadd.f32 %v2384_v13, %v2383_v9  ;;  %7515 = vmatpush1.bf16.msra.mxu0 %v11872_v61  ;;  %7547 = vmatpush1.bf16.msra.mxu1 %v11873_v10  ;;  %v11979_v13 = vld [vmem:[#allocation124_spill] sm:$0xff] }
 0x4fd   :  { %7517 = vmatprep.subr.bf16.mxu0 %v11874_v16  ;;  %7549 = vmatprep.subr.bf16.mxu1 %v11875_v22 }
 0x4fe   :  { %9012 = vtanh.f32 %v10387_v51 }
 0x4ff   :  { %9014 = vrcp.f32 %v2380_v60  ;;  %v11980_v60 = vld [vmem:[#allocation20_spill] sm:$0xff] }
 0x500   :  { %7519 = vmatpush1.bf16.msra.mxu0 %v11876_v5  ;;  %7551 = vmatpush1.bf16.msra.mxu1 %v11877_v52 }
 0x501   :  { %7521 = vmatprep.subr.bf16.mxu0 %v11878_v50  ;;  %7553 = vmatprep.subr.bf16.mxu1 %v11879_v54 }
 0x504   :  { %7523 = vmatpush1.bf16.msra.mxu0 %v11880_v1  ;;  %7555 = vmatpush1.bf16.msra.mxu1 %v11881_v25 }
 0x505   :  { %7525 = vmatprep.subr.bf16.mxu0 %v11927_v59  ;;  %7557 = vmatprep.subr.bf16.mxu1 %v10003_v40  ;;  %v12015_v40 = vld [vmem:[#allocation63_spill] sm:$0xff] }
 0x508   :  { %7527 = vmatpush1.bf16.msra.mxu0 %v10007_v4  ;;  %7559 = vmatpush1.bf16.msra.mxu1 %v10009_v42  ;;  %v9013_v35 = vpop.eup %9012 }
 0x509   :  { %7529 = vmatprep.subr.bf16.mxu0 %v10013_v45  ;;  %7561 = vmatprep.subr.bf16.mxu1 %v10015_v36  ;;  %v9015_v31 = vpop.eup %9014  ;;  %v11981_v45 = vld [vmem:[#allocation21_spill] sm:$0xff] }
 0x50a   :  { %v2387_v9 = vmul.f32 %v9015_v31, %v9013_v35  ;;  %v11987_v35 = vld [vmem:[#allocation30_spill] sm:$0xff]  ;;  %v11988_v31 = vld [vmem:[#allocation25_spill] sm:$0xff] }
 0x50c   :  { %7531 = vmatpush1.bf16.msra.mxu0 %v10019_v19  ;;  %7563 = vmatpush1.bf16.msra.mxu1 %v10021_v44  ;;  %v11982_v19 = vld [vmem:[#allocation22_spill] sm:$0xff] }
 0x50d   :  { %7533 = vmatprep.subr.bf16.mxu0 %v10025_v55  ;;  %7565 = vmatprep.subr.bf16.mxu1 %v11977_v6  ;;  %v11983_v44 = vld [vmem:[#allocation26_spill] sm:$0xff]  ;;  %v11984_v55 = vld [vmem:[#allocation23_spill] sm:$0xff] }
 0x50e   :  { %v11985_v6 = vld [vmem:[#allocation27_spill] sm:$0xff] }
 0x510   :  { %7535 = vmatpush1.bf16.msra.mxu0 %v11978_v27  ;;  %7567 = vmatpush1.bf16.msra.mxu1 %v11979_v13  ;;  %v11986_v13 = vld [vmem:[#allocation24_spill] sm:$0xff]  ;;  %v11996_v27 = vld [vmem:[#allocation33_spill] sm:$0xff] }
 0x511   :  { %7569 = vmatprep.subr.bf16.mxu0 %v11980_v60  ;;  %7601 = vmatprep.subr.bf16.mxu1 %v11981_v45  ;;  %v11989_v45 = vld [vmem:[#allocation31_spill] sm:$0xff]  ;;  %v11995_v60 = vld [vmem:[#allocation38_spill] sm:$0xff] }
 0x513   :  { %2792 = vmatmul.mubr.f32.vlgmr.msra.gmra.mrb[16].mxu0 %v2387_v9  ;;  %2863 = vmatmul.mubr.f32.vlgmr.msra.gmra.mrb[24].mxu1 %v2387_v9  ;;  %v11990_v9 = vld [vmem:[#allocation28_spill] sm:$0xff] }
 0x514   :  { %7571 = vmatpush1.bf16.msra.mxu0 %v11982_v19  ;;  %7603 = vmatpush1.bf16.msra.mxu1 %v11983_v44  ;;  %v11991_v19 = vld [vmem:[#allocation34_spill] sm:$0xff]  ;;  %v11992_v44 = vld [vmem:[#allocation29_spill] sm:$0xff] }
 0x515   :  { %7573 = vmatprep.subr.bf16.mxu0 %v11984_v55  ;;  %7605 = vmatprep.subr.bf16.mxu1 %v11985_v6  ;;  %v11993_v55 = vld [vmem:[#allocation35_spill] sm:$0xff]  ;;  %v11994_v6 = vld [vmem:[#allocation32_spill] sm:$0xff] }
 0x516   :  { %2962 = vmatprep.mubr.f32.mxu0 %v11771_v0  ;;  %3033 = vmatprep.mubr.f32.mxu1 %v11771_v0 }
 0x518   :  { %7575 = vmatpush1.bf16.msra.mxu0 %v11986_v13  ;;  %7607 = vmatpush1.bf16.msra.mxu1 %v11987_v35  ;;  %v11997_v13 = vld [vmem:[#allocation39_spill] sm:$0xff]  ;;  %v11998_v35 = vld [vmem:[#allocation36_spill] sm:$0xff] }
 0x519   :  { %7577 = vmatprep.subr.bf16.mxu0 %v11988_v31  ;;  %7609 = vmatprep.subr.bf16.mxu1 %v11989_v45  ;;  %v11999_v31 = vld [vmem:[#allocation42_spill] sm:$0xff]  ;;  %v12000_v45 = vld [vmem:[#allocation37_spill] sm:$0xff] }
 0x51c   :  { %7579 = vmatpush1.bf16.msra.mxu0 %v11990_v9  ;;  %7611 = vmatpush1.bf16.msra.mxu1 %v11991_v19  ;;  %v12001_v9 = vld [vmem:[#allocation43_spill] sm:$0xff]  ;;  %v12002_v19 = vld [vmem:[#allocation40_spill] sm:$0xff] }
 0x51d   :  { %7581 = vmatprep.subr.bf16.mxu0 %v11992_v44  ;;  %7613 = vmatprep.subr.bf16.mxu1 %v11993_v55  ;;  %v12003_v44 = vld [vmem:[#allocation46_spill] sm:$0xff]  ;;  %v12004_v55 = vld [vmem:[#allocation41_spill] sm:$0xff] }
 0x520   :  { %7583 = vmatpush1.bf16.msra.mxu0 %v11994_v6  ;;  %7615 = vmatpush1.bf16.msra.mxu1 %v11995_v60  ;;  %v12005_v6 = vld [vmem:[#allocation47_spill] sm:$0xff]  ;;  %v12006_v60 = vld [vmem:[#allocation44_spill] sm:$0xff] }
 0x521   :  { %7585 = vmatprep.subr.bf16.mxu0 %v11996_v27  ;;  %7617 = vmatprep.subr.bf16.mxu1 %v11997_v13  ;;  %v12007_v27 = vld [vmem:[#allocation49_spill] sm:$0xff] }
 0x522   :  { %v12008_v13 = vld [vmem:[#allocation45_spill] sm:$0xff] }
 0x524   :  { %7587 = vmatpush1.bf16.msra.mxu0 %v11998_v35  ;;  %7619 = vmatpush1.bf16.msra.mxu1 %v11999_v31  ;;  %v12009_v35 = vld [vmem:[#allocation50_spill] sm:$0xff]  ;;  %v12010_v31 = vld [vmem:[#allocation48_spill] sm:$0xff] }
 0x525   :  { %7589 = vmatprep.subr.bf16.mxu0 %v12000_v45  ;;  %7621 = vmatprep.subr.bf16.mxu1 %v12001_v9  ;;  %v12011_v45 = vld [vmem:[#allocation51_spill] sm:$0xff]  ;;  %v12012_v9 = vld [vmem:[#allocation52_spill] sm:$0xff] }
 0x528   :  { %7591 = vmatpush1.bf16.msra.mxu0 %v12002_v19  ;;  %7623 = vmatpush1.bf16.msra.mxu1 %v12003_v44  ;;  %v12013_v19 = vld [vmem:[#allocation53_spill] sm:$0xff] }
 0x529   :  { %7593 = vmatprep.subr.bf16.mxu0 %v12004_v55  ;;  %7625 = vmatprep.subr.bf16.mxu1 %v12005_v6 }
 0x52c   :  { %7595 = vmatpush1.bf16.msra.mxu0 %v12006_v60  ;;  %7627 = vmatpush1.bf16.msra.mxu1 %v12007_v27 }
 0x52d   :  { %7597 = vmatprep.subr.bf16.mxu0 %v12008_v13  ;;  %7629 = vmatprep.subr.bf16.mxu1 %v12009_v35  ;;  %v12014_v35 = vld [vmem:[#allocation61_spill] sm:$0xff] }
 0x530   :  { %7599 = vmatpush1.bf16.msra.mxu0 %v12010_v31  ;;  %7631 = vmatpush1.bf16.msra.mxu1 %v12011_v45  ;;  %v12016_v31 = vcombine.low %v12014_v35, %v12015_v40 }
 0x531   :  { %7633 = vmatprep.subr.bf16.mxu0 %v12012_v9  ;;  %7665 = vmatprep.subr.bf16.mxu1 %v12013_v19 }
 0x5a6   :  { %v2455_v44 = vpop.f32.mrb[14].mxu0  ;;  %v2526_v55 = vpop.f32.mrb[22].mxu1 }
 0x5a7   :  { %v2457_v36 = vpop.f32.mrb[15].mxu0  ;;  %v2528_v6 = vpop.f32.mrb[23].mxu1 }
 0x5a8   :  { %v2535_v42 = vcombine.low %v2455_v44, %v2457_v36  ;;  %v2536_v60 = vcombine.low %v2526_v55, %v2528_v6 }
 0x5aa   :  { %v2543_v27 = vrot.slane %v2535_v42, %v9796_v57  ;;  %v2550_v13 = vrot.slane %v2536_v60, %v9796_v57 }
 0x5ac   :  { %v2551_v4 = vcombine.low %v2543_v27, %v2550_v13 }
 0x5ae   :  { %v2553_v59 = vadd.f32 %v2551_v4, %v12016_v31 }
 0x5b0   :  { %v6644_v45 = vmul.f32 -1.442695, %v2553_v59  ;;  %v2561_v25 = vrot.slane %v2553_v59, 2  ;;  %v2572_v19 = vrot.slane %v2553_v59, 6  ;;  %v2569_v50 = vrot.slane %v2553_v59, 4 }
 0x5b2   :  { %9016 = vpow2.f32 %v6644_v45  ;;  %v6645_v9 = vmul.f32 -1.442695, %v2561_v25  ;;  %v6646_v1 = vmul.f32 -1.442695, %v2572_v19 }
 0x5b4   :  { %9018 = vpow2.f32 %v6645_v9 }
 0x5b5   :  { %9020 = vpow2.f32 %v6646_v1 }
 0x5bc   :  { %v9017_v54 = vpop.eup %9016 }
 0x5bd   :  { %v2557_v36 = vadd.f32 1.0, %v9017_v54 }
 0x5be   :  { %v9019_v44 = vpop.eup %9018 }
 0x5bf   :  { %9022 = vrcp.f32 %v2557_v36  ;;  %v2566_v42 = vadd.f32 1.0, %v9019_v44  ;;  %v9021_v55 = vpop.eup %9020  ;;  %v12017_v36 = vld [vmem:[#allocation74_spill] sm:$0xff] }
 0x5c0   :  { %9024 = vtanh.f32 %v2569_v50  ;;  %v2577_v13 = vadd.f32 1.0, %v9021_v55 }
 0x5c1   :  { %9026 = vrcp.f32 %v2566_v42 }
 0x5c2   :  { %9028 = vrcp.f32 %v2577_v13  ;;  %v12021_v13 = vld [vmem:[#allocation79_spill] sm:$0xff] }
 0x5c9   :  { %v9023_v6 = vpop.eup %9022 }
 0x5ca   :  { %v9025_v27 = vpop.eup %9024 }
 0x5cb   :  { %v9027_v4 = vpop.eup %9026  ;;  %v2581_v25 = vmul.f32 %v9025_v27, %v9023_v6  ;;  %v12018_v6 = vld [vmem:[#allocation76_spill] sm:$0xff]  ;;  %v12019_v27 = vld [vmem:[#allocation77_spill] sm:$0xff] }
 0x5cc   :  { %v2580_v45 = vmul.f32 %v9027_v4, %v10335_v63  ;;  %v9029_v19 = vpop.eup %9028  ;;  %v12020_v4 = vld [vmem:[#allocation78_spill] sm:$0xff] }
 0x5ce   :  { %v10454_v60 = vadd.f32 %v2581_v25, %v2580_v45  ;;  %v12022_v45 = vld [vmem:[#allocation81_spill] sm:$0xff]  ;;  %v12023_v25 = vld [vmem:[#allocation82_spill] sm:$0xff] }
 0x5d0   :  { %9030 = vtanh.f32 %v10454_v60 }
 0x5da   :  { %v9031_v54 = vpop.eup %9030 }
 0x5db   :  { %v2584_v1 = vmul.f32 %v9031_v54, %v9029_v19  ;;  %v12024_v54 = vld [vmem:[#allocation86_spill] sm:$0xff] }
 0x5dd   :  { %2963 = vmatmul.mubr.f32.vlgmr.msra.gmra.mrb[18].mxu0 %v2584_v1  ;;  %3034 = vmatmul.mubr.f32.vlgmr.msra.gmra.mrb[26].mxu1 %v2584_v1 }
 0x5de   :  { %7635 = vmatpush1.bf16.msra.mxu0 %v9843_v20  ;;  %7667 = vmatpush1.bf16.msra.mxu1 %v9845_v33 }
 0x5df   :  { %7637 = vmatprep.subr.bf16.mxu0 %v11827_v30  ;;  %7669 = vmatprep.subr.bf16.mxu1 %v11828_v62 }
 0x5e0   :  { %3158 = vmatprep.mubr.f32.mxu0 %v11771_v0  ;;  %3229 = vmatprep.mubr.f32.mxu1 %v11771_v0 }
 0x5e2   :  { %7639 = vmatpush1.bf16.msra.mxu0 %v11893_v47  ;;  %7671 = vmatpush1.bf16.msra.mxu1 %v11954_v3 }
 0x5e3   :  { %7641 = vmatprep.subr.bf16.mxu0 %v11955_v24  ;;  %7673 = vmatprep.subr.bf16.mxu1 %v11956_v58 }
 0x5e6   :  { %v2793_v50 = vpop.f32.mrb[16].mxu0  ;;  %v2864_v59 = vpop.f32.mrb[24].mxu1  ;;  %7643 = vmatpush1.bf16.msra.mxu0 %v11957_v37  ;;  %7675 = vmatpush1.bf16.msra.mxu1 %v11958_v23 }
 0x5e7   :  { %v8820_v63 = vadd.f32 %v2793_v50, %v11959_v34  ;;  %v2795_v31 = vpop.f32.mrb[17].mxu0  ;;  %v2866_v9 = vpop.f32.mrb[25].mxu1  ;;  %7645 = vmatprep.subr.bf16.mxu0 %v11960_v26  ;;  %7677 = vmatprep.subr.bf16.mxu1 %v12017_v36  ;;  %v8822_v19 = vadd.f32 %v2864_v59, %v10118_v11 }
 0x5e8   :  { %v8821_v44 = vadd.f32 %v2795_v31, %v11902_v41 }
 0x5e9   :  { %v6647_v42 = vmul.f32 -1.442695, %v8820_v63 }
 0x5ea   :  { %v6648_v55 = vmul.f32 -1.442695, %v8821_v44  ;;  %7647 = vmatpush1.bf16.msra.mxu0 %v11903_v14  ;;  %7679 = vmatpush1.bf16.msra.mxu1 %v12018_v6  ;;  %v12025_v44 = vld [vmem:[#allocation87_spill] sm:$0xff] }
 0x5eb   :  { %9032 = vpow2.f32 %v6647_v42  ;;  %7649 = vmatprep.subr.bf16.mxu0 %v12019_v27  ;;  %7681 = vmatprep.subr.bf16.mxu1 %v12020_v4 }
 0x5ec   :  { %9034 = vpow2.f32 %v6648_v55  ;;  %v8823_v55 = vadd.f32 %v2866_v9, %v11914_v2 }
 0x5ed   :  { %9036 = vtanh.f32 %v8822_v19 }
 0x5ee   :  { %7651 = vmatpush1.bf16.msra.mxu0 %v12021_v13  ;;  %7683 = vmatpush1.bf16.msra.mxu1 %v11964_v28  ;;  %v6649_v59 = vmul.f32 -1.442695, %v8823_v55 }
 0x5ef   :  { %7653 = vmatprep.subr.bf16.mxu0 %v12022_v45  ;;  %7685 = vmatprep.subr.bf16.mxu1 %v12023_v25 }
 0x5f2   :  { %7655 = vmatpush1.bf16.msra.mxu0 %v11967_v53  ;;  %7687 = vmatpush1.bf16.msra.mxu1 %v11968_v15 }
 0x5f3   :  { %7657 = vmatprep.subr.bf16.mxu0 %v11969_v29  ;;  %7689 = vmatprep.subr.bf16.mxu1 %v12024_v54 }
 0x5f5   :  { %v9033_v50 = vpop.eup %9032 }
 0x5f6   :  { %v9035_v63 = vpop.eup %9034  ;;  %v2876_v31 = vadd.f32 1.0, %v9033_v50  ;;  %7659 = vmatpush1.bf16.msra.mxu0 %v12025_v44  ;;  %7691 = vmatpush1.bf16.msra.mxu1 %v11858_v49  ;;  %v12026_v50 = vld [vmem:[#allocation99_spill] sm:$0xff] }
 0x5f7   :  { %v2882_v42 = vadd.f32 1.0, %v9035_v63  ;;  %7661 = vmatprep.subr.bf16.mxu0 %v11915_v38  ;;  %7693 = vmatprep.subr.bf16.mxu1 %v11916_v21  ;;  %v9037_v9 = vpop.eup %9036 }
 0x5f8   :  { %9038 = vrcp.f32 %v2876_v31 }
 0x5f9   :  { %9040 = vrcp.f32 %v2882_v42 }
 0x5fa   :  { %7663 = vmatpush1.bf16.msra.mxu0 %v11917_v8  ;;  %7695 = vmatpush1.bf16.msra.mxu1 %v11972_v12  ;;  %9042 = vpow2.f32 %v6649_v59  ;;  %v12028_v59 = vld [vmem:[#allocation109_spill] sm:$0xff] }
 0x5fb   :  { %7697 = vmatprep.subr.bf16.mxu0 %v11973_v46  ;;  %7729 = vmatprep.subr.bf16.mxu1 %v11974_v32 }
 0x5fd   :  { %3159 = vmatmul.mubr.f32.vlgmr.msra.gmra.mrb[20].mxu0 %v2584_v1  ;;  %3230 = vmatmul.mubr.f32.vlgmr.msra.gmra.mrb[28].mxu1 %v2584_v1 }
 0x5fe   :  { %7699 = vmatpush1.bf16.msra.mxu0 %v11921_v39  ;;  %7731 = vmatpush1.bf16.msra.mxu1 %v11922_v7 }
 0x5ff   :  { %7701 = vmatprep.subr.bf16.mxu0 %v11975_v18  ;;  %7733 = vmatprep.subr.bf16.mxu1 %v11924_v17 }
 0x600   :  { %3300 = vmatprep.mubr.f32.mxu0 %v11771_v0  ;;  %3371 = vmatprep.mubr.f32.mxu1 %v11771_v0 }
 0x602   :  { %v9039_v19 = vpop.eup %9038  ;;  %7703 = vmatpush1.bf16.msra.mxu0 %v12026_v50  ;;  %7735 = vmatpush1.bf16.msra.mxu1 %v11926_v56 }
 0x603   :  { %v9041_v1 = vpop.eup %9040  ;;  %v2893_v63 = vmul.f32 %v9039_v19, %v9037_v9  ;;  %7705 = vmatprep.subr.bf16.mxu0 %v11870_v48  ;;  %7737 = vmatprep.subr.bf16.mxu1 %v11871_v43  ;;  %v12029_v9 = vld [vmem:[#allocation110_spill] sm:$0xff]  ;;  %v12030_v19 = vld [vmem:[#allocation111_spill] sm:$0xff] }
 0x604   :  { %v2892_v31 = vmul.f32 %v9041_v1, %v10387_v51  ;;  %v9043_v55 = vpop.eup %9042  ;;  %v12031_v1 = vld [vmem:[#allocation112_spill] sm:$0xff] }
 0x605   :  { %v2889_v51 = vadd.f32 1.0, %v9043_v55  ;;  %v12038_v55 = vld [vmem:[#allocation119_spill] sm:$0xff] }
 0x606   :  { %v10506_v42 = vadd.f32 %v2893_v63, %v2892_v31  ;;  %7707 = vmatpush1.bf16.msra.mxu0 %v11872_v61  ;;  %7739 = vmatpush1.bf16.msra.mxu1 %v11873_v10  ;;  %v12032_v63 = vld [vmem:[#allocation113_spill] sm:$0xff]  ;;  %v12033_v31 = vld [vmem:[#allocation114_spill] sm:$0xff] }
 0x607   :  { %7709 = vmatprep.subr.bf16.mxu0 %v11874_v16  ;;  %7741 = vmatprep.subr.bf16.mxu1 %v11875_v22  ;;  %v12034_v22 = vld [vmem:[#allocation115_spill] sm:$0xff] }
 0x608   :  { %12027 = vst [vmem:[#allocation88_spill] sm:$0xff] %v10506_v42  ;;  %9044 = vtanh.f32 %v10506_v42 }
 0x609   :  { %9046 = vrcp.f32 %v2889_v51  ;;  %v12043_v51 = vld [vmem:[#allocation124_spill] sm:$0xff] }
 0x60a   :  { %7711 = vmatpush1.bf16.msra.mxu0 %v11876_v5  ;;  %7743 = vmatpush1.bf16.msra.mxu1 %v11877_v52  ;;  %v12035_v5 = vld [vmem:[#allocation116_spill] sm:$0xff]  ;;  %v12036_v52 = vld [vmem:[#allocation117_spill] sm:$0xff] }
 0x60b   :  { %7713 = vmatprep.subr.bf16.mxu0 %v12028_v59  ;;  %7745 = vmatprep.subr.bf16.mxu1 %v12029_v9  ;;  %v12037_v59 = vld [vmem:[#allocation118_spill] sm:$0xff] }
 0x60c   :  { %v12041_v9 = vld [vmem:[#allocation122_spill] sm:$0xff] }
 0x60e   :  { %7715 = vmatpush1.bf16.msra.mxu0 %v12030_v19  ;;  %7747 = vmatpush1.bf16.msra.mxu1 %v12031_v1  ;;  %v12039_v19 = vld [vmem:[#allocation120_spill] sm:$0xff]  ;;  %v12040_v1 = vld [vmem:[#allocation121_spill] sm:$0xff] }
 0x60f   :  { %7717 = vmatprep.subr.bf16.mxu0 %v12032_v63  ;;  %7749 = vmatprep.subr.bf16.mxu1 %v12033_v31  ;;  %v12042_v31 = vld [vmem:[#allocation123_spill] sm:$0xff] }
 0x612   :  { %7719 = vmatpush1.bf16.msra.mxu0 %v12034_v22  ;;  %7751 = vmatpush1.bf16.msra.mxu1 %v12035_v5  ;;  %v9045_v63 = vpop.eup %9044  ;;  %v12044_v5 = vld [vmem:[#allocation20_spill] sm:$0xff] }
 0x613   :  { %7721 = vmatprep.subr.bf16.mxu0 %v12036_v52  ;;  %7753 = vmatprep.subr.bf16.mxu1 %v12037_v59  ;;  %v9047_v16 = vpop.eup %9046  ;;  %v12045_v52 = vld [vmem:[#allocation21_spill] sm:$0xff] }
 0x614   :  { %v2896_v22 = vmul.f32 %v9047_v16, %v9045_v63  ;;  %v12051_v16 = vld [vmem:[#allocation30_spill] sm:$0xff]  ;;  %v12052_v63 = vld [vmem:[#allocation25_spill] sm:$0xff] }
 0x616   :  { %7723 = vmatpush1.bf16.msra.mxu0 %v12038_v55  ;;  %7755 = vmatpush1.bf16.msra.mxu1 %v12039_v19  ;;  %v12046_v55 = vld [vmem:[#allocation22_spill] sm:$0xff] }
 0x617   :  { %7725 = vmatprep.subr.bf16.mxu0 %v12040_v1  ;;  %7757 = vmatprep.subr.bf16.mxu1 %v12041_v9  ;;  %v12047_v19 = vld [vmem:[#allocation26_spill] sm:$0xff]  ;;  %v12048_v1 = vld [vmem:[#allocation23_spill] sm:$0xff] }
 0x618   :  { %v12049_v9 = vld [vmem:[#allocation27_spill] sm:$0xff] }
 0x61a   :  { %7727 = vmatpush1.bf16.msra.mxu0 %v12042_v31  ;;  %7759 = vmatpush1.bf16.msra.mxu1 %v12043_v51  ;;  %v12050_v51 = vld [vmem:[#allocation24_spill] sm:$0xff]  ;;  %v12060_v31 = vld [vmem:[#allocation33_spill] sm:$0xff] }
 0x61b   :  { %7761 = vmatprep.subr.bf16.mxu0 %v12044_v5  ;;  %7793 = vmatprep.subr.bf16.mxu1 %v12045_v52  ;;  %v12053_v52 = vld [vmem:[#allocation31_spill] sm:$0xff]  ;;  %v12059_v5 = vld [vmem:[#allocation38_spill] sm:$0xff] }
 0x61d   :  { %3301 = vmatmul.mubr.f32.vlgmr.msra.gmra.mrb[20].mxu0 %v2896_v22  ;;  %3372 = vmatmul.mubr.f32.vlgmr.msra.gmra.mrb[28].mxu1 %v2896_v22  ;;  %v12054_v22 = vld [vmem:[#allocation28_spill] sm:$0xff] }
 0x61e   :  { %7763 = vmatpush1.bf16.msra.mxu0 %v12046_v55  ;;  %7795 = vmatpush1.bf16.msra.mxu1 %v12047_v19  ;;  %v12055_v55 = vld [vmem:[#allocation34_spill] sm:$0xff]  ;;  %v12056_v19 = vld [vmem:[#allocation29_spill] sm:$0xff] }
 0x61f   :  { %7765 = vmatprep.subr.bf16.mxu0 %v12048_v1  ;;  %7797 = vmatprep.subr.bf16.mxu1 %v12049_v9  ;;  %v12057_v1 = vld [vmem:[#allocation35_spill] sm:$0xff]  ;;  %v12058_v9 = vld [vmem:[#allocation32_spill] sm:$0xff] }
 0x620   :  { %3471 = vmatprep.mubr.f32.mxu0 %v11771_v0  ;;  %3542 = vmatprep.mubr.f32.mxu1 %v11771_v0 }
 0x622   :  { %7767 = vmatpush1.bf16.msra.mxu0 %v12050_v51  ;;  %7799 = vmatpush1.bf16.msra.mxu1 %v12051_v16  ;;  %v12061_v51 = vld [vmem:[#allocation39_spill] sm:$0xff]  ;;  %v12062_v16 = vld [vmem:[#allocation36_spill] sm:$0xff] }
 0x623   :  { %7769 = vmatprep.subr.bf16.mxu0 %v12052_v63  ;;  %7801 = vmatprep.subr.bf16.mxu1 %v12053_v52  ;;  %v12063_v63 = vld [vmem:[#allocation42_spill] sm:$0xff]  ;;  %v12064_v52 = vld [vmem:[#allocation37_spill] sm:$0xff] }
 0x626   :  { %7771 = vmatpush1.bf16.msra.mxu0 %v12054_v22  ;;  %7803 = vmatpush1.bf16.msra.mxu1 %v12055_v55  ;;  %v12065_v22 = vld [vmem:[#allocation43_spill] sm:$0xff]  ;;  %v12066_v55 = vld [vmem:[#allocation40_spill] sm:$0xff] }
 0x627   :  { %7773 = vmatprep.subr.bf16.mxu0 %v12056_v19  ;;  %7805 = vmatprep.subr.bf16.mxu1 %v12057_v1  ;;  %v12067_v19 = vld [vmem:[#allocation46_spill] sm:$0xff]  ;;  %v12068_v1 = vld [vmem:[#allocation41_spill] sm:$0xff] }
 0x62a   :  { %7775 = vmatpush1.bf16.msra.mxu0 %v12058_v9  ;;  %7807 = vmatpush1.bf16.msra.mxu1 %v12059_v5  ;;  %v12069_v9 = vld [vmem:[#allocation47_spill] sm:$0xff]  ;;  %v12070_v5 = vld [vmem:[#allocation44_spill] sm:$0xff] }
 0x62b   :  { %7777 = vmatprep.subr.bf16.mxu0 %v12060_v31  ;;  %7809 = vmatprep.subr.bf16.mxu1 %v12061_v51  ;;  %v12071_v31 = vld [vmem:[#allocation49_spill] sm:$0xff] }
 0x62c   :  { %v12072_v51 = vld [vmem:[#allocation45_spill] sm:$0xff] }
 0x62e   :  { %7779 = vmatpush1.bf16.msra.mxu0 %v12062_v16  ;;  %7811 = vmatpush1.bf16.msra.mxu1 %v12063_v63  ;;  %v12073_v16 = vld [vmem:[#allocation50_spill] sm:$0xff]  ;;  %v12074_v63 = vld [vmem:[#allocation48_spill] sm:$0xff] }
 0x62f   :  { %7781 = vmatprep.subr.bf16.mxu0 %v12064_v52  ;;  %7813 = vmatprep.subr.bf16.mxu1 %v12065_v22  ;;  %v12075_v52 = vld [vmem:[#allocation51_spill] sm:$0xff]  ;;  %v12076_v22 = vld [vmem:[#allocation52_spill] sm:$0xff] }
 0x632   :  { %7783 = vmatpush1.bf16.msra.mxu0 %v12066_v55  ;;  %7815 = vmatpush1.bf16.msra.mxu1 %v12067_v19  ;;  %v12077_v55 = vld [vmem:[#allocation53_spill] sm:$0xff] }
 0x633   :  { %7785 = vmatprep.subr.bf16.mxu0 %v12068_v1  ;;  %7817 = vmatprep.subr.bf16.mxu1 %v12069_v9 }
 0x636   :  { %7787 = vmatpush1.bf16.msra.mxu0 %v12070_v5  ;;  %7819 = vmatpush1.bf16.msra.mxu1 %v12071_v31 }
 0x637   :  { %7789 = vmatprep.subr.bf16.mxu0 %v12072_v51  ;;  %7821 = vmatprep.subr.bf16.mxu1 %v12073_v16 }
 0x63a   :  { %7791 = vmatpush1.bf16.msra.mxu0 %v12074_v63  ;;  %7823 = vmatpush1.bf16.msra.mxu1 %v12075_v52  ;;  %v12078_v63 = vcombine.high %v12014_v35, %v12015_v40 }
 0x63b   :  { %7825 = vmatprep.subr.bf16.mxu0 %v12076_v22  ;;  %7857 = vmatprep.subr.bf16.mxu1 %v12077_v55 }
 0x6b0   :  { %v2964_v19 = vpop.f32.mrb[18].mxu0  ;;  %v3035_v1 = vpop.f32.mrb[26].mxu1 }
 0x6b1   :  { %v2966_v59 = vpop.f32.mrb[19].mxu0  ;;  %v3037_v9 = vpop.f32.mrb[27].mxu1 }
 0x6b2   :  { %v3044_v10 = vcombine.low %v2964_v19, %v2966_v59  ;;  %v3045_v5 = vcombine.low %v3035_v1, %v3037_v9 }
 0x6b4   :  { %v3052_v31 = vrot.slane %v3044_v10, %v9796_v57  ;;  %v3059_v51 = vrot.slane %v3045_v5, %v9796_v57 }
 0x6b6   :  { %v3060_v61 = vcombine.low %v3052_v31, %v3059_v51 }
 0x6b8   :  { %v3062_v16 = vadd.f32 %v3060_v61, %v12078_v63 }
 0x6ba   :  { %v6650_v52 = vmul.f32 -1.442695, %v3062_v16  ;;  %v3070_v42 = vrot.slane %v3062_v16, 2  ;;  %v3081_v55 = vrot.slane %v3062_v16, 6  ;;  %v3078_v56 = vrot.slane %v3062_v16, 4 }
 0x6bc   :  { %9048 = vpow2.f32 %v6650_v52  ;;  %v6651_v22 = vmul.f32 -1.442695, %v3070_v42  ;;  %v6652_v43 = vmul.f32 -1.442695, %v3081_v55 }
 0x6be   :  { %9050 = vpow2.f32 %v6651_v22 }
 0x6bf   :  { %9052 = vpow2.f32 %v6652_v43 }
 0x6c6   :  { %v9049_v48 = vpop.eup %9048 }
 0x6c7   :  { %v3066_v59 = vadd.f32 1.0, %v9049_v48 }
 0x6c8   :  { %v9051_v9 = vpop.eup %9050 }
 0x6c9   :  { %9054 = vrcp.f32 %v3066_v59  ;;  %v3075_v10 = vadd.f32 1.0, %v9051_v9  ;;  %v9053_v5 = vpop.eup %9052 }
 0x6ca   :  { %9056 = vtanh.f32 %v3078_v56  ;;  %v3086_v35 = vadd.f32 1.0, %v9053_v5 }
 0x6cb   :  { %9058 = vrcp.f32 %v3075_v10 }
 0x6cc   :  { %9060 = vrcp.f32 %v3086_v35 }
 0x6d3   :  { %v9055_v19 = vpop.eup %9054 }
 0x6d4   :  { %v9057_v40 = vpop.eup %9056 }
 0x6d5   :  { %v9059_v61 = vpop.eup %9058  ;;  %v3090_v42 = vmul.f32 %v9057_v40, %v9055_v19 }
 0x6d6   :  { %v3089_v52 = vmul.f32 %v9059_v61, %v10454_v60  ;;  %v9061_v48 = vpop.eup %9060 }
 0x6d8   :  { %v10573_v1 = vadd.f32 %v3090_v42, %v3089_v52 }
 0x6da   :  { %9062 = vtanh.f32 %v10573_v1 }
 0x6e4   :  { %v9063_v31 = vpop.eup %9062 }
 0x6e5   :  { %v3093_v43 = vmul.f32 %v9063_v31, %v9061_v48  ;;  %v12079_v48 = vld [vmem:[#allocation100_spill] sm:$0xff] }
 0x6e7   :  { %3472 = vmatmul.mubr.f32.vlgmr.msra.gmra.mrb[22].mxu0 %v3093_v43  ;;  %3543 = vmatmul.mubr.f32.vlgmr.msra.gmra.mrb[30].mxu1 %v3093_v43 }
 0x6e8   :  { %7827 = vmatpush1.bf16.msra.mxu0 %v9843_v20  ;;  %7859 = vmatpush1.bf16.msra.mxu1 %v9845_v33 }
 0x6e9   :  { %7829 = vmatprep.subr.bf16.mxu0 %v11827_v30  ;;  %7861 = vmatprep.subr.bf16.mxu1 %v11828_v62 }
 0x6ea   :  { %3667 = vmatprep.mubr.f32.mxu0 %v11771_v0  ;;  %3738 = vmatprep.mubr.f32.mxu1 %v11771_v0 }
 0x6ec   :  { %7831 = vmatpush1.bf16.msra.mxu0 %v11893_v47  ;;  %7863 = vmatpush1.bf16.msra.mxu1 %v11954_v3 }
 0x6ed   :  { %7833 = vmatprep.subr.bf16.mxu0 %v11955_v24  ;;  %7865 = vmatprep.subr.bf16.mxu1 %v11956_v58 }
 0x6f0   :  { %v3302_v56 = vpop.f32.mrb[20].mxu0  ;;  %v3373_v60 = vpop.f32.mrb[28].mxu1  ;;  %7835 = vmatpush1.bf16.msra.mxu0 %v11957_v37  ;;  %7867 = vmatpush1.bf16.msra.mxu1 %v11958_v23 }
 0x6f1   :  { %v8824_v55 = vadd.f32 %v3302_v56, %v11959_v34  ;;  %v3304_v51 = vpop.f32.mrb[21].mxu0  ;;  %v3375_v16 = vpop.f32.mrb[29].mxu1  ;;  %7837 = vmatprep.subr.bf16.mxu0 %v11960_v26  ;;  %7869 = vmatprep.subr.bf16.mxu1 %v12017_v36  ;;  %v8826_v9 = vadd.f32 %v3373_v60, %v10118_v11  ;;  %v12080_v56 = vld [vmem:[#allocation101_spill] sm:$0xff]  ;;  %v12081_v60 = vld [vmem:[#allocation102_spill] sm:$0xff] }
 0x6f2   :  { %v8825_v63 = vadd.f32 %v3304_v51, %v11902_v41  ;;  %v8827_v61 = vadd.f32 %v3375_v16, %v11914_v2 }
 0x6f3   :  { %v6653_v22 = vmul.f32 -1.442695, %v8824_v55  ;;  %v12082_v55 = vld [vmem:[#allocation88_spill] sm:$0xff] }
 0x6f4   :  { %v6654_v59 = vmul.f32 -1.442695, %v8825_v63  ;;  %7839 = vmatpush1.bf16.msra.mxu0 %v11903_v14  ;;  %7871 = vmatpush1.bf16.msra.mxu1 %v12018_v6  ;;  %v6655_v35 = vmul.f32 -1.442695, %v8827_v61  ;;  %v12084_v63 = vld [vmem:[#allocation103_spill] sm:$0xff]  ;;  %v12091_v61 = vld [vmem:[#allocation110_spill] sm:$0xff] }
 0x6f5   :  { %9064 = vpow2.f32 %v6653_v22  ;;  %7841 = vmatprep.subr.bf16.mxu0 %v12019_v27  ;;  %7873 = vmatprep.subr.bf16.mxu1 %v12020_v4  ;;  %v12085_v22 = vld [vmem:[#allocation104_spill] sm:$0xff] }
 0x6f6   :  { %9066 = vpow2.f32 %v6654_v59  ;;  %v12086_v59 = vld [vmem:[#allocation105_spill] sm:$0xff] }
 0x6f7   :  { %9068 = vtanh.f32 %v8826_v9  ;;  %v12087_v9 = vld [vmem:[#allocation106_spill] sm:$0xff] }
 0x6f8   :  { %7843 = vmatpush1.bf16.msra.mxu0 %v12021_v13  ;;  %7875 = vmatpush1.bf16.msra.mxu1 %v11964_v28 }
 0x6f9   :  { %7845 = vmatprep.subr.bf16.mxu0 %v12022_v45  ;;  %7877 = vmatprep.subr.bf16.mxu1 %v12023_v25 }
 0x6fc   :  { %7847 = vmatpush1.bf16.msra.mxu0 %v11967_v53  ;;  %7879 = vmatpush1.bf16.msra.mxu1 %v11968_v15 }
 0x6fd   :  { %7849 = vmatprep.subr.bf16.mxu0 %v11969_v29  ;;  %7881 = vmatprep.subr.bf16.mxu1 %v12024_v54 }
 0x6ff   :  { %v9065_v10 = vpop.eup %9064 }
 0x700   :  { %v9067_v5 = vpop.eup %9066  ;;  %v3385_v19 = vadd.f32 1.0, %v9065_v10  ;;  %7851 = vmatpush1.bf16.msra.mxu0 %v12025_v44  ;;  %7883 = vmatpush1.bf16.msra.mxu1 %v11858_v49 }
 0x701   :  { %v3391_v40 = vadd.f32 1.0, %v9067_v5  ;;  %7853 = vmatprep.subr.bf16.mxu0 %v11915_v38  ;;  %7885 = vmatprep.subr.bf16.mxu1 %v11916_v21  ;;  %v9069_v52 = vpop.eup %9068  ;;  %v12088_v5 = vld [vmem:[#allocation107_spill] sm:$0xff] }
 0x702   :  { %9070 = vrcp.f32 %v3385_v19  ;;  %v12089_v19 = vld [vmem:[#allocation108_spill] sm:$0xff] }
 0x703   :  { %9072 = vrcp.f32 %v3391_v40  ;;  %v12090_v40 = vld [vmem:[#allocation109_spill] sm:$0xff] }
 0x704   :  { %7855 = vmatpush1.bf16.msra.mxu0 %v11917_v8  ;;  %7887 = vmatpush1.bf16.msra.mxu1 %v11972_v12  ;;  %9074 = vpow2.f32 %v6655_v35 }
 0x705   :  { %7889 = vmatprep.subr.bf16.mxu0 %v11973_v46  ;;  %7921 = vmatprep.subr.bf16.mxu1 %v11974_v32 }
 0x707   :  { %3668 = vmatmul.mubr.f32.vlgmr.msra.gmra.mrb[24].mxu0 %v3093_v43  ;;  %3739 = vmatmul.mubr.f32.vlgmr.msra.gmra.mrb[32].mxu1 %v3093_v43 }
 0x708   :  { %7891 = vmatpush1.bf16.msra.mxu0 %v11921_v39  ;;  %7923 = vmatpush1.bf16.msra.mxu1 %v11922_v7 }
 0x709   :  { %7893 = vmatprep.subr.bf16.mxu0 %v11975_v18  ;;  %7925 = vmatprep.subr.bf16.mxu1 %v11924_v17 }
 0x70a   :  { %3809 = vmatprep.mubr.f32.mxu0 %v11771_v0  ;;  %3880 = vmatprep.mubr.f32.mxu1 %v11771_v0 }
 0x70c   :  { %v9071_v42 = vpop.eup %9070  ;;  %7895 = vmatpush1.bf16.msra.mxu0 %v12026_v50  ;;  %7927 = vmatpush1.bf16.msra.mxu1 %v12079_v48 }
 0x70d   :  { %v9073_v31 = vpop.eup %9072  ;;  %v3402_v43 = vmul.f32 %v9071_v42, %v9069_v52  ;;  %7897 = vmatprep.subr.bf16.mxu0 %v12080_v56  ;;  %7929 = vmatprep.subr.bf16.mxu1 %v12081_v60  ;;  %v12092_v52 = vld [vmem:[#allocation111_spill] sm:$0xff]  ;;  %v12093_v42 = vld [vmem:[#allocation112_spill] sm:$0xff] }
 0x70e   :  { %v3401_v51 = vmul.f32 %v9073_v31, %v12082_v55  ;;  %v9075_v10 = vpop.eup %9074  ;;  %v12094_v31 = vld [vmem:[#allocation113_spill] sm:$0xff]  ;;  %v12096_v55 = vld [vmem:[#allocation115_spill] sm:$0xff] }
 0x70f   :  { %v3398_v35 = vadd.f32 1.0, %v9075_v10  ;;  %v12100_v10 = vld [vmem:[#allocation119_spill] sm:$0xff] }
 0x710   :  { %v10625_v16 = vadd.f32 %v3402_v43, %v3401_v51  ;;  %7899 = vmatpush1.bf16.msra.mxu0 %v12084_v63  ;;  %7931 = vmatpush1.bf16.msra.mxu1 %v12085_v22  ;;  %v12095_v43 = vld [vmem:[#allocation114_spill] sm:$0xff]  ;;  %v12097_v51 = vld [vmem:[#allocation116_spill] sm:$0xff] }
 0x711   :  { %7901 = vmatprep.subr.bf16.mxu0 %v12086_v59  ;;  %7933 = vmatprep.subr.bf16.mxu1 %v12087_v9  ;;  %v12141_v22 = vld [vmem:[#allocation64_spill] sm:$0xff] }
 0x712   :  { %12083 = vst [vmem:[#allocation59_spill] sm:$0xff] %v10625_v16  ;;  %9076 = vtanh.f32 %v10625_v16 }
 0x713   :  { %9078 = vrcp.f32 %v3398_v35  ;;  %v12105_v35 = vld [vmem:[#allocation124_spill] sm:$0xff] }
 0x714   :  { %7903 = vmatpush1.bf16.msra.mxu0 %v12088_v5  ;;  %7935 = vmatpush1.bf16.msra.mxu1 %v12089_v19  ;;  %v12098_v19 = vld [vmem:[#allocation117_spill] sm:$0xff] }
 0x715   :  { %7905 = vmatprep.subr.bf16.mxu0 %v12090_v40  ;;  %7937 = vmatprep.subr.bf16.mxu1 %v12091_v61  ;;  %v12099_v40 = vld [vmem:[#allocation118_spill] sm:$0xff] }
 0x716   :  { %v12103_v61 = vld [vmem:[#allocation122_spill] sm:$0xff] }
 0x718   :  { %7907 = vmatpush1.bf16.msra.mxu0 %v12092_v52  ;;  %7939 = vmatpush1.bf16.msra.mxu1 %v12093_v42  ;;  %v12101_v52 = vld [vmem:[#allocation120_spill] sm:$0xff]  ;;  %v12102_v42 = vld [vmem:[#allocation121_spill] sm:$0xff] }
 0x719   :  { %7909 = vmatprep.subr.bf16.mxu0 %v12094_v31  ;;  %7941 = vmatprep.subr.bf16.mxu1 %v12095_v43  ;;  %v12104_v43 = vld [vmem:[#allocation123_spill] sm:$0xff] }
 0x71c   :  { %7911 = vmatpush1.bf16.msra.mxu0 %v12096_v55  ;;  %7943 = vmatpush1.bf16.msra.mxu1 %v12097_v51  ;;  %v9077_v31 = vpop.eup %9076  ;;  %v12106_v51 = vld [vmem:[#allocation20_spill] sm:$0xff] }
 0x71d   :  { %7913 = vmatprep.subr.bf16.mxu0 %v12098_v19  ;;  %7945 = vmatprep.subr.bf16.mxu1 %v12099_v40  ;;  %v9079_v5 = vpop.eup %9078  ;;  %v12107_v19 = vld [vmem:[#allocation21_spill] sm:$0xff] }
 0x71e   :  { %v3405_v55 = vmul.f32 %v9079_v5, %v9077_v31  ;;  %v12113_v5 = vld [vmem:[#allocation30_spill] sm:$0xff]  ;;  %v12114_v31 = vld [vmem:[#allocation25_spill] sm:$0xff] }
 0x720   :  { %7915 = vmatpush1.bf16.msra.mxu0 %v12100_v10  ;;  %7947 = vmatpush1.bf16.msra.mxu1 %v12101_v52  ;;  %v12108_v10 = vld [vmem:[#allocation22_spill] sm:$0xff] }
 0x721   :  { %7917 = vmatprep.subr.bf16.mxu0 %v12102_v42  ;;  %7949 = vmatprep.subr.bf16.mxu1 %v12103_v61  ;;  %v12109_v52 = vld [vmem:[#allocation26_spill] sm:$0xff]  ;;  %v12110_v42 = vld [vmem:[#allocation23_spill] sm:$0xff] }
 0x722   :  { %v12111_v61 = vld [vmem:[#allocation27_spill] sm:$0xff] }
 0x724   :  { %7919 = vmatpush1.bf16.msra.mxu0 %v12104_v43  ;;  %7951 = vmatpush1.bf16.msra.mxu1 %v12105_v35  ;;  %v12112_v35 = vld [vmem:[#allocation24_spill] sm:$0xff]  ;;  %v12122_v43 = vld [vmem:[#allocation33_spill] sm:$0xff] }
 0x725   :  { %7953 = vmatprep.subr.bf16.mxu0 %v12106_v51  ;;  %7985 = vmatprep.subr.bf16.mxu1 %v12107_v19  ;;  %v12115_v19 = vld [vmem:[#allocation31_spill] sm:$0xff]  ;;  %v12117_v51 = vld [vmem:[#allocation34_spill] sm:$0xff] }
 0x727   :  { %3810 = vmatmul.mubr.f32.vlgmr.msra.gmra.mrb[24].mxu0 %v3405_v55  ;;  %3881 = vmatmul.mubr.f32.vlgmr.msra.gmra.mrb[32].mxu1 %v3405_v55  ;;  %v12116_v55 = vld [vmem:[#allocation28_spill] sm:$0xff] }
 0x728   :  { %7955 = vmatpush1.bf16.msra.mxu0 %v12108_v10  ;;  %7987 = vmatpush1.bf16.msra.mxu1 %v12109_v52  ;;  %v12118_v52 = vld [vmem:[#allocation29_spill] sm:$0xff]  ;;  %v12121_v10 = vld [vmem:[#allocation38_spill] sm:$0xff] }
 0x729   :  { %7957 = vmatprep.subr.bf16.mxu0 %v12110_v42  ;;  %7989 = vmatprep.subr.bf16.mxu1 %v12111_v61  ;;  %v12119_v42 = vld [vmem:[#allocation35_spill] sm:$0xff]  ;;  %v12120_v61 = vld [vmem:[#allocation32_spill] sm:$0xff] }
 0x72a   :  { %3980 = vmatprep.mubr.f32.mxu0 %v11771_v0  ;;  %4051 = vmatprep.mubr.f32.mxu1 %v11771_v0 }
 0x72c   :  { %7959 = vmatpush1.bf16.msra.mxu0 %v12112_v35  ;;  %7991 = vmatpush1.bf16.msra.mxu1 %v12113_v5  ;;  %v12123_v35 = vld [vmem:[#allocation39_spill] sm:$0xff]  ;;  %v12124_v5 = vld [vmem:[#allocation36_spill] sm:$0xff] }
 0x72d   :  { %7961 = vmatprep.subr.bf16.mxu0 %v12114_v31  ;;  %7993 = vmatprep.subr.bf16.mxu1 %v12115_v19  ;;  %v12125_v31 = vld [vmem:[#allocation42_spill] sm:$0xff]  ;;  %v12126_v19 = vld [vmem:[#allocation37_spill] sm:$0xff] }
 0x730   :  { %7963 = vmatpush1.bf16.msra.mxu0 %v12116_v55  ;;  %7995 = vmatpush1.bf16.msra.mxu1 %v12117_v51  ;;  %v12127_v55 = vld [vmem:[#allocation43_spill] sm:$0xff]  ;;  %v12128_v51 = vld [vmem:[#allocation40_spill] sm:$0xff] }
 0x731   :  { %7965 = vmatprep.subr.bf16.mxu0 %v12118_v52  ;;  %7997 = vmatprep.subr.bf16.mxu1 %v12119_v42  ;;  %v12129_v52 = vld [vmem:[#allocation46_spill] sm:$0xff]  ;;  %v12130_v42 = vld [vmem:[#allocation41_spill] sm:$0xff] }
 0x734   :  { %7967 = vmatpush1.bf16.msra.mxu0 %v12120_v61  ;;  %7999 = vmatpush1.bf16.msra.mxu1 %v12121_v10  ;;  %v12131_v61 = vld [vmem:[#allocation47_spill] sm:$0xff]  ;;  %v12132_v10 = vld [vmem:[#allocation44_spill] sm:$0xff] }
 0x735   :  { %7969 = vmatprep.subr.bf16.mxu0 %v12122_v43  ;;  %8001 = vmatprep.subr.bf16.mxu1 %v12123_v35  ;;  %v12133_v43 = vld [vmem:[#allocation49_spill] sm:$0xff] }
 0x736   :  { %v12134_v35 = vld [vmem:[#allocation45_spill] sm:$0xff] }
 0x738   :  { %7971 = vmatpush1.bf16.msra.mxu0 %v12124_v5  ;;  %8003 = vmatpush1.bf16.msra.mxu1 %v12125_v31  ;;  %v12135_v5 = vld [vmem:[#allocation50_spill] sm:$0xff]  ;;  %v12136_v31 = vld [vmem:[#allocation48_spill] sm:$0xff] }
 0x739   :  { %7973 = vmatprep.subr.bf16.mxu0 %v12126_v19  ;;  %8005 = vmatprep.subr.bf16.mxu1 %v12127_v55  ;;  %v12137_v19 = vld [vmem:[#allocation51_spill] sm:$0xff]  ;;  %v12138_v55 = vld [vmem:[#allocation52_spill] sm:$0xff] }
 0x73c   :  { %7975 = vmatpush1.bf16.msra.mxu0 %v12128_v51  ;;  %8007 = vmatpush1.bf16.msra.mxu1 %v12129_v52  ;;  %v12139_v51 = vld [vmem:[#allocation53_spill] sm:$0xff] }
 0x73d   :  { %7977 = vmatprep.subr.bf16.mxu0 %v12130_v42  ;;  %8009 = vmatprep.subr.bf16.mxu1 %v12131_v61 }
 0x740   :  { %7979 = vmatpush1.bf16.msra.mxu0 %v12132_v10  ;;  %8011 = vmatpush1.bf16.msra.mxu1 %v12133_v43 }
 0x741   :  { %7981 = vmatprep.subr.bf16.mxu0 %v12134_v35  ;;  %8013 = vmatprep.subr.bf16.mxu1 %v12135_v5  ;;  %v12140_v5 = vld [vmem:[#allocation62_spill] sm:$0xff] }
 0x744   :  { %7983 = vmatpush1.bf16.msra.mxu0 %v12136_v31  ;;  %8015 = vmatpush1.bf16.msra.mxu1 %v12137_v19  ;;  %v12142_v31 = vcombine.low %v12140_v5, %v12141_v22 }
 0x745   :  { %8017 = vmatprep.subr.bf16.mxu0 %v12138_v55  ;;  %8049 = vmatprep.subr.bf16.mxu1 %v12139_v51 }
 0x7ba   :  { %v3473_v52 = vpop.f32.mrb[22].mxu0  ;;  %v3544_v42 = vpop.f32.mrb[30].mxu1 }
 0x7bb   :  { %v3475_v40 = vpop.f32.mrb[23].mxu0  ;;  %v3546_v61 = vpop.f32.mrb[31].mxu1 }
 0x7bc   :  { %v3553_v9 = vcombine.low %v3473_v52, %v3475_v40  ;;  %v3554_v10 = vcombine.low %v3544_v42, %v3546_v61 }
 0x7be   :  { %v3561_v43 = vrot.slane %v3553_v9, %v9796_v57  ;;  %v3568_v35 = vrot.slane %v3554_v10, %v9796_v57 }
 0x7c0   :  { %v3569_v59 = vcombine.low %v3561_v43, %v3568_v35 }
 0x7c2   :  { %v3571_v63 = vadd.f32 %v3569_v59, %v12142_v31 }
 0x7c4   :  { %v6656_v19 = vmul.f32 -1.442695, %v3571_v63  ;;  %v3579_v16 = vrot.slane %v3571_v63, 2  ;;  %v3590_v51 = vrot.slane %v3571_v63, 6  ;;  %v3587_v48 = vrot.slane %v3571_v63, 4 }
 0x7c6   :  { %9080 = vpow2.f32 %v6656_v19  ;;  %v6657_v55 = vmul.f32 -1.442695, %v3579_v16  ;;  %v6658_v60 = vmul.f32 -1.442695, %v3590_v51 }
 0x7c8   :  { %9082 = vpow2.f32 %v6657_v55 }
 0x7c9   :  { %9084 = vpow2.f32 %v6658_v60 }
 0x7d0   :  { %v9081_v56 = vpop.eup %9080 }
 0x7d1   :  { %v3575_v40 = vadd.f32 1.0, %v9081_v56 }
 0x7d2   :  { %v9083_v52 = vpop.eup %9082 }
 0x7d3   :  { %9086 = vrcp.f32 %v3575_v40  ;;  %v3584_v9 = vadd.f32 1.0, %v9083_v52  ;;  %v9085_v42 = vpop.eup %9084 }
 0x7d4   :  { %9088 = vtanh.f32 %v3587_v48  ;;  %v3595_v43 = vadd.f32 1.0, %v9085_v42 }
 0x7d5   :  { %9090 = vrcp.f32 %v3584_v9 }
 0x7d6   :  { %9092 = vrcp.f32 %v3595_v43 }
 0x7dd   :  { %v9087_v61 = vpop.eup %9086 }
 0x7de   :  { %v9089_v10 = vpop.eup %9088 }
 0x7df   :  { %v9091_v59 = vpop.eup %9090  ;;  %v3599_v16 = vmul.f32 %v9089_v10, %v9087_v61 }
 0x7e0   :  { %v3598_v35 = vmul.f32 %v9091_v59, %v10573_v1  ;;  %v9093_v56 = vpop.eup %9092 }
 0x7e2   :  { %v10692_v55 = vadd.f32 %v3599_v16, %v3598_v35 }
 0x7e4   :  { %9094 = vtanh.f32 %v10692_v55 }
 0x7ee   :  { %v9095_v63 = vpop.eup %9094 }
 0x7ef   :  { %v3602_v60 = vmul.f32 %v9095_v63, %v9093_v56 }
 0x7f1   :  { %3981 = vmatmul.mubr.f32.vlgmr.msra.gmra.mrb[26].mxu0 %v3602_v60  ;;  %4052 = vmatmul.mubr.f32.vlgmr.msra.gmra.mrb[34].mxu1 %v3602_v60 }
 0x7f2   :  { %8019 = vmatpush1.bf16.msra.mxu0 %v9843_v20  ;;  %8051 = vmatpush1.bf16.msra.mxu1 %v9845_v33 }
 0x7f3   :  { %8021 = vmatprep.subr.bf16.mxu0 %v11827_v30  ;;  %8053 = vmatprep.subr.bf16.mxu1 %v11828_v62 }
 0x7f4   :  { %4176 = vmatprep.mubr.f32.mxu0 %v11771_v0  ;;  %4247 = vmatprep.mubr.f32.mxu1 %v11771_v0 }
 0x7f6   :  { %8023 = vmatpush1.bf16.msra.mxu0 %v11893_v47  ;;  %8055 = vmatpush1.bf16.msra.mxu1 %v11954_v3 }
 0x7f7   :  { %8025 = vmatprep.subr.bf16.mxu0 %v11955_v24  ;;  %8057 = vmatprep.subr.bf16.mxu1 %v11956_v58 }
 0x7fa   :  { %v3811_v1 = vpop.f32.mrb[24].mxu0  ;;  %v3882_v48 = vpop.f32.mrb[32].mxu1  ;;  %8027 = vmatpush1.bf16.msra.mxu0 %v11957_v37  ;;  %8059 = vmatpush1.bf16.msra.mxu1 %v11958_v23 }
 0x7fb   :  { %v8828_v51 = vadd.f32 %v3811_v1, %v11959_v34  ;;  %v3813_v31 = vpop.f32.mrb[25].mxu0  ;;  %v3884_v19 = vpop.f32.mrb[33].mxu1  ;;  %8029 = vmatprep.subr.bf16.mxu0 %v11960_v26  ;;  %8061 = vmatprep.subr.bf16.mxu1 %v12017_v36  ;;  %v8830_v42 = vadd.f32 %v3882_v48, %v10118_v11  ;;  %v12143_v1 = vld [vmem:[#allocation100_spill] sm:$0xff]  ;;  %v12160_v11 = vld [vmem:[#allocation115_spill] sm:$0xff] }
 0x7fc   :  { %v8829_v40 = vadd.f32 %v3813_v31, %v11902_v41  ;;  %v8831_v35 = vadd.f32 %v3884_v19, %v11914_v2  ;;  %v12145_v31 = vld [vmem:[#allocation102_spill] sm:$0xff]  ;;  %v12146_v19 = vld [vmem:[#allocation59_spill] sm:$0xff]  ;;  %v12161_v2 = vld [vmem:[#allocation116_spill] sm:$0xff] }
 0x7fd   :  { %v6659_v52 = vmul.f32 -1.442695, %v8828_v51  ;;  %v12144_v51 = vld [vmem:[#allocation101_spill] sm:$0xff] }
 0x7fe   :  { %v6660_v9 = vmul.f32 -1.442695, %v8829_v40  ;;  %8031 = vmatpush1.bf16.msra.mxu0 %v11903_v14  ;;  %8063 = vmatpush1.bf16.msra.mxu1 %v12018_v6  ;;  %v6661_v16 = vmul.f32 -1.442695, %v8831_v35  ;;  %v12153_v35 = vld [vmem:[#allocation108_spill] sm:$0xff] }
 0x7ff   :  { %9096 = vpow2.f32 %v6659_v52  ;;  %8033 = vmatprep.subr.bf16.mxu0 %v12019_v27  ;;  %8065 = vmatprep.subr.bf16.mxu1 %v12020_v4 }
 0x800   :  { %9098 = vpow2.f32 %v6660_v9  ;;  %v12148_v9 = vld [vmem:[#allocation103_spill] sm:$0xff] }
 0x801   :  { %9100 = vtanh.f32 %v8830_v42  ;;  %v12149_v42 = vld [vmem:[#allocation104_spill] sm:$0xff] }
 0x802   :  { %8035 = vmatpush1.bf16.msra.mxu0 %v12021_v13  ;;  %8067 = vmatpush1.bf16.msra.mxu1 %v11964_v28 }
 0x803   :  { %8037 = vmatprep.subr.bf16.mxu0 %v12022_v45  ;;  %8069 = vmatprep.subr.bf16.mxu1 %v12023_v25 }
 0x806   :  { %8039 = vmatpush1.bf16.msra.mxu0 %v11967_v53  ;;  %8071 = vmatpush1.bf16.msra.mxu1 %v11968_v15 }
 0x807   :  { %8041 = vmatprep.subr.bf16.mxu0 %v11969_v29  ;;  %8073 = vmatprep.subr.bf16.mxu1 %v12024_v54 }
 0x809   :  { %v9097_v61 = vpop.eup %9096 }
 0x80a   :  { %v9099_v10 = vpop.eup %9098  ;;  %v3894_v59 = vadd.f32 1.0, %v9097_v61  ;;  %8043 = vmatpush1.bf16.msra.mxu0 %v12025_v44  ;;  %8075 = vmatpush1.bf16.msra.mxu1 %v11858_v49  ;;  %v12150_v61 = vld [vmem:[#allocation105_spill] sm:$0xff] }
 0x80b   :  { %v3900_v43 = vadd.f32 1.0, %v9099_v10  ;;  %8045 = vmatprep.subr.bf16.mxu0 %v11915_v38  ;;  %8077 = vmatprep.subr.bf16.mxu1 %v11916_v21  ;;  %v9101_v56 = vpop.eup %9100  ;;  %v12151_v10 = vld [vmem:[#allocation106_spill] sm:$0xff] }
 0x80c   :  { %9102 = vrcp.f32 %v3894_v59 }
 0x80d   :  { %9104 = vrcp.f32 %v3900_v43  ;;  %v12152_v43 = vld [vmem:[#allocation107_spill] sm:$0xff] }
 0x80e   :  { %8047 = vmatpush1.bf16.msra.mxu0 %v11917_v8  ;;  %8079 = vmatpush1.bf16.msra.mxu1 %v11972_v12  ;;  %9106 = vpow2.f32 %v6661_v16  ;;  %v12154_v16 = vld [vmem:[#allocation109_spill] sm:$0xff] }
 0x80f   :  { %8081 = vmatprep.subr.bf16.mxu0 %v11973_v46  ;;  %8113 = vmatprep.subr.bf16.mxu1 %v11974_v32 }
 0x811   :  { %4177 = vmatmul.mubr.f32.vlgmr.msra.gmra.mrb[28].mxu0 %v3602_v60  ;;  %4248 = vmatmul.mubr.f32.vlgmr.msra.gmra.mrb[36].mxu1 %v3602_v60 }
 0x812   :  { %8083 = vmatpush1.bf16.msra.mxu0 %v11921_v39  ;;  %8115 = vmatpush1.bf16.msra.mxu1 %v11922_v7 }
 0x813   :  { %8085 = vmatprep.subr.bf16.mxu0 %v11975_v18  ;;  %8117 = vmatprep.subr.bf16.mxu1 %v11924_v17 }
 0x814   :  { %4318 = vmatprep.mubr.f32.mxu0 %v11771_v0  ;;  %4389 = vmatprep.mubr.f32.mxu1 %v11771_v0 }
 0x816   :  { %v9103_v63 = vpop.eup %9102  ;;  %8087 = vmatpush1.bf16.msra.mxu0 %v12026_v50  ;;  %8119 = vmatpush1.bf16.msra.mxu1 %v12143_v1 }
 0x817   :  { %v9105_v60 = vpop.eup %9104  ;;  %v3911_v48 = vmul.f32 %v9103_v63, %v9101_v56  ;;  %8089 = vmatprep.subr.bf16.mxu0 %v12144_v51  ;;  %8121 = vmatprep.subr.bf16.mxu1 %v12145_v31  ;;  %v12155_v56 = vld [vmem:[#allocation110_spill] sm:$0xff] }
 0x818   :  { %v3910_v40 = vmul.f32 %v9105_v60, %v12146_v19  ;;  %v9107_v59 = vpop.eup %9106  ;;  %v12156_v60 = vld [vmem:[#allocation111_spill] sm:$0xff]  ;;  %v12158_v19 = vld [vmem:[#allocation113_spill] sm:$0xff] }
 0x819   :  { %v3907_v63 = vadd.f32 1.0, %v9107_v59  ;;  %v12164_v59 = vld [vmem:[#allocation119_spill] sm:$0xff] }
 0x81a   :  { %v10744_v52 = vadd.f32 %v3911_v48, %v3910_v40  ;;  %8091 = vmatpush1.bf16.msra.mxu0 %v12148_v9  ;;  %8123 = vmatpush1.bf16.msra.mxu1 %v12149_v42  ;;  %v12157_v48 = vld [vmem:[#allocation112_spill] sm:$0xff]  ;;  %v12159_v40 = vld [vmem:[#allocation114_spill] sm:$0xff] }
 0x81b   :  { %8093 = vmatprep.subr.bf16.mxu0 %v12150_v61  ;;  %8125 = vmatprep.subr.bf16.mxu1 %v12151_v10 }
 0x81c   :  { %12147 = vst [vmem:[#allocation60_spill] sm:$0xff] %v10744_v52  ;;  %9108 = vtanh.f32 %v10744_v52  ;;  %v12167_v52 = vld [vmem:[#allocation122_spill] sm:$0xff] }
 0x81d   :  { %9110 = vrcp.f32 %v3907_v63  ;;  %v12169_v63 = vld [vmem:[#allocation124_spill] sm:$0xff] }
 0x81e   :  { %8095 = vmatpush1.bf16.msra.mxu0 %v12152_v43  ;;  %8127 = vmatpush1.bf16.msra.mxu1 %v12153_v35  ;;  %v12162_v35 = vld [vmem:[#allocation117_spill] sm:$0xff] }
 0x81f   :  { %8097 = vmatprep.subr.bf16.mxu0 %v12154_v16  ;;  %8129 = vmatprep.subr.bf16.mxu1 %v12155_v56  ;;  %v12163_v16 = vld [vmem:[#allocation118_spill] sm:$0xff] }
 0x822   :  { %8099 = vmatpush1.bf16.msra.mxu0 %v12156_v60  ;;  %8131 = vmatpush1.bf16.msra.mxu1 %v12157_v48  ;;  %v12165_v60 = vld [vmem:[#allocation120_spill] sm:$0xff]  ;;  %v12166_v48 = vld [vmem:[#allocation121_spill] sm:$0xff] }
 0x823   :  { %8101 = vmatprep.subr.bf16.mxu0 %v12158_v19  ;;  %8133 = vmatprep.subr.bf16.mxu1 %v12159_v40  ;;  %v12168_v40 = vld [vmem:[#allocation123_spill] sm:$0xff] }
 0x826   :  { %8103 = vmatpush1.bf16.msra.mxu0 %v12160_v11  ;;  %8135 = vmatpush1.bf16.msra.mxu1 %v12161_v2  ;;  %v9109_v19 = vpop.eup %9108  ;;  %v12170_v2 = vld [vmem:[#allocation52_spill] sm:$0xff] }
 0x827   :  { %8105 = vmatprep.subr.bf16.mxu0 %v12162_v35  ;;  %8137 = vmatprep.subr.bf16.mxu1 %v12163_v16  ;;  %v9111_v56 = vpop.eup %9110  ;;  %v12171_v35 = vld [vmem:[#allocation53_spill] sm:$0xff] }
 0x828   :  { %v3914_v11 = vmul.f32 %v9111_v56, %v9109_v19  ;;  %v12182_v56 = vld [vmem:[#allocation116_spill] sm:$0xff]  ;;  %v12183_v19 = vld [vmem:[#allocation125_spill] sm:$0xff] }
 0x82a   :  { %8107 = vmatpush1.bf16.msra.mxu0 %v12164_v59  ;;  %8139 = vmatpush1.bf16.msra.mxu1 %v12165_v60 }
 0x82b   :  { %8109 = vmatprep.subr.bf16.mxu0 %v12166_v48  ;;  %8141 = vmatprep.subr.bf16.mxu1 %v12167_v52 }
 0x82e   :  { %8111 = vmatpush1.bf16.msra.mxu0 %v12168_v40  ;;  %8143 = vmatpush1.bf16.msra.mxu1 %v12169_v63 }
 0x82f   :  { %8145 = vmatprep.subr.bf16.mxu0 %v12170_v2  ;;  %8177 = vmatprep.subr.bf16.mxu1 %v12171_v35 }
 0x831   :  { %4319 = vmatmul.mubr.f32.vlgmr.msra.gmra.mrb[28].mxu0 %v3914_v11  ;;  %4390 = vmatmul.mubr.f32.vlgmr.msra.gmra.mrb[36].mxu1 %v3914_v11 }
 0x832   :  { %8147 = vmatpush1.bf16.msra.mxu0 %v9843_v20  ;;  %8179 = vmatpush1.bf16.msra.mxu1 %v9845_v33 }
 0x833   :  { %8149 = vmatprep.subr.bf16.mxu0 %v11827_v30  ;;  %8181 = vmatprep.subr.bf16.mxu1 %v11828_v62 }
 0x834   :  { %4488 = vmatprep.mubr.f32.mxu0 %v11771_v0  ;;  %4559 = vmatprep.mubr.f32.mxu1 %v11771_v0 }
 0x836   :  { %8151 = vmatpush1.bf16.msra.mxu0 %v11893_v47  ;;  %8183 = vmatpush1.bf16.msra.mxu1 %v11954_v3 }
 0x837   :  { %8153 = vmatprep.subr.bf16.mxu0 %v11955_v24  ;;  %8185 = vmatprep.subr.bf16.mxu1 %v11956_v58 }
 0x83a   :  { %8155 = vmatpush1.bf16.msra.mxu0 %v11957_v37  ;;  %8187 = vmatpush1.bf16.msra.mxu1 %v11958_v23 }
 0x83b   :  { %8157 = vmatprep.subr.bf16.mxu0 %v11960_v26  ;;  %8189 = vmatprep.subr.bf16.mxu1 %v12017_v36 }
 0x83e   :  { %8159 = vmatpush1.bf16.msra.mxu0 %v11903_v14  ;;  %8191 = vmatpush1.bf16.msra.mxu1 %v12018_v6 }
 0x83f   :  { %8161 = vmatprep.subr.bf16.mxu0 %v12019_v27  ;;  %8193 = vmatprep.subr.bf16.mxu1 %v12020_v4 }
 0x842   :  { %8163 = vmatpush1.bf16.msra.mxu0 %v12021_v13  ;;  %8195 = vmatpush1.bf16.msra.mxu1 %v11964_v28 }
 0x843   :  { %8165 = vmatprep.subr.bf16.mxu0 %v12022_v45  ;;  %8197 = vmatprep.subr.bf16.mxu1 %v12023_v25 }
 0x846   :  { %8167 = vmatpush1.bf16.msra.mxu0 %v11967_v53  ;;  %8199 = vmatpush1.bf16.msra.mxu1 %v11968_v15 }
 0x847   :  { %8169 = vmatprep.subr.bf16.mxu0 %v11969_v29  ;;  %8201 = vmatprep.subr.bf16.mxu1 %v12024_v54 }
 0x84a   :  { %8171 = vmatpush1.bf16.msra.mxu0 %v12025_v44  ;;  %8203 = vmatpush1.bf16.msra.mxu1 %v11858_v49 }
 0x84b   :  { %8173 = vmatprep.subr.bf16.mxu0 %v11915_v38  ;;  %8205 = vmatprep.subr.bf16.mxu1 %v11916_v21  ;;  %v12172_v38 = vcombine.high %v12140_v5, %v12141_v22  ;;  %v12173_v5 = vld [vmem:[#allocation108_spill] sm:$0xff] }
 0x84e   :  { %8175 = vmatpush1.bf16.msra.mxu0 %v11917_v8  ;;  %8207 = vmatpush1.bf16.msra.mxu1 %v11972_v12 }
 0x84f   :  { %8209 = vmatprep.subr.bf16.mxu0 %v11973_v46  ;;  %8241 = vmatprep.subr.bf16.mxu1 %v11974_v32 }
 0x8c4   :  { %v3982_v20 = vpop.f32.mrb[26].mxu0  ;;  %v4053_v33 = vpop.f32.mrb[34].mxu1 }
 0x8c5   :  { %v3984_v30 = vpop.f32.mrb[27].mxu0  ;;  %v4055_v62 = vpop.f32.mrb[35].mxu1 }
 0x8c6   :  { %v4062_v11 = vcombine.low %v3982_v20, %v3984_v30  ;;  %v4063_v47 = vcombine.low %v4053_v33, %v4055_v62  ;;  %v12184_v33 = vld [vmem:[#allocation117_spill] sm:$0xff] }
 0x8c7   :  { %v4737_v30 = vld [vmem:[#allocation10 + $0x8] sm:$0xff] }
 0x8c8   :  { %v4070_v49 = vrot.slane %v4062_v11, %v9796_v57  ;;  %v4077_v14 = vrot.slane %v4063_v47, %v9796_v57  ;;  %v4741_v62 = vld [vmem:[#allocation10 + $0x28] sm:$0xff]  ;;  %v4739_v11 = vld [vmem:[#allocation10 + $0x18] sm:$0xff] }
 0x8c9   :  { %v4743_v47 = vld [vmem:[#allocation10 + $0x38] sm:$0xff] }
 0x8ca   :  { %v4078_v2 = vcombine.low %v4070_v49, %v4077_v14 }
 0x8cc   :  { %v4080_v21 = vadd.f32 %v4078_v2, %v12172_v38 }
 0x8ce   :  { %v6662_v8 = vmul.f32 -1.442695, %v4080_v21  ;;  %v4088_v3 = vrot.slane %v4080_v21, 2  ;;  %v4099_v32 = vrot.slane %v4080_v21, 6  ;;  %v4096_v23 = vrot.slane %v4080_v21, 4 }
 0x8cf   :  { %v10849_v21 = vpack.c.bf16 %v4741_v62, %v4737_v30  ;;  %v4764_v30 = vld [vmem:[#allocation10 + $0xe0] sm:$0xff] }
 0x8d0   :  { %9112 = vpow2.f32 %v6662_v8  ;;  %v6663_v24 = vmul.f32 -1.442695, %v4088_v3  ;;  %v6664_v58 = vmul.f32 -1.442695, %v4099_v32 }
 0x8d2   :  { %9114 = vpow2.f32 %v6663_v24  ;;  %v12185_v24 = vld [vmem:[#allocation60_spill] sm:$0xff] }
 0x8d3   :  { %9116 = vpow2.f32 %v6664_v58 }
 0x8da   :  { %v9113_v37 = vpop.eup %9112 }
 0x8db   :  { %v4084_v26 = vadd.f32 1.0, %v9113_v37  ;;  %v4740_v37 = vld [vmem:[#allocation10 + $0x20] sm:$0xff] }
 0x8dc   :  { %v9115_v28 = vpop.eup %9114 }
 0x8dd   :  { %9118 = vrcp.f32 %v4084_v26  ;;  %v4093_v53 = vadd.f32 1.0, %v9115_v28  ;;  %v9117_v15 = vpop.eup %9116  ;;  %v4745_v26 = vld [vmem:[#allocation10 + $0x48] sm:$0xff] }
 0x8de   :  { %9120 = vtanh.f32 %v4096_v23  ;;  %v4104_v36 = vadd.f32 1.0, %v9117_v15  ;;  %v4742_v23 = vld [vmem:[#allocation10 + $0x30] sm:$0xff]  ;;  %v4749_v28 = vld [vmem:[#allocation10 + $0x68] sm:$0xff]  ;;  %v4751_v15 = vld [vmem:[#allocation10 + $0x78] sm:$0xff] }
 0x8df   :  { %9122 = vrcp.f32 %v4093_v53  ;;  %v4747_v53 = vld [vmem:[#allocation10 + $0x58] sm:$0xff] }
 0x8e0   :  { %9124 = vrcp.f32 %v4104_v36 }
 0x8e7   :  { %v9119_v29 = vpop.eup %9118 }
 0x8e8   :  { %v9121_v12 = vpop.eup %9120 }
 0x8e9   :  { %v9123_v46 = vpop.eup %9122  ;;  %v4108_v27 = vmul.f32 %v9121_v12, %v9119_v29 }
 0x8ea   :  { %v4107_v6 = vmul.f32 %v9123_v46, %v10692_v55  ;;  %v9125_v13 = vpop.eup %9124  ;;  %v12174_v55 = vld [vmem:[#allocation109_spill] sm:$0xff] }
 0x8ec   :  { %v4109_v4 = vadd.f32 %v4108_v27, %v4107_v6  ;;  %v4744_v6 = vld [vmem:[#allocation10 + $0x40] sm:$0xff] }
 0x8ed   :  { %v4748_v27 = vld [vmem:[#allocation10 + $0x60] sm:$0xff] }
 0x8ee   :  { %9126 = vtanh.f32 %v4109_v4 }
 0x8f8   :  { %v9127_v45 = vpop.eup %9126 }
 0x8f9   :  { %v10811_v25 = vmul.f32 %v9127_v45, %v9125_v13  ;;  %v10865_v13 = vpack.c.bf16 %v4749_v28, %v4745_v26  ;;  %v10867_v45 = vpack.c.bf16 %v4751_v15, %v4747_v53  ;;  %v4783_v26 = vld [vmem:[#allocation10 + $0x178] sm:$0xff]  ;;  %v4776_v15 = vld [vmem:[#allocation10 + $0x140] sm:$0xff] }
 0x8fb   :  { %4489 = vmatmul.mubr.f32.vlgmr.msra.gmra.mrb[30].mxu0 %v10811_v25  ;;  %4560 = vmatmul.mubr.f32.vlgmr.msra.gmra.mrb[38].mxu1 %v10811_v25 }
 0x8fc   :  { %8211 = vmatpush1.bf16.msra.mxu0 %v11921_v39  ;;  %8243 = vmatpush1.bf16.msra.mxu1 %v11922_v7 }
 0x8fd   :  { %8213 = vmatprep.subr.bf16.mxu0 %v11975_v18  ;;  %8245 = vmatprep.subr.bf16.mxu1 %v11924_v17 }
 0x8fe   :  { %4630 = vmatprep.mubr.f32.mxu0 %v11771_v0  ;;  %4701 = vmatprep.mubr.f32.mxu1 %v11771_v0 }
 0x900   :  { %8215 = vmatpush1.bf16.msra.mxu0 %v12026_v50  ;;  %8247 = vmatpush1.bf16.msra.mxu1 %v12143_v1  ;;  %v12175_v1 = vld [vmem:[#allocation110_spill] sm:$0xff] }
 0x901   :  { %8217 = vmatprep.subr.bf16.mxu0 %v12144_v51  ;;  %8249 = vmatprep.subr.bf16.mxu1 %v12145_v31  ;;  %v12176_v51 = vld [vmem:[#allocation126_spill] sm:$0xff] }
 0x904   :  { %v4320_v54 = vpop.f32.mrb[28].mxu0  ;;  %v4391_v39 = vpop.f32.mrb[36].mxu1  ;;  %8219 = vmatpush1.bf16.msra.mxu0 %v12148_v9  ;;  %8251 = vmatpush1.bf16.msra.mxu1 %v12149_v42  ;;  %v12177_v9 = vld [vmem:[#allocation111_spill] sm:$0xff]  ;;  %v12178_v42 = vld [vmem:[#allocation112_spill] sm:$0xff] }
 0x905   :  { %v8832_v7 = vadd.f32 %v4320_v54, %v11959_v34  ;;  %v4322_v17 = vpop.f32.mrb[29].mxu0  ;;  %v4393_v18 = vpop.f32.mrb[37].mxu1  ;;  %8221 = vmatprep.subr.bf16.mxu0 %v12150_v61  ;;  %8253 = vmatprep.subr.bf16.mxu1 %v12151_v10  ;;  %v12179_v61 = vld [vmem:[#allocation113_spill] sm:$0xff]  ;;  %v12180_v10 = vld [vmem:[#allocation114_spill] sm:$0xff]  ;;  %v8834_v20 = vadd.f32 %v4391_v39, %v12183_v19 }
 0x906   :  { %v8833_v44 = vadd.f32 %v4322_v17, %v11902_v41  ;;  %v8835_v31 = vadd.f32 %v4393_v18, %v12176_v51  ;;  %v4746_v54 = vld [vmem:[#allocation10 + $0x50] sm:$0xff]  ;;  %v4757_v17 = vld [vmem:[#allocation10 + $0xa8] sm:$0xff]  ;;  %v4755_v18 = vld [vmem:[#allocation10 + $0x98] sm:$0xff] }
 0x907   :  { %v6665_v50 = vmul.f32 -1.442695, %v8832_v7  ;;  %v4750_v39 = vld [vmem:[#allocation10 + $0x70] sm:$0xff]  ;;  %v4753_v7 = vld [vmem:[#allocation10 + $0x88] sm:$0xff] }
 0x908   :  { %v6666_v22 = vmul.f32 -1.442695, %v8833_v44  ;;  %8223 = vmatpush1.bf16.msra.mxu0 %v12152_v43  ;;  %8255 = vmatpush1.bf16.msra.mxu1 %v12173_v5  ;;  %v6667_v35 = vmul.f32 -1.442695, %v8835_v31  ;;  %v12181_v43 = vld [vmem:[#allocation115_spill] sm:$0xff]  ;;  %v4752_v5 = vld [vmem:[#allocation10 + $0x80] sm:$0xff] }
 0x909   :  { %9128 = vpow2.f32 %v6665_v50  ;;  %8225 = vmatprep.subr.bf16.mxu0 %v12174_v55  ;;  %8257 = vmatprep.subr.bf16.mxu1 %v12175_v1  ;;  %v4759_v44 = vld [vmem:[#allocation10 + $0xb8] sm:$0xff]  ;;  %v10871_v50 = vpack.c.bf16 %v4748_v27, %v4744_v6  ;;  %v4756_v55 = vld [vmem:[#allocation10 + $0xa0] sm:$0xff]  ;;  %v10877_v1 = vpack.c.bf16 %v4757_v17, %v4753_v7  ;;  %v4778_v27 = vld [vmem:[#allocation10 + $0x150] sm:$0xff] }
 0x90a   :  { %9130 = vpow2.f32 %v6666_v22  ;;  %v10873_v22 = vpack.c.bf16 %v4750_v39, %v4746_v54  ;;  %v10879_v31 = vpack.c.bf16 %v4759_v44, %v4755_v18  ;;  %v4785_v54 = vld [vmem:[#allocation10 + $0x188] sm:$0xff]  ;;  %v4787_v7 = vld [vmem:[#allocation10 + $0x198] sm:$0xff] }
 0x90b   :  { %9132 = vpow2.f32 %v6667_v35  ;;  %v4763_v35 = vld [vmem:[#allocation10 + $0xd8] sm:$0xff]  ;;  %v4789_v39 = vld [vmem:[#allocation10 + $0x1a8] sm:$0xff] }
 0x90c   :  { %8227 = vmatpush1.bf16.msra.mxu0 %v12177_v9  ;;  %8259 = vmatpush1.bf16.msra.mxu1 %v12178_v42  ;;  %9134 = vtanh.f32 %v8834_v20  ;;  %v4754_v9 = vld [vmem:[#allocation10 + $0x90] sm:$0xff]  ;;  %v4791_v17 = vld [vmem:[#allocation10 + $0x1b8] sm:$0xff] }
 0x90d   :  { %8229 = vmatprep.subr.bf16.mxu0 %v12179_v61  ;;  %8261 = vmatprep.subr.bf16.mxu1 %v12180_v10  ;;  %v4758_v42 = vld [vmem:[#allocation10 + $0xb0] sm:$0xff]  ;;  %v4761_v61 = vld [vmem:[#allocation10 + $0xc8] sm:$0xff] }
 0x90e   :  { %v4765_v10 = vld [vmem:[#allocation10 + $0xe8] sm:$0xff]  ;;  %v10887_v20 = vpack.c.bf16 %v4758_v42, %v4754_v9  ;;  %v8296_v9 = vpack.c.bf16 %v4789_v39, %v4785_v54  ;;  %v8328_v42 = vpack.c.bf16 %v4791_v17, %v4787_v7  ;;  %v12188_v54 = vld [vmem:[#allocation56_spill] sm:$0xff]  ;;  %v12189_v17 = vld [vmem:[#allocation58_spill] sm:$0xff] }
 0x90f   :  { %v10891_v62 = vpack.c.bf16 %v4765_v10, %v4761_v61  ;;  %v4786_v61 = vld [vmem:[#allocation10 + $0x190] sm:$0xff] }
 0x910   :  { %8231 = vmatpush1.bf16.msra.mxu0 %v12181_v43  ;;  %8263 = vmatpush1.bf16.msra.mxu1 %v12182_v56  ;;  %v4767_v43 = vld [vmem:[#allocation10 + $0xf8] sm:$0xff]  ;;  %v10885_v56 = vpack.c.bf16 %v4756_v55, %v4752_v5  ;;  %v4784_v5 = vld [vmem:[#allocation10 + $0x180] sm:$0xff]  ;;  %v4790_v10 = vld [vmem:[#allocation10 + $0x1b0] sm:$0xff] }
 0x911   :  { %8233 = vmatprep.subr.bf16.mxu0 %v12184_v33  ;;  %8265 = vmatprep.subr.bf16.mxu1 %v12163_v16  ;;  %v10851_v16 = vpack.c.bf16 %v4743_v47, %v4739_v11  ;;  %v4760_v33 = vld [vmem:[#allocation10 + $0xc0] sm:$0xff]  ;;  %v10893_v11 = vpack.c.bf16 %v4767_v43, %v4763_v35  ;;  %v4762_v47 = vld [vmem:[#allocation10 + $0xd0] sm:$0xff]  ;;  %v4793_v35 = vld [vmem:[#allocation10 + $0x1c8] sm:$0xff] }
 0x912   :  { %v4788_v55 = vld [vmem:[#allocation10 + $0x1a0] sm:$0xff]  ;;  %v4797_v43 = vld [vmem:[#allocation10 + $0x1e8] sm:$0xff] }
 0x913   :  { %v9129_v49 = vpop.eup %9128 }
 0x914   :  { %v9131_v14 = vpop.eup %9130  ;;  %v4403_v2 = vadd.f32 1.0, %v9129_v49  ;;  %8235 = vmatpush1.bf16.msra.mxu0 %v12164_v59  ;;  %8267 = vmatpush1.bf16.msra.mxu1 %v12165_v60  ;;  %v4766_v49 = vld [vmem:[#allocation10 + $0xf0] sm:$0xff] }
 0x915   :  { %v4409_v38 = vadd.f32 1.0, %v9131_v14  ;;  %8237 = vmatprep.subr.bf16.mxu0 %v12166_v48  ;;  %8269 = vmatprep.subr.bf16.mxu1 %v12167_v52  ;;  %v9133_v60 = vpop.eup %9132  ;;  %v4769_v14 = vld [vmem:[#allocation10 + $0x108] sm:$0xff] }
 0x916   :  { %9136 = vrcp.f32 %v4403_v2  ;;  %v9135_v59 = vpop.eup %9134  ;;  %v4416_v52 = vadd.f32 1.0, %v9133_v60  ;;  %v4773_v2 = vld [vmem:[#allocation10 + $0x128] sm:$0xff]  ;;  %v4775_v60 = vld [vmem:[#allocation10 + $0x138] sm:$0xff] }
 0x917   :  { %9138 = vrcp.f32 %v4409_v38  ;;  %v4771_v38 = vld [vmem:[#allocation10 + $0x118] sm:$0xff] }
 0x918   :  { %8239 = vmatpush1.bf16.msra.mxu0 %v12168_v40  ;;  %8271 = vmatpush1.bf16.msra.mxu1 %v12169_v63  ;;  %9140 = vrcp.f32 %v4416_v52  ;;  %v4736_v40 = vld [vmem:[#allocation10] sm:$0xff]  ;;  %v4738_v63 = vld [vmem:[#allocation10 + $0x10] sm:$0xff]  ;;  %v10903_v52 = vpack.c.bf16 %v4773_v2, %v4769_v14  ;;  %v8300_v2 = vpack.c.bf16 %v4797_v43, %v4793_v35 }
 0x919   :  { %8273 = vmatprep.subr.bf16.mxu0 %v10849_v21  ;;  %8305 = vmatprep.subr.bf16.mxu1 %v10851_v16  ;;  %v10861_v46 = vpack.c.bf16 %v4740_v37, %v4736_v40  ;;  %v10863_v36 = vpack.c.bf16 %v4742_v23, %v4738_v63  ;;  %v4774_v40 = vld [vmem:[#allocation10 + $0x130] sm:$0xff]  ;;  %v4777_v37 = vld [vmem:[#allocation10 + $0x148] sm:$0xff]  ;;  %v4779_v23 = vld [vmem:[#allocation10 + $0x158] sm:$0xff] }
 0x91a   :  { %v4781_v63 = vld [vmem:[#allocation10 + $0x168] sm:$0xff]  ;;  %v10917_v6 = vpack.c.bf16 %v4783_v26, %v4779_v23  ;;  %v4792_v14 = vld [vmem:[#allocation10 + $0x1c0] sm:$0xff]  ;;  %v9397_v23 = vmov 1966171168   ;;  %v12190_v43 = vld [vmem:[#allocation54_spill] sm:$0xff] }
 0x91b   :  { %v4971_v26 = vunpack.c.l.s4 %v9397_v23  ;;  %v5303_v23 = vld [vmem:[#allocation12 + $0xb8] sm:$0xff] }
 0x91d   :  { %v4972_v7 = vunpack.c.0.s8 %v4971_v26 }
 0x920   :  { %v9137_v8 = vpop.eup %9136 }
 0x921   :  { %v9139_v48 = vpop.eup %9138  ;;  %v4420_v3 = vmul.f32 %v9137_v8, %v9135_v59  ;;  %v10897_v59 = vpack.c.bf16 %v4764_v30, %v4760_v33  ;;  %v10899_v8 = vpack.c.bf16 %v4766_v49, %v4762_v47  ;;  %v4795_v33 = vld [vmem:[#allocation10 + $0x1d8] sm:$0xff]  ;;  %v8298_v47 = vpack.c.bf16 %v4788_v55, %v4784_v5 }
 0x922   :  { %v4419_v32 = vmul.f32 %v9139_v48, %v12185_v24  ;;  %v9141_v29 = vpop.eup %9140  ;;  %v4768_v48 = vld [vmem:[#allocation10 + $0x100] sm:$0xff]  ;;  %v10905_v24 = vpack.c.bf16 %v4775_v60, %v4771_v38  ;;  %v4799_v30 = vld [vmem:[#allocation10 + $0x1f8] sm:$0xff]  ;;  %v8330_v49 = vpack.c.bf16 %v4790_v10, %v4786_v61 }
 0x923   :  { %v8332_v38 = vpack.c.bf16 %v4799_v30, %v4795_v33  ;;  %v4796_v60 = vld [vmem:[#allocation10 + $0x1e0] sm:$0xff]  ;;  %v10968_v33 = vsub.s32 %v4972_v7, %v12190_v43  ;;  %v5307_v7 = vld [vmem:[#allocation12 + $0xd8] sm:$0xff]  ;;  %v5313_v43 = vld [vmem:[#allocation12 + $0x108] sm:$0xff] }
 0x924   :  { %v10858_v58 = vadd.f32 %v4420_v3, %v4419_v32  ;;  %v4772_v3 = vld [vmem:[#allocation10 + $0x120] sm:$0xff]  ;;  %v4770_v32 = vld [vmem:[#allocation10 + $0x110] sm:$0xff] }
 0x925   :  { %v10909_v28 = vpack.c.bf16 %v4772_v3, %v4768_v48  ;;  %v10911_v53 = vpack.c.bf16 %v4774_v40, %v4770_v32  ;;  %v4794_v48 = vld [vmem:[#allocation10 + $0x1d0] sm:$0xff]  ;;  %v8302_v32 = vpack.c.bf16 %v4796_v60, %v4792_v14  ;;  %v5280_v60 = vld [vmem:[#allocation12] sm:$0xff] }
 0x926   :  { %9142 = vtanh.f32 %v10858_v58  ;;  %v4798_v3 = vld [vmem:[#allocation10 + $0x1f0] sm:$0xff] }
 0x927   :  { %v8334_v40 = vpack.c.bf16 %v4798_v3, %v4794_v48  ;;  %v5284_v48 = vld [vmem:[#allocation12 + $0x20] sm:$0xff]  ;;  %v12191_v3 = vlaneseq }
 0x929   :  { %vm10973_vm2 = vcmp.lt.s32.totalorder %v12191_v3, 512  ;;  %v5314_v3 = vld [vmem:[#allocation12 + $0x110] sm:$0xff] }
 0x930   :  { %v9143_v12 = vpop.eup %9142 }
 0x931   :  { %v4423_v4 = vmul.f32 %v9143_v12, %v9141_v29  ;;  %v4780_v29 = vld [vmem:[#allocation10 + $0x160] sm:$0xff]  ;;  %v10915_v12 = vpack.c.bf16 %v4781_v63, %v4777_v37 }
 0x932   :  { %v8294_v18 = vpack.c.bf16 %v4780_v29, %v4776_v15  ;;  %v12186_v29 = vld [vmem:[#allocation55_spill] sm:$0xff] }
 0x933   :  { %4631 = vmatmul.mubr.f32.vlgmr.msra.gmra.mrb[30].mxu0 %v4423_v4  ;;  %4702 = vmatmul.mubr.f32.vlgmr.msra.gmra.mrb[38].mxu1 %v4423_v4  ;;  %v4782_v4 = vld [vmem:[#allocation10 + $0x170] sm:$0xff] }
 0x934   :  { %8275 = vmatpush1.bf16.msra.mxu0 %v10861_v46  ;;  %8307 = vmatpush1.bf16.msra.mxu1 %v10863_v36  ;;  %v8326_v44 = vpack.c.bf16 %v4782_v4, %v4778_v27 }
 0x935   :  { %8277 = vmatprep.subr.bf16.mxu0 %v10865_v13  ;;  %8309 = vmatprep.subr.bf16.mxu1 %v10867_v45 }
 0x936   :  { %4886 = vmatprep.mubr.f32.mxu0 %v11771_v0  ;;  %4957 = vmatprep.mubr.f32.mxu1 %v11771_v0 }
 0x938   :  { %8279 = vmatpush1.bf16.msra.mxu0 %v10871_v50  ;;  %8311 = vmatpush1.bf16.msra.mxu1 %v10873_v22 }
 0x939   :  { %8281 = vmatprep.subr.bf16.mxu0 %v10877_v1  ;;  %8313 = vmatprep.subr.bf16.mxu1 %v10879_v31 }
 0x93c   :  { %8283 = vmatpush1.bf16.msra.mxu0 %v10885_v56  ;;  %8315 = vmatpush1.bf16.msra.mxu1 %v10887_v20 }
 0x93d   :  { %8285 = vmatprep.subr.bf16.mxu0 %v10891_v62  ;;  %8317 = vmatprep.subr.bf16.mxu1 %v10893_v11 }
 0x940   :  { %8287 = vmatpush1.bf16.msra.mxu0 %v10897_v59  ;;  %8319 = vmatpush1.bf16.msra.mxu1 %v10899_v8 }
 0x941   :  { %8289 = vmatprep.subr.bf16.mxu0 %v10903_v52  ;;  %8321 = vmatprep.subr.bf16.mxu1 %v10905_v24 }
 0x944   :  { %8291 = vmatpush1.bf16.msra.mxu0 %v10909_v28  ;;  %8323 = vmatpush1.bf16.msra.mxu1 %v10911_v53 }
 0x945   :  { %8293 = vmatprep.subr.bf16.mxu0 %v10915_v12  ;;  %8325 = vmatprep.subr.bf16.mxu1 %v10917_v6 }
 0x948   :  { %8295 = vmatpush1.bf16.msra.mxu0 %v8294_v18  ;;  %8327 = vmatpush1.bf16.msra.mxu1 %v8326_v44 }
 0x949   :  { %8297 = vmatprep.subr.bf16.mxu0 %v8296_v9  ;;  %8329 = vmatprep.subr.bf16.mxu1 %v8328_v42 }
 0x94c   :  { %8299 = vmatpush1.bf16.msra.mxu0 %v8298_v47  ;;  %8331 = vmatpush1.bf16.msra.mxu1 %v8330_v49 }
 0x94d   :  { %8301 = vmatprep.subr.bf16.mxu0 %v8300_v2  ;;  %8333 = vmatprep.subr.bf16.mxu1 %v8332_v38 }
 0x950   :  { %8303 = vmatpush1.bf16.msra.mxu0 %v8302_v32  ;;  %8335 = vmatpush1.bf16.msra.mxu1 %v8334_v40 }
 0x951   :  { %8337 = vmatprep.subr.bf16.mxu0 %v10849_v21  ;;  %8369 = vmatprep.subr.bf16.mxu1 %v10851_v16  ;;  %v5285_v21 = vld [vmem:[#allocation12 + $0x28] sm:$0xff]  ;;  %v5283_v16 = vld [vmem:[#allocation12 + $0x18] sm:$0xff] }
 0x953   :  { %4887 = vmatmul.mubr.f32.vlgmr.msra.gmra.mrb[32].mxu0 %v10811_v25  ;;  %4958 = vmatmul.mubr.f32.vlgmr.msra.gmra.mrb[40].mxu1 %v10811_v25  ;;  %v5281_v25 = vld [vmem:[#allocation12 + $0x8] sm:$0xff] }
 0x954   :  { %8339 = vmatpush1.bf16.msra.mxu0 %v10861_v46  ;;  %8371 = vmatpush1.bf16.msra.mxu1 %v10863_v36  ;;  %v10949_v46 = vpack.c.bf16 %v5285_v21, %v5281_v25  ;;  %v5287_v36 = vld [vmem:[#allocation12 + $0x38] sm:$0xff]  ;;  %v5286_v25 = vld [vmem:[#allocation12 + $0x30] sm:$0xff]  ;;  %v5289_v21 = vld [vmem:[#allocation12 + $0x48] sm:$0xff] }
 0x955   :  { %8341 = vmatprep.subr.bf16.mxu0 %v10865_v13  ;;  %8373 = vmatprep.subr.bf16.mxu1 %v10867_v45  ;;  %v10951_v13 = vpack.c.bf16 %v5287_v36, %v5283_v16 }
 0x956   :  { %5159 = vmatprep.mubr.f32.mxu0 %v11771_v0  ;;  %5230 = vmatprep.mubr.f32.mxu1 %v11771_v0 }
 0x958   :  { %8343 = vmatpush1.bf16.msra.mxu0 %v10871_v50  ;;  %8375 = vmatpush1.bf16.msra.mxu1 %v10873_v22 }
 0x959   :  { %8345 = vmatprep.subr.bf16.mxu0 %v10877_v1  ;;  %8377 = vmatprep.subr.bf16.mxu1 %v10879_v31 }
 0x95c   :  { %8347 = vmatpush1.bf16.msra.mxu0 %v10885_v56  ;;  %8379 = vmatpush1.bf16.msra.mxu1 %v10887_v20 }
 0x95d   :  { %8349 = vmatprep.subr.bf16.mxu0 %v10891_v62  ;;  %8381 = vmatprep.subr.bf16.mxu1 %v10893_v11 }
 0x960   :  { %8351 = vmatpush1.bf16.msra.mxu0 %v10897_v59  ;;  %8383 = vmatpush1.bf16.msra.mxu1 %v10899_v8 }
 0x961   :  { %8353 = vmatprep.subr.bf16.mxu0 %v10903_v52  ;;  %8385 = vmatprep.subr.bf16.mxu1 %v10905_v24 }
 0x964   :  { %8355 = vmatpush1.bf16.msra.mxu0 %v10909_v28  ;;  %8387 = vmatpush1.bf16.msra.mxu1 %v10911_v53 }
 0x965   :  { %8357 = vmatprep.subr.bf16.mxu0 %v10915_v12  ;;  %8389 = vmatprep.subr.bf16.mxu1 %v10917_v6  ;;  %v12187_v6 = vld [vmem:[#allocation57_spill] sm:$0xff] }
 0x968   :  { %8359 = vmatpush1.bf16.msra.mxu0 %v8294_v18  ;;  %8391 = vmatpush1.bf16.msra.mxu1 %v8326_v44 }
 0x969   :  { %8361 = vmatprep.subr.bf16.mxu0 %v8296_v9  ;;  %8393 = vmatprep.subr.bf16.mxu1 %v8328_v42 }
 0x96c   :  { %8363 = vmatpush1.bf16.msra.mxu0 %v8298_v47  ;;  %8395 = vmatpush1.bf16.msra.mxu1 %v8330_v49 }
 0x96d   :  { %8365 = vmatprep.subr.bf16.mxu0 %v8300_v2  ;;  %8397 = vmatprep.subr.bf16.mxu1 %v8332_v38 }
 0x970   :  { %8367 = vmatpush1.bf16.msra.mxu0 %v8302_v32  ;;  %8399 = vmatpush1.bf16.msra.mxu1 %v8334_v40  ;;  %v5282_v40 = vld [vmem:[#allocation12 + $0x10] sm:$0xff] }
 0x971   :  { %8401 = vmatprep.subr.bf16.mxu0 %v10949_v46  ;;  %8433 = vmatprep.subr.bf16.mxu1 %v10951_v13 }
 0xa06   :  { %v4632_v45 = vpop.f32.mrb[30].mxu0  ;;  %v4703_v50 = vpop.f32.mrb[38].mxu1 }
 0xa07   :  { %v8836_v22 = vadd.f32 %v4632_v45, %v11959_v34  ;;  %v4634_v1 = vpop.f32.mrb[31].mxu0  ;;  %v4705_v31 = vpop.f32.mrb[39].mxu1  ;;  %v8838_v8 = vadd.f32 %v4703_v50, %v12183_v19  ;;  %v5293_v45 = vld [vmem:[#allocation12 + $0x68] sm:$0xff]  ;;  %v5291_v50 = vld [vmem:[#allocation12 + $0x58] sm:$0xff] }
 0xa08   :  { %v8837_v56 = vadd.f32 %v4634_v1, %v11902_v41  ;;  %v8839_v11 = vadd.f32 %v4705_v31, %v12176_v51  ;;  %v4800_v41 = vld [vmem:[%s11454_s9] sm:$0xf] }
 0xa09   :  { %v6668_v20 = vmul.f32 -1.442695, %v8836_v22  ;;  %v4805_v12 = vrot.slane %v4800_v41, %v12186_v29  ;;  %v4813_v27 = vrot.slane %v4800_v41, %v12187_v6  ;;  %v4809_v39 = vrot.slane %v4800_v41, %v12188_v54  ;;  %v5295_v22 = vld [vmem:[#allocation12 + $0x78] sm:$0xff] }
 0xa0a   :  { %v6669_v62 = vmul.f32 -1.442695, %v8837_v56  ;;  %v6670_v59 = vmul.f32 -1.442695, %v8839_v11  ;;  %v4817_v18 = vrot.slane %v4800_v41, %v12189_v17  ;;  %v10983_v56 = vpack.c.bf16 %v5284_v48, %v5280_v60  ;;  %v5292_v11 = vld [vmem:[#allocation12 + $0x60] sm:$0xff]  ;;  %v5299_v41 = vld [vmem:[#allocation12 + $0x98] sm:$0xff] }
 0xa0b   :  { %9144 = vpow2.f32 %v6668_v20  ;;  %v10985_v20 = vpack.c.bf16 %v5286_v25, %v5282_v40  ;;  %v5318_v40 = vld [vmem:[#allocation12 + $0x130] sm:$0xff]  ;;  %v5321_v25 = vld [vmem:[#allocation12 + $0x148] sm:$0xff] }
 0xa0c   :  { %9146 = vpow2.f32 %v6669_v62  ;;  %v5288_v62 = vld [vmem:[#allocation12 + $0x40] sm:$0xff] }
 0xa0d   :  { %9148 = vpow2.f32 %v6670_v59  ;;  %v10993_v26 = vpack.c.bf16 %v5292_v11, %v5288_v62  ;;  %v5322_v11 = vld [vmem:[#allocation12 + $0x150] sm:$0xff] }
 0xa0e   :  { %9150 = vtanh.f32 %v8838_v8  ;;  %v10987_v8 = vpack.c.bf16 %v5293_v45, %v5289_v21  ;;  %v5325_v21 = vld [vmem:[#allocation12 + $0x168] sm:$0xff] }
 0xa15   :  { %v9145_v52 = vpop.eup %9144 }
 0xa16   :  { %v9147_v24 = vpop.eup %9146  ;;  %v4715_v37 = vadd.f32 1.0, %v9145_v52  ;;  %v10989_v52 = vpack.c.bf16 %v5295_v22, %v5291_v50  ;;  %v11033_v50 = vpack.c.bf16 %v5318_v40, %v5314_v3  ;;  %v5320_v22 = vld [vmem:[#allocation12 + $0x140] sm:$0xff] }
 0xa17   :  { %v4721_v63 = vadd.f32 1.0, %v9147_v24  ;;  %v9149_v34 = vpop.eup %9148  ;;  %v5290_v24 = vld [vmem:[#allocation12 + $0x50] sm:$0xff] }
 0xa18   :  { %9152 = vrcp.f32 %v4715_v37  ;;  %v9151_v28 = vpop.eup %9150  ;;  %v4728_v19 = vadd.f32 1.0, %v9149_v34  ;;  %v5294_v37 = vld [vmem:[#allocation12 + $0x70] sm:$0xff]  ;;  %v5301_v34 = vld [vmem:[#allocation12 + $0xa8] sm:$0xff] }
 0xa19   :  { %9154 = vrcp.f32 %v4721_v63  ;;  %v5297_v63 = vld [vmem:[#allocation12 + $0x88] sm:$0xff] }
 0xa1a   :  { %9156 = vrcp.f32 %v4728_v19  ;;  %v11001_v19 = vpack.c.bf16 %v5303_v23, %v5299_v41 }
 0xa22   :  { %v9153_v51 = vpop.eup %9152 }
 0xa23   :  { %v9155_v53 = vpop.eup %9154  ;;  %v4732_v15 = vmul.f32 %v9153_v51, %v9151_v28  ;;  %v10995_v28 = vpack.c.bf16 %v5294_v37, %v5290_v24  ;;  %v5296_v51 = vld [vmem:[#allocation12 + $0x80] sm:$0xff]  ;;  %v5329_v24 = vld [vmem:[#allocation12 + $0x188] sm:$0xff] }
 0xa24   :  { %v4731_v4 = vmul.f32 %v9155_v53, %v10858_v58  ;;  %v9157_v1 = vpop.eup %9156  ;;  %v5300_v53 = vld [vmem:[#allocation12 + $0xa0] sm:$0xff]  ;;  %v5333_v37 = vld [vmem:[#allocation12 + $0x1a8] sm:$0xff] }
 0xa26   :  { %v4733_v44 = vadd.f32 %v4732_v15, %v4731_v4  ;;  %v4888_v5 = vpop.f32.mrb[32].mxu0  ;;  %v4959_v55 = vpop.f32.mrb[40].mxu1  ;;  %v10999_v15 = vpack.c.bf16 %v5301_v34, %v5297_v63  ;;  %v5305_v4 = vld [vmem:[#allocation12 + $0xc8] sm:$0xff]  ;;  %v5331_v63 = vld [vmem:[#allocation12 + $0x198] sm:$0xff] }
 0xa27   :  { %v4889_v9 = vadd.f32 %v4888_v5, %v4805_v12  ;;  %v4960_v42 = vadd.f32 %v4959_v55, %v4813_v27  ;;  %v4890_v61 = vpop.f32.mrb[33].mxu0  ;;  %v4961_v10 = vpop.f32.mrb[41].mxu1  ;;  %v5298_v12 = vld [vmem:[#allocation12 + $0x90] sm:$0xff]  ;;  %v5304_v55 = vld [vmem:[#allocation12 + $0xc0] sm:$0xff]  ;;  %v5335_v34 = vld [vmem:[#allocation12 + $0x1b8] sm:$0xff] }
 0xa28   :  { %9158 = vtanh.f32 %v4733_v44  ;;  %v4891_v35 = vadd.f32 %v4890_v61, %v4809_v39  ;;  %v4962_v30 = vadd.f32 %v4961_v10, %v4817_v18  ;;  %v5302_v27 = vld [vmem:[#allocation12 + $0xb0] sm:$0xff]  ;;  %v5309_v39 = vld [vmem:[#allocation12 + $0xe8] sm:$0xff]  ;;  %v5311_v18 = vld [vmem:[#allocation12 + $0xf8] sm:$0xff]  ;;  %v11007_v44 = vpack.c.bf16 %v5300_v53, %v5296_v51 }
 0xa29   :  { %v11009_v5 = vpack.c.bf16 %v5302_v27, %v5298_v12  ;;  %v11015_v61 = vpack.c.bf16 %v5311_v18, %v5307_v7  ;;  %v5306_v10 = vld [vmem:[#allocation12 + $0xd0] sm:$0xff]  ;;  %v5328_v51 = vld [vmem:[#allocation12 + $0x180] sm:$0xff]  ;;  %v8424_v12 = vpack.c.bf16 %v5333_v37, %v5329_v24  ;;  %v8456_v27 = vpack.c.bf16 %v5335_v34, %v5331_v63  ;;  %v5337_v7 = vld [vmem:[#allocation12 + $0x1c8] sm:$0xff] }
 0xa2a   :  { %v4968_v58 = vcombine.low %v4889_v9, %v4891_v35  ;;  %v4969_v47 = vcombine.low %v4960_v42, %v4962_v30  ;;  %v5308_v9 = vld [vmem:[#allocation12 + $0xe0] sm:$0xff]  ;;  %v11013_v42 = vpack.c.bf16 %v5309_v39, %v5305_v4  ;;  %v5310_v35 = vld [vmem:[#allocation12 + $0xf0] sm:$0xff]  ;;  %v5317_v30 = vld [vmem:[#allocation12 + $0x128] sm:$0xff] }
 0xa2b   :  { %v11025_v60 = vpack.c.bf16 %v5317_v30, %v5313_v43  ;;  %v5332_v53 = vld [vmem:[#allocation12 + $0x1a0] sm:$0xff]  ;;  %v5330_v4 = vld [vmem:[#allocation12 + $0x190] sm:$0xff]  ;;  %v5341_v18 = vld [vmem:[#allocation12 + $0x1e8] sm:$0xff] }
 0xa2c   :  { %v4976_v49 = vrot.slane %v4968_v58, %v10968_v33  ;;  %v4983_v14 = vrot.slane %v4969_v47, %v10968_v33  ;;  %v5315_v58 = vld [vmem:[#allocation12 + $0x118] sm:$0xff]  ;;  %v5334_v39 = vld [vmem:[#allocation12 + $0x1b0] sm:$0xff]  ;;  %v5336_v43 = vld [vmem:[#allocation12 + $0x1c0] sm:$0xff]  ;;  %v8428_v30 = vpack.c.bf16 %v5341_v18, %v5337_v7 }
 0xa2d   :  { %v5319_v47 = vld [vmem:[#allocation12 + $0x138] sm:$0xff] }
 0xa2e   :  { %v4984_v2 = vcombine.low %v4976_v49, %v4983_v14  ;;  %v4985_v38 = vcombine.high %v4976_v49, %v4983_v14  ;;  %v11019_v49 = vpack.c.bf16 %v5308_v9, %v5304_v55  ;;  %v11021_v14 = vpack.c.bf16 %v5310_v35, %v5306_v10  ;;  %v5339_v55 = vld [vmem:[#allocation12 + $0x1d8] sm:$0xff] }
 0xa2f   :  { %v11027_v48 = vpack.c.bf16 %v5319_v47, %v5315_v58  ;;  %v5343_v9 = vld [vmem:[#allocation12 + $0x1f8] sm:$0xff]  ;;  %v8426_v10 = vpack.c.bf16 %v5332_v53, %v5328_v51  ;;  %v8458_v35 = vpack.c.bf16 %v5334_v39, %v5330_v4  ;;  %v5340_v47 = vld [vmem:[#allocation12 + $0x1e0] sm:$0xff] }
 0xa30   :  { %v4992_v16 = vrot.slane %v4984_v2, %v10968_v33  ;;  %v4999_v36 = vrot.slane %v4985_v38, %v10968_v33  ;;  %v5312_v2 = vld [vmem:[#allocation12 + $0x100] sm:$0xff]  ;;  %v8460_v58 = vpack.c.bf16 %v5343_v9, %v5339_v55  ;;  %v8430_v3 = vpack.c.bf16 %v5340_v47, %v5336_v43 }
 0xa31   :  { %v5316_v38 = vld [vmem:[#allocation12 + $0x120] sm:$0xff] }
 0xa32   :  { %v9159_v31 = vpop.eup %9158  ;;  %5006 = vst.msk [vmem:[#allocation3] ss:$2 sm:$0xf] %vm10973_vm2, %v4992_v16  ;;  %5008 = vst.msk [vmem:[#allocation3 + $0x8] ss:$2 sm:$0xf] %vm10973_vm2, %v4999_v36  ;;  %v11031_v45 = vpack.c.bf16 %v5316_v38, %v5312_v2 }
 0xa33   :  { %v4735_v59 = vmul.f32 %v9159_v31, %v9157_v1  ;;  %v5323_v16 = vld [vmem:[#allocation12 + $0x158] sm:$0xff]  ;;  %v5324_v1 = vld [vmem:[#allocation12 + $0x160] sm:$0xff]  ;;  %v11037_v31 = vpack.c.bf16 %v5325_v21, %v5321_v25  ;;  %v5338_v2 = vld [vmem:[#allocation12 + $0x1d0] sm:$0xff] }
 0xa34   :  { %v5327_v36 = vld [vmem:[#allocation12 + $0x178] sm:$0xff]  ;;  %v8422_v41 = vpack.c.bf16 %v5324_v1, %v5320_v22  ;;  %v5342_v38 = vld [vmem:[#allocation12 + $0x1f0] sm:$0xff] }
 0xa35   :  { %5160 = vmatmul.mubr.f32.vlgmr.msra.gmra.mrb[34].mxu0 %v4735_v59  ;;  %5231 = vmatmul.mubr.f32.vlgmr.msra.gmra.mrb[42].mxu1 %v4735_v59  ;;  %v11039_v62 = vpack.c.bf16 %v5327_v36, %v5323_v16  ;;  %v5326_v59 = vld [vmem:[#allocation12 + $0x170] sm:$0xff]  ;;  %v8462_v40 = vpack.c.bf16 %v5342_v38, %v5338_v2 }
 0xa36   :  { %8403 = vmatpush1.bf16.msra.mxu0 %v10983_v56  ;;  %8435 = vmatpush1.bf16.msra.mxu1 %v10985_v20  ;;  %v8454_v23 = vpack.c.bf16 %v5326_v59, %v5322_v11 }
 0xa37   :  { %8405 = vmatprep.subr.bf16.mxu0 %v10987_v8  ;;  %8437 = vmatprep.subr.bf16.mxu1 %v10989_v52 }
 0xa38   :  { %5408 = vmatprep.mubr.f32.mxu0 %v11771_v0  ;;  %5479 = vmatprep.mubr.f32.mxu1 %v11771_v0 }
 0xa3a   :  { %8407 = vmatpush1.bf16.msra.mxu0 %v10993_v26  ;;  %8439 = vmatpush1.bf16.msra.mxu1 %v10995_v28 }
 0xa3b   :  { %8409 = vmatprep.subr.bf16.mxu0 %v10999_v15  ;;  %8441 = vmatprep.subr.bf16.mxu1 %v11001_v19 }
 0xa3e   :  { %8411 = vmatpush1.bf16.msra.mxu0 %v11007_v44  ;;  %8443 = vmatpush1.bf16.msra.mxu1 %v11009_v5 }
 0xa3f   :  { %8413 = vmatprep.subr.bf16.mxu0 %v11013_v42  ;;  %8445 = vmatprep.subr.bf16.mxu1 %v11015_v61 }
 0xa42   :  { %8415 = vmatpush1.bf16.msra.mxu0 %v11019_v49  ;;  %8447 = vmatpush1.bf16.msra.mxu1 %v11021_v14 }
 0xa43   :  { %8417 = vmatprep.subr.bf16.mxu0 %v11025_v60  ;;  %8449 = vmatprep.subr.bf16.mxu1 %v11027_v48 }
 0xa46   :  { %8419 = vmatpush1.bf16.msra.mxu0 %v11031_v45  ;;  %8451 = vmatpush1.bf16.msra.mxu1 %v11033_v50 }
 0xa47   :  { %8421 = vmatprep.subr.bf16.mxu0 %v11037_v31  ;;  %8453 = vmatprep.subr.bf16.mxu1 %v11039_v62 }
 0xa4a   :  { %8423 = vmatpush1.bf16.msra.mxu0 %v8422_v41  ;;  %8455 = vmatpush1.bf16.msra.mxu1 %v8454_v23 }
 0xa4b   :  { %8425 = vmatprep.subr.bf16.mxu0 %v8424_v12  ;;  %8457 = vmatprep.subr.bf16.mxu1 %v8456_v27 }
 0xa4e   :  { %8427 = vmatpush1.bf16.msra.mxu0 %v8426_v10  ;;  %8459 = vmatpush1.bf16.msra.mxu1 %v8458_v35 }
 0xa4f   :  { %8429 = vmatprep.subr.bf16.mxu0 %v8428_v30  ;;  %8461 = vmatprep.subr.bf16.mxu1 %v8460_v58 }
 0xa52   :  { %8431 = vmatpush1.bf16.msra.mxu0 %v8430_v3  ;;  %8463 = vmatpush1.bf16.msra.mxu1 %v8462_v40 }
 0xa53   :  { %8465 = vmatprep.subr.bf16.mxu0 %v10949_v46  ;;  %8497 = vmatprep.subr.bf16.mxu1 %v10951_v13  ;;  %v5739_v46 = vld [vmem:[#allocation13 + $0x8] sm:$0xff] }
 0xa54   :  { %v5743_v13 = vld [vmem:[#allocation13 + $0x28] sm:$0xff] }
 0xa55   :  { %5409 = vmatmul.mubr.f32.vlgmr.msra.gmra.mrb[36].mxu0 %v11771_v0  ;;  %5480 = vmatmul.mubr.f32.vlgmr.msra.gmra.mrb[44].mxu1 %v11771_v0 }
 0xa56   :  { %8467 = vmatpush1.bf16.msra.mxu0 %v10983_v56  ;;  %8499 = vmatpush1.bf16.msra.mxu1 %v10985_v20  ;;  %v5741_v56 = vld [vmem:[#allocation13 + $0x18] sm:$0xff]  ;;  %v11071_v20 = vpack.c.bf16 %v5743_v13, %v5739_v46  ;;  %v5740_v46 = vld [vmem:[#allocation13 + $0x10] sm:$0xff] }
 0xa57   :  { %8469 = vmatprep.subr.bf16.mxu0 %v10987_v8  ;;  %8501 = vmatprep.subr.bf16.mxu1 %v10989_v52  ;;  %v5745_v8 = vld [vmem:[#allocation13 + $0x38] sm:$0xff]  ;;  %v5744_v13 = vld [vmem:[#allocation13 + $0x30] sm:$0xff] }
 0xa58   :  { %5606 = vmatprep.mubr.f32.mxu0 %v11771_v0  ;;  %5677 = vmatprep.mubr.f32.mxu1 %v11771_v0  ;;  %v11073_v52 = vpack.c.bf16 %v5745_v8, %v5741_v56  ;;  %v5747_v56 = vld [vmem:[#allocation13 + $0x48] sm:$0xff] }
 0xa59   :  { %v5751_v8 = vld [vmem:[#allocation13 + $0x68] sm:$0xff] }
 0xa5a   :  { %8471 = vmatpush1.bf16.msra.mxu0 %v10993_v26  ;;  %8503 = vmatpush1.bf16.msra.mxu1 %v10995_v28  ;;  %v5073_v26 = vld [vmem:[%s11454_s9] sm:$0xf] }
 0xa5b   :  { %8473 = vmatprep.subr.bf16.mxu0 %v10999_v15  ;;  %8505 = vmatprep.subr.bf16.mxu1 %v11001_v19  ;;  %v5078_v28 = vrot.slane %v5073_v26, %v12186_v29  ;;  %v5086_v15 = vrot.slane %v5073_v26, %v12187_v6  ;;  %v5082_v19 = vrot.slane %v5073_v26, %v12188_v54  ;;  %v5997_v6 = vld [vmem:[#allocation15 + $0xf8] sm:$0xff]  ;;  %v6003_v54 = vld [vmem:[#allocation15 + $0x128] sm:$0xff] }
 0xa5c   :  { %v6001_v29 = vld [vmem:[#allocation15 + $0x118] sm:$0xff] }
 0xa5e   :  { %8475 = vmatpush1.bf16.msra.mxu0 %v11007_v44  ;;  %8507 = vmatpush1.bf16.msra.mxu1 %v11009_v5  ;;  %v5090_v44 = vrot.slane %v5073_v26, %v12189_v17  ;;  %v5749_v26 = vld [vmem:[#allocation13 + $0x58] sm:$0xff]  ;;  %v5999_v17 = vld [vmem:[#allocation15 + $0x108] sm:$0xff] }
 0xa5f   :  { %8477 = vmatprep.subr.bf16.mxu0 %v11013_v42  ;;  %8509 = vmatprep.subr.bf16.mxu1 %v11015_v61 }
 0xa62   :  { %8479 = vmatpush1.bf16.msra.mxu0 %v11019_v49  ;;  %8511 = vmatpush1.bf16.msra.mxu1 %v11021_v14 }
 0xa63   :  { %8481 = vmatprep.subr.bf16.mxu0 %v11025_v60  ;;  %8513 = vmatprep.subr.bf16.mxu1 %v11027_v48 }
 0xa66   :  { %8483 = vmatpush1.bf16.msra.mxu0 %v11031_v45  ;;  %8515 = vmatpush1.bf16.msra.mxu1 %v11033_v50 }
 0xa67   :  { %8485 = vmatprep.subr.bf16.mxu0 %v11037_v31  ;;  %8517 = vmatprep.subr.bf16.mxu1 %v11039_v62 }
 0xa6a   :  { %8487 = vmatpush1.bf16.msra.mxu0 %v8422_v41  ;;  %8519 = vmatpush1.bf16.msra.mxu1 %v8454_v23 }
 0xa6b   :  { %8489 = vmatprep.subr.bf16.mxu0 %v8424_v12  ;;  %8521 = vmatprep.subr.bf16.mxu1 %v8456_v27 }
 0xa6e   :  { %8491 = vmatpush1.bf16.msra.mxu0 %v8426_v10  ;;  %8523 = vmatpush1.bf16.msra.mxu1 %v8458_v35 }
 0xa6f   :  { %8493 = vmatprep.subr.bf16.mxu0 %v8428_v30  ;;  %8525 = vmatprep.subr.bf16.mxu1 %v8460_v58 }
 0xa72   :  { %8495 = vmatpush1.bf16.msra.mxu0 %v8430_v3  ;;  %8527 = vmatpush1.bf16.msra.mxu1 %v8462_v40  ;;  %v5738_v3 = vld [vmem:[#allocation13] sm:$0xff] }
 0xa73   :  { %8529 = vmatprep.subr.bf16.mxu0 %v11071_v20  ;;  %8561 = vmatprep.subr.bf16.mxu1 %v11073_v52  ;;  %v5742_v40 = vld [vmem:[#allocation13 + $0x20] sm:$0xff] }
 0xb08   :  { %v5161_v5 = vpop.f32.mrb[34].mxu0  ;;  %v5232_v42 = vpop.f32.mrb[42].mxu1 }
 0xb09   :  { %v5162_v61 = vadd.f32 %v5161_v5, %v5078_v28  ;;  %v5233_v49 = vadd.f32 %v5232_v42, %v5086_v15  ;;  %v5163_v14 = vpop.f32.mrb[35].mxu0  ;;  %v5234_v60 = vpop.f32.mrb[43].mxu1  ;;  %v5753_v28 = vld [vmem:[#allocation13 + $0x78] sm:$0xff]  ;;  %v11099_v5 = vpack.c.bf16 %v5744_v13, %v5740_v46  ;;  %v5746_v42 = vld [vmem:[#allocation13 + $0x40] sm:$0xff] }
 0xb0a   :  { %v5164_v48 = vadd.f32 %v5163_v14, %v5082_v19  ;;  %v5235_v25 = vadd.f32 %v5234_v60, %v5090_v44  ;;  %v11097_v44 = vpack.c.bf16 %v5742_v40, %v5738_v3  ;;  %v11103_v14 = vpack.c.bf16 %v5751_v8, %v5747_v56  ;;  %v5779_v3 = vld [vmem:[#allocation13 + $0x148] sm:$0xff]  ;;  %v5781_v46 = vld [vmem:[#allocation13 + $0x158] sm:$0xff] }
 0xb0b   :  { %v11105_v60 = vpack.c.bf16 %v5753_v28, %v5749_v26  ;;  %v5783_v40 = vld [vmem:[#allocation13 + $0x168] sm:$0xff]  ;;  %v5785_v13 = vld [vmem:[#allocation13 + $0x178] sm:$0xff]  ;;  %v5778_v26 = vld [vmem:[#allocation13 + $0x140] sm:$0xff] }
 0xb0c   :  { %v5241_v21 = vcombine.low %v5162_v61, %v5164_v48  ;;  %v5242_v16 = vcombine.low %v5233_v49, %v5235_v25  ;;  %v5750_v61 = vld [vmem:[#allocation13 + $0x60] sm:$0xff]  ;;  %v5748_v48 = vld [vmem:[#allocation13 + $0x50] sm:$0xff] }
 0xb0d   :  { %v5752_v25 = vld [vmem:[#allocation13 + $0x70] sm:$0xff]  ;;  %v5782_v28 = vld [vmem:[#allocation13 + $0x160] sm:$0xff] }
 0xb0e   :  { %v5249_v36 = vrot.slane %v5241_v21, %v10968_v33  ;;  %v5256_v45 = vrot.slane %v5242_v16, %v10968_v33  ;;  %v5755_v21 = vld [vmem:[#allocation13 + $0x88] sm:$0xff] }
 0xb0f   :  { %v5759_v16 = vld [vmem:[#allocation13 + $0xa8] sm:$0xff] }
 0xb10   :  { %v5257_v50 = vcombine.low %v5249_v36, %v5256_v45  ;;  %v5258_v22 = vcombine.high %v5249_v36, %v5256_v45  ;;  %v5757_v36 = vld [vmem:[#allocation13 + $0x98] sm:$0xff] }
 0xb11   :  { %v5761_v45 = vld [vmem:[#allocation13 + $0xb8] sm:$0xff] }
 0xb12   :  { %v5265_v1 = vrot.slane %v5257_v50, %v10968_v33  ;;  %v5272_v31 = vrot.slane %v5258_v22, %v10968_v33  ;;  %v11111_v50 = vpack.c.bf16 %v5750_v61, %v5746_v42  ;;  %v11113_v22 = vpack.c.bf16 %v5752_v25, %v5748_v48  ;;  %v5780_v42 = vld [vmem:[#allocation13 + $0x150] sm:$0xff]  ;;  %v5787_v48 = vld [vmem:[#allocation13 + $0x188] sm:$0xff] }
 0xb13   :  { %v5784_v61 = vld [vmem:[#allocation13 + $0x170] sm:$0xff]  ;;  %v5791_v25 = vld [vmem:[#allocation13 + $0x1a8] sm:$0xff] }
 0xb14   :  { %5276 = vst.msk [vmem:[#allocation3 + $0x1] ss:$2 sm:$0xf] %vm10973_vm2, %v5265_v1  ;;  %5278 = vst.msk [vmem:[#allocation3 + $0x9] ss:$2 sm:$0xf] %vm10973_vm2, %v5272_v31 }
 0xb15   :  { %v5754_v1 = vld [vmem:[#allocation13 + $0x80] sm:$0xff] }
 0xb16   :  { %v5758_v31 = vld [vmem:[#allocation13 + $0xa0] sm:$0xff] }
 0xb1b   :  { %v5279_v51 = vld [vmem:[#allocation3] sm:$0xff] }
 0xb28   :  { %v5410_v62 = vpop.f32.mrb[36].mxu0  ;;  %v5481_v11 = vpop.f32.mrb[44].mxu1 }
 0xb29   :  { %v5412_v59 = vpop.f32.mrb[37].mxu0  ;;  %v5483_v24 = vpop.f32.mrb[45].mxu1 }
 0xb2a   :  { %v5490_v37 = vcombine.low %v5410_v62, %v5412_v59  ;;  %v5491_v63 = vcombine.low %v5481_v11, %v5483_v24  ;;  %v11117_v62 = vpack.c.bf16 %v5759_v16, %v5755_v21  ;;  %v11119_v11 = vpack.c.bf16 %v5761_v45, %v5757_v36  ;;  %v5756_v59 = vld [vmem:[#allocation13 + $0x90] sm:$0xff]  ;;  %v5789_v21 = vld [vmem:[#allocation13 + $0x198] sm:$0xff] }
 0xb2b   :  { %v5760_v24 = vld [vmem:[#allocation13 + $0xb0] sm:$0xff]  ;;  %v5793_v16 = vld [vmem:[#allocation13 + $0x1b8] sm:$0xff]  ;;  %v11161_v36 = vpack.c.bf16 %v5782_v28, %v5778_v26  ;;  %v11163_v45 = vpack.c.bf16 %v5784_v61, %v5780_v42  ;;  %v5966_v26 = vld [vmem:[#allocation15] sm:$0xff] }
 0xb2c   :  { %v5498_v34 = vrot.slane %v5490_v37, %v9796_v57  ;;  %v5505_v41 = vrot.slane %v5491_v63, %v9796_v57  ;;  %v5763_v37 = vld [vmem:[#allocation13 + $0xc8] sm:$0xff]  ;;  %v5970_v28 = vld [vmem:[#allocation15 + $0x20] sm:$0xff] }
 0xb2d   :  { %v5767_v63 = vld [vmem:[#allocation13 + $0xe8] sm:$0xff] }
 0xb2e   :  { %v5506_v23 = vcombine.low %v5498_v34, %v5505_v41  ;;  %v5765_v34 = vld [vmem:[#allocation13 + $0xd8] sm:$0xff] }
 0xb2f   :  { %v5769_v41 = vld [vmem:[#allocation13 + $0xf8] sm:$0xff] }
 0xb30   :  { %v5508_v53 = vadd.f32 %v5506_v23, %v5279_v51  ;;  %v11125_v23 = vpack.c.bf16 %v5758_v31, %v5754_v1  ;;  %v11127_v51 = vpack.c.bf16 %v5760_v24, %v5756_v59  ;;  %v5786_v1 = vld [vmem:[#allocation13 + $0x180] sm:$0xff]  ;;  %v11167_v59 = vpack.c.bf16 %v5791_v25, %v5787_v48  ;;  %v5968_v48 = vld [vmem:[#allocation15 + $0x10] sm:$0xff] }
 0xb31   :  { %v5790_v31 = vld [vmem:[#allocation13 + $0x1a0] sm:$0xff]  ;;  %v11169_v24 = vpack.c.bf16 %v5793_v16, %v5789_v21  ;;  %v5972_v25 = vld [vmem:[#allocation15 + $0x30] sm:$0xff]  ;;  %v5975_v21 = vld [vmem:[#allocation15 + $0x48] sm:$0xff] }
 0xb32   :  { %v6671_v33 = vmul.f32 -1.442695, %v5508_v53  ;;  %v5516_v12 = vrot.slane %v5508_v53, 2  ;;  %v5527_v32 = vrot.slane %v5508_v53, 6  ;;  %v5524_v7 = vrot.slane %v5508_v53, 4  ;;  %v5762_v53 = vld [vmem:[#allocation13 + $0xc0] sm:$0xff] }
 0xb33   :  { %v5979_v16 = vld [vmem:[#allocation15 + $0x68] sm:$0xff] }
 0xb34   :  { %9160 = vpow2.f32 %v6671_v33  ;;  %v6672_v27 = vmul.f32 -1.442695, %v5516_v12  ;;  %v6673_v4 = vmul.f32 -1.442695, %v5527_v32  ;;  %v5766_v33 = vld [vmem:[#allocation13 + $0xe0] sm:$0xff]  ;;  %v11131_v12 = vpack.c.bf16 %v5767_v63, %v5763_v37  ;;  %v5764_v32 = vld [vmem:[#allocation13 + $0xd0] sm:$0xff] }
 0xb35   :  { %v5788_v37 = vld [vmem:[#allocation13 + $0x190] sm:$0xff] }
 0xb36   :  { %9162 = vpow2.f32 %v6672_v27  ;;  %v11133_v27 = vpack.c.bf16 %v5769_v41, %v5765_v34  ;;  %v5792_v63 = vld [vmem:[#allocation13 + $0x1b0] sm:$0xff]  ;;  %v5795_v34 = vld [vmem:[#allocation13 + $0x1c8] sm:$0xff] }
 0xb37   :  { %9164 = vpow2.f32 %v6673_v4  ;;  %v5768_v4 = vld [vmem:[#allocation13 + $0xf0] sm:$0xff]  ;;  %v5799_v41 = vld [vmem:[#allocation13 + $0x1e8] sm:$0xff] }
 0xb3e   :  { %v9161_v39 = vpop.eup %9160 }
 0xb3f   :  { %v5512_v18 = vadd.f32 1.0, %v9161_v39  ;;  %v5771_v39 = vld [vmem:[#allocation13 + $0x108] sm:$0xff] }
 0xb40   :  { %v9163_v55 = vpop.eup %9162 }
 0xb41   :  { %9166 = vrcp.f32 %v5512_v18  ;;  %v5521_v9 = vadd.f32 1.0, %v9163_v55  ;;  %v9165_v10 = vpop.eup %9164  ;;  %v5773_v18 = vld [vmem:[#allocation13 + $0x118] sm:$0xff] }
 0xb42   :  { %9168 = vtanh.f32 %v5524_v7  ;;  %v5532_v58 = vadd.f32 1.0, %v9165_v10  ;;  %v5775_v7 = vld [vmem:[#allocation13 + $0x128] sm:$0xff]  ;;  %v5777_v55 = vld [vmem:[#allocation13 + $0x138] sm:$0xff]  ;;  %v11139_v10 = vpack.c.bf16 %v5768_v4, %v5764_v32  ;;  %v11173_v32 = vpack.c.bf16 %v5790_v31, %v5786_v1 }
 0xb43   :  { %9170 = vrcp.f32 %v5521_v9  ;;  %v11137_v9 = vpack.c.bf16 %v5766_v33, %v5762_v53  ;;  %v5797_v53 = vld [vmem:[#allocation13 + $0x1d8] sm:$0xff]  ;;  %v11175_v4 = vpack.c.bf16 %v5792_v63, %v5788_v37  ;;  %v11197_v37 = vpack.c.bf16 %v5970_v28, %v5966_v26  ;;  %v5982_v26 = vld [vmem:[#allocation15 + $0x80] sm:$0xff] }
 0xb44   :  { %9172 = vrcp.f32 %v5532_v58  ;;  %v11145_v58 = vpack.c.bf16 %v5777_v55, %v5773_v18  ;;  %v5801_v33 = vld [vmem:[#allocation13 + $0x1f8] sm:$0xff]  ;;  %v11179_v18 = vpack.c.bf16 %v5799_v41, %v5795_v34  ;;  %v11199_v63 = vpack.c.bf16 %v5972_v25, %v5968_v48  ;;  %v5974_v34 = vld [vmem:[#allocation15 + $0x40] sm:$0xff] }
 0xb45   :  { %v11181_v55 = vpack.c.bf16 %v5801_v33, %v5797_v53  ;;  %v5977_v1 = vld [vmem:[#allocation15 + $0x58] sm:$0xff]  ;;  %v5978_v41 = vld [vmem:[#allocation15 + $0x60] sm:$0xff]  ;;  %v11203_v53 = vpack.c.bf16 %v5979_v16, %v5975_v21  ;;  %v5984_v21 = vld [vmem:[#allocation15 + $0x90] sm:$0xff] }
 0xb46   :  { %v5981_v31 = vld [vmem:[#allocation15 + $0x78] sm:$0xff]  ;;  %v5986_v28 = vld [vmem:[#allocation15 + $0xa0] sm:$0xff]  ;;  %v5991_v16 = vld [vmem:[#allocation15 + $0xc8] sm:$0xff] }
 0xb47   :  { %v11205_v33 = vpack.c.bf16 %v5981_v31, %v5977_v1  ;;  %v5995_v1 = vld [vmem:[#allocation15 + $0xe8] sm:$0xff]  ;;  %v5993_v31 = vld [vmem:[#allocation15 + $0xd8] sm:$0xff] }
 0xb4b   :  { %v9167_v35 = vpop.eup %9166 }
 0xb4c   :  { %v9169_v43 = vpop.eup %9168 }
 0xb4d   :  { %v9171_v30 = vpop.eup %9170  ;;  %v5536_v2 = vmul.f32 %v9169_v43, %v9167_v35  ;;  %v5770_v35 = vld [vmem:[#allocation13 + $0x100] sm:$0xff] }
 0xb4e   :  { %v5535_v47 = vmul.f32 0.0, %v9171_v30  ;;  %v9173_v15 = vpop.eup %9172  ;;  %v5774_v43 = vld [vmem:[#allocation13 + $0x120] sm:$0xff]  ;;  %v11143_v30 = vpack.c.bf16 %v5775_v7, %v5771_v39 }
 0xb4f   :  { %v11149_v56 = vpack.c.bf16 %v5774_v43, %v5770_v35  ;;  %v5794_v39 = vld [vmem:[#allocation13 + $0x1c0] sm:$0xff]  ;;  %v5796_v35 = vld [vmem:[#allocation13 + $0x1d0] sm:$0xff] }
 0xb50   :  { %v11094_v38 = vadd.f32 %v5536_v2, %v5535_v47  ;;  %v5772_v47 = vld [vmem:[#allocation13 + $0x110] sm:$0xff]  ;;  %v5798_v7 = vld [vmem:[#allocation13 + $0x1e0] sm:$0xff] }
 0xb51   :  { %v5776_v2 = vld [vmem:[#allocation13 + $0x130] sm:$0xff] }
 0xb52   :  { %9174 = vtanh.f32 %v11094_v38  ;;  %v11151_v8 = vpack.c.bf16 %v5776_v2, %v5772_v47  ;;  %v5800_v43 = vld [vmem:[#allocation13 + $0x1f0] sm:$0xff]  ;;  %v5967_v47 = vld [vmem:[#allocation15 + $0x8] sm:$0xff] }
 0xb53   :  { %v5971_v2 = vld [vmem:[#allocation15 + $0x28] sm:$0xff] }
 0xb54   :  { %v11191_v42 = vpack.c.bf16 %v5971_v2, %v5967_v47  ;;  %v5985_v47 = vld [vmem:[#allocation15 + $0x98] sm:$0xff] }
 0xb55   :  { %v5989_v2 = vld [vmem:[#allocation15 + $0xb8] sm:$0xff] }
 0xb56   :  { %v11219_v25 = vpack.c.bf16 %v5989_v2, %v5985_v47  ;;  %v5992_v47 = vld [vmem:[#allocation15 + $0xd0] sm:$0xff] }
 0xb57   :  { %v5996_v2 = vld [vmem:[#allocation15 + $0xf0] sm:$0xff] }
 0xb58   :  { %12196 = vst [vmem:[#allocation75_spill] sm:$0xff] %v11219_v25 }
 0xb5c   :  { %v9175_v19 = vpop.eup %9174 }
 0xb5d   :  { %v11101_v49 = vmul.f32 %v9175_v19, %v9173_v15  ;;  %v11155_v15 = vpack.c.bf16 %v5783_v40, %v5779_v3  ;;  %v11157_v19 = vpack.c.bf16 %v5785_v13, %v5781_v46  ;;  %v5969_v3 = vld [vmem:[#allocation15 + $0x18] sm:$0xff]  ;;  %v11185_v46 = vpack.c.bf16 %v5798_v7, %v5794_v39  ;;  %v5976_v39 = vld [vmem:[#allocation15 + $0x50] sm:$0xff] }
 0xb5e   :  { %v5973_v40 = vld [vmem:[#allocation15 + $0x38] sm:$0xff]  ;;  %v11187_v13 = vpack.c.bf16 %v5800_v43, %v5796_v35  ;;  %v5980_v7 = vld [vmem:[#allocation15 + $0x70] sm:$0xff]  ;;  %v5983_v35 = vld [vmem:[#allocation15 + $0x88] sm:$0xff] }
 0xb5f   :  { %5607 = vmatmul.mubr.f32.vlgmr.msra.gmra.mrb[38].mxu0 %v11101_v49  ;;  %5678 = vmatmul.mubr.f32.vlgmr.msra.gmra.mrb[46].mxu1 %v11101_v49  ;;  %v11193_v61 = vpack.c.bf16 %v5973_v40, %v5969_v3  ;;  %v5987_v43 = vld [vmem:[#allocation15 + $0xa8] sm:$0xff]  ;;  %v11211_v3 = vpack.c.bf16 %v5978_v41, %v5974_v34  ;;  %v11213_v40 = vpack.c.bf16 %v5980_v7, %v5976_v39  ;;  %v5990_v39 = vld [vmem:[#allocation15 + $0xc0] sm:$0xff] }
 0xb60   :  { %8531 = vmatpush1.bf16.msra.mxu0 %v11097_v44  ;;  %8563 = vmatpush1.bf16.msra.mxu1 %v11099_v5  ;;  %v11217_v48 = vpack.c.bf16 %v5987_v43, %v5983_v35  ;;  %v11225_v34 = vpack.c.bf16 %v5986_v28, %v5982_v26  ;;  %v5994_v7 = vld [vmem:[#allocation15 + $0xe0] sm:$0xff]  ;;  %v11231_v35 = vpack.c.bf16 %v5995_v1, %v5991_v16  ;;  %v6000_v1 = vld [vmem:[#allocation15 + $0x110] sm:$0xff] }
 0xb61   :  { %8533 = vmatprep.subr.bf16.mxu0 %v11103_v14  ;;  %8565 = vmatprep.subr.bf16.mxu1 %v11105_v60  ;;  %12194 = vst [vmem:[#allocation67_spill] sm:$0xff] %v11213_v40  ;;  %v11233_v43 = vpack.c.bf16 %v5997_v6, %v5993_v31  ;;  %v11237_v26 = vpack.c.bf16 %v5994_v7, %v5990_v39  ;;  %v6004_v31 = vld [vmem:[#allocation15 + $0x130] sm:$0xff] }
 0xb62   :  { %5888 = vmatprep.mubr.f32.mxu0 %v11771_v0  ;;  %5959 = vmatprep.mubr.f32.mxu1 %v11771_v0  ;;  %12195 = vst [vmem:[#allocation66_spill] sm:$0xff] %v11217_v48  ;;  %12197 = vst [vmem:[#allocation89_spill] sm:$0xff] %v11225_v34  ;;  %v11239_v28 = vpack.c.bf16 %v5996_v2, %v5992_v47  ;;  %v11243_v6 = vpack.c.bf16 %v6003_v54, %v5999_v17  ;;  %v6006_v47 = vld [vmem:[#allocation15 + $0x140] sm:$0xff]  ;;  %v6008_v17 = vld [vmem:[#allocation15 + $0x150] sm:$0xff] }
 0xb63   :  { %12199 = vst [vmem:[#allocation91_spill] sm:$0xff] %v11231_v35  ;;  %12200 = vst [vmem:[#allocation95_spill] sm:$0xff] %v11233_v43  ;;  %v11251_v7 = vpack.c.bf16 %v6004_v31, %v6000_v1  ;;  %v6010_v2 = vld [vmem:[#allocation15 + $0x160] sm:$0xff] }
 0xb64   :  { %8535 = vmatpush1.bf16.msra.mxu0 %v11111_v50  ;;  %8567 = vmatpush1.bf16.msra.mxu1 %v11113_v22  ;;  %12201 = vst [vmem:[#allocation96_spill] sm:$0xff] %v11237_v26  ;;  %12202 = vst [vmem:[#allocation98_spill] sm:$0xff] %v11239_v28  ;;  %v6014_v1 = vld [vmem:[#allocation15 + $0x180] sm:$0xff] }
 0xb65   :  { %8537 = vmatprep.subr.bf16.mxu0 %v11117_v62  ;;  %8569 = vmatprep.subr.bf16.mxu1 %v11119_v11  ;;  %12203 = vst [vmem:[#allocation68_spill] sm:$0xff] %v11243_v6  ;;  %12206 = vst [vmem:[#allocation71_spill] sm:$0xff] %v11251_v7  ;;  %v6018_v31 = vld [vmem:[#allocation15 + $0x1a0] sm:$0xff] }
 0xb68   :  { %8539 = vmatpush1.bf16.msra.mxu0 %v11125_v23  ;;  %8571 = vmatpush1.bf16.msra.mxu1 %v11127_v51 }
 0xb69   :  { %8541 = vmatprep.subr.bf16.mxu0 %v11131_v12  ;;  %8573 = vmatprep.subr.bf16.mxu1 %v11133_v27 }
 0xb6c   :  { %8543 = vmatpush1.bf16.msra.mxu0 %v11137_v9  ;;  %8575 = vmatpush1.bf16.msra.mxu1 %v11139_v10 }
 0xb6d   :  { %8545 = vmatprep.subr.bf16.mxu0 %v11143_v30  ;;  %8577 = vmatprep.subr.bf16.mxu1 %v11145_v58 }
 0xb70   :  { %8547 = vmatpush1.bf16.msra.mxu0 %v11149_v56  ;;  %8579 = vmatpush1.bf16.msra.mxu1 %v11151_v8 }
 0xb71   :  { %8549 = vmatprep.subr.bf16.mxu0 %v11155_v15  ;;  %8581 = vmatprep.subr.bf16.mxu1 %v11157_v19 }
 0xb74   :  { %8551 = vmatpush1.bf16.msra.mxu0 %v11161_v36  ;;  %8583 = vmatpush1.bf16.msra.mxu1 %v11163_v45 }
 0xb75   :  { %8553 = vmatprep.subr.bf16.mxu0 %v11167_v59  ;;  %8585 = vmatprep.subr.bf16.mxu1 %v11169_v24 }
 0xb78   :  { %8555 = vmatpush1.bf16.msra.mxu0 %v11173_v32  ;;  %8587 = vmatpush1.bf16.msra.mxu1 %v11175_v4 }
 0xb79   :  { %8557 = vmatprep.subr.bf16.mxu0 %v11179_v18  ;;  %8589 = vmatprep.subr.bf16.mxu1 %v11181_v55 }
 0xb7c   :  { %8559 = vmatpush1.bf16.msra.mxu0 %v11185_v46  ;;  %8591 = vmatpush1.bf16.msra.mxu1 %v11187_v13 }
 0xb7d   :  { %8593 = vmatprep.subr.bf16.mxu0 %v11191_v42  ;;  %8625 = vmatprep.subr.bf16.mxu1 %v11193_v61 }
 0xb7f   :  { %5889 = vmatmul.mubr.f32.vlgmr.msra.gmra.mrb[40].mxu0 %v11101_v49  ;;  %5960 = vmatmul.mubr.f32.vlgmr.msra.gmra.mrb[48].mxu1 %v11101_v49  ;;  %v5988_v49 = vld [vmem:[#allocation15 + $0xb0] sm:$0xff] }
 0xb80   :  { %8595 = vmatpush1.bf16.msra.mxu0 %v11197_v37  ;;  %8627 = vmatpush1.bf16.msra.mxu1 %v11199_v63  ;;  %v11227_v41 = vpack.c.bf16 %v5988_v49, %v5984_v21  ;;  %v5998_v21 = vld [vmem:[#allocation15 + $0x100] sm:$0xff] }
 0xb81   :  { %8597 = vmatprep.subr.bf16.mxu0 %v11203_v53  ;;  %8629 = vmatprep.subr.bf16.mxu1 %v11205_v33  ;;  %v6002_v49 = vld [vmem:[#allocation15 + $0x120] sm:$0xff] }
 0xb82   :  { %6094 = vmatprep.mubr.f32.mxu0 %v11771_v0  ;;  %6165 = vmatprep.mubr.f32.mxu1 %v11771_v0  ;;  %12198 = vst [vmem:[#allocation90_spill] sm:$0xff] %v11227_v41  ;;  %v11249_v39 = vpack.c.bf16 %v6002_v49, %v5998_v21  ;;  %v11261_v21 = vpack.c.bf16 %v6010_v2, %v6006_v47 }
 0xb83   :  { %v11273_v47 = vpack.c.bf16 %v6018_v31, %v6014_v1 }
 0xb84   :  { %8599 = vmatpush1.bf16.msra.mxu0 %v11211_v3  ;;  %8631 = vmatpush1.bf16.msra.mxu1 %v11213_v40  ;;  %v6005_v40 = vld [vmem:[#allocation15 + $0x138] sm:$0xff]  ;;  %12205 = vst [vmem:[#allocation70_spill] sm:$0xff] %v11249_v39 }
 0xb85   :  { %8601 = vmatprep.subr.bf16.mxu0 %v11217_v48  ;;  %8633 = vmatprep.subr.bf16.mxu1 %v11219_v25  ;;  %v11245_v16 = vpack.c.bf16 %v6005_v40, %v6001_v29  ;;  %v6007_v25 = vld [vmem:[#allocation15 + $0x148] sm:$0xff]  ;;  %v6009_v48 = vld [vmem:[#allocation15 + $0x158] sm:$0xff]  ;;  %v6012_v40 = vld [vmem:[#allocation15 + $0x170] sm:$0xff] }
 0xb86   :  { %v11263_v49 = vpack.c.bf16 %v6012_v40, %v6008_v17  ;;  %v6022_v17 = vld [vmem:[#allocation15 + $0x1c0] sm:$0xff]  ;;  %v6028_v40 = vld [vmem:[#allocation15 + $0x1f0] sm:$0xff] }
 0xb87   :  { %12204 = vst [vmem:[#allocation69_spill] sm:$0xff] %v11245_v16 }
 0xb88   :  { %8603 = vmatpush1.bf16.msra.mxu0 %v11225_v34  ;;  %8635 = vmatpush1.bf16.msra.mxu1 %v11227_v41  ;;  %v6011_v34 = vld [vmem:[#allocation15 + $0x168] sm:$0xff]  ;;  %v6013_v41 = vld [vmem:[#allocation15 + $0x178] sm:$0xff] }
 0xb89   :  { %8605 = vmatprep.subr.bf16.mxu0 %v11231_v35  ;;  %8637 = vmatprep.subr.bf16.mxu1 %v11233_v43  ;;  %v11255_v29 = vpack.c.bf16 %v6011_v34, %v6007_v25  ;;  %v11257_v54 = vpack.c.bf16 %v6013_v41, %v6009_v48  ;;  %v6015_v43 = vld [vmem:[#allocation15 + $0x188] sm:$0xff]  ;;  %v6017_v35 = vld [vmem:[#allocation15 + $0x198] sm:$0xff]  ;;  %v6016_v34 = vld [vmem:[#allocation15 + $0x190] sm:$0xff] }
 0xb8a   :  { %v6020_v41 = vld [vmem:[#allocation15 + $0x1b0] sm:$0xff] }
 0xb8b   :  { %v11275_v2 = vpack.c.bf16 %v6020_v41, %v6016_v34 }
 0xb8c   :  { %8607 = vmatpush1.bf16.msra.mxu0 %v11237_v26  ;;  %8639 = vmatpush1.bf16.msra.mxu1 %v11239_v28  ;;  %v6019_v26 = vld [vmem:[#allocation15 + $0x1a8] sm:$0xff]  ;;  %v6021_v28 = vld [vmem:[#allocation15 + $0x1b8] sm:$0xff] }
 0xb8d   :  { %8609 = vmatprep.subr.bf16.mxu0 %v11243_v6  ;;  %8641 = vmatprep.subr.bf16.mxu1 %v11245_v16  ;;  %v11267_v48 = vpack.c.bf16 %v6019_v26, %v6015_v43  ;;  %v11269_v25 = vpack.c.bf16 %v6021_v28, %v6017_v35  ;;  %v6023_v16 = vld [vmem:[#allocation15 + $0x1c8] sm:$0xff]  ;;  %v6025_v6 = vld [vmem:[#allocation15 + $0x1d8] sm:$0xff]  ;;  %v6026_v26 = vld [vmem:[#allocation15 + $0x1e0] sm:$0xff] }
 0xb8e   :  { %v6024_v28 = vld [vmem:[#allocation15 + $0x1d0] sm:$0xff]  ;;  %v11285_v1 = vpack.c.bf16 %v6026_v26, %v6022_v17  ;;  %v12214_v17 = vld [vmem:[#allocation91_spill] sm:$0xff] }
 0xb8f   :  { %v11287_v31 = vpack.c.bf16 %v6028_v40, %v6024_v28  ;;  %v12215_v26 = vld [vmem:[#allocation95_spill] sm:$0xff] }
 0xb90   :  { %8611 = vmatpush1.bf16.msra.mxu0 %v11249_v39  ;;  %8643 = vmatpush1.bf16.msra.mxu1 %v11251_v7  ;;  %v6027_v39 = vld [vmem:[#allocation15 + $0x1e8] sm:$0xff]  ;;  %v6029_v7 = vld [vmem:[#allocation15 + $0x1f8] sm:$0xff] }
 0xb91   :  { %8613 = vmatprep.subr.bf16.mxu0 %v11255_v29  ;;  %8645 = vmatprep.subr.bf16.mxu1 %v11257_v54  ;;  %v11279_v35 = vpack.c.bf16 %v6027_v39, %v6023_v16  ;;  %v11281_v43 = vpack.c.bf16 %v6029_v7, %v6025_v6  ;;  %v12212_v39 = vld [vmem:[#allocation89_spill] sm:$0xff]  ;;  %v12213_v7 = vld [vmem:[#allocation90_spill] sm:$0xff] }
 0xb94   :  { %8615 = vmatpush1.bf16.msra.mxu0 %v11261_v21  ;;  %8647 = vmatpush1.bf16.msra.mxu1 %v11263_v49 }
 0xb95   :  { %8617 = vmatprep.subr.bf16.mxu0 %v11267_v48  ;;  %8649 = vmatprep.subr.bf16.mxu1 %v11269_v25 }
 0xb98   :  { %8619 = vmatpush1.bf16.msra.mxu0 %v11273_v47  ;;  %8651 = vmatpush1.bf16.msra.mxu1 %v11275_v2 }
 0xb99   :  { %8621 = vmatprep.subr.bf16.mxu0 %v11279_v35  ;;  %8653 = vmatprep.subr.bf16.mxu1 %v11281_v43 }
 0xb9c   :  { %8623 = vmatpush1.bf16.msra.mxu0 %v11285_v1  ;;  %8655 = vmatpush1.bf16.msra.mxu1 %v11287_v31 }
 0xb9d   :  { %8657 = vmatprep.subr.bf16.mxu0 %v11071_v20  ;;  %8689 = vmatprep.subr.bf16.mxu1 %v11073_v52 }
 0xb9f   :  { %6095 = vmatmul.mubr.f32.vlgmr.msra.gmra.mrb[40].mxu0 %v11771_v0  ;;  %6166 = vmatmul.mubr.f32.vlgmr.msra.gmra.mrb[48].mxu1 %v11771_v0 }
 0xba0   :  { %8659 = vmatpush1.bf16.msra.mxu0 %v11097_v44  ;;  %8691 = vmatpush1.bf16.msra.mxu1 %v11099_v5 }
 0xba1   :  { %8661 = vmatprep.subr.bf16.mxu0 %v11103_v14  ;;  %8693 = vmatprep.subr.bf16.mxu1 %v11105_v60 }
 0xba2   :  { %6264 = vmatprep.mubr.f32.mxu0 %v11771_v0  ;;  %6335 = vmatprep.mubr.f32.mxu1 %v11771_v0 }
 0xba4   :  { %8663 = vmatpush1.bf16.msra.mxu0 %v11111_v50  ;;  %8695 = vmatpush1.bf16.msra.mxu1 %v11113_v22 }
 0xba5   :  { %8665 = vmatprep.subr.bf16.mxu0 %v11117_v62  ;;  %8697 = vmatprep.subr.bf16.mxu1 %v11119_v11  ;;  %v5541_v11 = vld [vmem:[#allocation3 + $0x8] sm:$0xff] }
 0xba8   :  { %8667 = vmatpush1.bf16.msra.mxu0 %v11125_v23  ;;  %8699 = vmatpush1.bf16.msra.mxu1 %v11127_v51 }
 0xba9   :  { %8669 = vmatprep.subr.bf16.mxu0 %v11131_v12  ;;  %8701 = vmatprep.subr.bf16.mxu1 %v11133_v27 }
 0xbac   :  { %8671 = vmatpush1.bf16.msra.mxu0 %v11137_v9  ;;  %8703 = vmatpush1.bf16.msra.mxu1 %v11139_v10 }
 0xbad   :  { %8673 = vmatprep.subr.bf16.mxu0 %v11143_v30  ;;  %8705 = vmatprep.subr.bf16.mxu1 %v11145_v58 }
 0xbb0   :  { %8675 = vmatpush1.bf16.msra.mxu0 %v11149_v56  ;;  %8707 = vmatpush1.bf16.msra.mxu1 %v11151_v8 }
 0xbb1   :  { %8677 = vmatprep.subr.bf16.mxu0 %v11155_v15  ;;  %8709 = vmatprep.subr.bf16.mxu1 %v11157_v19 }
 0xbb4   :  { %8679 = vmatpush1.bf16.msra.mxu0 %v11161_v36  ;;  %8711 = vmatpush1.bf16.msra.mxu1 %v11163_v45 }
 0xbb5   :  { %8681 = vmatprep.subr.bf16.mxu0 %v11167_v59  ;;  %8713 = vmatprep.subr.bf16.mxu1 %v11169_v24 }
 0xbb8   :  { %8683 = vmatpush1.bf16.msra.mxu0 %v11173_v32  ;;  %8715 = vmatpush1.bf16.msra.mxu1 %v11175_v4 }
 0xbb9   :  { %8685 = vmatprep.subr.bf16.mxu0 %v11179_v18  ;;  %8717 = vmatprep.subr.bf16.mxu1 %v11181_v55 }
 0xbbc   :  { %8687 = vmatpush1.bf16.msra.mxu0 %v11185_v46  ;;  %8719 = vmatpush1.bf16.msra.mxu1 %v11187_v13  ;;  %v12207_v13 = vld [vmem:[#allocation67_spill] sm:$0xff] }
 0xbbd   :  { %8721 = vmatprep.subr.bf16.mxu0 %v11191_v42  ;;  %8753 = vmatprep.subr.bf16.mxu1 %v11193_v61  ;;  %v12208_v42 = vld [vmem:[#allocation55_spill] sm:$0xff] }
 0xc32   :  { %v5608_v20 = vpop.f32.mrb[38].mxu0  ;;  %v5679_v52 = vpop.f32.mrb[46].mxu1 }
 0xc33   :  { %v5610_v44 = vpop.f32.mrb[39].mxu0  ;;  %v5681_v5 = vpop.f32.mrb[47].mxu1 }
 0xc34   :  { %v5688_v14 = vcombine.low %v5608_v20, %v5610_v44  ;;  %v5689_v60 = vcombine.low %v5679_v52, %v5681_v5  ;;  %v12216_v52 = vld [vmem:[#allocation58_spill] sm:$0xff]  ;;  %v12217_v5 = vld [vmem:[#allocation96_spill] sm:$0xff] }
 0xc36   :  { %v5696_v50 = vrot.slane %v5688_v14, %v9796_v57  ;;  %v5703_v22 = vrot.slane %v5689_v60, %v9796_v57  ;;  %v12218_v14 = vld [vmem:[#allocation98_spill] sm:$0xff]  ;;  %v12219_v60 = vld [vmem:[#allocation68_spill] sm:$0xff] }
 0xc38   :  { %v5704_v62 = vcombine.low %v5696_v50, %v5703_v22  ;;  %v12220_v50 = vld [vmem:[#allocation69_spill] sm:$0xff] }
 0xc3a   :  { %v5706_v23 = vadd.f32 %v5704_v62, %v5541_v11  ;;  %v12221_v62 = vld [vmem:[#allocation70_spill] sm:$0xff]  ;;  %v12222_v11 = vld [vmem:[#allocation71_spill] sm:$0xff] }
 0xc3c   :  { %v6674_v51 = vmul.f32 -1.442695, %v5706_v23  ;;  %v5714_v12 = vrot.slane %v5706_v23, 2  ;;  %v5725_v9 = vrot.slane %v5706_v23, 6  ;;  %v5722_v58 = vrot.slane %v5706_v23, 4  ;;  %v12223_v23 = vld [vmem:[#allocation57_spill] sm:$0xff] }
 0xc3e   :  { %9176 = vpow2.f32 %v6674_v51  ;;  %v6675_v27 = vmul.f32 -1.442695, %v5714_v12  ;;  %v6676_v10 = vmul.f32 -1.442695, %v5725_v9 }
 0xc40   :  { %9178 = vpow2.f32 %v6675_v27 }
 0xc41   :  { %9180 = vpow2.f32 %v6676_v10 }
 0xc48   :  { %v9177_v30 = vpop.eup %9176 }
 0xc49   :  { %v5710_v56 = vadd.f32 1.0, %v9177_v30 }
 0xc4a   :  { %v9179_v8 = vpop.eup %9178 }
 0xc4b   :  { %9182 = vrcp.f32 %v5710_v56  ;;  %v5719_v15 = vadd.f32 1.0, %v9179_v8  ;;  %v9181_v57 = vpop.eup %9180 }
 0xc4c   :  { %9184 = vtanh.f32 %v5722_v58  ;;  %v5730_v59 = vadd.f32 1.0, %v9181_v57  ;;  %v6514_v57 = vld [vmem:[%s11458_s13 + $0x10] sm:$0xff] }
 0xc4d   :  { %9186 = vrcp.f32 %v5719_v15  ;;  %v9398_v15 = vmov 0.0|0.0  }
 0xc4e   :  { %9188 = vrcp.f32 %v5730_v59  ;;  %v6517_v59 = vld [vmem:[%s11458_s13 + $0x28] sm:$0xff] }
 0xc55   :  { %v9183_v19 = vpop.eup %9182 }
 0xc56   :  { %v9185_v36 = vpop.eup %9184 }
 0xc57   :  { %v9187_v45 = vpop.eup %9186  ;;  %v5734_v32 = vmul.f32 %v9185_v36, %v9183_v19  ;;  %v6515_v19 = vld [vmem:[%s11458_s13 + $0x18] sm:$0xff] }
 0xc58   :  { %v5733_v24 = vmul.f32 %v9187_v45, %v11094_v38  ;;  %v9189_v18 = vpop.eup %9188  ;;  %v5802_v38 = vld [vmem:[%s11457_s12] sm:$0xf]  ;;  %v8788_v36 = vpack.c.bf16 %v6515_v19, %v6514_v57 }
 0xc59   :  { %v11346_v61 = vrot.slane %v5802_v38, %v12208_v42  ;;  %v11360_v44 = vrot.slane %v5802_v38, %v12216_v52  ;;  %v11370_v51 = vrot.slane %v5802_v38, %v12223_v23  ;;  %v6516_v45 = vld [vmem:[%s11458_s13 + $0x20] sm:$0xff]  ;;  %v6523_v42 = vld [vmem:[%s11458_s13 + $0x58] sm:$0xff] }
 0xc5a   :  { %v5735_v4 = vadd.f32 %v5734_v32, %v5733_v24  ;;  %v8791_v24 = vpack.c.bf16 %v6517_v59, %v6516_v45  ;;  %v6518_v32 = vld [vmem:[%s11458_s13 + $0x30] sm:$0xff] }
 0xc5c   :  { %9190 = vtanh.f32 %v5735_v4  ;;  %v6519_v4 = vld [vmem:[%s11458_s13 + $0x38] sm:$0xff] }
 0xc66   :  { %v9191_v55 = vpop.eup %9190 }
 0xc67   :  { %v5737_v46 = vmul.f32 %v9191_v55, %v9189_v18  ;;  %v8794_v18 = vpack.c.bf16 %v6519_v4, %v6518_v32  ;;  %v6520_v55 = vld [vmem:[%s11458_s13 + $0x40] sm:$0xff] }
 0xc69   :  { %6265 = vmatmul.mubr.f32.vlgmr.msra.gmra.mrb[42].mxu0 %v5737_v46  ;;  %6336 = vmatmul.mubr.f32.vlgmr.msra.gmra.mrb[50].mxu1 %v5737_v46  ;;  %v6521_v46 = vld [vmem:[%s11458_s13 + $0x48] sm:$0xff] }
 0xc6a   :  { %8723 = vmatpush1.bf16.msra.mxu0 %v11197_v37  ;;  %8755 = vmatpush1.bf16.msra.mxu1 %v11199_v63  ;;  %v12209_v37 = vld [vmem:[#allocation66_spill] sm:$0xff]  ;;  %v12210_v63 = vld [vmem:[#allocation75_spill] sm:$0xff] }
 0xc6b   :  { %8725 = vmatprep.subr.bf16.mxu0 %v11203_v53  ;;  %8757 = vmatprep.subr.bf16.mxu1 %v11205_v33  ;;  %v12211_v53 = vld [vmem:[#allocation56_spill] sm:$0xff] }
 0xc6c   :  { %6406 = vmatprep.mubr.f32.mxu0 %v11771_v0  ;;  %6477 = vmatprep.mubr.f32.mxu1 %v11771_v0  ;;  %v11351_v33 = vrot.slane %v5802_v38, %v12211_v53  ;;  %v8797_v38 = vpack.c.bf16 %v6521_v46, %v6520_v55  ;;  %v6525_v53 = vld [vmem:[%s11458_s13 + $0x68] sm:$0xff] }
 0xc6e   :  { %8727 = vmatpush1.bf16.msra.mxu0 %v11211_v3  ;;  %8759 = vmatpush1.bf16.msra.mxu1 %v12207_v13  ;;  %v6522_v13 = vld [vmem:[%s11458_s13 + $0x50] sm:$0xff] }
 0xc6f   :  { %8729 = vmatprep.subr.bf16.mxu0 %v12209_v37  ;;  %8761 = vmatprep.subr.bf16.mxu1 %v12210_v63  ;;  %v6524_v37 = vld [vmem:[%s11458_s13 + $0x60] sm:$0xff]  ;;  %v8800_v63 = vpack.c.bf16 %v6523_v42, %v6522_v13 }
 0xc72   :  { %v6096_v6 = vpop.f32.mrb[40].mxu0  ;;  %v6167_v16 = vpop.f32.mrb[48].mxu1  ;;  %8731 = vmatpush1.bf16.msra.mxu0 %v12212_v39  ;;  %8763 = vmatpush1.bf16.msra.mxu1 %v12213_v7  ;;  %v6527_v39 = vld [vmem:[%s11458_s13 + $0x78] sm:$0xff] }
 0xc73   :  { %v8840_v3 = vadd.f32 %v6096_v6, %v11346_v61  ;;  %v6098_v34 = vpop.f32.mrb[41].mxu0  ;;  %v6169_v41 = vpop.f32.mrb[49].mxu1  ;;  %8733 = vmatprep.subr.bf16.mxu0 %v12214_v17  ;;  %8765 = vmatprep.subr.bf16.mxu1 %v12215_v26  ;;  %v8842_v27 = vadd.f32 %v6167_v16, %v11370_v51  ;;  %v8803_v6 = vpack.c.bf16 %v6525_v53, %v6524_v37  ;;  %v6526_v16 = vld [vmem:[%s11458_s13 + $0x70] sm:$0xff] }
 0xc74   :  { %v8841_v28 = vadd.f32 %v6098_v34, %v11351_v33  ;;  %v8843_v22 = vadd.f32 %v6169_v41, %v11360_v44  ;;  %v8806_v7 = vpack.c.bf16 %v6527_v39, %v6526_v16 }
 0xc75   :  { %v6677_v40 = vmul.f32 -1.442695, %v8840_v3 }
 0xc76   :  { %v6678_v20 = vmul.f32 -1.442695, %v8841_v28  ;;  %8735 = vmatpush1.bf16.msra.mxu0 %v12217_v5  ;;  %8767 = vmatpush1.bf16.msra.mxu1 %v12218_v14  ;;  %v6679_v12 = vmul.f32 -1.442695, %v8843_v22 }
 0xc77   :  { %9192 = vpow2.f32 %v6677_v40  ;;  %8737 = vmatprep.subr.bf16.mxu0 %v12219_v60  ;;  %8769 = vmatprep.subr.bf16.mxu1 %v12220_v50 }
 0xc78   :  { %9194 = vpow2.f32 %v6678_v20 }
 0xc79   :  { %9196 = vpow2.f32 %v6679_v12 }
 0xc7a   :  { %8739 = vmatpush1.bf16.msra.mxu0 %v12221_v62  ;;  %8771 = vmatpush1.bf16.msra.mxu1 %v12222_v11  ;;  %9198 = vtanh.f32 %v8842_v27 }
 0xc7b   :  { %8741 = vmatprep.subr.bf16.mxu0 %v11255_v29  ;;  %8773 = vmatprep.subr.bf16.mxu1 %v11257_v54 }
 0xc7e   :  { %8743 = vmatpush1.bf16.msra.mxu0 %v11261_v21  ;;  %8775 = vmatpush1.bf16.msra.mxu1 %v11263_v49 }
 0xc7f   :  { %8745 = vmatprep.subr.bf16.mxu0 %v11267_v48  ;;  %8777 = vmatprep.subr.bf16.mxu1 %v11269_v25 }
 0xc81   :  { %v9193_v9 = vpop.eup %9192 }
 0xc82   :  { %v9195_v10 = vpop.eup %9194  ;;  %v6179_v30 = vadd.f32 1.0, %v9193_v9  ;;  %8747 = vmatpush1.bf16.msra.mxu0 %v11273_v47  ;;  %8779 = vmatpush1.bf16.msra.mxu1 %v11275_v2 }
 0xc83   :  { %v6185_v29 = vadd.f32 1.0, %v9195_v10  ;;  %8749 = vmatprep.subr.bf16.mxu0 %v11279_v35  ;;  %8781 = vmatprep.subr.bf16.mxu1 %v11281_v43  ;;  %v9197_v54 = vpop.eup %9196 }
 0xc84   :  { %9200 = vrcp.f32 %v6179_v30  ;;  %v9199_v21 = vpop.eup %9198  ;;  %v6192_v47 = vadd.f32 1.0, %v9197_v54  ;;  %v6683_v30 = vld [vmem:[#allocation4] ss:$0 sm:$0xff] }
 0xc85   :  { %9202 = vrcp.f32 %v6185_v29 }
 0xc86   :  { %8751 = vmatpush1.bf16.msra.mxu0 %v11285_v1  ;;  %8783 = vmatpush1.bf16.msra.mxu1 %v11287_v31  ;;  %9204 = vrcp.f32 %v6192_v47  ;;  %v6512_v1 = vld [vmem:[%s11458_s13] sm:$0xff]  ;;  %v6513_v31 = vld [vmem:[%s11458_s13 + $0x8] sm:$0xff] }
 0xc87   :  { %v8785_v8 = vpack.c.bf16 %v6513_v31, %v6512_v1  ;;  %8784 = vmatprep.subr.bf16.mxu0 %v9398_v15 }
 0xc8e   :  { %v9201_v49 = vpop.eup %9200 }
 0xc8f   :  { %v9203_v48 = vpop.eup %9202  ;;  %v6196_v25 = vmul.f32 %v9201_v49, %v9199_v21 }
 0xc90   :  { %v6195_v58 = vmul.f32 0.0, %v9203_v48  ;;  %v9205_v35 = vpop.eup %9204 }
 0xc92   :  { %v11385_v2 = vadd.f32 %v6196_v25, %v6195_v58 }
 0xc94   :  { %9206 = vtanh.f32 %v11385_v2 }
 0xc9e   :  { %v9207_v43 = vpop.eup %9206 }
 0xc9f   :  { %v6199_v56 = vmul.f32 %v9207_v43, %v9205_v35 }
 0xca1   :  { %6407 = vmatmul.mubr.f32.vlgmr.msra.gmra.mrb[42].mxu0 %v6199_v56  ;;  %6478 = vmatmul.mubr.f32.vlgmr.msra.gmra.mrb[50].mxu1 %v6199_v56 }
 0xca2   :  { %8786 = vmatpush3.bf16.msra.mxu0 %v8785_v8  ;;  %6733 = vmatprep.mubr.msk.f32.mxu0 %vm9399_vm3, %v11771_v0 }
 0xca3   :  { %8787 = vmatprep.subr.bf16.mxu0 %v9398_v15 }
 0xca6   :  { %8789 = vmatpush3.bf16.msra.mxu0 %v8788_v36 }
 0xca7   :  { %8790 = vmatprep.subr.bf16.mxu0 %v9398_v15 }
 0xcaa   :  { %8792 = vmatpush3.bf16.msra.mxu0 %v8791_v24 }
 0xcab   :  { %8793 = vmatprep.subr.bf16.mxu0 %v9398_v15 }
 0xcae   :  { %8795 = vmatpush3.bf16.msra.mxu0 %v8794_v18 }
 0xcaf   :  { %8796 = vmatprep.subr.bf16.mxu0 %v9398_v15 }
 0xcb2   :  { %8798 = vmatpush3.bf16.msra.mxu0 %v8797_v38 }
 0xcb3   :  { %8799 = vmatprep.subr.bf16.mxu0 %v9398_v15 }
 0xcb6   :  { %8801 = vmatpush3.bf16.msra.mxu0 %v8800_v63 }
 0xcb7   :  { %8802 = vmatprep.subr.bf16.mxu0 %v9398_v15 }
 0xcba   :  { %8804 = vmatpush3.bf16.msra.mxu0 %v8803_v6 }
 0xcbb   :  { %8805 = vmatprep.subr.bf16.mxu0 %v9398_v15 }
 0xcbe   :  { %8807 = vmatpush3.bf16.msra.mxu0 %v8806_v7 }
 0xd74   :  { %v6408_v3 = vpop.f32.mrb[42].mxu0  ;;  %v6479_v34 = vpop.f32.mrb[50].mxu1 }
 0xd75   :  { %v8844_v41 = vadd.f32 %v6408_v3, %v11346_v61  ;;  %v6410_v0 = vpop.f32.mrb[43].mxu0  ;;  %v6481_v17 = vpop.f32.mrb[51].mxu1  ;;  %v8846_v5 = vadd.f32 %v6479_v34, %v11370_v51 }
 0xd76   :  { %v8845_v26 = vadd.f32 %v6410_v0, %v11351_v33  ;;  %v8847_v20 = vadd.f32 %v6481_v17, %v11360_v44 }
 0xd77   :  { %v6680_v28 = vmul.f32 -1.442695, %v8844_v41 }
 0xd78   :  { %v6681_v40 = vmul.f32 -1.442695, %v8845_v26  ;;  %v6682_v52 = vmul.f32 -1.442695, %v8847_v20 }
 0xd79   :  { %9208 = vpow2.f32 %v6680_v28 }
 0xd7a   :  { %9210 = vpow2.f32 %v6681_v40 }
 0xd7b   :  { %9212 = vpow2.f32 %v6682_v52 }
 0xd7c   :  { %9214 = vtanh.f32 %v8846_v5 }
 0xd83   :  { %v9209_v14 = vpop.eup %9208 }
 0xd84   :  { %v9211_v60 = vpop.eup %9210  ;;  %v6491_v50 = vadd.f32 1.0, %v9209_v14 }
 0xd85   :  { %v6497_v22 = vadd.f32 1.0, %v9211_v60  ;;  %v9213_v61 = vpop.eup %9212 }
 0xd86   :  { %9216 = vrcp.f32 %v6491_v50  ;;  %v9215_v62 = vpop.eup %9214  ;;  %v6504_v12 = vadd.f32 1.0, %v9213_v61 }
 0xd87   :  { %9218 = vrcp.f32 %v6497_v22 }
 0xd88   :  { %9220 = vrcp.f32 %v6504_v12 }
 0xd90   :  { %v9217_v33 = vpop.eup %9216 }
 0xd91   :  { %v9219_v11 = vpop.eup %9218  ;;  %v6508_v23 = vmul.f32 %v9217_v33, %v9215_v62 }
 0xd92   :  { %v6507_v27 = vmul.f32 %v9219_v11, %v11385_v2  ;;  %v9221_v51 = vpop.eup %9220 }
 0xd94   :  { %v6509_v44 = vadd.f32 %v6508_v23, %v6507_v27 }
 0xd96   :  { %9222 = vtanh.f32 %v6509_v44 }
 0xda0   :  { %v9223_v9 = vpop.eup %9222 }
 0xda1   :  { %v6511_v10 = vmul.f32 %v9223_v9, %v9221_v51 }
 0xda3   :  { %6734 = vmatmul.mubr.f32.vlgmr.msra.gmra.mrb[44].mxu0 %v6511_v10 }
 0xe76   :  { %v6601_v29 = vpop.f32.mrb[44].mxu0 }
 0xe77   :  { %v6602_v54 = vadd.f32 %v6683_v30, %v6601_v29  ;;  %v6735_v21 = vpop.f32.mrb[45].mxu0 }
 0xe79   :  { %6606 = vst.msk [vmem:[%s11460_s15] sm:$0x3] %vm6605_vm4, %v6602_v54 }
 0xe7a   :  { %6611 = vsyncpa [#allocation6], 1 }
 0xe7b   :  { %6612 = vsyncpa [#allocation8], 1 }
 0xe7c   :  { %6613 = vsyncpa [#allocation11], 1 }
 0xe7d   :  { %6614 = vsyncpa [#allocation14], 1 }

</bundles_post_ra>
